<compile_context>
chip_gen: v6e
topology: v6e:2x2x1
jax: 0.10.0
libtpu: 0.0.40
codegen_flags: <defaults>
</compile_context>

<pallas_src>
import numpy as np
import jax
import jax.numpy as jnp
from jax import lax
from jax.experimental import pallas as pl
from jax.experimental.pallas import tpu as pltpu

BN_EPS = 1e-5
KK = 3          # conv kernel size used throughout the Decoder
GUARD = 128     # lane guard on each end of the flat activation buffers
PIN = 8         # conv_start row halo (dil=1); 8 keeps the interior 128-aligned


# --------------------------------------------------------------------------
# Fused whole-decoder Pallas kernel
# --------------------------------------------------------------------------
def _make_decoder_kernel(H, W, Cin, Ch, num_blocks, P, mask_index):
    HW = H * W
    B_ACT = GUARD + P * W      # interior start lane in act/tmp buffers
    B_PIN = PIN * W            # interior start lane in the conv_start buffer

    def taps_for(dil):
        # A tap contributes iff its shifted window overlaps the valid image;
        # otherwise it only reads zero padding and is skipped statically.
        return [(kh, kw) for kh in range(KK) for kw in range(KK)
                if abs((kh - 1) * dil) < H and abs((kw - 1) * dil) < W]

    def kernel(x_ref, w0_ref, b0_ref, wres_ref, bres_ref, wend_ref, bend_ref,
               wm_ref, out_ref, pin_ref, act_ref, tmp_ref):
        # One-time zeroing of halo rows / guard lanes.  Scratch persists
        # across grid steps; interiors are fully rewritten before every read
        # and borders are never written again.  (Grid axis is "arbitrary",
        # so every step runs on the core that executed step 0.)
        @pl.when(pl.program_id(0) == 0)
        def _zero_halos():
            pin_ref[...] = jnp.zeros_like(pin_ref)
            act_ref[...] = jnp.zeros_like(act_ref)
            tmp_ref[...] = jnp.zeros_like(tmp_ref)

        # (1, HW) column-validity masks for W-boundary wrap, one per dw shift.
        masks = {dw: wm_ref[i:i + 1, :] for dw, i in mask_index.items()}

        def conv_taps(src_ref, base, w_full, bias, dil, cin):
            """Dilated KKxKK conv + folded BN via per-tap MXU accumulation.

            src_ref : (cin, L) zero-padded flat buffer, interior at `base`.
            w_full  : (cout, KK*KK*cin) pre-transposed folded weights.
            bias    : (cout, 1).  Returns (cout, HW) in f32.
            """
            acc = None
            for kh, kw in taps_for(dil):
                dh = (kh - 1) * dil
                dw = (kw - 1) * dil
                start = base + dh * W + dw              # static lane offset
                s = src_ref[:, start:start + HW]        # (cin, HW)
                if dw != 0:
                    s = s * masks[dw]                   # zero wrapped columns
                t = kh * KK + kw
                wt = w_full[:, t * cin:(t + 1) * cin]   # (cout, cin)
                p = jnp.dot(wt, s, preferred_element_type=jnp.float32)
                acc = p if acc is None else acc + p
            return acc + bias

        # ---- conv_start: 3x3 / pad 1 conv + folded BN + ReLU ---------------
        pin_ref[:, B_PIN:B_PIN + HW] = x_ref[0]
        y0 = conv_taps(pin_ref, B_PIN, w0_ref[...], b0_ref[...], 1, Cin)
        act_ref[:, B_ACT:B_ACT + HW] = jnp.maximum(y0, 0.0)

        # ---- dilated residual blocks ---------------------------------------
        for blk in range(num_blocks):
            dil = 2 ** (blk + 1)                        # static Python int
            h = conv_taps(act_ref, B_ACT, wres_ref[2 * blk],
                          bres_ref[2 * blk], dil, Ch)
            tmp_ref[:, B_ACT:B_ACT + HW] = jnp.maximum(h, 0.0)
            r = conv_taps(tmp_ref, B_ACT, wres_ref[2 * blk + 1],
                          bres_ref[2 * blk + 1], dil, Ch)
            ident = act_ref[:, B_ACT:B_ACT + HW]
            act_ref[:, B_ACT:B_ACT + HW] = jnp.maximum(r + ident, 0.0)

        # ---- conv_end: 1x1 conv Ch -> 1, lane-dense (1, HW) output ---------
        a = act_ref[:, B_ACT:B_ACT + HW]
        out_ref[0] = (jnp.dot(wend_ref[...], a,
                              preferred_element_type=jnp.float32)
                      + bend_ref[...])

    return kernel


def _decoder_pallas(x, w0, b0, wres, bres, wend, bend, wmasks, mask_index,
                    *, num_blocks, H, W):
    """x: (N, Cin, H*W) f32.  Returns (N, 1, H*W) f32 (row-major HxW)."""
    N, Cin, HW = x.shape
    Ch = w0.shape[0]
    dils = [2 ** (i + 1) for i in range(num_blocks)]
    # Row halo: only dilations that keep off-center taps need zero rows.
    P = max([d for d in dils if d < H] + [0])
    assert max([d for d in dils if d < W] + [1]) <= GUARD
    pin_lanes = HW + 2 * PIN * W
    act_lanes = HW + 2 * P * W + 2 * GUARD

    kernel = _make_decoder_kernel(H, W, Cin, Ch, num_blocks, P, mask_index)

    return pl.pallas_call(
        kernel,
        out_shape=jax.ShapeDtypeStruct((N, 1, HW), jnp.float32),
        grid=(N,),
        in_specs=[
            pl.BlockSpec((1, Cin, HW), lambda n: (n, 0, 0)),
            # Weights/biases/masks: constant block index (fetched once).
            pl.BlockSpec(w0.shape, lambda n: (0, 0)),
            pl.BlockSpec(b0.shape, lambda n: (0, 0)),
            pl.BlockSpec(wres.shape, lambda n: (0, 0, 0)),
            pl.BlockSpec(bres.shape, lambda n: (0, 0, 0)),
            pl.BlockSpec(wend.shape, lambda n: (0, 0)),
            pl.BlockSpec(bend.shape, lambda n: (0, 0)),
            pl.BlockSpec(wmasks.shape, lambda n: (0, 0)),
        ],
        out_specs=pl.BlockSpec((1, 1, HW), lambda n: (n, 0, 0)),
        scratch_shapes=[
            pltpu.VMEM((Cin, pin_lanes), jnp.float32),   # conv_start padded in
            pltpu.VMEM((Ch, act_lanes), jnp.float32),    # padded activations
            pltpu.VMEM((Ch, act_lanes), jnp.float32),    # padded block temp
        ],
        compiler_params=pltpu.CompilerParams(
            # "arbitrary" keeps the whole batch on one core so the one-time
            # pl.when(program_id == 0) halo zeroing is valid even on megacore
            # parts (a "parallel" axis may be split across cores with private
            # scratch); parallel-vs-arbitrary is a measured no-op otherwise.
            dimension_semantics=("arbitrary",),
            vmem_limit_bytes=32 * 1024 * 1024,
        ),
    )(x, w0, b0, wres, bres, wend, bend, wmasks)


# --------------------------------------------------------------------------
# Parameter construction (deterministic, synthetic)
# --------------------------------------------------------------------------
def _conv_params(key, kh, kw, cin, cout):
    kw_, kb = jax.random.split(key)
    fan_in = kh * kw * cin
    w = jax.random.normal(kw_, (kh, kw, cin, cout), jnp.float32) * (0.5 / jnp.sqrt(fan_in))
    b = 0.05 * jax.random.normal(kb, (cout,), jnp.float32)
    return {"w": w, "b": b}


def _bn_params(key, c):
    k1, k2, k3, k4 = jax.random.split(key, 4)
    return {
        "gamma": 1.0 + 0.1 * jax.random.normal(k1, (c,), jnp.float32),
        "beta": 0.05 * jax.random.normal(k2, (c,), jnp.float32),
        "mean": 0.05 * jax.random.normal(k3, (c,), jnp.float32),
        "var": 1.0 + 0.1 * jax.random.uniform(k4, (c,), jnp.float32),
    }


def init_decoder_params(key, in_channel, hidden, filter_size, num_blocks):
    assert filter_size == KK, "Decoder residual structure requires 3x3 convs"
    keys = jax.random.split(key, 2 + 4 * num_blocks + 1)
    params = {
        "conv_start": {"conv": _conv_params(keys[0], 3, 3, in_channel, hidden),
                       "bn": _bn_params(keys[1], hidden)},
        "res_blocks": [],
        "conv_end": _conv_params(keys[-1], 1, 1, hidden, 1),
    }
    for i in range(num_blocks):
        k0, k1, k2, k3 = keys[2 + 4 * i: 2 + 4 * (i + 1)]
        params["res_blocks"].append({
            "conv1": _conv_params(k0, filter_size, filter_size, hidden, hidden),
            "bn1": _bn_params(k1, hidden),
            "conv2": _conv_params(k2, filter_size, filter_size, hidden, hidden),
            "bn2": _bn_params(k3, hidden),
        })
    return params


def _fold_conv_bn(conv, bn):
    """Fold conv bias + eval-mode BatchNorm into (scaled weights, bias)."""
    scale = bn["gamma"] / jnp.sqrt(bn["var"] + BN_EPS)
    bias = scale * (conv["b"] - bn["mean"]) + bn["beta"]
    return conv["w"] * scale, bias


def _build_col_masks(H, W, num_blocks):
    """(M, H*W) f32 column-validity masks, one per needed W-shift dw."""
    dils = [1] + [2 ** (i + 1) for i in range(num_blocks)]
    dws = sorted({s for d in dils if d < W for s in (-d, d)})
    col = np.arange(H * W, dtype=np.int64) % W
    index = {int(dw): i for i, dw in enumerate(dws)}
    rows = [((col + dw >= 0) & (col + dw < W)).astype(np.float32) for dw in dws]
    return jnp.asarray(np.stack(rows, axis=0)), index


# --------------------------------------------------------------------------
# Decoder forward (NCHW in / NCHW out, like the PyTorch module)
# --------------------------------------------------------------------------
def decoder_forward(params, x_nchw):
    N, Cin, H, W = x_nchw.shape
    x = x_nchw.reshape(N, Cin, H * W).astype(jnp.float32)   # lane-dense input
    num_blocks = len(params["res_blocks"])
    hidden = params["conv_start"]["conv"]["w"].shape[-1]

    def to_t(w):   # (kh, kw, cin, cout) -> (cout, kh*kw*cin), lane-dense
        cout = w.shape[-1]
        return jnp.transpose(w, (3, 0, 1, 2)).reshape(cout, -1)

    # conv_start (3x3, pad 1) folded with its BN
    w0, b0 = _fold_conv_bn(params["conv_start"]["conv"],
                           params["conv_start"]["bn"])
    w0 = to_t(w0)                                            # (hidden, 9*Cin)
    b0 = b0.reshape(hidden, 1)

    # residual-block convs folded with their BNs
    wres, bres = [], []
    for blk in params["res_blocks"]:
        for cname, bname in (("conv1", "bn1"), ("conv2", "bn2")):
            w, b = _fold_conv_bn(blk[cname], blk[bname])
            wres.append(to_t(w))                             # (hidden, 9*hidden)
            bres.append(b.reshape(hidden, 1))
    wres = jnp.stack(wres)                                   # (2*nb, hidden, 9*hidden)
    bres = jnp.stack(bres)                                   # (2*nb, hidden, 1)

    # conv_end (1x1, hidden -> 1), no BN
    wend = to_t(params["conv_end"]["w"])                     # (1, hidden)
    bend = params["conv_end"]["b"].reshape(1, 1)

    wmasks, mask_index = _build_col_masks(H, W, num_blocks)

    out = _decoder_pallas(x, w0, b0, wres, bres, wend, bend, wmasks,
                          mask_index, num_blocks=num_blocks, H=H, W=W)
    return out.reshape(N, 1, H, W)                           # -> NCHW


# --------------------------------------------------------------------------
# Pure-JAX reference (for correctness check)
# --------------------------------------------------------------------------
def _ref_conv(x, w, b, dil, pad):
    y = lax.conv_general_dilated(
        x, w, window_strides=(1, 1), padding=((pad, pad), (pad, pad)),
        rhs_dilation=(dil, dil), dimension_numbers=("NHWC", "HWIO", "NHWC"),
        precision=lax.Precision.HIGHEST)
    return y + b


def _ref_bn(x, bn):
    return (x - bn["mean"]) / jnp.sqrt(bn["var"] + BN_EPS) * bn["gamma"] + bn["beta"]


def decoder_reference(params, x_nchw):
    x = jnp.transpose(x_nchw, (0, 2, 3, 1)).astype(jnp.float32)
    p = params["conv_start"]
    x = jnp.maximum(_ref_bn(_ref_conv(x, p["conv"]["w"], p["conv"]["b"], 1, 1),
                            p["bn"]), 0.0)
    for i, blk in enumerate(params["res_blocks"]):
        dil = 2 ** (i + 1)
        h = jnp.maximum(_ref_bn(_ref_conv(x, blk["conv1"]["w"], blk["conv1"]["b"],
                                          dil, dil), blk["bn1"]), 0.0)
        r = _ref_bn(_ref_conv(h, blk["conv2"]["w"], blk["conv2"]["b"], dil, dil),
                    blk["bn2"])
        x = jnp.maximum(r + x, 0.0)
    p = params["conv_end"]
    out = _ref_conv(x, p["w"], p["b"], 1, 0)
    return jnp.transpose(out, (0, 3, 1, 2))


# --------------------------------------------------------------------------
if __name__ == "__main__":
    N, in_channel, H, W = 2, 4, 16, 16
    hidden, filter_size, num_blocks = 32, 3, 5

    key = jax.random.PRNGKey(0)
    k_params, k_x = jax.random.split(key)
    params = init_decoder_params(k_params, in_channel, hidden, filter_size,
                                 num_blocks)
    x = jax.random.normal(k_x, (N, in_channel, H, W), jnp.float32)

    out = jax.block_until_ready(jax.jit(decoder_forward)(params, x))
    assert out.shape == (N, 1, H, W), out.shape

    ref = jax.block_until_ready(decoder_reference(params, x))
    err = float(jnp.max(jnp.abs(out - ref)))
    assert jnp.allclose(out, ref, atol=5e-3, rtol=5e-3), err

    print("KERNEL_OK")
</pallas_src>

<mosaic_0001>
module attributes {stable_mosaic.version = 11 : i64} {
  func.func @kernel(%arg0: i32, %arg1: memref<1x4x256xf32, #tpu.memory_space<vmem>>, %arg2: memref<32x36xf32, #tpu.memory_space<vmem>>, %arg3: memref<32x1xf32, #tpu.memory_space<vmem>>, %arg4: memref<10x32x288xf32, #tpu.memory_space<vmem>>, %arg5: memref<10x32x1xf32, #tpu.memory_space<vmem>>, %arg6: memref<1x32xf32, #tpu.memory_space<vmem>>, %arg7: memref<1x1xf32, #tpu.memory_space<vmem>>, %arg8: memref<8x256xf32, #tpu.memory_space<vmem>>, %arg9: memref<1x1x256xf32, #tpu.memory_space<vmem>>, %arg10: memref<4x512xf32, #tpu.memory_space<vmem>>, %arg11: memref<32x768xf32, #tpu.memory_space<vmem>>, %arg12: memref<32x768xf32, #tpu.memory_space<vmem>>) attributes {dimension_semantics = [#tpu.dimension_semantics<arbitrary>], iteration_bounds = array<i64: 2>, scalar_prefetch = 0 : i64, scratch_operands = 3 : i64, tpu.core_type = #tpu.core_type<tc>, window_params = [{transform_indices = @transform_0, window_bounds = array<i64: 1, 4, 256>}, {pipeline_mode = #tpu.pipeline_mode<synchronous>, transform_indices = @transform_1, window_bounds = array<i64: 32, 36>}, {pipeline_mode = #tpu.pipeline_mode<synchronous>, transform_indices = @transform_2, window_bounds = array<i64: 32, 1>}, {pipeline_mode = #tpu.pipeline_mode<synchronous>, transform_indices = @transform_3, window_bounds = array<i64: 10, 32, 288>}, {pipeline_mode = #tpu.pipeline_mode<synchronous>, transform_indices = @transform_4, window_bounds = array<i64: 10, 32, 1>}, {pipeline_mode = #tpu.pipeline_mode<synchronous>, transform_indices = @transform_5, window_bounds = array<i64: 1, 32>}, {pipeline_mode = #tpu.pipeline_mode<synchronous>, transform_indices = @transform_6, window_bounds = array<i64: 1, 1>}, {pipeline_mode = #tpu.pipeline_mode<synchronous>, transform_indices = @transform_7, window_bounds = array<i64: 8, 256>}, {transform_indices = @transform_8, window_bounds = array<i64: 1, 1, 256>}]} {
    %c0_i32 = arith.constant 0 : i32
    %0 = arith.cmpi eq, %arg0, %c0_i32 : i32
    %1 = arith.extui %0 : i1 to i32
    %c0_i32_0 = arith.constant 0 : i32
    %2 = arith.cmpi ne, %1, %c0_i32_0 : i32
    scf.if %2 {
      %cst_296 = arith.constant 0.000000e+00 : f32
      %471 = vector.broadcast %cst_296 : f32 to vector<4x512xf32>
      %c0_297 = arith.constant 0 : index
      %c0_298 = arith.constant 0 : index
      %472 = vector.load %arg10[%c0_297, %c0_298] : memref<4x512xf32, #tpu.memory_space<vmem>>, vector<4x512xf32>
      tpu.vector_store %arg10[%c0_297, %c0_298], %471 {strides = array<i32>} : memref<4x512xf32, #tpu.memory_space<vmem>>, vector<4x512xf32>,
      %cst_299 = arith.constant 0.000000e+00 : f32
      %473 = vector.broadcast %cst_299 : f32 to vector<32x768xf32>
      %c0_300 = arith.constant 0 : index
      %c0_301 = arith.constant 0 : index
      %474 = vector.load %arg11[%c0_300, %c0_301] : memref<32x768xf32, #tpu.memory_space<vmem>>, vector<32x768xf32>
      tpu.vector_store %arg11[%c0_300, %c0_301], %473 {strides = array<i32>} : memref<32x768xf32, #tpu.memory_space<vmem>>, vector<32x768xf32>,
      %cst_302 = arith.constant 0.000000e+00 : f32
      %475 = vector.broadcast %cst_302 : f32 to vector<32x768xf32>
      %c0_303 = arith.constant 0 : index
      %c0_304 = arith.constant 0 : index
      %476 = vector.load %arg12[%c0_303, %c0_304] : memref<32x768xf32, #tpu.memory_space<vmem>>, vector<32x768xf32>
      tpu.vector_store %arg12[%c0_303, %c0_304], %475 {strides = array<i32>} : memref<32x768xf32, #tpu.memory_space<vmem>>, vector<32x768xf32>,
    } else {
    }
    %c0 = arith.constant 0 : index
    %c0_1 = arith.constant 0 : index
    %3 = vector.load %arg8[%c0, %c0_1] : memref<8x256xf32, #tpu.memory_space<vmem>>, vector<1x256xf32>
    %c1 = arith.constant 1 : index
    %c0_2 = arith.constant 0 : index
    %4 = vector.load %arg8[%c1, %c0_2] : memref<8x256xf32, #tpu.memory_space<vmem>>, vector<1x256xf32>
    %c2 = arith.constant 2 : index
    %c0_3 = arith.constant 0 : index
    %5 = vector.load %arg8[%c2, %c0_3] : memref<8x256xf32, #tpu.memory_space<vmem>>, vector<1x256xf32>
    %c3 = arith.constant 3 : index
    %c0_4 = arith.constant 0 : index
    %6 = vector.load %arg8[%c3, %c0_4] : memref<8x256xf32, #tpu.memory_space<vmem>>, vector<1x256xf32>
    %c4 = arith.constant 4 : index
    %c0_5 = arith.constant 0 : index
    %7 = vector.load %arg8[%c4, %c0_5] : memref<8x256xf32, #tpu.memory_space<vmem>>, vector<1x256xf32>
    %c5 = arith.constant 5 : index
    %c0_6 = arith.constant 0 : index
    %8 = vector.load %arg8[%c5, %c0_6] : memref<8x256xf32, #tpu.memory_space<vmem>>, vector<1x256xf32>
    %c6 = arith.constant 6 : index
    %c0_7 = arith.constant 0 : index
    %9 = vector.load %arg8[%c6, %c0_7] : memref<8x256xf32, #tpu.memory_space<vmem>>, vector<1x256xf32>
    %c7 = arith.constant 7 : index
    %c0_8 = arith.constant 0 : index
    %10 = vector.load %arg8[%c7, %c0_8] : memref<8x256xf32, #tpu.memory_space<vmem>>, vector<1x256xf32>
    %c0_9 = arith.constant 0 : index
    %c0_10 = arith.constant 0 : index
    %c0_11 = arith.constant 0 : index
    %11 = vector.load %arg1[%c0_9, %c0_10, %c0_11] : memref<1x4x256xf32, #tpu.memory_space<vmem>>, vector<1x4x256xf32>
    %12 = vector.shape_cast %11 : vector<1x4x256xf32> to vector<4x256xf32>
    %c0_12 = arith.constant 0 : index
    %c128 = arith.constant 128 : index
    %13 = vector.load %arg10[%c0_12, %c128] : memref<4x512xf32, #tpu.memory_space<vmem>>, vector<4x256xf32>
    tpu.vector_store %arg10[%c0_12, %c128], %12 {strides = array<i32>} : memref<4x512xf32, #tpu.memory_space<vmem>>, vector<4x256xf32>,
    %c0_13 = arith.constant 0 : index
    %c0_14 = arith.constant 0 : index
    %14 = vector.load %arg2[%c0_13, %c0_14] : memref<32x36xf32, #tpu.memory_space<vmem>>, vector<32x36xf32>
    %c0_15 = arith.constant 0 : index
    %c0_16 = arith.constant 0 : index
    %15 = vector.load %arg3[%c0_15, %c0_16] : memref<32x1xf32, #tpu.memory_space<vmem>>, vector<32x1xf32>
    %c0_17 = arith.constant 0 : index
    %c111 = arith.constant 111 : index
    %16 = vector.load %arg10[%c0_17, %c111] : memref<4x512xf32, #tpu.memory_space<vmem>>, vector<4x256xf32>
    %17 = vector.broadcast %6 : vector<1x256xf32> to vector<4x256xf32>
    %18 = arith.mulf %16, %17 : vector<4x256xf32>
    %19 = vector.extract_strided_slice %14 {offsets = [0, 0], sizes = [32, 4], strides = [1, 1]} : vector<32x36xf32> to vector<32x4xf32>
    %cst = arith.constant dense<0.000000e+00> : vector<32x256xf32>
    %20 = tpu.matmul %19, %18, %cst {dimension_numbers = #tpu.dot_dimension_numbers<[1], [0], [0], [1], [0, 0, 1, 1], [], []>} : vector<32x4xf32>, vector<4x256xf32>, vector<32x256xf32> -> vector<32x256xf32>
    %c0_18 = arith.constant 0 : index
    %c112 = arith.constant 112 : index
    %21 = vector.load %arg10[%c0_18, %c112] : memref<4x512xf32, #tpu.memory_space<vmem>>, vector<4x256xf32>
    %22 = vector.extract_strided_slice %14 {offsets = [0, 4], sizes = [32, 4], strides = [1, 1]} : vector<32x36xf32> to vector<32x4xf32>
    %cst_19 = arith.constant dense<0.000000e+00> : vector<32x256xf32>
    %23 = tpu.matmul %22, %21, %cst_19 {dimension_numbers = #tpu.dot_dimension_numbers<[1], [0], [0], [1], [0, 0, 1, 1], [], []>} : vector<32x4xf32>, vector<4x256xf32>, vector<32x256xf32> -> vector<32x256xf32>
    %24 = arith.addf %20, %23 : vector<32x256xf32>
    %c0_20 = arith.constant 0 : index
    %c113 = arith.constant 113 : index
    %25 = vector.load %arg10[%c0_20, %c113] : memref<4x512xf32, #tpu.memory_space<vmem>>, vector<4x256xf32>
    %26 = vector.broadcast %7 : vector<1x256xf32> to vector<4x256xf32>
    %27 = arith.mulf %25, %26 : vector<4x256xf32>
    %28 = vector.extract_strided_slice %14 {offsets = [0, 8], sizes = [32, 4], strides = [1, 1]} : vector<32x36xf32> to vector<32x4xf32>
    %cst_21 = arith.constant dense<0.000000e+00> : vector<32x256xf32>
    %29 = tpu.matmul %28, %27, %cst_21 {dimension_numbers = #tpu.dot_dimension_numbers<[1], [0], [0], [1], [0, 0, 1, 1], [], []>} : vector<32x4xf32>, vector<4x256xf32>, vector<32x256xf32> -> vector<32x256xf32>
    %30 = arith.addf %24, %29 : vector<32x256xf32>
    %c0_22 = arith.constant 0 : index
    %c127 = arith.constant 127 : index
    %31 = vector.load %arg10[%c0_22, %c127] : memref<4x512xf32, #tpu.memory_space<vmem>>, vector<4x256xf32>
    %32 = vector.broadcast %6 : vector<1x256xf32> to vector<4x256xf32>
    %33 = arith.mulf %31, %32 : vector<4x256xf32>
    %34 = vector.extract_strided_slice %14 {offsets = [0, 12], sizes = [32, 4], strides = [1, 1]} : vector<32x36xf32> to vector<32x4xf32>
    %cst_23 = arith.constant dense<0.000000e+00> : vector<32x256xf32>
    %35 = tpu.matmul %34, %33, %cst_23 {dimension_numbers = #tpu.dot_dimension_numbers<[1], [0], [0], [1], [0, 0, 1, 1], [], []>} : vector<32x4xf32>, vector<4x256xf32>, vector<32x256xf32> -> vector<32x256xf32>
    %36 = arith.addf %30, %35 : vector<32x256xf32>
    %c0_24 = arith.constant 0 : index
    %c128_25 = arith.constant 128 : index
    %37 = vector.load %arg10[%c0_24, %c128_25] : memref<4x512xf32, #tpu.memory_space<vmem>>, vector<4x256xf32>
    %38 = vector.extract_strided_slice %14 {offsets = [0, 16], sizes = [32, 4], strides = [1, 1]} : vector<32x36xf32> to vector<32x4xf32>
    %cst_26 = arith.constant dense<0.000000e+00> : vector<32x256xf32>
    %39 = tpu.matmul %38, %37, %cst_26 {dimension_numbers = #tpu.dot_dimension_numbers<[1], [0], [0], [1], [0, 0, 1, 1], [], []>} : vector<32x4xf32>, vector<4x256xf32>, vector<32x256xf32> -> vector<32x256xf32>
    %40 = arith.addf %36, %39 : vector<32x256xf32>
    %c0_27 = arith.constant 0 : index
    %c129 = arith.constant 129 : index
    %41 = vector.load %arg10[%c0_27, %c129] : memref<4x512xf32, #tpu.memory_space<vmem>>, vector<4x256xf32>
    %42 = vector.broadcast %7 : vector<1x256xf32> to vector<4x256xf32>
    %43 = arith.mulf %41, %42 : vector<4x256xf32>
    %44 = vector.extract_strided_slice %14 {offsets = [0, 20], sizes = [32, 4], strides = [1, 1]} : vector<32x36xf32> to vector<32x4xf32>
    %cst_28 = arith.constant dense<0.000000e+00> : vector<32x256xf32>
    %45 = tpu.matmul %44, %43, %cst_28 {dimension_numbers = #tpu.dot_dimension_numbers<[1], [0], [0], [1], [0, 0, 1, 1], [], []>} : vector<32x4xf32>, vector<4x256xf32>, vector<32x256xf32> -> vector<32x256xf32>
    %46 = arith.addf %40, %45 : vector<32x256xf32>
    %c0_29 = arith.constant 0 : index
    %c143 = arith.constant 143 : index
    %47 = vector.load %arg10[%c0_29, %c143] : memref<4x512xf32, #tpu.memory_space<vmem>>, vector<4x256xf32>
    %48 = vector.broadcast %6 : vector<1x256xf32> to vector<4x256xf32>
    %49 = arith.mulf %47, %48 : vector<4x256xf32>
    %50 = vector.extract_strided_slice %14 {offsets = [0, 24], sizes = [32, 4], strides = [1, 1]} : vector<32x36xf32> to vector<32x4xf32>
    %cst_30 = arith.constant dense<0.000000e+00> : vector<32x256xf32>
    %51 = tpu.matmul %50, %49, %cst_30 {dimension_numbers = #tpu.dot_dimension_numbers<[1], [0], [0], [1], [0, 0, 1, 1], [], []>} : vector<32x4xf32>, vector<4x256xf32>, vector<32x256xf32> -> vector<32x256xf32>
    %52 = arith.addf %46, %51 : vector<32x256xf32>
    %c0_31 = arith.constant 0 : index
    %c144 = arith.constant 144 : index
    %53 = vector.load %arg10[%c0_31, %c144] : memref<4x512xf32, #tpu.memory_space<vmem>>, vector<4x256xf32>
    %54 = vector.extract_strided_slice %14 {offsets = [0, 28], sizes = [32, 4], strides = [1, 1]} : vector<32x36xf32> to vector<32x4xf32>
    %cst_32 = arith.constant dense<0.000000e+00> : vector<32x256xf32>
    %55 = tpu.matmul %54, %53, %cst_32 {dimension_numbers = #tpu.dot_dimension_numbers<[1], [0], [0], [1], [0, 0, 1, 1], [], []>} : vector<32x4xf32>, vector<4x256xf32>, vector<32x256xf32> -> vector<32x256xf32>
    %56 = arith.addf %52, %55 : vector<32x256xf32>
    %c0_33 = arith.constant 0 : index
    %c145 = arith.constant 145 : index
    %57 = vector.load %arg10[%c0_33, %c145] : memref<4x512xf32, #tpu.memory_space<vmem>>, vector<4x256xf32>
    %58 = vector.broadcast %7 : vector<1x256xf32> to vector<4x256xf32>
    %59 = arith.mulf %57, %58 : vector<4x256xf32>
    %60 = vector.extract_strided_slice %14 {offsets = [0, 32], sizes = [32, 4], strides = [1, 1]} : vector<32x36xf32> to vector<32x4xf32>
    %cst_34 = arith.constant dense<0.000000e+00> : vector<32x256xf32>
    %61 = tpu.matmul %60, %59, %cst_34 {dimension_numbers = #tpu.dot_dimension_numbers<[1], [0], [0], [1], [0, 0, 1, 1], [], []>} : vector<32x4xf32>, vector<4x256xf32>, vector<32x256xf32> -> vector<32x256xf32>
    %62 = arith.addf %56, %61 : vector<32x256xf32>
    %63 = vector.broadcast %15 : vector<32x1xf32> to vector<32x256xf32>
    %64 = arith.addf %62, %63 : vector<32x256xf32>
    %cst_35 = arith.constant 0.000000e+00 : f32
    %65 = vector.broadcast %cst_35 : f32 to vector<32x256xf32>
    %66 = arith.maximumf %64, %65 : vector<32x256xf32>
    %c0_36 = arith.constant 0 : index
    %c256 = arith.constant 256 : index
    %67 = vector.load %arg11[%c0_36, %c256] : memref<32x768xf32, #tpu.memory_space<vmem>>, vector<32x256xf32>
    tpu.vector_store %arg11[%c0_36, %c256], %66 {strides = array<i32>} : memref<32x768xf32, #tpu.memory_space<vmem>>, vector<32x256xf32>,
    %c0_37 = arith.constant 0 : index
    %c0_38 = arith.constant 0 : index
    %c0_39 = arith.constant 0 : index
    %68 = vector.load %arg4[%c0_37, %c0_38, %c0_39] : memref<10x32x288xf32, #tpu.memory_space<vmem>>, vector<1x32x288xf32>
    %69 = vector.shape_cast %68 : vector<1x32x288xf32> to vector<32x288xf32>
    %c0_40 = arith.constant 0 : index
    %c0_41 = arith.constant 0 : index
    %c0_42 = arith.constant 0 : index
    %70 = vector.load %arg5[%c0_40, %c0_41, %c0_42] : memref<10x32x1xf32, #tpu.memory_space<vmem>>, vector<1x32x1xf32>
    %71 = vector.shape_cast %70 : vector<1x32x1xf32> to vector<32x1xf32>
    %c0_43 = arith.constant 0 : index
    %c222 = arith.constant 222 : index
    %72 = vector.load %arg11[%c0_43, %c222] : memref<32x768xf32, #tpu.memory_space<vmem>>, vector<32x256xf32>
    %73 = vector.broadcast %5 : vector<1x256xf32> to vector<32x256xf32>
    %74 = arith.mulf %72, %73 : vector<32x256xf32>
    %75 = vector.extract_strided_slice %69 {offsets = [0, 0], sizes = [32, 32], strides = [1, 1]} : vector<32x288xf32> to vector<32x32xf32>
    %cst_44 = arith.constant dense<0.000000e+00> : vector<32x256xf32>
    %76 = tpu.matmul %75, %74, %cst_44 {dimension_numbers = #tpu.dot_dimension_numbers<[1], [0], [0], [1], [0, 0, 1, 1], [], []>} : vector<32x32xf32>, vector<32x256xf32>, vector<32x256xf32> -> vector<32x256xf32>
    %c0_45 = arith.constant 0 : index
    %c224 = arith.constant 224 : index
    %77 = vector.load %arg11[%c0_45, %c224] : memref<32x768xf32, #tpu.memory_space<vmem>>, vector<32x256xf32>
    %78 = vector.extract_strided_slice %69 {offsets = [0, 32], sizes = [32, 32], strides = [1, 1]} : vector<32x288xf32> to vector<32x32xf32>
    %cst_46 = arith.constant dense<0.000000e+00> : vector<32x256xf32>
    %79 = tpu.matmul %78, %77, %cst_46 {dimension_numbers = #tpu.dot_dimension_numbers<[1], [0], [0], [1], [0, 0, 1, 1], [], []>} : vector<32x32xf32>, vector<32x256xf32>, vector<32x256xf32> -> vector<32x256xf32>
    %80 = arith.addf %76, %79 : vector<32x256xf32>
    %c0_47 = arith.constant 0 : index
    %c226 = arith.constant 226 : index
    %81 = vector.load %arg11[%c0_47, %c226] : memref<32x768xf32, #tpu.memory_space<vmem>>, vector<32x256xf32>
    %82 = vector.broadcast %8 : vector<1x256xf32> to vector<32x256xf32>
    %83 = arith.mulf %81, %82 : vector<32x256xf32>
    %84 = vector.extract_strided_slice %69 {offsets = [0, 64], sizes = [32, 32], strides = [1, 1]} : vector<32x288xf32> to vector<32x32xf32>
    %cst_48 = arith.constant dense<0.000000e+00> : vector<32x256xf32>
    %85 = tpu.matmul %84, %83, %cst_48 {dimension_numbers = #tpu.dot_dimension_numbers<[1], [0], [0], [1], [0, 0, 1, 1], [], []>} : vector<32x32xf32>, vector<32x256xf32>, vector<32x256xf32> -> vector<32x256xf32>
    %86 = arith.addf %80, %85 : vector<32x256xf32>
    %c0_49 = arith.constant 0 : index
    %c254 = arith.constant 254 : index
    %87 = vector.load %arg11[%c0_49, %c254] : memref<32x768xf32, #tpu.memory_space<vmem>>, vector<32x256xf32>
    %88 = vector.broadcast %5 : vector<1x256xf32> to vector<32x256xf32>
    %89 = arith.mulf %87, %88 : vector<32x256xf32>
    %90 = vector.extract_strided_slice %69 {offsets = [0, 96], sizes = [32, 32], strides = [1, 1]} : vector<32x288xf32> to vector<32x32xf32>
    %cst_50 = arith.constant dense<0.000000e+00> : vector<32x256xf32>
    %91 = tpu.matmul %90, %89, %cst_50 {dimension_numbers = #tpu.dot_dimension_numbers<[1], [0], [0], [1], [0, 0, 1, 1], [], []>} : vector<32x32xf32>, vector<32x256xf32>, vector<32x256xf32> -> vector<32x256xf32>
    %92 = arith.addf %86, %91 : vector<32x256xf32>
    %c0_51 = arith.constant 0 : index
    %c256_52 = arith.constant 256 : index
    %93 = vector.load %arg11[%c0_51, %c256_52] : memref<32x768xf32, #tpu.memory_space<vmem>>, vector<32x256xf32>
    %94 = vector.extract_strided_slice %69 {offsets = [0, 128], sizes = [32, 32], strides = [1, 1]} : vector<32x288xf32> to vector<32x32xf32>
    %cst_53 = arith.constant dense<0.000000e+00> : vector<32x256xf32>
    %95 = tpu.matmul %94, %93, %cst_53 {dimension_numbers = #tpu.dot_dimension_numbers<[1], [0], [0], [1], [0, 0, 1, 1], [], []>} : vector<32x32xf32>, vector<32x256xf32>, vector<32x256xf32> -> vector<32x256xf32>
    %96 = arith.addf %92, %95 : vector<32x256xf32>
    %c0_54 = arith.constant 0 : index
    %c258 = arith.constant 258 : index
    %97 = vector.load %arg11[%c0_54, %c258] : memref<32x768xf32, #tpu.memory_space<vmem>>, vector<32x256xf32>
    %98 = vector.broadcast %8 : vector<1x256xf32> to vector<32x256xf32>
    %99 = arith.mulf %97, %98 : vector<32x256xf32>
    %100 = vector.extract_strided_slice %69 {offsets = [0, 160], sizes = [32, 32], strides = [1, 1]} : vector<32x288xf32> to vector<32x32xf32>
    %cst_55 = arith.constant dense<0.000000e+00> : vector<32x256xf32>
    %101 = tpu.matmul %100, %99, %cst_55 {dimension_numbers = #tpu.dot_dimension_numbers<[1], [0], [0], [1], [0, 0, 1, 1], [], []>} : vector<32x32xf32>, vector<32x256xf32>, vector<32x256xf32> -> vector<32x256xf32>
    %102 = arith.addf %96, %101 : vector<32x256xf32>
    %c0_56 = arith.constant 0 : index
    %c286 = arith.constant 286 : index
    %103 = vector.load %arg11[%c0_56, %c286] : memref<32x768xf32, #tpu.memory_space<vmem>>, vector<32x256xf32>
    %104 = vector.broadcast %5 : vector<1x256xf32> to vector<32x256xf32>
    %105 = arith.mulf %103, %104 : vector<32x256xf32>
    %106 = vector.extract_strided_slice %69 {offsets = [0, 192], sizes = [32, 32], strides = [1, 1]} : vector<32x288xf32> to vector<32x32xf32>
    %cst_57 = arith.constant dense<0.000000e+00> : vector<32x256xf32>
    %107 = tpu.matmul %106, %105, %cst_57 {dimension_numbers = #tpu.dot_dimension_numbers<[1], [0], [0], [1], [0, 0, 1, 1], [], []>} : vector<32x32xf32>, vector<32x256xf32>, vector<32x256xf32> -> vector<32x256xf32>
    %108 = arith.addf %102, %107 : vector<32x256xf32>
    %c0_58 = arith.constant 0 : index
    %c288 = arith.constant 288 : index
    %109 = vector.load %arg11[%c0_58, %c288] : memref<32x768xf32, #tpu.memory_space<vmem>>, vector<32x256xf32>
    %110 = vector.extract_strided_slice %69 {offsets = [0, 224], sizes = [32, 32], strides = [1, 1]} : vector<32x288xf32> to vector<32x32xf32>
    %cst_59 = arith.constant dense<0.000000e+00> : vector<32x256xf32>
    %111 = tpu.matmul %110, %109, %cst_59 {dimension_numbers = #tpu.dot_dimension_numbers<[1], [0], [0], [1], [0, 0, 1, 1], [], []>} : vector<32x32xf32>, vector<32x256xf32>, vector<32x256xf32> -> vector<32x256xf32>
    %112 = arith.addf %108, %111 : vector<32x256xf32>
    %c0_60 = arith.constant 0 : index
    %c290 = arith.constant 290 : index
    %113 = vector.load %arg11[%c0_60, %c290] : memref<32x768xf32, #tpu.memory_space<vmem>>, vector<32x256xf32>
    %114 = vector.broadcast %8 : vector<1x256xf32> to vector<32x256xf32>
    %115 = arith.mulf %113, %114 : vector<32x256xf32>
    %116 = vector.extract_strided_slice %69 {offsets = [0, 256], sizes = [32, 32], strides = [1, 1]} : vector<32x288xf32> to vector<32x32xf32>
    %cst_61 = arith.constant dense<0.000000e+00> : vector<32x256xf32>
    %117 = tpu.matmul %116, %115, %cst_61 {dimension_numbers = #tpu.dot_dimension_numbers<[1], [0], [0], [1], [0, 0, 1, 1], [], []>} : vector<32x32xf32>, vector<32x256xf32>, vector<32x256xf32> -> vector<32x256xf32>
    %118 = arith.addf %112, %117 : vector<32x256xf32>
    %119 = vector.broadcast %71 : vector<32x1xf32> to vector<32x256xf32>
    %120 = arith.addf %118, %119 : vector<32x256xf32>
    %cst_62 = arith.constant 0.000000e+00 : f32
    %121 = vector.broadcast %cst_62 : f32 to vector<32x256xf32>
    %122 = arith.maximumf %120, %121 : vector<32x256xf32>
    %c0_63 = arith.constant 0 : index
    %c256_64 = arith.constant 256 : index
    %123 = vector.load %arg12[%c0_63, %c256_64] : memref<32x768xf32, #tpu.memory_space<vmem>>, vector<32x256xf32>
    tpu.vector_store %arg12[%c0_63, %c256_64], %122 {strides = array<i32>} : memref<32x768xf32, #tpu.memory_space<vmem>>, vector<32x256xf32>,
    %c1_65 = arith.constant 1 : index
    %c0_66 = arith.constant 0 : index
    %c0_67 = arith.constant 0 : index
    %124 = vector.load %arg4[%c1_65, %c0_66, %c0_67] : memref<10x32x288xf32, #tpu.memory_space<vmem>>, vector<1x32x288xf32>
    %125 = vector.shape_cast %124 : vector<1x32x288xf32> to vector<32x288xf32>
    %c1_68 = arith.constant 1 : index
    %c0_69 = arith.constant 0 : index
    %c0_70 = arith.constant 0 : index
    %126 = vector.load %arg5[%c1_68, %c0_69, %c0_70] : memref<10x32x1xf32, #tpu.memory_space<vmem>>, vector<1x32x1xf32>
    %127 = vector.shape_cast %126 : vector<1x32x1xf32> to vector<32x1xf32>
    %c0_71 = arith.constant 0 : index
    %c222_72 = arith.constant 222 : index
    %128 = vector.load %arg12[%c0_71, %c222_72] : memref<32x768xf32, #tpu.memory_space<vmem>>, vector<32x256xf32>
    %129 = vector.broadcast %5 : vector<1x256xf32> to vector<32x256xf32>
    %130 = arith.mulf %128, %129 : vector<32x256xf32>
    %131 = vector.extract_strided_slice %125 {offsets = [0, 0], sizes = [32, 32], strides = [1, 1]} : vector<32x288xf32> to vector<32x32xf32>
    %cst_73 = arith.constant dense<0.000000e+00> : vector<32x256xf32>
    %132 = tpu.matmul %131, %130, %cst_73 {dimension_numbers = #tpu.dot_dimension_numbers<[1], [0], [0], [1], [0, 0, 1, 1], [], []>} : vector<32x32xf32>, vector<32x256xf32>, vector<32x256xf32> -> vector<32x256xf32>
    %c0_74 = arith.constant 0 : index
    %c224_75 = arith.constant 224 : index
    %133 = vector.load %arg12[%c0_74, %c224_75] : memref<32x768xf32, #tpu.memory_space<vmem>>, vector<32x256xf32>
    %134 = vector.extract_strided_slice %125 {offsets = [0, 32], sizes = [32, 32], strides = [1, 1]} : vector<32x288xf32> to vector<32x32xf32>
    %cst_76 = arith.constant dense<0.000000e+00> : vector<32x256xf32>
    %135 = tpu.matmul %134, %133, %cst_76 {dimension_numbers = #tpu.dot_dimension_numbers<[1], [0], [0], [1], [0, 0, 1, 1], [], []>} : vector<32x32xf32>, vector<32x256xf32>, vector<32x256xf32> -> vector<32x256xf32>
    %136 = arith.addf %132, %135 : vector<32x256xf32>
    %c0_77 = arith.constant 0 : index
    %c226_78 = arith.constant 226 : index
    %137 = vector.load %arg12[%c0_77, %c226_78] : memref<32x768xf32, #tpu.memory_space<vmem>>, vector<32x256xf32>
    %138 = vector.broadcast %8 : vector<1x256xf32> to vector<32x256xf32>
    %139 = arith.mulf %137, %138 : vector<32x256xf32>
    %140 = vector.extract_strided_slice %125 {offsets = [0, 64], sizes = [32, 32], strides = [1, 1]} : vector<32x288xf32> to vector<32x32xf32>
    %cst_79 = arith.constant dense<0.000000e+00> : vector<32x256xf32>
    %141 = tpu.matmul %140, %139, %cst_79 {dimension_numbers = #tpu.dot_dimension_numbers<[1], [0], [0], [1], [0, 0, 1, 1], [], []>} : vector<32x32xf32>, vector<32x256xf32>, vector<32x256xf32> -> vector<32x256xf32>
    %142 = arith.addf %136, %141 : vector<32x256xf32>
    %c0_80 = arith.constant 0 : index
    %c254_81 = arith.constant 254 : index
    %143 = vector.load %arg12[%c0_80, %c254_81] : memref<32x768xf32, #tpu.memory_space<vmem>>, vector<32x256xf32>
    %144 = vector.broadcast %5 : vector<1x256xf32> to vector<32x256xf32>
    %145 = arith.mulf %143, %144 : vector<32x256xf32>
    %146 = vector.extract_strided_slice %125 {offsets = [0, 96], sizes = [32, 32], strides = [1, 1]} : vector<32x288xf32> to vector<32x32xf32>
    %cst_82 = arith.constant dense<0.000000e+00> : vector<32x256xf32>
    %147 = tpu.matmul %146, %145, %cst_82 {dimension_numbers = #tpu.dot_dimension_numbers<[1], [0], [0], [1], [0, 0, 1, 1], [], []>} : vector<32x32xf32>, vector<32x256xf32>, vector<32x256xf32> -> vector<32x256xf32>
    %148 = arith.addf %142, %147 : vector<32x256xf32>
    %c0_83 = arith.constant 0 : index
    %c256_84 = arith.constant 256 : index
    %149 = vector.load %arg12[%c0_83, %c256_84] : memref<32x768xf32, #tpu.memory_space<vmem>>, vector<32x256xf32>
    %150 = vector.extract_strided_slice %125 {offsets = [0, 128], sizes = [32, 32], strides = [1, 1]} : vector<32x288xf32> to vector<32x32xf32>
    %cst_85 = arith.constant dense<0.000000e+00> : vector<32x256xf32>
    %151 = tpu.matmul %150, %149, %cst_85 {dimension_numbers = #tpu.dot_dimension_numbers<[1], [0], [0], [1], [0, 0, 1, 1], [], []>} : vector<32x32xf32>, vector<32x256xf32>, vector<32x256xf32> -> vector<32x256xf32>
    %152 = arith.addf %148, %151 : vector<32x256xf32>
    %c0_86 = arith.constant 0 : index
    %c258_87 = arith.constant 258 : index
    %153 = vector.load %arg12[%c0_86, %c258_87] : memref<32x768xf32, #tpu.memory_space<vmem>>, vector<32x256xf32>
    %154 = vector.broadcast %8 : vector<1x256xf32> to vector<32x256xf32>
    %155 = arith.mulf %153, %154 : vector<32x256xf32>
    %156 = vector.extract_strided_slice %125 {offsets = [0, 160], sizes = [32, 32], strides = [1, 1]} : vector<32x288xf32> to vector<32x32xf32>
    %cst_88 = arith.constant dense<0.000000e+00> : vector<32x256xf32>
    %157 = tpu.matmul %156, %155, %cst_88 {dimension_numbers = #tpu.dot_dimension_numbers<[1], [0], [0], [1], [0, 0, 1, 1], [], []>} : vector<32x32xf32>, vector<32x256xf32>, vector<32x256xf32> -> vector<32x256xf32>
    %158 = arith.addf %152, %157 : vector<32x256xf32>
    %c0_89 = arith.constant 0 : index
    %c286_90 = arith.constant 286 : index
    %159 = vector.load %arg12[%c0_89, %c286_90] : memref<32x768xf32, #tpu.memory_space<vmem>>, vector<32x256xf32>
    %160 = vector.broadcast %5 : vector<1x256xf32> to vector<32x256xf32>
    %161 = arith.mulf %159, %160 : vector<32x256xf32>
    %162 = vector.extract_strided_slice %125 {offsets = [0, 192], sizes = [32, 32], strides = [1, 1]} : vector<32x288xf32> to vector<32x32xf32>
    %cst_91 = arith.constant dense<0.000000e+00> : vector<32x256xf32>
    %163 = tpu.matmul %162, %161, %cst_91 {dimension_numbers = #tpu.dot_dimension_numbers<[1], [0], [0], [1], [0, 0, 1, 1], [], []>} : vector<32x32xf32>, vector<32x256xf32>, vector<32x256xf32> -> vector<32x256xf32>
    %164 = arith.addf %158, %163 : vector<32x256xf32>
    %c0_92 = arith.constant 0 : index
    %c288_93 = arith.constant 288 : index
    %165 = vector.load %arg12[%c0_92, %c288_93] : memref<32x768xf32, #tpu.memory_space<vmem>>, vector<32x256xf32>
    %166 = vector.extract_strided_slice %125 {offsets = [0, 224], sizes = [32, 32], strides = [1, 1]} : vector<32x288xf32> to vector<32x32xf32>
    %cst_94 = arith.constant dense<0.000000e+00> : vector<32x256xf32>
    %167 = tpu.matmul %166, %165, %cst_94 {dimension_numbers = #tpu.dot_dimension_numbers<[1], [0], [0], [1], [0, 0, 1, 1], [], []>} : vector<32x32xf32>, vector<32x256xf32>, vector<32x256xf32> -> vector<32x256xf32>
    %168 = arith.addf %164, %167 : vector<32x256xf32>
    %c0_95 = arith.constant 0 : index
    %c290_96 = arith.constant 290 : index
    %169 = vector.load %arg12[%c0_95, %c290_96] : memref<32x768xf32, #tpu.memory_space<vmem>>, vector<32x256xf32>
    %170 = vector.broadcast %8 : vector<1x256xf32> to vector<32x256xf32>
    %171 = arith.mulf %169, %170 : vector<32x256xf32>
    %172 = vector.extract_strided_slice %125 {offsets = [0, 256], sizes = [32, 32], strides = [1, 1]} : vector<32x288xf32> to vector<32x32xf32>
    %cst_97 = arith.constant dense<0.000000e+00> : vector<32x256xf32>
    %173 = tpu.matmul %172, %171, %cst_97 {dimension_numbers = #tpu.dot_dimension_numbers<[1], [0], [0], [1], [0, 0, 1, 1], [], []>} : vector<32x32xf32>, vector<32x256xf32>, vector<32x256xf32> -> vector<32x256xf32>
    %174 = arith.addf %168, %173 : vector<32x256xf32>
    %175 = vector.broadcast %127 : vector<32x1xf32> to vector<32x256xf32>
    %176 = arith.addf %174, %175 : vector<32x256xf32>
    %c0_98 = arith.constant 0 : index
    %c256_99 = arith.constant 256 : index
    %177 = vector.load %arg11[%c0_98, %c256_99] : memref<32x768xf32, #tpu.memory_space<vmem>>, vector<32x256xf32>
    %178 = arith.addf %176, %177 : vector<32x256xf32>
    %cst_100 = arith.constant 0.000000e+00 : f32
    %179 = vector.broadcast %cst_100 : f32 to vector<32x256xf32>
    %180 = arith.maximumf %178, %179 : vector<32x256xf32>
    %c0_101 = arith.constant 0 : index
    %c256_102 = arith.constant 256 : index
    %181 = vector.load %arg11[%c0_101, %c256_102] : memref<32x768xf32, #tpu.memory_space<vmem>>, vector<32x256xf32>
    tpu.vector_store %arg11[%c0_101, %c256_102], %180 {strides = array<i32>} : memref<32x768xf32, #tpu.memory_space<vmem>>, vector<32x256xf32>,
    %c2_103 = arith.constant 2 : index
    %c0_104 = arith.constant 0 : index
    %c0_105 = arith.constant 0 : index
    %182 = vector.load %arg4[%c2_103, %c0_104, %c0_105] : memref<10x32x288xf32, #tpu.memory_space<vmem>>, vector<1x32x288xf32>
    %183 = vector.shape_cast %182 : vector<1x32x288xf32> to vector<32x288xf32>
    %c2_106 = arith.constant 2 : index
    %c0_107 = arith.constant 0 : index
    %c0_108 = arith.constant 0 : index
    %184 = vector.load %arg5[%c2_106, %c0_107, %c0_108] : memref<10x32x1xf32, #tpu.memory_space<vmem>>, vector<1x32x1xf32>
    %185 = vector.shape_cast %184 : vector<1x32x1xf32> to vector<32x1xf32>
    %c0_109 = arith.constant 0 : index
    %c188 = arith.constant 188 : index
    %186 = vector.load %arg11[%c0_109, %c188] : memref<32x768xf32, #tpu.memory_space<vmem>>, vector<32x256xf32>
    %187 = vector.broadcast %4 : vector<1x256xf32> to vector<32x256xf32>
    %188 = arith.mulf %186, %187 : vector<32x256xf32>
    %189 = vector.extract_strided_slice %183 {offsets = [0, 0], sizes = [32, 32], strides = [1, 1]} : vector<32x288xf32> to vector<32x32xf32>
    %cst_110 = arith.constant dense<0.000000e+00> : vector<32x256xf32>
    %190 = tpu.matmul %189, %188, %cst_110 {dimension_numbers = #tpu.dot_dimension_numbers<[1], [0], [0], [1], [0, 0, 1, 1], [], []>} : vector<32x32xf32>, vector<32x256xf32>, vector<32x256xf32> -> vector<32x256xf32>
    %c0_111 = arith.constant 0 : index
    %c192 = arith.constant 192 : index
    %191 = vector.load %arg11[%c0_111, %c192] : memref<32x768xf32, #tpu.memory_space<vmem>>, vector<32x256xf32>
    %192 = vector.extract_strided_slice %183 {offsets = [0, 32], sizes = [32, 32], strides = [1, 1]} : vector<32x288xf32> to vector<32x32xf32>
    %cst_112 = arith.constant dense<0.000000e+00> : vector<32x256xf32>
    %193 = tpu.matmul %192, %191, %cst_112 {dimension_numbers = #tpu.dot_dimension_numbers<[1], [0], [0], [1], [0, 0, 1, 1], [], []>} : vector<32x32xf32>, vector<32x256xf32>, vector<32x256xf32> -> vector<32x256xf32>
    %194 = arith.addf %190, %193 : vector<32x256xf32>
    %c0_113 = arith.constant 0 : index
    %c196 = arith.constant 196 : index
    %195 = vector.load %arg11[%c0_113, %c196] : memref<32x768xf32, #tpu.memory_space<vmem>>, vector<32x256xf32>
    %196 = vector.broadcast %9 : vector<1x256xf32> to vector<32x256xf32>
    %197 = arith.mulf %195, %196 : vector<32x256xf32>
    %198 = vector.extract_strided_slice %183 {offsets = [0, 64], sizes = [32, 32], strides = [1, 1]} : vector<32x288xf32> to vector<32x32xf32>
    %cst_114 = arith.constant dense<0.000000e+00> : vector<32x256xf32>
    %199 = tpu.matmul %198, %197, %cst_114 {dimension_numbers = #tpu.dot_dimension_numbers<[1], [0], [0], [1], [0, 0, 1, 1], [], []>} : vector<32x32xf32>, vector<32x256xf32>, vector<32x256xf32> -> vector<32x256xf32>
    %200 = arith.addf %194, %199 : vector<32x256xf32>
    %c0_115 = arith.constant 0 : index
    %c252 = arith.constant 252 : index
    %201 = vector.load %arg11[%c0_115, %c252] : memref<32x768xf32, #tpu.memory_space<vmem>>, vector<32x256xf32>
    %202 = vector.broadcast %4 : vector<1x256xf32> to vector<32x256xf32>
    %203 = arith.mulf %201, %202 : vector<32x256xf32>
    %204 = vector.extract_strided_slice %183 {offsets = [0, 96], sizes = [32, 32], strides = [1, 1]} : vector<32x288xf32> to vector<32x32xf32>
    %cst_116 = arith.constant dense<0.000000e+00> : vector<32x256xf32>
    %205 = tpu.matmul %204, %203, %cst_116 {dimension_numbers = #tpu.dot_dimension_numbers<[1], [0], [0], [1], [0, 0, 1, 1], [], []>} : vector<32x32xf32>, vector<32x256xf32>, vector<32x256xf32> -> vector<32x256xf32>
    %206 = arith.addf %200, %205 : vector<32x256xf32>
    %c0_117 = arith.constant 0 : index
    %c256_118 = arith.constant 256 : index
    %207 = vector.load %arg11[%c0_117, %c256_118] : memref<32x768xf32, #tpu.memory_space<vmem>>, vector<32x256xf32>
    %208 = vector.extract_strided_slice %183 {offsets = [0, 128], sizes = [32, 32], strides = [1, 1]} : vector<32x288xf32> to vector<32x32xf32>
    %cst_119 = arith.constant dense<0.000000e+00> : vector<32x256xf32>
    %209 = tpu.matmul %208, %207, %cst_119 {dimension_numbers = #tpu.dot_dimension_numbers<[1], [0], [0], [1], [0, 0, 1, 1], [], []>} : vector<32x32xf32>, vector<32x256xf32>, vector<32x256xf32> -> vector<32x256xf32>
    %210 = arith.addf %206, %209 : vector<32x256xf32>
    %c0_120 = arith.constant 0 : index
    %c260 = arith.constant 260 : index
    %211 = vector.load %arg11[%c0_120, %c260] : memref<32x768xf32, #tpu.memory_space<vmem>>, vector<32x256xf32>
    %212 = vector.broadcast %9 : vector<1x256xf32> to vector<32x256xf32>
    %213 = arith.mulf %211, %212 : vector<32x256xf32>
    %214 = vector.extract_strided_slice %183 {offsets = [0, 160], sizes = [32, 32], strides = [1, 1]} : vector<32x288xf32> to vector<32x32xf32>
    %cst_121 = arith.constant dense<0.000000e+00> : vector<32x256xf32>
    %215 = tpu.matmul %214, %213, %cst_121 {dimension_numbers = #tpu.dot_dimension_numbers<[1], [0], [0], [1], [0, 0, 1, 1], [], []>} : vector<32x32xf32>, vector<32x256xf32>, vector<32x256xf32> -> vector<32x256xf32>
    %216 = arith.addf %210, %215 : vector<32x256xf32>
    %c0_122 = arith.constant 0 : index
    %c316 = arith.constant 316 : index
    %217 = vector.load %arg11[%c0_122, %c316] : memref<32x768xf32, #tpu.memory_space<vmem>>, vector<32x256xf32>
    %218 = vector.broadcast %4 : vector<1x256xf32> to vector<32x256xf32>
    %219 = arith.mulf %217, %218 : vector<32x256xf32>
    %220 = vector.extract_strided_slice %183 {offsets = [0, 192], sizes = [32, 32], strides = [1, 1]} : vector<32x288xf32> to vector<32x32xf32>
    %cst_123 = arith.constant dense<0.000000e+00> : vector<32x256xf32>
    %221 = tpu.matmul %220, %219, %cst_123 {dimension_numbers = #tpu.dot_dimension_numbers<[1], [0], [0], [1], [0, 0, 1, 1], [], []>} : vector<32x32xf32>, vector<32x256xf32>, vector<32x256xf32> -> vector<32x256xf32>
    %222 = arith.addf %216, %221 : vector<32x256xf32>
    %c0_124 = arith.constant 0 : index
    %c320 = arith.constant 320 : index
    %223 = vector.load %arg11[%c0_124, %c320] : memref<32x768xf32, #tpu.memory_space<vmem>>, vector<32x256xf32>
    %224 = vector.extract_strided_slice %183 {offsets = [0, 224], sizes = [32, 32], strides = [1, 1]} : vector<32x288xf32> to vector<32x32xf32>
    %cst_125 = arith.constant dense<0.000000e+00> : vector<32x256xf32>
    %225 = tpu.matmul %224, %223, %cst_125 {dimension_numbers = #tpu.dot_dimension_numbers<[1], [0], [0], [1], [0, 0, 1, 1], [], []>} : vector<32x32xf32>, vector<32x256xf32>, vector<32x256xf32> -> vector<32x256xf32>
    %226 = arith.addf %222, %225 : vector<32x256xf32>
    %c0_126 = arith.constant 0 : index
    %c324 = arith.constant 324 : index
    %227 = vector.load %arg11[%c0_126, %c324] : memref<32x768xf32, #tpu.memory_space<vmem>>, vector<32x256xf32>
    %228 = vector.broadcast %9 : vector<1x256xf32> to vector<32x256xf32>
    %229 = arith.mulf %227, %228 : vector<32x256xf32>
    %230 = vector.extract_strided_slice %183 {offsets = [0, 256], sizes = [32, 32], strides = [1, 1]} : vector<32x288xf32> to vector<32x32xf32>
    %cst_127 = arith.constant dense<0.000000e+00> : vector<32x256xf32>
    %231 = tpu.matmul %230, %229, %cst_127 {dimension_numbers = #tpu.dot_dimension_numbers<[1], [0], [0], [1], [0, 0, 1, 1], [], []>} : vector<32x32xf32>, vector<32x256xf32>, vector<32x256xf32> -> vector<32x256xf32>
    %232 = arith.addf %226, %231 : vector<32x256xf32>
    %233 = vector.broadcast %185 : vector<32x1xf32> to vector<32x256xf32>
    %234 = arith.addf %232, %233 : vector<32x256xf32>
    %cst_128 = arith.constant 0.000000e+00 : f32
    %235 = vector.broadcast %cst_128 : f32 to vector<32x256xf32>
    %236 = arith.maximumf %234, %235 : vector<32x256xf32>
    %c0_129 = arith.constant 0 : index
    %c256_130 = arith.constant 256 : index
    %237 = vector.load %arg12[%c0_129, %c256_130] : memref<32x768xf32, #tpu.memory_space<vmem>>, vector<32x256xf32>
    tpu.vector_store %arg12[%c0_129, %c256_130], %236 {strides = array<i32>} : memref<32x768xf32, #tpu.memory_space<vmem>>, vector<32x256xf32>,
    %c3_131 = arith.constant 3 : index
    %c0_132 = arith.constant 0 : index
    %c0_133 = arith.constant 0 : index
    %238 = vector.load %arg4[%c3_131, %c0_132, %c0_133] : memref<10x32x288xf32, #tpu.memory_space<vmem>>, vector<1x32x288xf32>
    %239 = vector.shape_cast %238 : vector<1x32x288xf32> to vector<32x288xf32>
    %c3_134 = arith.constant 3 : index
    %c0_135 = arith.constant 0 : index
    %c0_136 = arith.constant 0 : index
    %240 = vector.load %arg5[%c3_134, %c0_135, %c0_136] : memref<10x32x1xf32, #tpu.memory_space<vmem>>, vector<1x32x1xf32>
    %241 = vector.shape_cast %240 : vector<1x32x1xf32> to vector<32x1xf32>
    %c0_137 = arith.constant 0 : index
    %c188_138 = arith.constant 188 : index
    %242 = vector.load %arg12[%c0_137, %c188_138] : memref<32x768xf32, #tpu.memory_space<vmem>>, vector<32x256xf32>
    %243 = vector.broadcast %4 : vector<1x256xf32> to vector<32x256xf32>
    %244 = arith.mulf %242, %243 : vector<32x256xf32>
    %245 = vector.extract_strided_slice %239 {offsets = [0, 0], sizes = [32, 32], strides = [1, 1]} : vector<32x288xf32> to vector<32x32xf32>
    %cst_139 = arith.constant dense<0.000000e+00> : vector<32x256xf32>
    %246 = tpu.matmul %245, %244, %cst_139 {dimension_numbers = #tpu.dot_dimension_numbers<[1], [0], [0], [1], [0, 0, 1, 1], [], []>} : vector<32x32xf32>, vector<32x256xf32>, vector<32x256xf32> -> vector<32x256xf32>
    %c0_140 = arith.constant 0 : index
    %c192_141 = arith.constant 192 : index
    %247 = vector.load %arg12[%c0_140, %c192_141] : memref<32x768xf32, #tpu.memory_space<vmem>>, vector<32x256xf32>
    %248 = vector.extract_strided_slice %239 {offsets = [0, 32], sizes = [32, 32], strides = [1, 1]} : vector<32x288xf32> to vector<32x32xf32>
    %cst_142 = arith.constant dense<0.000000e+00> : vector<32x256xf32>
    %249 = tpu.matmul %248, %247, %cst_142 {dimension_numbers = #tpu.dot_dimension_numbers<[1], [0], [0], [1], [0, 0, 1, 1], [], []>} : vector<32x32xf32>, vector<32x256xf32>, vector<32x256xf32> -> vector<32x256xf32>
    %250 = arith.addf %246, %249 : vector<32x256xf32>
    %c0_143 = arith.constant 0 : index
    %c196_144 = arith.constant 196 : index
    %251 = vector.load %arg12[%c0_143, %c196_144] : memref<32x768xf32, #tpu.memory_space<vmem>>, vector<32x256xf32>
    %252 = vector.broadcast %9 : vector<1x256xf32> to vector<32x256xf32>
    %253 = arith.mulf %251, %252 : vector<32x256xf32>
    %254 = vector.extract_strided_slice %239 {offsets = [0, 64], sizes = [32, 32], strides = [1, 1]} : vector<32x288xf32> to vector<32x32xf32>
    %cst_145 = arith.constant dense<0.000000e+00> : vector<32x256xf32>
    %255 = tpu.matmul %254, %253, %cst_145 {dimension_numbers = #tpu.dot_dimension_numbers<[1], [0], [0], [1], [0, 0, 1, 1], [], []>} : vector<32x32xf32>, vector<32x256xf32>, vector<32x256xf32> -> vector<32x256xf32>
    %256 = arith.addf %250, %255 : vector<32x256xf32>
    %c0_146 = arith.constant 0 : index
    %c252_147 = arith.constant 252 : index
    %257 = vector.load %arg12[%c0_146, %c252_147] : memref<32x768xf32, #tpu.memory_space<vmem>>, vector<32x256xf32>
    %258 = vector.broadcast %4 : vector<1x256xf32> to vector<32x256xf32>
    %259 = arith.mulf %257, %258 : vector<32x256xf32>
    %260 = vector.extract_strided_slice %239 {offsets = [0, 96], sizes = [32, 32], strides = [1, 1]} : vector<32x288xf32> to vector<32x32xf32>
    %cst_148 = arith.constant dense<0.000000e+00> : vector<32x256xf32>
    %261 = tpu.matmul %260, %259, %cst_148 {dimension_numbers = #tpu.dot_dimension_numbers<[1], [0], [0], [1], [0, 0, 1, 1], [], []>} : vector<32x32xf32>, vector<32x256xf32>, vector<32x256xf32> -> vector<32x256xf32>
    %262 = arith.addf %256, %261 : vector<32x256xf32>
    %c0_149 = arith.constant 0 : index
    %c256_150 = arith.constant 256 : index
    %263 = vector.load %arg12[%c0_149, %c256_150] : memref<32x768xf32, #tpu.memory_space<vmem>>, vector<32x256xf32>
    %264 = vector.extract_strided_slice %239 {offsets = [0, 128], sizes = [32, 32], strides = [1, 1]} : vector<32x288xf32> to vector<32x32xf32>
    %cst_151 = arith.constant dense<0.000000e+00> : vector<32x256xf32>
    %265 = tpu.matmul %264, %263, %cst_151 {dimension_numbers = #tpu.dot_dimension_numbers<[1], [0], [0], [1], [0, 0, 1, 1], [], []>} : vector<32x32xf32>, vector<32x256xf32>, vector<32x256xf32> -> vector<32x256xf32>
    %266 = arith.addf %262, %265 : vector<32x256xf32>
    %c0_152 = arith.constant 0 : index
    %c260_153 = arith.constant 260 : index
    %267 = vector.load %arg12[%c0_152, %c260_153] : memref<32x768xf32, #tpu.memory_space<vmem>>, vector<32x256xf32>
    %268 = vector.broadcast %9 : vector<1x256xf32> to vector<32x256xf32>
    %269 = arith.mulf %267, %268 : vector<32x256xf32>
    %270 = vector.extract_strided_slice %239 {offsets = [0, 160], sizes = [32, 32], strides = [1, 1]} : vector<32x288xf32> to vector<32x32xf32>
    %cst_154 = arith.constant dense<0.000000e+00> : vector<32x256xf32>
    %271 = tpu.matmul %270, %269, %cst_154 {dimension_numbers = #tpu.dot_dimension_numbers<[1], [0], [0], [1], [0, 0, 1, 1], [], []>} : vector<32x32xf32>, vector<32x256xf32>, vector<32x256xf32> -> vector<32x256xf32>
    %272 = arith.addf %266, %271 : vector<32x256xf32>
    %c0_155 = arith.constant 0 : index
    %c316_156 = arith.constant 316 : index
    %273 = vector.load %arg12[%c0_155, %c316_156] : memref<32x768xf32, #tpu.memory_space<vmem>>, vector<32x256xf32>
    %274 = vector.broadcast %4 : vector<1x256xf32> to vector<32x256xf32>
    %275 = arith.mulf %273, %274 : vector<32x256xf32>
    %276 = vector.extract_strided_slice %239 {offsets = [0, 192], sizes = [32, 32], strides = [1, 1]} : vector<32x288xf32> to vector<32x32xf32>
    %cst_157 = arith.constant dense<0.000000e+00> : vector<32x256xf32>
    %277 = tpu.matmul %276, %275, %cst_157 {dimension_numbers = #tpu.dot_dimension_numbers<[1], [0], [0], [1], [0, 0, 1, 1], [], []>} : vector<32x32xf32>, vector<32x256xf32>, vector<32x256xf32> -> vector<32x256xf32>
    %278 = arith.addf %272, %277 : vector<32x256xf32>
    %c0_158 = arith.constant 0 : index
    %c320_159 = arith.constant 320 : index
    %279 = vector.load %arg12[%c0_158, %c320_159] : memref<32x768xf32, #tpu.memory_space<vmem>>, vector<32x256xf32>
    %280 = vector.extract_strided_slice %239 {offsets = [0, 224], sizes = [32, 32], strides = [1, 1]} : vector<32x288xf32> to vector<32x32xf32>
    %cst_160 = arith.constant dense<0.000000e+00> : vector<32x256xf32>
    %281 = tpu.matmul %280, %279, %cst_160 {dimension_numbers = #tpu.dot_dimension_numbers<[1], [0], [0], [1], [0, 0, 1, 1], [], []>} : vector<32x32xf32>, vector<32x256xf32>, vector<32x256xf32> -> vector<32x256xf32>
    %282 = arith.addf %278, %281 : vector<32x256xf32>
    %c0_161 = arith.constant 0 : index
    %c324_162 = arith.constant 324 : index
    %283 = vector.load %arg12[%c0_161, %c324_162] : memref<32x768xf32, #tpu.memory_space<vmem>>, vector<32x256xf32>
    %284 = vector.broadcast %9 : vector<1x256xf32> to vector<32x256xf32>
    %285 = arith.mulf %283, %284 : vector<32x256xf32>
    %286 = vector.extract_strided_slice %239 {offsets = [0, 256], sizes = [32, 32], strides = [1, 1]} : vector<32x288xf32> to vector<32x32xf32>
    %cst_163 = arith.constant dense<0.000000e+00> : vector<32x256xf32>
    %287 = tpu.matmul %286, %285, %cst_163 {dimension_numbers = #tpu.dot_dimension_numbers<[1], [0], [0], [1], [0, 0, 1, 1], [], []>} : vector<32x32xf32>, vector<32x256xf32>, vector<32x256xf32> -> vector<32x256xf32>
    %288 = arith.addf %282, %287 : vector<32x256xf32>
    %289 = vector.broadcast %241 : vector<32x1xf32> to vector<32x256xf32>
    %290 = arith.addf %288, %289 : vector<32x256xf32>
    %c0_164 = arith.constant 0 : index
    %c256_165 = arith.constant 256 : index
    %291 = vector.load %arg11[%c0_164, %c256_165] : memref<32x768xf32, #tpu.memory_space<vmem>>, vector<32x256xf32>
    %292 = arith.addf %290, %291 : vector<32x256xf32>
    %cst_166 = arith.constant 0.000000e+00 : f32
    %293 = vector.broadcast %cst_166 : f32 to vector<32x256xf32>
    %294 = arith.maximumf %292, %293 : vector<32x256xf32>
    %c0_167 = arith.constant 0 : index
    %c256_168 = arith.constant 256 : index
    %295 = vector.load %arg11[%c0_167, %c256_168] : memref<32x768xf32, #tpu.memory_space<vmem>>, vector<32x256xf32>
    tpu.vector_store %arg11[%c0_167, %c256_168], %294 {strides = array<i32>} : memref<32x768xf32, #tpu.memory_space<vmem>>, vector<32x256xf32>,
    %c4_169 = arith.constant 4 : index
    %c0_170 = arith.constant 0 : index
    %c0_171 = arith.constant 0 : index
    %296 = vector.load %arg4[%c4_169, %c0_170, %c0_171] : memref<10x32x288xf32, #tpu.memory_space<vmem>>, vector<1x32x288xf32>
    %297 = vector.shape_cast %296 : vector<1x32x288xf32> to vector<32x288xf32>
    %c4_172 = arith.constant 4 : index
    %c0_173 = arith.constant 0 : index
    %c0_174 = arith.constant 0 : index
    %298 = vector.load %arg5[%c4_172, %c0_173, %c0_174] : memref<10x32x1xf32, #tpu.memory_space<vmem>>, vector<1x32x1xf32>
    %299 = vector.shape_cast %298 : vector<1x32x1xf32> to vector<32x1xf32>
    %c0_175 = arith.constant 0 : index
    %c120 = arith.constant 120 : index
    %300 = vector.load %arg11[%c0_175, %c120] : memref<32x768xf32, #tpu.memory_space<vmem>>, vector<32x256xf32>
    %301 = vector.broadcast %3 : vector<1x256xf32> to vector<32x256xf32>
    %302 = arith.mulf %300, %301 : vector<32x256xf32>
    %303 = vector.extract_strided_slice %297 {offsets = [0, 0], sizes = [32, 32], strides = [1, 1]} : vector<32x288xf32> to vector<32x32xf32>
    %cst_176 = arith.constant dense<0.000000e+00> : vector<32x256xf32>
    %304 = tpu.matmul %303, %302, %cst_176 {dimension_numbers = #tpu.dot_dimension_numbers<[1], [0], [0], [1], [0, 0, 1, 1], [], []>} : vector<32x32xf32>, vector<32x256xf32>, vector<32x256xf32> -> vector<32x256xf32>
    %c0_177 = arith.constant 0 : index
    %c128_178 = arith.constant 128 : index
    %305 = vector.load %arg11[%c0_177, %c128_178] : memref<32x768xf32, #tpu.memory_space<vmem>>, vector<32x256xf32>
    %306 = vector.extract_strided_slice %297 {offsets = [0, 32], sizes = [32, 32], strides = [1, 1]} : vector<32x288xf32> to vector<32x32xf32>
    %cst_179 = arith.constant dense<0.000000e+00> : vector<32x256xf32>
    %307 = tpu.matmul %306, %305, %cst_179 {dimension_numbers = #tpu.dot_dimension_numbers<[1], [0], [0], [1], [0, 0, 1, 1], [], []>} : vector<32x32xf32>, vector<32x256xf32>, vector<32x256xf32> -> vector<32x256xf32>
    %308 = arith.addf %304, %307 : vector<32x256xf32>
    %c0_180 = arith.constant 0 : index
    %c136 = arith.constant 136 : index
    %309 = vector.load %arg11[%c0_180, %c136] : memref<32x768xf32, #tpu.memory_space<vmem>>, vector<32x256xf32>
    %310 = vector.broadcast %10 : vector<1x256xf32> to vector<32x256xf32>
    %311 = arith.mulf %309, %310 : vector<32x256xf32>
    %312 = vector.extract_strided_slice %297 {offsets = [0, 64], sizes = [32, 32], strides = [1, 1]} : vector<32x288xf32> to vector<32x32xf32>
    %cst_181 = arith.constant dense<0.000000e+00> : vector<32x256xf32>
    %313 = tpu.matmul %312, %311, %cst_181 {dimension_numbers = #tpu.dot_dimension_numbers<[1], [0], [0], [1], [0, 0, 1, 1], [], []>} : vector<32x32xf32>, vector<32x256xf32>, vector<32x256xf32> -> vector<32x256xf32>
    %314 = arith.addf %308, %313 : vector<32x256xf32>
    %c0_182 = arith.constant 0 : index
    %c248 = arith.constant 248 : index
    %315 = vector.load %arg11[%c0_182, %c248] : memref<32x768xf32, #tpu.memory_space<vmem>>, vector<32x256xf32>
    %316 = vector.broadcast %3 : vector<1x256xf32> to vector<32x256xf32>
    %317 = arith.mulf %315, %316 : vector<32x256xf32>
    %318 = vector.extract_strided_slice %297 {offsets = [0, 96], sizes = [32, 32], strides = [1, 1]} : vector<32x288xf32> to vector<32x32xf32>
    %cst_183 = arith.constant dense<0.000000e+00> : vector<32x256xf32>
    %319 = tpu.matmul %318, %317, %cst_183 {dimension_numbers = #tpu.dot_dimension_numbers<[1], [0], [0], [1], [0, 0, 1, 1], [], []>} : vector<32x32xf32>, vector<32x256xf32>, vector<32x256xf32> -> vector<32x256xf32>
    %320 = arith.addf %314, %319 : vector<32x256xf32>
    %c0_184 = arith.constant 0 : index
    %c256_185 = arith.constant 256 : index
    %321 = vector.load %arg11[%c0_184, %c256_185] : memref<32x768xf32, #tpu.memory_space<vmem>>, vector<32x256xf32>
    %322 = vector.extract_strided_slice %297 {offsets = [0, 128], sizes = [32, 32], strides = [1, 1]} : vector<32x288xf32> to vector<32x32xf32>
    %cst_186 = arith.constant dense<0.000000e+00> : vector<32x256xf32>
    %323 = tpu.matmul %322, %321, %cst_186 {dimension_numbers = #tpu.dot_dimension_numbers<[1], [0], [0], [1], [0, 0, 1, 1], [], []>} : vector<32x32xf32>, vector<32x256xf32>, vector<32x256xf32> -> vector<32x256xf32>
    %324 = arith.addf %320, %323 : vector<32x256xf32>
    %c0_187 = arith.constant 0 : index
    %c264 = arith.constant 264 : index
    %325 = vector.load %arg11[%c0_187, %c264] : memref<32x768xf32, #tpu.memory_space<vmem>>, vector<32x256xf32>
    %326 = vector.broadcast %10 : vector<1x256xf32> to vector<32x256xf32>
    %327 = arith.mulf %325, %326 : vector<32x256xf32>
    %328 = vector.extract_strided_slice %297 {offsets = [0, 160], sizes = [32, 32], strides = [1, 1]} : vector<32x288xf32> to vector<32x32xf32>
    %cst_188 = arith.constant dense<0.000000e+00> : vector<32x256xf32>
    %329 = tpu.matmul %328, %327, %cst_188 {dimension_numbers = #tpu.dot_dimension_numbers<[1], [0], [0], [1], [0, 0, 1, 1], [], []>} : vector<32x32xf32>, vector<32x256xf32>, vector<32x256xf32> -> vector<32x256xf32>
    %330 = arith.addf %324, %329 : vector<32x256xf32>
    %c0_189 = arith.constant 0 : index
    %c376 = arith.constant 376 : index
    %331 = vector.load %arg11[%c0_189, %c376] : memref<32x768xf32, #tpu.memory_space<vmem>>, vector<32x256xf32>
    %332 = vector.broadcast %3 : vector<1x256xf32> to vector<32x256xf32>
    %333 = arith.mulf %331, %332 : vector<32x256xf32>
    %334 = vector.extract_strided_slice %297 {offsets = [0, 192], sizes = [32, 32], strides = [1, 1]} : vector<32x288xf32> to vector<32x32xf32>
    %cst_190 = arith.constant dense<0.000000e+00> : vector<32x256xf32>
    %335 = tpu.matmul %334, %333, %cst_190 {dimension_numbers = #tpu.dot_dimension_numbers<[1], [0], [0], [1], [0, 0, 1, 1], [], []>} : vector<32x32xf32>, vector<32x256xf32>, vector<32x256xf32> -> vector<32x256xf32>
    %336 = arith.addf %330, %335 : vector<32x256xf32>
    %c0_191 = arith.constant 0 : index
    %c384 = arith.constant 384 : index
    %337 = vector.load %arg11[%c0_191, %c384] : memref<32x768xf32, #tpu.memory_space<vmem>>, vector<32x256xf32>
    %338 = vector.extract_strided_slice %297 {offsets = [0, 224], sizes = [32, 32], strides = [1, 1]} : vector<32x288xf32> to vector<32x32xf32>
    %cst_192 = arith.constant dense<0.000000e+00> : vector<32x256xf32>
    %339 = tpu.matmul %338, %337, %cst_192 {dimension_numbers = #tpu.dot_dimension_numbers<[1], [0], [0], [1], [0, 0, 1, 1], [], []>} : vector<32x32xf32>, vector<32x256xf32>, vector<32x256xf32> -> vector<32x256xf32>
    %340 = arith.addf %336, %339 : vector<32x256xf32>
    %c0_193 = arith.constant 0 : index
    %c392 = arith.constant 392 : index
    %341 = vector.load %arg11[%c0_193, %c392] : memref<32x768xf32, #tpu.memory_space<vmem>>, vector<32x256xf32>
    %342 = vector.broadcast %10 : vector<1x256xf32> to vector<32x256xf32>
    %343 = arith.mulf %341, %342 : vector<32x256xf32>
    %344 = vector.extract_strided_slice %297 {offsets = [0, 256], sizes = [32, 32], strides = [1, 1]} : vector<32x288xf32> to vector<32x32xf32>
    %cst_194 = arith.constant dense<0.000000e+00> : vector<32x256xf32>
    %345 = tpu.matmul %344, %343, %cst_194 {dimension_numbers = #tpu.dot_dimension_numbers<[1], [0], [0], [1], [0, 0, 1, 1], [], []>} : vector<32x32xf32>, vector<32x256xf32>, vector<32x256xf32> -> vector<32x256xf32>
    %346 = arith.addf %340, %345 : vector<32x256xf32>
    %347 = vector.broadcast %299 : vector<32x1xf32> to vector<32x256xf32>
    %348 = arith.addf %346, %347 : vector<32x256xf32>
    %cst_195 = arith.constant 0.000000e+00 : f32
    %349 = vector.broadcast %cst_195 : f32 to vector<32x256xf32>
    %350 = arith.maximumf %348, %349 : vector<32x256xf32>
    %c0_196 = arith.constant 0 : index
    %c256_197 = arith.constant 256 : index
    %351 = vector.load %arg12[%c0_196, %c256_197] : memref<32x768xf32, #tpu.memory_space<vmem>>, vector<32x256xf32>
    tpu.vector_store %arg12[%c0_196, %c256_197], %350 {strides = array<i32>} : memref<32x768xf32, #tpu.memory_space<vmem>>, vector<32x256xf32>,
    %c5_198 = arith.constant 5 : index
    %c0_199 = arith.constant 0 : index
    %c0_200 = arith.constant 0 : index
    %352 = vector.load %arg4[%c5_198, %c0_199, %c0_200] : memref<10x32x288xf32, #tpu.memory_space<vmem>>, vector<1x32x288xf32>
    %353 = vector.shape_cast %352 : vector<1x32x288xf32> to vector<32x288xf32>
    %c5_201 = arith.constant 5 : index
    %c0_202 = arith.constant 0 : index
    %c0_203 = arith.constant 0 : index
    %354 = vector.load %arg5[%c5_201, %c0_202, %c0_203] : memref<10x32x1xf32, #tpu.memory_space<vmem>>, vector<1x32x1xf32>
    %355 = vector.shape_cast %354 : vector<1x32x1xf32> to vector<32x1xf32>
    %c0_204 = arith.constant 0 : index
    %c120_205 = arith.constant 120 : index
    %356 = vector.load %arg12[%c0_204, %c120_205] : memref<32x768xf32, #tpu.memory_space<vmem>>, vector<32x256xf32>
    %357 = vector.broadcast %3 : vector<1x256xf32> to vector<32x256xf32>
    %358 = arith.mulf %356, %357 : vector<32x256xf32>
    %359 = vector.extract_strided_slice %353 {offsets = [0, 0], sizes = [32, 32], strides = [1, 1]} : vector<32x288xf32> to vector<32x32xf32>
    %cst_206 = arith.constant dense<0.000000e+00> : vector<32x256xf32>
    %360 = tpu.matmul %359, %358, %cst_206 {dimension_numbers = #tpu.dot_dimension_numbers<[1], [0], [0], [1], [0, 0, 1, 1], [], []>} : vector<32x32xf32>, vector<32x256xf32>, vector<32x256xf32> -> vector<32x256xf32>
    %c0_207 = arith.constant 0 : index
    %c128_208 = arith.constant 128 : index
    %361 = vector.load %arg12[%c0_207, %c128_208] : memref<32x768xf32, #tpu.memory_space<vmem>>, vector<32x256xf32>
    %362 = vector.extract_strided_slice %353 {offsets = [0, 32], sizes = [32, 32], strides = [1, 1]} : vector<32x288xf32> to vector<32x32xf32>
    %cst_209 = arith.constant dense<0.000000e+00> : vector<32x256xf32>
    %363 = tpu.matmul %362, %361, %cst_209 {dimension_numbers = #tpu.dot_dimension_numbers<[1], [0], [0], [1], [0, 0, 1, 1], [], []>} : vector<32x32xf32>, vector<32x256xf32>, vector<32x256xf32> -> vector<32x256xf32>
    %364 = arith.addf %360, %363 : vector<32x256xf32>
    %c0_210 = arith.constant 0 : index
    %c136_211 = arith.constant 136 : index
    %365 = vector.load %arg12[%c0_210, %c136_211] : memref<32x768xf32, #tpu.memory_space<vmem>>, vector<32x256xf32>
    %366 = vector.broadcast %10 : vector<1x256xf32> to vector<32x256xf32>
    %367 = arith.mulf %365, %366 : vector<32x256xf32>
    %368 = vector.extract_strided_slice %353 {offsets = [0, 64], sizes = [32, 32], strides = [1, 1]} : vector<32x288xf32> to vector<32x32xf32>
    %cst_212 = arith.constant dense<0.000000e+00> : vector<32x256xf32>
    %369 = tpu.matmul %368, %367, %cst_212 {dimension_numbers = #tpu.dot_dimension_numbers<[1], [0], [0], [1], [0, 0, 1, 1], [], []>} : vector<32x32xf32>, vector<32x256xf32>, vector<32x256xf32> -> vector<32x256xf32>
    %370 = arith.addf %364, %369 : vector<32x256xf32>
    %c0_213 = arith.constant 0 : index
    %c248_214 = arith.constant 248 : index
    %371 = vector.load %arg12[%c0_213, %c248_214] : memref<32x768xf32, #tpu.memory_space<vmem>>, vector<32x256xf32>
    %372 = vector.broadcast %3 : vector<1x256xf32> to vector<32x256xf32>
    %373 = arith.mulf %371, %372 : vector<32x256xf32>
    %374 = vector.extract_strided_slice %353 {offsets = [0, 96], sizes = [32, 32], strides = [1, 1]} : vector<32x288xf32> to vector<32x32xf32>
    %cst_215 = arith.constant dense<0.000000e+00> : vector<32x256xf32>
    %375 = tpu.matmul %374, %373, %cst_215 {dimension_numbers = #tpu.dot_dimension_numbers<[1], [0], [0], [1], [0, 0, 1, 1], [], []>} : vector<32x32xf32>, vector<32x256xf32>, vector<32x256xf32> -> vector<32x256xf32>
    %376 = arith.addf %370, %375 : vector<32x256xf32>
    %c0_216 = arith.constant 0 : index
    %c256_217 = arith.constant 256 : index
    %377 = vector.load %arg12[%c0_216, %c256_217] : memref<32x768xf32, #tpu.memory_space<vmem>>, vector<32x256xf32>
    %378 = vector.extract_strided_slice %353 {offsets = [0, 128], sizes = [32, 32], strides = [1, 1]} : vector<32x288xf32> to vector<32x32xf32>
    %cst_218 = arith.constant dense<0.000000e+00> : vector<32x256xf32>
    %379 = tpu.matmul %378, %377, %cst_218 {dimension_numbers = #tpu.dot_dimension_numbers<[1], [0], [0], [1], [0, 0, 1, 1], [], []>} : vector<32x32xf32>, vector<32x256xf32>, vector<32x256xf32> -> vector<32x256xf32>
    %380 = arith.addf %376, %379 : vector<32x256xf32>
    %c0_219 = arith.constant 0 : index
    %c264_220 = arith.constant 264 : index
    %381 = vector.load %arg12[%c0_219, %c264_220] : memref<32x768xf32, #tpu.memory_space<vmem>>, vector<32x256xf32>
    %382 = vector.broadcast %10 : vector<1x256xf32> to vector<32x256xf32>
    %383 = arith.mulf %381, %382 : vector<32x256xf32>
    %384 = vector.extract_strided_slice %353 {offsets = [0, 160], sizes = [32, 32], strides = [1, 1]} : vector<32x288xf32> to vector<32x32xf32>
    %cst_221 = arith.constant dense<0.000000e+00> : vector<32x256xf32>
    %385 = tpu.matmul %384, %383, %cst_221 {dimension_numbers = #tpu.dot_dimension_numbers<[1], [0], [0], [1], [0, 0, 1, 1], [], []>} : vector<32x32xf32>, vector<32x256xf32>, vector<32x256xf32> -> vector<32x256xf32>
    %386 = arith.addf %380, %385 : vector<32x256xf32>
    %c0_222 = arith.constant 0 : index
    %c376_223 = arith.constant 376 : index
    %387 = vector.load %arg12[%c0_222, %c376_223] : memref<32x768xf32, #tpu.memory_space<vmem>>, vector<32x256xf32>
    %388 = vector.broadcast %3 : vector<1x256xf32> to vector<32x256xf32>
    %389 = arith.mulf %387, %388 : vector<32x256xf32>
    %390 = vector.extract_strided_slice %353 {offsets = [0, 192], sizes = [32, 32], strides = [1, 1]} : vector<32x288xf32> to vector<32x32xf32>
    %cst_224 = arith.constant dense<0.000000e+00> : vector<32x256xf32>
    %391 = tpu.matmul %390, %389, %cst_224 {dimension_numbers = #tpu.dot_dimension_numbers<[1], [0], [0], [1], [0, 0, 1, 1], [], []>} : vector<32x32xf32>, vector<32x256xf32>, vector<32x256xf32> -> vector<32x256xf32>
    %392 = arith.addf %386, %391 : vector<32x256xf32>
    %c0_225 = arith.constant 0 : index
    %c384_226 = arith.constant 384 : index
    %393 = vector.load %arg12[%c0_225, %c384_226] : memref<32x768xf32, #tpu.memory_space<vmem>>, vector<32x256xf32>
    %394 = vector.extract_strided_slice %353 {offsets = [0, 224], sizes = [32, 32], strides = [1, 1]} : vector<32x288xf32> to vector<32x32xf32>
    %cst_227 = arith.constant dense<0.000000e+00> : vector<32x256xf32>
    %395 = tpu.matmul %394, %393, %cst_227 {dimension_numbers = #tpu.dot_dimension_numbers<[1], [0], [0], [1], [0, 0, 1, 1], [], []>} : vector<32x32xf32>, vector<32x256xf32>, vector<32x256xf32> -> vector<32x256xf32>
    %396 = arith.addf %392, %395 : vector<32x256xf32>
    %c0_228 = arith.constant 0 : index
    %c392_229 = arith.constant 392 : index
    %397 = vector.load %arg12[%c0_228, %c392_229] : memref<32x768xf32, #tpu.memory_space<vmem>>, vector<32x256xf32>
    %398 = vector.broadcast %10 : vector<1x256xf32> to vector<32x256xf32>
    %399 = arith.mulf %397, %398 : vector<32x256xf32>
    %400 = vector.extract_strided_slice %353 {offsets = [0, 256], sizes = [32, 32], strides = [1, 1]} : vector<32x288xf32> to vector<32x32xf32>
    %cst_230 = arith.constant dense<0.000000e+00> : vector<32x256xf32>
    %401 = tpu.matmul %400, %399, %cst_230 {dimension_numbers = #tpu.dot_dimension_numbers<[1], [0], [0], [1], [0, 0, 1, 1], [], []>} : vector<32x32xf32>, vector<32x256xf32>, vector<32x256xf32> -> vector<32x256xf32>
    %402 = arith.addf %396, %401 : vector<32x256xf32>
    %403 = vector.broadcast %355 : vector<32x1xf32> to vector<32x256xf32>
    %404 = arith.addf %402, %403 : vector<32x256xf32>
    %c0_231 = arith.constant 0 : index
    %c256_232 = arith.constant 256 : index
    %405 = vector.load %arg11[%c0_231, %c256_232] : memref<32x768xf32, #tpu.memory_space<vmem>>, vector<32x256xf32>
    %406 = arith.addf %404, %405 : vector<32x256xf32>
    %cst_233 = arith.constant 0.000000e+00 : f32
    %407 = vector.broadcast %cst_233 : f32 to vector<32x256xf32>
    %408 = arith.maximumf %406, %407 : vector<32x256xf32>
    %c0_234 = arith.constant 0 : index
    %c256_235 = arith.constant 256 : index
    %409 = vector.load %arg11[%c0_234, %c256_235] : memref<32x768xf32, #tpu.memory_space<vmem>>, vector<32x256xf32>
    tpu.vector_store %arg11[%c0_234, %c256_235], %408 {strides = array<i32>} : memref<32x768xf32, #tpu.memory_space<vmem>>, vector<32x256xf32>,
    %c6_236 = arith.constant 6 : index
    %c0_237 = arith.constant 0 : index
    %c0_238 = arith.constant 0 : index
    %410 = vector.load %arg4[%c6_236, %c0_237, %c0_238] : memref<10x32x288xf32, #tpu.memory_space<vmem>>, vector<1x32x288xf32>
    %411 = vector.shape_cast %410 : vector<1x32x288xf32> to vector<32x288xf32>
    %c6_239 = arith.constant 6 : index
    %c0_240 = arith.constant 0 : index
    %c0_241 = arith.constant 0 : index
    %412 = vector.load %arg5[%c6_239, %c0_240, %c0_241] : memref<10x32x1xf32, #tpu.memory_space<vmem>>, vector<1x32x1xf32>
    %413 = vector.shape_cast %412 : vector<1x32x1xf32> to vector<32x1xf32>
    %c0_242 = arith.constant 0 : index
    %c256_243 = arith.constant 256 : index
    %414 = vector.load %arg11[%c0_242, %c256_243] : memref<32x768xf32, #tpu.memory_space<vmem>>, vector<32x256xf32>
    %415 = vector.extract_strided_slice %411 {offsets = [0, 128], sizes = [32, 32], strides = [1, 1]} : vector<32x288xf32> to vector<32x32xf32>
    %cst_244 = arith.constant dense<0.000000e+00> : vector<32x256xf32>
    %416 = tpu.matmul %415, %414, %cst_244 {dimension_numbers = #tpu.dot_dimension_numbers<[1], [0], [0], [1], [0, 0, 1, 1], [], []>} : vector<32x32xf32>, vector<32x256xf32>, vector<32x256xf32> -> vector<32x256xf32>
    %417 = vector.broadcast %413 : vector<32x1xf32> to vector<32x256xf32>
    %418 = arith.addf %416, %417 : vector<32x256xf32>
    %cst_245 = arith.constant 0.000000e+00 : f32
    %419 = vector.broadcast %cst_245 : f32 to vector<32x256xf32>
    %420 = arith.maximumf %418, %419 : vector<32x256xf32>
    %c0_246 = arith.constant 0 : index
    %c256_247 = arith.constant 256 : index
    %421 = vector.load %arg12[%c0_246, %c256_247] : memref<32x768xf32, #tpu.memory_space<vmem>>, vector<32x256xf32>
    tpu.vector_store %arg12[%c0_246, %c256_247], %420 {strides = array<i32>} : memref<32x768xf32, #tpu.memory_space<vmem>>, vector<32x256xf32>,
    %c7_248 = arith.constant 7 : index
    %c0_249 = arith.constant 0 : index
    %c0_250 = arith.constant 0 : index
    %422 = vector.load %arg4[%c7_248, %c0_249, %c0_250] : memref<10x32x288xf32, #tpu.memory_space<vmem>>, vector<1x32x288xf32>
    %423 = vector.shape_cast %422 : vector<1x32x288xf32> to vector<32x288xf32>
    %c7_251 = arith.constant 7 : index
    %c0_252 = arith.constant 0 : index
    %c0_253 = arith.constant 0 : index
    %424 = vector.load %arg5[%c7_251, %c0_252, %c0_253] : memref<10x32x1xf32, #tpu.memory_space<vmem>>, vector<1x32x1xf32>
    %425 = vector.shape_cast %424 : vector<1x32x1xf32> to vector<32x1xf32>
    %c0_254 = arith.constant 0 : index
    %c256_255 = arith.constant 256 : index
    %426 = vector.load %arg12[%c0_254, %c256_255] : memref<32x768xf32, #tpu.memory_space<vmem>>, vector<32x256xf32>
    %427 = vector.extract_strided_slice %423 {offsets = [0, 128], sizes = [32, 32], strides = [1, 1]} : vector<32x288xf32> to vector<32x32xf32>
    %cst_256 = arith.constant dense<0.000000e+00> : vector<32x256xf32>
    %428 = tpu.matmul %427, %426, %cst_256 {dimension_numbers = #tpu.dot_dimension_numbers<[1], [0], [0], [1], [0, 0, 1, 1], [], []>} : vector<32x32xf32>, vector<32x256xf32>, vector<32x256xf32> -> vector<32x256xf32>
    %429 = vector.broadcast %425 : vector<32x1xf32> to vector<32x256xf32>
    %430 = arith.addf %428, %429 : vector<32x256xf32>
    %c0_257 = arith.constant 0 : index
    %c256_258 = arith.constant 256 : index
    %431 = vector.load %arg11[%c0_257, %c256_258] : memref<32x768xf32, #tpu.memory_space<vmem>>, vector<32x256xf32>
    %432 = arith.addf %430, %431 : vector<32x256xf32>
    %cst_259 = arith.constant 0.000000e+00 : f32
    %433 = vector.broadcast %cst_259 : f32 to vector<32x256xf32>
    %434 = arith.maximumf %432, %433 : vector<32x256xf32>
    %c0_260 = arith.constant 0 : index
    %c256_261 = arith.constant 256 : index
    %435 = vector.load %arg11[%c0_260, %c256_261] : memref<32x768xf32, #tpu.memory_space<vmem>>, vector<32x256xf32>
    tpu.vector_store %arg11[%c0_260, %c256_261], %434 {strides = array<i32>} : memref<32x768xf32, #tpu.memory_space<vmem>>, vector<32x256xf32>,
    %c8 = arith.constant 8 : index
    %c0_262 = arith.constant 0 : index
    %c0_263 = arith.constant 0 : index
    %436 = vector.load %arg4[%c8, %c0_262, %c0_263] : memref<10x32x288xf32, #tpu.memory_space<vmem>>, vector<1x32x288xf32>
    %437 = vector.shape_cast %436 : vector<1x32x288xf32> to vector<32x288xf32>
    %c8_264 = arith.constant 8 : index
    %c0_265 = arith.constant 0 : index
    %c0_266 = arith.constant 0 : index
    %438 = vector.load %arg5[%c8_264, %c0_265, %c0_266] : memref<10x32x1xf32, #tpu.memory_space<vmem>>, vector<1x32x1xf32>
    %439 = vector.shape_cast %438 : vector<1x32x1xf32> to vector<32x1xf32>
    %c0_267 = arith.constant 0 : index
    %c256_268 = arith.constant 256 : index
    %440 = vector.load %arg11[%c0_267, %c256_268] : memref<32x768xf32, #tpu.memory_space<vmem>>, vector<32x256xf32>
    %441 = vector.extract_strided_slice %437 {offsets = [0, 128], sizes = [32, 32], strides = [1, 1]} : vector<32x288xf32> to vector<32x32xf32>
    %cst_269 = arith.constant dense<0.000000e+00> : vector<32x256xf32>
    %442 = tpu.matmul %441, %440, %cst_269 {dimension_numbers = #tpu.dot_dimension_numbers<[1], [0], [0], [1], [0, 0, 1, 1], [], []>} : vector<32x32xf32>, vector<32x256xf32>, vector<32x256xf32> -> vector<32x256xf32>
    %443 = vector.broadcast %439 : vector<32x1xf32> to vector<32x256xf32>
    %444 = arith.addf %442, %443 : vector<32x256xf32>
    %cst_270 = arith.constant 0.000000e+00 : f32
    %445 = vector.broadcast %cst_270 : f32 to vector<32x256xf32>
    %446 = arith.maximumf %444, %445 : vector<32x256xf32>
    %c0_271 = arith.constant 0 : index
    %c256_272 = arith.constant 256 : index
    %447 = vector.load %arg12[%c0_271, %c256_272] : memref<32x768xf32, #tpu.memory_space<vmem>>, vector<32x256xf32>
    tpu.vector_store %arg12[%c0_271, %c256_272], %446 {strides = array<i32>} : memref<32x768xf32, #tpu.memory_space<vmem>>, vector<32x256xf32>,
    %c9 = arith.constant 9 : index
    %c0_273 = arith.constant 0 : index
    %c0_274 = arith.constant 0 : index
    %448 = vector.load %arg4[%c9, %c0_273, %c0_274] : memref<10x32x288xf32, #tpu.memory_space<vmem>>, vector<1x32x288xf32>
    %449 = vector.shape_cast %448 : vector<1x32x288xf32> to vector<32x288xf32>
    %c9_275 = arith.constant 9 : index
    %c0_276 = arith.constant 0 : index
    %c0_277 = arith.constant 0 : index
    %450 = vector.load %arg5[%c9_275, %c0_276, %c0_277] : memref<10x32x1xf32, #tpu.memory_space<vmem>>, vector<1x32x1xf32>
    %451 = vector.shape_cast %450 : vector<1x32x1xf32> to vector<32x1xf32>
    %c0_278 = arith.constant 0 : index
    %c256_279 = arith.constant 256 : index
    %452 = vector.load %arg12[%c0_278, %c256_279] : memref<32x768xf32, #tpu.memory_space<vmem>>, vector<32x256xf32>
    %453 = vector.extract_strided_slice %449 {offsets = [0, 128], sizes = [32, 32], strides = [1, 1]} : vector<32x288xf32> to vector<32x32xf32>
    %cst_280 = arith.constant dense<0.000000e+00> : vector<32x256xf32>
    %454 = tpu.matmul %453, %452, %cst_280 {dimension_numbers = #tpu.dot_dimension_numbers<[1], [0], [0], [1], [0, 0, 1, 1], [], []>} : vector<32x32xf32>, vector<32x256xf32>, vector<32x256xf32> -> vector<32x256xf32>
    %455 = vector.broadcast %451 : vector<32x1xf32> to vector<32x256xf32>
    %456 = arith.addf %454, %455 : vector<32x256xf32>
    %c0_281 = arith.constant 0 : index
    %c256_282 = arith.constant 256 : index
    %457 = vector.load %arg11[%c0_281, %c256_282] : memref<32x768xf32, #tpu.memory_space<vmem>>, vector<32x256xf32>
    %458 = arith.addf %456, %457 : vector<32x256xf32>
    %cst_283 = arith.constant 0.000000e+00 : f32
    %459 = vector.broadcast %cst_283 : f32 to vector<32x256xf32>
    %460 = arith.maximumf %458, %459 : vector<32x256xf32>
    %c0_284 = arith.constant 0 : index
    %c256_285 = arith.constant 256 : index
    %461 = vector.load %arg11[%c0_284, %c256_285] : memref<32x768xf32, #tpu.memory_space<vmem>>, vector<32x256xf32>
    tpu.vector_store %arg11[%c0_284, %c256_285], %460 {strides = array<i32>} : memref<32x768xf32, #tpu.memory_space<vmem>>, vector<32x256xf32>,
    %c0_286 = arith.constant 0 : index
    %c256_287 = arith.constant 256 : index
    %462 = vector.load %arg11[%c0_286, %c256_287] : memref<32x768xf32, #tpu.memory_space<vmem>>, vector<32x256xf32>
    %c0_288 = arith.constant 0 : index
    %c0_289 = arith.constant 0 : index
    %463 = vector.load %arg6[%c0_288, %c0_289] : memref<1x32xf32, #tpu.memory_space<vmem>>, vector<1x32xf32>
    %cst_290 = arith.constant dense<0.000000e+00> : vector<1x256xf32>
    %464 = tpu.matmul %463, %462, %cst_290 {dimension_numbers = #tpu.dot_dimension_numbers<[1], [0], [0], [1], [0, 0, 1, 1], [], []>} : vector<1x32xf32>, vector<32x256xf32>, vector<1x256xf32> -> vector<1x256xf32>
    %c0_291 = arith.constant 0 : index
    %c0_292 = arith.constant 0 : index
    %465 = vector.load %arg7[%c0_291, %c0_292] : memref<1x1xf32, #tpu.memory_space<vmem>>, vector<1x1xf32>
    %466 = vector.broadcast %465 : vector<1x1xf32> to vector<1x256xf32>
    %467 = arith.addf %464, %466 : vector<1x256xf32>
    %c0_293 = arith.constant 0 : index
    %c0_294 = arith.constant 0 : index
    %c0_295 = arith.constant 0 : index
    %468 = vector.load %arg9[%c0_293, %c0_294, %c0_295] : memref<1x1x256xf32, #tpu.memory_space<vmem>>, vector<1x1x256xf32>
    %469 = vector.shape_cast %468 : vector<1x1x256xf32> to vector<1x256xf32>
    %470 = vector.shape_cast %467 : vector<1x256xf32> to vector<1x1x256xf32>
    tpu.vector_store %arg9[%c0_293, %c0_294, %c0_295], %470 {strides = array<i32>} : memref<1x1x256xf32, #tpu.memory_space<vmem>>, vector<1x1x256xf32>,
    return
  }
  func.func @transform_0(%arg0: i32) -> (i32, i32, i32) {
    %c0_i32 = arith.constant 0 : i32
    %c0_i32_0 = arith.constant 0 : i32
    %c0_i32_1 = arith.constant 0 : i32
    return %arg0, %c0_i32, %c0_i32_0 : i32, i32, i32
  }
  func.func @transform_1(%arg0: i32) -> (i32, i32) {
    %c0_i32 = arith.constant 0 : i32
    %c0_i32_0 = arith.constant 0 : i32
    %c0_i32_1 = arith.constant 0 : i32
    return %c0_i32, %c0_i32_0 : i32, i32
  }
  func.func @transform_2(%arg0: i32) -> (i32, i32) {
    %c0_i32 = arith.constant 0 : i32
    %c0_i32_0 = arith.constant 0 : i32
    %c0_i32_1 = arith.constant 0 : i32
    return %c0_i32, %c0_i32_0 : i32, i32
  }
  func.func @transform_3(%arg0: i32) -> (i32, i32, i32) {
    %c0_i32 = arith.constant 0 : i32
    %c0_i32_0 = arith.constant 0 : i32
    %c0_i32_1 = arith.constant 0 : i32
    %c0_i32_2 = arith.constant 0 : i32
    return %c0_i32, %c0_i32_0, %c0_i32_1 : i32, i32, i32
  }
  func.func @transform_4(%arg0: i32) -> (i32, i32, i32) {
    %c0_i32 = arith.constant 0 : i32
    %c0_i32_0 = arith.constant 0 : i32
    %c0_i32_1 = arith.constant 0 : i32
    %c0_i32_2 = arith.constant 0 : i32
    return %c0_i32, %c0_i32_0, %c0_i32_1 : i32, i32, i32
  }
  func.func @transform_5(%arg0: i32) -> (i32, i32) {
    %c0_i32 = arith.constant 0 : i32
    %c0_i32_0 = arith.constant 0 : i32
    %c0_i32_1 = arith.constant 0 : i32
    return %c0_i32, %c0_i32_0 : i32, i32
  }
  func.func @transform_6(%arg0: i32) -> (i32, i32) {
    %c0_i32 = arith.constant 0 : i32
    %c0_i32_0 = arith.constant 0 : i32
    %c0_i32_1 = arith.constant 0 : i32
    return %c0_i32, %c0_i32_0 : i32, i32
  }
  func.func @transform_7(%arg0: i32) -> (i32, i32) {
    %c0_i32 = arith.constant 0 : i32
    %c0_i32_0 = arith.constant 0 : i32
    %c0_i32_1 = arith.constant 0 : i32
    return %c0_i32, %c0_i32_0 : i32, i32
  }
  func.func @transform_8(%arg0: i32) -> (i32, i32, i32) {
    %c0_i32 = arith.constant 0 : i32
    %c0_i32_0 = arith.constant 0 : i32
    %c0_i32_1 = arith.constant 0 : i32
    return %arg0, %c0_i32, %c0_i32_0 : i32, i32, i32
  }
}

</mosaic_0001>

<bundles_post_ra>
// kernel: decoder_forward.1
= control target key start
LH: loop header
LB: loop body
LE: loop exit
PB: predicated region body
PF: predicated region fallthrough
CT: control target
= control target key end

     0   :  { %s12488_s29 = smov 0   ;;  %s18595_s0 = inlined_call_operand.vmem [shape: f32[2,4,256], index: 0, kind: input, shape index: {}]   ;;  %s18596_s1 = inlined_call_operand.vmem [shape: f32[32,36], index: 1, kind: input, shape index: {}]   ;;  %s18597_s2 = inlined_call_operand.vmem [shape: f32[32,1], index: 2, kind: input, shape index: {}]   ;;  %s18598_s3 = inlined_call_operand.vmem [shape: f32[10,32,288], index: 3, kind: input, shape index: {}]   ;;  %s18599_s4 = inlined_call_operand.vmem [shape: f32[10,32,1], index: 4, kind: input, shape index: {}]   ;;  %s18600_s5 = inlined_call_operand.vmem [shape: f32[1,32], index: 5, kind: input, shape index: {}]   ;;  %s18601_s6 = inlined_call_operand.<no memory space> [shape: f32[1,1], index: 6, kind: input, shape index: {}]   ;;  %s18602_s7 = inlined_call_operand.vmem [shape: f32[8,256], index: 7, kind: input, shape index: {}]   ;;  %s18603_s8 = inlined_call_operand.vmem [shape: f32[2,1,256], index: 8, kind: output, shape index: {}]  }
   0x1   :  { %v13_v0 = vstv %s18601_s6 }
   0x2   :  { %14 = vst [vmem:[#allocation5] sm:$0x1] %v13_v0 }
   0x3 LB: > { %s11894_s30 = sadd.s32 4294967295, %s12407_s29   ;;  %p11898_p0 = scmp.ge.s32.totalorder %s12407_s29, 1  ;;  %s12407_s29 = sphi %s12488_s29, %s20_s29  }
   0x4   : > { %p264_p1 = scmp.lt.s32.totalorder %s12407_s29, 3 }
   0x6   : > { %p265_p2 = pnand %p11898_p0, %p264_p1 }
   0x8   : > { %268 = sbr.rel (%p265_p2) target bundleno = 4452 (0x1164), region = 52 }
   0xd   : > { %p297_p3 = scmp.lt.s32.totalorder %s11894_s30, 1  ;;  %p11902_p4 = scmp.ne.s32.totalorder %s11894_s30, 0 }
   0xf   : > { %s298_s9 = scalar_select %p297_p3, %s11894_s30, 1 }
  0x10   : > { %309 = sbr.rel (%p11902_p4) target bundleno = 43 (0x2b), region = 56 }
  0x11   : > { %s12311_s10 = sshll.u32 %s298_s9, 3  ;;  %s11901_s6 = sshll.u32 %s298_s9, 1 }
  0x12   : > { %s12499_s13 = scalar_lea.vmem %s18595_s0, %s12311_s10  ;;  %s12504_s16 = scalar_lea.vmem %s18603_s8, %s11901_s6 }
  0x15   : > { %v12409_v1 = vmov 0.0  }
  0x16   : > { %310 = vst [vmem:[#allocation2] sm:$0xff] %v12409_v1  ;;  %311 = vst [vmem:[#allocation2 + $0x8] sm:$0xff] %v12409_v1 }
  0x17   : > { %312 = vst [vmem:[#allocation3 + $0xb0] sm:$0xff] %v12409_v1  ;;  %313 = vst [vmem:[#allocation3] sm:$0xff] %v12409_v1 }
  0x18   : > { %314 = vst [vmem:[#allocation3 + $0x10] sm:$0xff] %v12409_v1  ;;  %315 = vst [vmem:[#allocation3 + $0x48] sm:$0xff] %v12409_v1 }
  0x19   : > { %316 = vst [vmem:[#allocation3 + $0x60] sm:$0xff] %v12409_v1  ;;  %317 = vst [vmem:[#allocation3 + $0x28] sm:$0xff] %v12409_v1 }
  0x1a   : > { %318 = vst [vmem:[#allocation3 + $0x40] sm:$0xff] %v12409_v1  ;;  %319 = vst [vmem:[#allocation3 + $0x78] sm:$0xff] %v12409_v1 }
  0x1b   : > { %320 = vst [vmem:[#allocation3 + $0x88] sm:$0xff] %v12409_v1  ;;  %321 = vst [vmem:[#allocation3 + $0x90] sm:$0xff] %v12409_v1 }
  0x1c   : > { %322 = vst [vmem:[#allocation3 + $0x18] sm:$0xff] %v12409_v1  ;;  %323 = vst [vmem:[#allocation3 + $0x98] sm:$0xff] %v12409_v1 }
  0x1d   : > { %324 = vst [vmem:[#allocation3 + $0x38] sm:$0xff] %v12409_v1  ;;  %325 = vst [vmem:[#allocation3 + $0x50] sm:$0xff] %v12409_v1 }
  0x1e   : > { %326 = vst [vmem:[#allocation3 + $0x70] sm:$0xff] %v12409_v1  ;;  %327 = vst [vmem:[#allocation3 + $0xa0] sm:$0xff] %v12409_v1 }
  0x1f   : > { %328 = vst [vmem:[#allocation3 + $0xa8] sm:$0xff] %v12409_v1  ;;  %329 = vst [vmem:[#allocation3 + $0x68] sm:$0xff] %v12409_v1 }
  0x20   : > { %330 = vst [vmem:[#allocation3 + $0x30] sm:$0xff] %v12409_v1  ;;  %331 = vst [vmem:[#allocation3 + $0x58] sm:$0xff] %v12409_v1 }
  0x21   : > { %332 = vst [vmem:[#allocation3 + $0x80] sm:$0xff] %v12409_v1  ;;  %333 = vst [vmem:[#allocation3 + $0xb8] sm:$0xff] %v12409_v1 }
  0x22   : > { %334 = vst [vmem:[#allocation3 + $0x20] sm:$0xff] %v12409_v1  ;;  %335 = vst [vmem:[#allocation3 + $0x8] sm:$0xff] %v12409_v1 }
  0x23   : > { %336 = vst [vmem:[#allocation4 + $0x30] sm:$0xff] %v12409_v1  ;;  %337 = vst [vmem:[#allocation4 + $0x98] sm:$0xff] %v12409_v1 }
  0x24   : > { %340 = vst [vmem:[#allocation4 + $0xa8] sm:$0xff] %v12409_v1  ;;  %341 = vst [vmem:[#allocation4 + $0x28] sm:$0xff] %v12409_v1 }
  0x25   : > { %342 = vst [vmem:[#allocation4 + $0x78] sm:$0xff] %v12409_v1  ;;  %343 = vst [vmem:[#allocation4 + $0x70] sm:$0xff] %v12409_v1 }
  0x26   : > { %346 = vst [vmem:[#allocation4 + $0xb0] sm:$0xff] %v12409_v1  ;;  %347 = vst [vmem:[#allocation4 + $0x20] sm:$0xff] %v12409_v1 }
  0x27   : > { %348 = vst [vmem:[#allocation4 + $0x40] sm:$0xff] %v12409_v1  ;;  %349 = vst [vmem:[#allocation4 + $0x10] sm:$0xff] %v12409_v1 }
  0x28   : > { %352 = vst [vmem:[#allocation4 + $0x58] sm:$0xff] %v12409_v1  ;;  %353 = vst [vmem:[#allocation4 + $0x38] sm:$0xff] %v12409_v1 }
  0x29   : > { %354 = vst [vmem:[#allocation4] sm:$0xff] %v12409_v1  ;;  %355 = vst [vmem:[#allocation4 + $0x88] sm:$0xff] %v12409_v1 }
  0x2a   : > { %358 = vst [vmem:[#allocation4 + $0x8] sm:$0xff] %v12409_v1  ;;  %359 = vst [vmem:[#allocation4 + $0x90] sm:$0xff] %v12409_v1 }
  0x2b PF: > { %v18604_v2 = vlaneseq  ;;  %v12507_v3 = vld [vmem:[%s12499_s13] sm:$0xff]  ;;  %s12410_s21 = smov 111   ;;  %s12411_s22 = smov 127   ;;  %v12550_v19 = vld [vmem:[%s18596_s1 + $0x8] sm:$0xff]  ;;  %v12555_v20 = vld [vmem:[%s18596_s1 + $0x18] sm:$0xff]  ;;  %v18605_v22 = vmov 0.0  }
  0x2c   : > { %376 = vst [vmem:[#allocation2 + $0x4] sm:$0xff] %v12507_v3  ;;  %v11905_v5 = vld [vmem:[%s18602_s7 + $0x3] ss:$8 sm:$0x3]  ;;  %s12412_s23 = smov 113   ;;  %s12413_s24 = smov 1   ;;  %508 = vmatprep.mubr.f32.mxu0 %v18605_v22  ;;  %526 = vmatprep.mubr.f32.mxu1 %v18605_v22 }
  0x2d   : > { %v12511_v4 = vshrl.u32 %v18604_v2, 7  ;;  %v11906_v6 = vld [vmem:[%s18602_s7 + $0x4] ss:$8 sm:$0x3]  ;;  %s12414_s25 = smov 15   ;;  %s12415_s26 = smov 17  }
  0x2e   : > { %s12416_s27 = smov 16   ;;  %v12542_v18 = vld [vmem:[%s18596_s1] sm:$0xff]  ;;  %s12417_s9 = smov 124   ;;  %v12564_v21 = vld [vmem:[%s18596_s1 + $0x10] sm:$0xff]  ;;  %vm400_vm0 = vcmask 908288   ;;  %vm661_vm1 = vcmask 924672  }
  0x2f   : > { %18810 = vst [vmem:[#allocation6_spill] sm:$0xff] %v12511_v4  ;;  %v12520_v7 = vsub.s32 0, %v12511_v4  ;;  %v12523_v8 = vsub.s32 1, %v12511_v4  ;;  %s12418_s15 = smov 120   ;;  %s12419_s17 = smov 112   ;;  %vm427_vm2 = vcmask 130048  }
  0x30   : > { %s12420_s18 = smov 116   ;;  %vm439_vm3 = vcmask 1043456   ;;  %vm801_vm4 = vcmask 1039360   ;;  %vm430_vm5 = vcmask 31744   ;;  %v1057_v51 = vld [vmem:[#allocation2 + $0xc] sm:$0xf] }
  0x31   : > { %18811 = vst [vmem:[#allocation7_spill] sm:$0xff] %v12520_v7  ;;  %18812 = vst [vmem:[#allocation8_spill] sm:$0xff] %v12523_v8  ;;  %v391_v9 = vrot.slane %v11905_v5, %v12520_v7  ;;  %v395_v10 = vrot.slane %v11905_v5, %v12523_v8  ;;  %v652_v11 = vrot.slane %v11906_v6, %v12520_v7  ;;  %vm824_vm6 = vcmask 7168   ;;  %s12422_s19 = smov 108   ;;  %v1195_v59 = vld [vmem:[#allocation2 + $0xc] sm:$0xf] }
  0x32   : > { %v656_v12 = vrot.slane %v11906_v6, %v12523_v8  ;;  %s12423_s20 = smov 104   ;;  %vm684_vm7 = vcmask 121856   ;;  %v12644_v6 = vcombine.high %v12507_v3, %v12507_v3  ;;  %vm542_vm8 = vcmask 138240   ;;  %s12427_s14 = smov 94  }
  0x33   : > { %v396_v13 = vcombine.low %v391_v9, %v395_v10  ;;  %v12533_v15 = vld [vmem:[#allocation2] sm:$0xff]  ;;  %v386_v17 = vld [vmem:[#allocation2 + $0x8] sm:$0xf]  ;;  %v12424_v9 = vmov 0   ;;  %vm1351_vm9 = vcmask 916480   ;;  %s12434_s11 = smov 64  }
  0x34   : > { %v657_v14 = vcombine.low %v652_v11, %v656_v12  ;;  %v420_v16 = vcombine.high %v12533_v15, %v12533_v15  ;;  %v647_v28 = vld [vmem:[#allocation2 + $0x8] sm:$0xf]  ;;  %12353 = vset.pattern.permute.xlu0 %v12424_v9  ;;  %12354 = vset.pattern.permute.xlu1 %v12424_v9  ;;  %v1333_v12 = vld [vmem:[#allocation2 + $0xc] sm:$0xf]  ;;  %vm2028_vm10 = vcmask 801792   ;;  %vm1686_vm11 = vcmask 769024  }
  0x35   : > { %397 = vrot.lane.b32.xlu0 %v396_v13, %s12410_s21  ;;  %798 = vrot.lane.b32.xlu1 %v396_v13, %s12411_s22  ;;  %v797_v33 = vld [vmem:[#allocation2 + $0x8] sm:$0xf]  ;;  %vm2215_vm12 = vcmask 1031168   ;;  %vm2276_vm13 = vcmask 15360   ;;  %vm2089_vm14 = vcmask 244736   ;;  %vm1901_vm15 = vcmask 277504  }
  0x36   : > { %s12435_s10 = smov 60   ;;  %s12436_s6 = smov 68  }
  0x39   : > { %658 = vrot.lane.b32.xlu0 %v657_v14, %s12412_s23  ;;  %1058 = vrot.lane.b32.xlu1 %v657_v14, %s12413_s24 }
  0x3d   : > { %1196 = vrot.lane.b32.xlu0 %v396_v13, %s12414_s25  ;;  %1465 = vrot.lane.b32.xlu1 %v657_v14, %s12415_s26  ;;  %v1464_v14 = vld [vmem:[#allocation2 + $0xc] sm:$0xf] }
  0x41   : > { %423 = vrot.lane.b32.xlu0 %v420_v16, %s12416_s27  ;;  %425 = vrot.lane.b32.xlu1 %v386_v17, %s12416_s27 }
  0x45   : > { %421 = vrot.lane.b32.xlu0 %v12533_v15, %s12416_s27  ;;  %410 = vrot.lane.b32.xlu1 %v12542_v18, %s12417_s9  ;;  %s12438_s27 = smov 8  }
  0x49   : > { %412 = vrot.lane.b32.xlu0 %v12550_v19, %s12417_s9  ;;  %416 = vrot.lane.b32.xlu1 %v12555_v20, %s12417_s9 }
  0x4d   : > { %414 = vrot.lane.b32.xlu0 %v12564_v21, %s12417_s9  ;;  %667 = vrot.lane.b32.xlu1 %v12542_v18, %s12418_s15 }
  0x51   : > { %671 = vrot.lane.b32.xlu1 %v12564_v21, %s12418_s15  ;;  %669 = vrot.lane.b32.xlu0 %v12550_v19, %s12418_s15 }
  0x55   : > { %937 = vrot.lane.b32.xlu1 %v12542_v18, %s12419_s17  ;;  %673 = vrot.lane.b32.xlu0 %v12555_v20, %s12418_s15 }
  0x59   : > { %939 = vrot.lane.b32.xlu1 %v12550_v19, %s12419_s17  ;;  %807 = vrot.lane.b32.xlu0 %v12542_v18, %s12420_s18 }
  0x5d   : > { %941 = vrot.lane.b32.xlu1 %v12564_v21, %s12419_s17  ;;  %809 = vrot.lane.b32.xlu0 %v12550_v19, %s12420_s18 }
  0x61   : > { %811 = vrot.lane.b32.xlu0 %v12564_v21, %s12420_s18 }
  0xa7   : > { %v398_v23 = vpop.permute.xlu0 %397  ;;  %v799_v24 = vpop.permute.xlu1 %798 }
  0xa8   : > { %v399_v25 = vrot.slane %v398_v23, 4  ;;  %v800_v32 = vrot.slane %v799_v24, 4 }
  0xaa   : > { %v405_v26 = vmul.f32 %v399_v25, %v386_v17  ;;  %v401_v30 = vsel %vm400_vm0, %v399_v25, %v398_v23  ;;  %v806_v40 = vmul.f32 %v800_v32, %v797_v33  ;;  %v802_v45 = vsel %vm801_vm4, %v800_v32, %v799_v24  ;;  %v383_v17 = vld [vmem:[%s18597_s2 + $0x10] sm:$0xff]  ;;  %v384_v23 = vld [vmem:[%s18597_s2 + $0x18] sm:$0xff]  ;;  %v382_v24 = vld [vmem:[%s18597_s2 + $0x8] sm:$0xff] }
  0xab   : > { %v659_v27 = vpop.permute.xlu0 %658  ;;  %v1059_v29 = vpop.permute.xlu1 %1058  ;;  %v404_v36 = vmul.f32 %v401_v30, %v12533_v15  ;;  %v805_v50 = vmul.f32 %v802_v45, %v12533_v15  ;;  %v11904_v25 = vld [vmem:[%s18602_s7 + $0x2] ss:$8 sm:$0x3] }
  0xac   : > { %v660_v31 = vrot.slane %v659_v27, 4  ;;  %540 = vrot.lane.b32.xlu1 %v405_v26, %s12415_s26  ;;  %v1060_v52 = vrot.slane %v1059_v29, 4  ;;  %v381_v26 = vld [vmem:[%s18597_s2] sm:$0xff]  ;;  %v1681_v30 = vrot.slane %v11904_v25, %v12523_v8 }
  0xad   : > { %v535_v41 = vcombine.high %v404_v36, %v404_v36  ;;  %v817_v61 = vcombine.high %v805_v50, %v805_v50 }
  0xae   : > { %v662_v34 = vsel %vm661_vm1, %v660_v31, %v659_v27  ;;  %v666_v35 = vmul.f32 %v660_v31, %v647_v28  ;;  %v1065_v55 = vmul.f32 %v1060_v52, %v1057_v51  ;;  %v1061_v57 = vsel %vm824_vm6, %v1060_v52, %v1059_v29  ;;  %v11907_v29 = vld [vmem:[%s18602_s7 + $0x5] ss:$8 sm:$0x3]  ;;  %v12755_v51 = vld [vmem:[%s18598_s3 + $0x30] sm:$0xff] }
  0xaf   : > { %v665_v37 = vmul.f32 %v662_v34, %v12533_v15  ;;  %v1197_v38 = vpop.permute.xlu0 %1196  ;;  %v12595_v39 = vpop.permute.xlu1 %1465  ;;  %v1064_v58 = vmul.f32 %v1061_v57, %v12507_v3  ;;  %v1677_v28 = vrot.slane %v11904_v25, %v12520_v7  ;;  %v2019_v31 = vrot.slane %v11907_v29, %v12520_v7 }
  0xb0   : > { %682 = vrot.lane.b32.xlu1 %v666_v35, %s12414_s25  ;;  %v1198_v60 = vrot.slane %v1197_v38, 4  ;;  %v1467_v10 = vrot.slane %v12595_v39, 4  ;;  %v2023_v33 = vrot.slane %v11907_v29, %v12523_v8 }
  0xb1   : > { %678 = vrot.lane.b32.xlu0 %v665_v37, %s12414_s25  ;;  %v677_v46 = vcombine.high %v665_v37, %v665_v37  ;;  %v1076_v1 = vcombine.high %v1064_v58, %v1064_v58 }
  0xb2   : > { %v1203_v62 = vmul.f32 %v1198_v60, %v1195_v59  ;;  %v1199_v63 = vsel %vm684_vm7, %v1198_v60, %v1197_v38  ;;  %v1468_v11 = vsel %vm542_vm8, %v1467_v10, %v12595_v39  ;;  %v1472_v16 = vmul.f32 %v1467_v10, %v1464_v14  ;;  %v12721_v39 = vld [vmem:[#allocation3 + $0x58] sm:$0xff] }
  0xb3   : > { %v424_v42 = vpop.permute.xlu0 %423  ;;  %v426_v43 = vpop.permute.xlu1 %425  ;;  %v1202_v0 = vmul.f32 %v1199_v63, %v12507_v3  ;;  %v1471_v13 = vmul.f32 %v1468_v11, %v12507_v3 }
  0xb4   : > { %822 = vrot.lane.b32.xlu1 %v806_v40, %s12413_s24  ;;  %v429_v44 = vsel %vm427_vm2, %v424_v42, %v426_v43  ;;  %v12723_v40 = vld [vmem:[#allocation3 + $0x50] sm:$0xff] }
  0xb5   : > { %538 = vrot.lane.b32.xlu0 %v535_v41, %s12415_s26  ;;  %11910 = vmatprep.subr.msk.mxu0 %vm439_vm3, %v429_v44  ;;  %v1214_v5 = vcombine.high %v1202_v0, %v1202_v0  ;;  %v1483_v15 = vcombine.high %v1471_v13, %v1471_v13 }
  0xb6   : > { %12312 = vmatprep.subr.msk.mxu1 %vm439_vm3, %v429_v44  ;;  %v12737_v44 = vld [vmem:[#allocation3 + $0x78] sm:$0xff] }
  0xb7   : > { %v422_v47 = vpop.permute.xlu0 %421  ;;  %v411_v48 = vpop.permute.xlu1 %410 }
  0xb8   : > { %536 = vrot.lane.b32.xlu1 %v404_v36, %s12415_s26  ;;  %v428_v49 = vsel %vm427_vm2, %v422_v47, %v424_v42  ;;  %vm4902_vm2 = vcmask 490496  }
  0xb9   : > { %680 = vrot.lane.b32.xlu0 %v677_v46, %s12414_s25  ;;  %11911 = vmatpush1.msk.msra.mxu0 %vm439_vm3, %v428_v49  ;;  %v12739_v46 = vld [vmem:[#allocation3] sm:$0xff] }
  0xba   : > { %12313 = vmatpush1.msk.msra.mxu1 %vm439_vm3, %v428_v49  ;;  %11912 = vmatmul.mubr.msk.f32.vlgmr.msra.gmra.mxu0 %vm430_vm5, %v411_v48  ;;  %v12748_v48 = vld [vmem:[%s18598_s3 + $0x18] sm:$0xff] }
  0xbb   : > { %514 = vmatprep.mubr.f32.mxu0 %v18605_v22  ;;  %v413_v53 = vpop.permute.xlu0 %412  ;;  %v417_v54 = vpop.permute.xlu1 %416 }
  0xbc   : > { %818 = vrot.lane.b32.xlu1 %v805_v50, %s12413_s24  ;;  %11915 = vmatmul.mubr.msk.f32.vlgmr.msra.gmra.mxu1 %vm430_vm5, %v417_v54 }
  0xbd   : > { %813 = vrot.lane.b32.xlu0 %v12555_v20, %s12420_s18  ;;  %621 = vmatprep.mubr.f32.mxu1 %v18605_v22  ;;  %s12429_s18 = smov 126  }
  0xbe   : > { %11913 = vmatmul.mubr.msk.f32.gmra.mxu0 %vm430_vm5, %v413_v53 }
  0xbf   : > { %520 = vmatprep.mubr.f32.mxu0 %v18605_v22  ;;  %v415_v56 = vpop.permute.xlu0 %414  ;;  %v12690_v27 = vpop.permute.xlu1 %667 }
  0xc0   : > { %943 = vrot.lane.b32.xlu1 %v12555_v20, %s12419_s17 }
  0xc1   : > { %1081 = vrot.lane.b32.xlu0 %v1065_v55, %s12411_s22 }
  0xc2   : > { %11914 = vmatmul.mubr.msk.f32.gmra.mxu0 %vm430_vm5, %v415_v56 }
  0xc3   : > { %763 = vmatprep.mubr.f32.mxu0 %v18605_v22  ;;  %v12699_v32 = vpop.permute.xlu0 %669  ;;  %v12703_v34 = vpop.permute.xlu1 %671 }
  0xc4   : > { %1066 = vrot.lane.b32.xlu1 %v12542_v18, %s12422_s19 }
  0xc5   : > { %1077 = vrot.lane.b32.xlu0 %v1064_v58, %s12411_s22 }
  0xc7   : > { %v12707_v35 = vpop.permute.xlu0 %673  ;;  %v12709_v36 = vpop.permute.xlu1 %937 }
  0xc8   : > { %1204 = vrot.lane.b32.xlu1 %v12542_v18, %s12423_s20 }
  0xc9   : > { %820 = vrot.lane.b32.xlu0 %v817_v61, %s12413_s24  ;;  %s12433_s24 = smov 34  }
  0xcb   : > { %v12714_v37 = vpop.permute.xlu0 %807  ;;  %v12717_v38 = vpop.permute.xlu1 %939 }
  0xcc   : > { %1206 = vrot.lane.b32.xlu1 %v12550_v19, %s12423_s20 }
  0xcd   : > { %1219 = vrot.lane.b32.xlu0 %v1203_v62, %s12412_s23 }
  0xcf   : > { %v12725_v41 = vpop.permute.xlu0 %809  ;;  %v12727_v42 = vpop.permute.xlu1 %941 }
  0xd0   : > { %1208 = vrot.lane.b32.xlu1 %v12564_v21, %s12423_s20 }
  0xd1   : > { %1215 = vrot.lane.b32.xlu0 %v1202_v0, %s12412_s23 }
  0xd3   : > { %v12734_v43 = vpop.permute.xlu0 %811 }
  0xd4   : > { %1079 = vrot.lane.b32.xlu1 %v1076_v1, %s12411_s22  ;;  %s12425_s22 = smov 100  }
  0xd5   : > { %1068 = vrot.lane.b32.xlu0 %v12550_v19, %s12422_s19 }
  0xd8   : > { %1217 = vrot.lane.b32.xlu1 %v1214_v5, %s12412_s23  ;;  %s12426_s23 = smov 96  }
  0xd9   : > { %1070 = vrot.lane.b32.xlu0 %v12564_v21, %s12422_s19 }
  0xdc   : > { %1347 = vrot.lane.b32.xlu1 %v12644_v6, %s12419_s17 }
  0xdd   : > { %1072 = vrot.lane.b32.xlu0 %v12555_v20, %s12422_s19  ;;  %s12430_s19 = smov 2  }
  0xe0   : > { %1210 = vrot.lane.b32.xlu1 %v12555_v20, %s12423_s20  ;;  %s12431_s20 = smov 30  }
  0xe1   : > { %1349 = vrot.lane.b32.xlu0 %v1333_v12, %s12419_s17 }
  0xe4   : > { %1334 = vrot.lane.b32.xlu1 %v12542_v18, %s12425_s22 }
  0xe5   : > { %1345 = vrot.lane.b32.xlu0 %v12507_v3, %s12419_s17  ;;  %s12428_s17 = smov 98  }
  0xe8   : > { %1486 = vrot.lane.b32.xlu1 %v1483_v15, %s12410_s21 }
  0xe9   : > { %1488 = vrot.lane.b32.xlu0 %v1472_v16, %s12410_s21 }
  0xec   : > { %1473 = vrot.lane.b32.xlu1 %v12542_v18, %s12426_s23 }
  0xed   : > { %1484 = vrot.lane.b32.xlu0 %v1471_v13, %s12410_s21 }
  0xf0   : > { %1475 = vrot.lane.b32.xlu1 %v12550_v19, %s12426_s23 }
  0xf1   : > { %1336 = vrot.lane.b32.xlu0 %v12550_v19, %s12425_s22 }
  0xf4   : > { %1477 = vrot.lane.b32.xlu1 %v12564_v21, %s12426_s23 }
  0xf5   : > { %1338 = vrot.lane.b32.xlu0 %v12564_v21, %s12425_s22 }
  0xf8   : > { %1479 = vrot.lane.b32.xlu1 %v12555_v20, %s12426_s23 }
  0xf9   : > { %1340 = vrot.lane.b32.xlu0 %v12555_v20, %s12425_s22  ;;  %s12432_s22 = smov 32  }
  0xfc   : > { %1613 = vperm.xlu1 %12354, %v383_v17  }
  0xfd   : > { %1618 = vperm.xlu0 %12353, %v384_v23  }
 0x100   : > { %1608 = vperm.xlu1 %12354, %v382_v24  }
 0x101   : > { %1603 = vperm.xlu0 %12353, %v381_v26  }
 0x104   : > { %1682 = vrot.lane.b32.xlu1 %v1677_v28, %s12427_s14 }
 0x105   : > { %1684 = vrot.lane.b32.xlu0 %v1681_v30, %s12427_s14 }
 0x108   : > { %2024 = vrot.lane.b32.xlu1 %v2019_v31, %s12428_s17 }
 0x109   : > { %2026 = vrot.lane.b32.xlu0 %v2023_v33, %s12428_s17 }
 0x10c   : > { %2211 = vrot.lane.b32.xlu1 %v1677_v28, %s12429_s18 }
 0x10d   : > { %2213 = vrot.lane.b32.xlu0 %v1681_v30, %s12429_s18 }
 0x110   : > { %2519 = vrot.lane.b32.xlu1 %v2019_v31, %s12430_s19 }
 0x111   : > { %2521 = vrot.lane.b32.xlu0 %v2023_v33, %s12430_s19 }
 0x114   : > { %2704 = vrot.lane.b32.xlu1 %v1677_v28, %s12431_s20 }
 0x115   : > { %2706 = vrot.lane.b32.xlu0 %v1681_v30, %s12431_s20 }
 0x118   : > { %1745 = vrot.lane.b32.xlu1 %v12721_v39, %s12432_s22 }
 0x119   : > { %1739 = vrot.lane.b32.xlu0 %v12723_v40, %s12432_s22 }
 0x11c   : > { %3055 = vrot.lane.b32.xlu1 %v2019_v31, %s12433_s24 }
 0x11d   : > { %3057 = vrot.lane.b32.xlu0 %v2023_v33, %s12433_s24 }
 0x11e   : > { %v541_v45 = vpop.permute.xlu1 %540 }
 0x120   : > { %1733 = vrot.lane.b32.xlu1 %v12737_v44, %s12432_s22 }
 0x121   : > { %1727 = vrot.lane.b32.xlu0 %v12739_v46, %s12432_s22 }
 0x122   : > { %v683_v47 = vpop.permute.xlu1 %682 }
 0x123   : > { %v679_v49 = vpop.permute.xlu0 %678 }
 0x125   : > { %1709 = vrot.lane.b32.xlu0 %v12748_v48, %s12426_s23 }
 0x126   : > { %v823_v50 = vpop.permute.xlu1 %822 }
 0x127   : > { %v539_v52 = vpop.permute.xlu0 %538 }
 0x128   : > { %v544_v53 = vsel %vm542_vm8, %v539_v52, %v541_v45 }
 0x129   : > { %11916 = vmatprep.subr.msk.mxu1 %vm439_vm3, %v544_v53  ;;  %1711 = vrot.lane.b32.xlu0 %v12755_v51, %s12426_s23 }
 0x12a   : > { %v537_v54 = vpop.permute.xlu1 %536 }
 0x12b   : > { %v543_v55 = vsel %vm542_vm8, %v537_v54, %v539_v52  ;;  %v681_v56 = vpop.permute.xlu0 %680 }
 0x12c   : > { %v685_v57 = vsel %vm684_vm7, %v679_v49, %v681_v56  ;;  %11917 = vmatpush1.msk.msra.mxu1 %vm439_vm3, %v543_v55  ;;  %v686_v58 = vsel %vm684_vm7, %v681_v56, %v683_v47  ;;  %vm8260_vm7 = vcmask 64512  }
 0x12d   : > { %11918 = vmatmul.mubr.msk.f32.vlgmr.msra.gmra.mxu1 %vm430_vm5, %v12542_v18  ;;  %11922 = vmatprep.subr.msk.mxu0 %vm439_vm3, %v686_v58 }
 0x12e   : > { %v819_v59 = vpop.permute.xlu1 %818  ;;  %11923 = vmatpush1.msk.msra.mxu0 %vm439_vm3, %v685_v57  ;;  %627 = vmatprep.mubr.f32.mxu1 %v18605_v22 }
 0x12f   : > { %11924 = vmatmul.mubr.msk.f32.vlgmr.msra.gmra.mxu0 %vm430_vm5, %v12690_v27  ;;  %v814_v60 = vpop.permute.xlu0 %813  ;;  %11934 = vmatprep.subr.msk.mxu0 %vm439_vm3, %v12644_v6 }
 0x130   : > { %769 = vmatprep.mubr.f32.mxu0 %v18605_v22  ;;  %11935 = vmatpush1.msk.msra.mxu0 %vm439_vm3, %v12507_v3 }
 0x131   : > { %11919 = vmatmul.mubr.msk.f32.gmra.mxu1 %vm430_vm5, %v12550_v19 }
 0x132   : > { %v944_v18 = vpop.permute.xlu1 %943  ;;  %633 = vmatprep.mubr.f32.mxu1 %v18605_v22 }
 0x133   : > { %11925 = vmatmul.mubr.msk.f32.gmra.mxu0 %vm430_vm5, %v12699_v32  ;;  %v1082_v61 = vpop.permute.xlu0 %1081 }
 0x134   : > { %775 = vmatprep.mubr.f32.mxu0 %v18605_v22 }
 0x135   : > { %11920 = vmatmul.mubr.msk.f32.gmra.mxu1 %vm430_vm5, %v12564_v21 }
 0x136   : > { %v1067_v62 = vpop.permute.xlu1 %1066  ;;  %639 = vmatprep.mubr.f32.mxu1 %v18605_v22 }
 0x137   : > { %11926 = vmatmul.mubr.msk.f32.gmra.mxu0 %vm430_vm5, %v12703_v34  ;;  %v1078_v3 = vpop.permute.xlu0 %1077  ;;  %v12852_v34 = vld [vmem:[%s18598_s3] sm:$0xff] }
 0x138   : > { %781 = vmatprep.mubr.f32.mxu0 %v18605_v22  ;;  %1707 = vrot.lane.b32.xlu1 %v12852_v34, %s12426_s23 }
 0x139   : > { %11921 = vmatmul.mubr.msk.f32.gmra.mxu1 %vm430_vm5, %v12555_v20 }
 0x13a   : > { %v1205_v19 = vpop.permute.xlu1 %1204  ;;  %903 = vmatprep.mubr.f32.mxu1 %v18605_v22 }
 0x13b   : > { %11927 = vmatmul.mubr.msk.f32.gmra.mxu0 %vm430_vm5, %v12707_v35  ;;  %v821_v63 = vpop.permute.xlu0 %820 }
 0x13c   : > { %v825_v21 = vsel %vm824_vm6, %v819_v59, %v821_v63  ;;  %v826_v0 = vsel %vm824_vm6, %v821_v63, %v823_v50  ;;  %1023 = vmatprep.mubr.f32.mxu0 %v18605_v22  ;;  %vm4967_vm6 = vcmask 523264  }
 0x13d   : > { %11928 = vmatprep.subr.msk.mxu1 %vm439_vm3, %v826_v0 }
 0x13e   : > { %v1207_v1 = vpop.permute.xlu1 %1206  ;;  %11929 = vmatpush1.msk.msra.mxu1 %vm439_vm3, %v825_v21 }
 0x13f   : > { %11930 = vmatmul.mubr.msk.f32.vlgmr.msra.gmra.mxu1 %vm430_vm5, %v12714_v37  ;;  %11936 = vmatmul.mubr.msk.f32.vlgmr.msra.gmra.mxu0 %vm430_vm5, %v12709_v36  ;;  %v1220_v20 = vpop.permute.xlu0 %1219 }
 0x140   : > { %909 = vmatprep.mubr.f32.mxu1 %v18605_v22  ;;  %1029 = vmatprep.mubr.f32.mxu0 %v18605_v22 }
 0x142   : > { %v1209_v5 = vpop.permute.xlu1 %1208 }
 0x143   : > { %11931 = vmatmul.mubr.msk.f32.gmra.mxu1 %vm430_vm5, %v12725_v41  ;;  %11937 = vmatmul.mubr.msk.f32.gmra.mxu0 %vm430_vm5, %v12717_v38  ;;  %v1216_v6 = vpop.permute.xlu0 %1215 }
 0x144   : > { %915 = vmatprep.mubr.f32.mxu1 %v18605_v22  ;;  %1035 = vmatprep.mubr.f32.mxu0 %v18605_v22 }
 0x146   : > { %v1080_v9 = vpop.permute.xlu1 %1079 }
 0x147   : > { %v1083_v10 = vsel %vm801_vm4, %v1078_v3, %v1080_v9  ;;  %11932 = vmatmul.mubr.msk.f32.gmra.mxu1 %vm430_vm5, %v12734_v43  ;;  %11938 = vmatmul.mubr.msk.f32.gmra.mxu0 %vm430_vm5, %v12727_v42  ;;  %v1069_v11 = vpop.permute.xlu0 %1068  ;;  %v1084_v12 = vsel %vm801_vm4, %v1080_v9, %v1082_v61  ;;  %vm5429_vm4 = vcmask 1014784  }
 0x148   : > { %11940 = vmatprep.subr.msk.mxu1 %vm439_vm3, %v1084_v12  ;;  %921 = vmatprep.mubr.f32.mxu1 %v18605_v22  ;;  %v12968_v12 = vld [vmem:[#allocation3 + $0x18] sm:$0xff] }
 0x149   : > { %11941 = vmatpush1.msk.msra.mxu1 %vm439_vm3, %v1083_v10  ;;  %1041 = vmatprep.mubr.f32.mxu0 %v18605_v22  ;;  %v12960_v10 = vld [vmem:[#allocation3 + $0x60] sm:$0xff]  ;;  %18827 = vst [vmem:[#allocation23_spill] sm:$0xff] %v12968_v12 }
 0x14a   : > { %v1218_v13 = vpop.permute.xlu1 %1217  ;;  %18826 = vst [vmem:[#allocation22_spill] sm:$0xff] %v12960_v10 }
 0x14b   : > { %v1221_v14 = vsel %vm661_vm1, %v1216_v6, %v1218_v13  ;;  %11933 = vmatmul.mubr.msk.f32.gmra.mxu1 %vm430_vm5, %v814_v60  ;;  %11939 = vmatmul.mubr.msk.f32.gmra.mxu0 %vm430_vm5, %v944_v18  ;;  %v1071_v15 = vpop.permute.xlu0 %1070  ;;  %v1222_v16 = vsel %vm661_vm1, %v1218_v13, %v1220_v20  ;;  %v1654_v60 = vld [vmem:[%s18598_s3 + $0x48] sm:$0xff]  ;;  %vm2933_vm1 = vcmask 785408  }
 0x14c   : > { %11946 = vmatprep.subr.msk.mxu0 %vm439_vm3, %v1222_v16  ;;  %1161 = vmatprep.mubr.f32.mxu1 %v18605_v22  ;;  %v12987_v16 = vld [vmem:[%s18598_s3 + $0x8] sm:$0xff] }
 0x14d   : > { %11947 = vmatpush1.msk.msra.mxu0 %vm439_vm3, %v1221_v14  ;;  %1299 = vmatprep.mubr.f32.mxu0 %v18605_v22  ;;  %18828 = vst [vmem:[#allocation24_spill] sm:$0xff] %v12987_v16 }
 0x14e   : > { %v1348_v17 = vpop.permute.xlu1 %1347 }
 0x14f   : > { %11942 = vmatmul.mubr.msk.f32.vlgmr.msra.gmra.mxu1 %vm430_vm5, %v1067_v62  ;;  %11948 = vmatmul.mubr.msk.f32.vlgmr.msra.gmra.mxu0 %vm430_vm5, %v1205_v19  ;;  %v1073_v23 = vpop.permute.xlu0 %1072 }
 0x150   : > { %1167 = vmatprep.mubr.f32.mxu1 %v18605_v22  ;;  %1305 = vmatprep.mubr.f32.mxu0 %v18605_v22 }
 0x152   : > { %v1211_v24 = vpop.permute.xlu1 %1210 }
 0x153   : > { %11943 = vmatmul.mubr.msk.f32.gmra.mxu1 %vm430_vm5, %v1069_v11  ;;  %11949 = vmatmul.mubr.msk.f32.gmra.mxu0 %vm430_vm5, %v1207_v1  ;;  %v1350_v25 = vpop.permute.xlu0 %1349 }
 0x154   : > { %v1353_v26 = vsel %vm1351_vm9, %v1348_v17, %v1350_v25  ;;  %1173 = vmatprep.mubr.f32.mxu1 %v18605_v22  ;;  %1311 = vmatprep.mubr.f32.mxu0 %v18605_v22 }
 0x155   : > { %11952 = vmatprep.subr.msk.mxu1 %vm439_vm3, %v1353_v26 }
 0x156   : > { %v1335_v27 = vpop.permute.xlu1 %1334 }
 0x157   : > { %11944 = vmatmul.mubr.msk.f32.gmra.mxu1 %vm430_vm5, %v1071_v15  ;;  %11950 = vmatmul.mubr.msk.f32.gmra.mxu0 %vm430_vm5, %v1209_v5  ;;  %v1346_v28 = vpop.permute.xlu0 %1345  ;;  %v12943_v5 = vld [vmem:[#allocation3 + $0x20] sm:$0xff] }
 0x158   : > { %v1352_v29 = vsel %vm1351_vm9, %v1346_v28, %v1348_v17  ;;  %1179 = vmatprep.mubr.f32.mxu1 %v18605_v22  ;;  %1317 = vmatprep.mubr.f32.mxu0 %v18605_v22  ;;  %18823 = vst [vmem:[#allocation19_spill] sm:$0xff] %v12943_v5  ;;  %v12992_v17 = vld [vmem:[%s18598_s3 + $0x20] sm:$0xff] }
 0x159   : > { %11953 = vmatpush1.msk.msra.mxu1 %vm439_vm3, %v1352_v29  ;;  %18829 = vst [vmem:[#allocation25_spill] sm:$0xff] %v12992_v17 }
 0x15a   : > { %v1487_v30 = vpop.permute.xlu1 %1486 }
 0x15b   : > { %11945 = vmatmul.mubr.msk.f32.gmra.mxu1 %vm430_vm5, %v1073_v23  ;;  %11951 = vmatmul.mubr.msk.f32.gmra.mxu0 %vm430_vm5, %v1211_v24  ;;  %v1489_v31 = vpop.permute.xlu0 %1488 }
 0x15c   : > { %v1491_v32 = vsel %vm400_vm0, %v1487_v30, %v1489_v31  ;;  %1430 = vmatprep.mubr.f32.mxu1 %v18605_v22  ;;  %1568 = vmatprep.mubr.f32.mxu0 %v18605_v22 }
 0x15d   : > { %11958 = vmatprep.subr.msk.mxu0 %vm439_vm3, %v1491_v32 }
 0x15e   : > { %v1474_v33 = vpop.permute.xlu1 %1473 }
 0x15f   : > { %11954 = vmatmul.mubr.msk.f32.vlgmr.msra.gmra.mxu1 %vm430_vm5, %v1335_v27  ;;  %v1485_v35 = vpop.permute.xlu0 %1484 }
 0x160   : > { %v1490_v36 = vsel %vm400_vm0, %v1485_v35, %v1487_v30  ;;  %1436 = vmatprep.mubr.f32.mxu1 %v18605_v22  ;;  %vm1751_vm0 = vcmask 261120  }
 0x161   : > { %11959 = vmatpush1.msk.msra.mxu0 %vm439_vm3, %v1490_v36  ;;  %vm5117_vm3 = vcmask 556032  }
 0x162   : > { %11960 = vmatmul.mubr.msk.f32.vlgmr.msra.gmra.mxu0 %vm430_vm5, %v1474_v33  ;;  %v1476_v37 = vpop.permute.xlu1 %1475 }
 0x163   : > { %v1337_v38 = vpop.permute.xlu0 %1336  ;;  %1574 = vmatprep.mubr.f32.mxu0 %v18605_v22 }
 0x164   : > { %11955 = vmatmul.mubr.msk.f32.gmra.mxu1 %vm430_vm5, %v1337_v38 }
 0x165   : > { %1442 = vmatprep.mubr.f32.mxu1 %v18605_v22 }
 0x166   : > { %11961 = vmatmul.mubr.msk.f32.gmra.mxu0 %vm430_vm5, %v1476_v37  ;;  %v1478_v41 = vpop.permute.xlu1 %1477 }
 0x167   : > { %v1339_v42 = vpop.permute.xlu0 %1338  ;;  %1580 = vmatprep.mubr.f32.mxu0 %v18605_v22 }
 0x168   : > { %11956 = vmatmul.mubr.msk.f32.gmra.mxu1 %vm430_vm5, %v1339_v42 }
 0x169   : > { %1448 = vmatprep.mubr.f32.mxu1 %v18605_v22 }
 0x16a   : > { %11962 = vmatmul.mubr.msk.f32.gmra.mxu0 %vm430_vm5, %v1478_v41  ;;  %v1480_v45 = vpop.permute.xlu1 %1479 }
 0x16b   : > { %v1341_v43 = vpop.permute.xlu0 %1340  ;;  %1586 = vmatprep.mubr.f32.mxu0 %v18605_v22 }
 0x16c   : > { %11957 = vmatmul.mubr.msk.f32.gmra.mxu1 %vm430_vm5, %v1341_v43 }
 0x16d   : > { %1840 = vmatprep.mubr.f32.mxu1 %v18605_v22 }
 0x16e   : > { %11963 = vmatmul.mubr.msk.f32.gmra.mxu0 %vm430_vm5, %v1480_v45 }
 0x16f   : > { %1990 = vmatprep.mubr.f32.mxu0 %v18605_v22 }
 0x177   : > { %v12874_v47 = vpop.permute.xlu1 %1613 }
 0x178   : > { %18813 = vst [vmem:[#allocation9_spill] sm:$0xff] %v12874_v47  ;;  %v12899_v59 = vpop.permute.xlu0 %1618 }
 0x179   : > { %18817 = vst [vmem:[#allocation13_spill] sm:$0xff] %v12899_v59 }
 0x17a   : > { %v510_v23 = vpop.f32.mrf.mxu0 }
 0x17b   : > { %v12876_v49 = vpop.permute.xlu1 %1608 }
 0x17c   : > { %18814 = vst [vmem:[#allocation10_spill] sm:$0xff] %v12876_v49  ;;  %v12910_v62 = vpop.permute.xlu0 %1603  ;;  %v512_v24 = vpop.f32.mrf.mxu0 }
 0x17d   : > { %v13002_v27 = vpop.f32.mrf.mxu1 }
 0x17e   : > { %v516_v25 = vpop.f32.mrf.mxu0 }
 0x17f   : > { %v12878_v50 = vpop.permute.xlu1 %1682  ;;  %v13004_v29 = vpop.f32.mrf.mxu1 }
 0x180   : > { %18815 = vst [vmem:[#allocation11_spill] sm:$0xff] %v12878_v50  ;;  %v1700_v52 = vmul.f32 %v12878_v50, %v12721_v39  ;;  %v1697_v53 = vmul.f32 %v12878_v50, %v12723_v40  ;;  %v1694_v57 = vmul.f32 %v12878_v50, %v12737_v44  ;;  %v1691_v58 = vmul.f32 %v12878_v50, %v12739_v46  ;;  %v12922_v63 = vpop.permute.xlu0 %1684  ;;  %v518_v26 = vpop.f32.mrf.mxu0 }
 0x181   : > { %18819 = vst [vmem:[#allocation15_spill] sm:$0xff] %v12922_v63 }
 0x182   : > { %1895 = vrot.lane.b32.xlu1 %v1700_v52, %s12433_s24  ;;  %v522_v28 = vpop.f32.mrf.mxu0 }
 0x183   : > { %v12885_v54 = vpop.permute.xlu1 %2024 }
 0x184   : > { %18816 = vst [vmem:[#allocation12_spill] sm:$0xff] %v12885_v54  ;;  %v2042_v55 = vmul.f32 %v12885_v54, %v12721_v39  ;;  %v2039_v56 = vmul.f32 %v12885_v54, %v12723_v40  ;;  %v2033_v18 = vmul.f32 %v12885_v54, %v12739_v46  ;;  %v2036_v61 = vmul.f32 %v12885_v54, %v12737_v44  ;;  %v12931_v1 = vpop.permute.xlu0 %2026  ;;  %v524_v30 = vpop.f32.mrf.mxu0 }
 0x185   : > { %18820 = vst [vmem:[#allocation16_spill] sm:$0xff] %v12931_v1 }
 0x186   : > { %2083 = vrot.lane.b32.xlu0 %v2042_v55, %s12431_s20  ;;  %1889 = vrot.lane.b32.xlu1 %v1697_v53, %s12433_s24 }
 0x187   : > { %v12914_v3 = vpop.permute.xlu1 %2211 }
 0x188   : > { %18818 = vst [vmem:[#allocation14_spill] sm:$0xff] %v12914_v3  ;;  %v2229_v19 = vmul.f32 %v12914_v3, %v12721_v39  ;;  %v2223_v21 = vmul.f32 %v12914_v3, %v12737_v44  ;;  %v2226_v0 = vmul.f32 %v12914_v3, %v12723_v40  ;;  %v2220_v39 = vmul.f32 %v12914_v3, %v12739_v46  ;;  %v12937_v20 = vpop.permute.xlu0 %2213  ;;  %v12951_v46 = vld [vmem:[#allocation3 + $0xa8] sm:$0xff] }
 0x189   : > { %18821 = vst [vmem:[#allocation17_spill] sm:$0xff] %v12937_v20  ;;  %18824 = vst [vmem:[#allocation20_spill] sm:$0xff] %v12951_v46 }
 0x18a   : > { %2077 = vrot.lane.b32.xlu0 %v2039_v56, %s12431_s20  ;;  %1883 = vrot.lane.b32.xlu1 %v1694_v57, %s12433_s24 }
 0x18c   : > { %v12941_v44 = vpop.permute.xlu0 %2521 }
 0x18d   : > { %18822 = vst [vmem:[#allocation18_spill] sm:$0xff] %v12941_v44  ;;  %v2538_v40 = vmul.f32 %v12941_v44, %v12943_v5  ;;  %v2535_v6 = vmul.f32 %v12941_v44, %v12951_v46  ;;  %v2529_v11 = vmul.f32 %v12941_v44, %v12960_v10 }
 0x18e   : > { %1877 = vrot.lane.b32.xlu0 %v1691_v58, %s12433_s24  ;;  %1713 = vrot.lane.b32.xlu1 %v1654_v60, %s12426_s23 }
 0x190   : > { %v12958_v9 = vpop.permute.xlu0 %2706 }
 0x191   : > { %18825 = vst [vmem:[#allocation21_spill] sm:$0xff] %v12958_v9  ;;  %v2717_v13 = vmul.f32 %v12958_v9, %v12968_v12  ;;  %v2720_v14 = vmul.f32 %v12958_v9, %v12951_v46  ;;  %v2714_v15 = vmul.f32 %v12958_v9, %v12960_v10 }
 0x192   : > { %2065 = vrot.lane.b32.xlu0 %v2033_v18, %s12431_s20  ;;  %2071 = vrot.lane.b32.xlu1 %v2036_v61, %s12431_s20 }
 0x196   : > { %2047 = vrot.lane.b32.xlu0 %v12748_v48, %s12434_s11  ;;  %2045 = vrot.lane.b32.xlu1 %v12852_v34, %s12434_s11 }
 0x19a   : > { %2049 = vrot.lane.b32.xlu0 %v12755_v51, %s12434_s11  ;;  %2270 = vrot.lane.b32.xlu1 %v2229_v19, %s12430_s19 }
 0x19e   : > { %2258 = vrot.lane.b32.xlu0 %v2223_v21, %s12430_s19  ;;  %2264 = vrot.lane.b32.xlu1 %v2226_v0, %s12430_s19 }
 0x1a2   : > { %2252 = vrot.lane.b32.xlu0 %v2220_v39, %s12430_s19  ;;  %2051 = vrot.lane.b32.xlu1 %v1654_v60, %s12434_s11 }
 0x1a6   : > { %2234 = vrot.lane.b32.xlu0 %v12748_v48, %s12432_s22  ;;  %2232 = vrot.lane.b32.xlu1 %v12852_v34, %s12432_s22  ;;  %v2723_v48 = vmul.f32 %v12958_v9, %v12943_v5 }
 0x1aa   : > { %2581 = vrot.lane.b32.xlu0 %v2538_v40, %s12429_s18  ;;  %2236 = vrot.lane.b32.xlu1 %v12755_v51, %s12432_s22  ;;  %v2532_v51 = vmul.f32 %v12941_v44, %v12968_v12 }
 0x1ae   : > { %2575 = vrot.lane.b32.xlu0 %v2535_v6, %s12429_s18  ;;  %2238 = vrot.lane.b32.xlu1 %v1654_v60, %s12432_s22 }
 0x1b2   : > { %2766 = vrot.lane.b32.xlu0 %v2723_v48, %s12428_s17  ;;  %2563 = vrot.lane.b32.xlu1 %v2529_v11, %s12429_s18 }
 0x1b6   : > { %2569 = vrot.lane.b32.xlu0 %v2532_v51, %s12429_s18  ;;  %2754 = vrot.lane.b32.xlu1 %v2717_v13, %s12428_s17 }
 0x1ba   : > { %2760 = vrot.lane.b32.xlu0 %v2720_v14, %s12428_s17  ;;  %2748 = vrot.lane.b32.xlu1 %v2714_v15, %s12428_s17 }
 0x1be   : > { %2539 = vrot.lane.b32.xlu0 %v12987_v16, %s12426_s23  ;;  %2541 = vrot.lane.b32.xlu1 %v12992_v17, %s12426_s23 }
 0x1c2   : > { %2724 = vrot.lane.b32.xlu0 %v12987_v16, %s12434_s11 }
 0x1c6   : > { %2726 = vrot.lane.b32.xlu0 %v12992_v17, %s12434_s11 }
 0x1ed   : > { %v623_v31 = vpop.f32.mrf.mxu1 }
 0x1ee   : > { %v624_v15 = vadd.f32 %v623_v31, %v510_v23 }
 0x1ef   : > { %v625_v32 = vpop.f32.mrf.mxu1  ;;  %v765_v33 = vpop.f32.mrf.mxu0 }
 0x1f0   : > { %v626_v4 = vadd.f32 %v625_v32, %v512_v24  ;;  %v788_v17 = vadd.f32 %v765_v33, %v624_v15 }
 0x1f1   : > { %v629_v34 = vpop.f32.mrf.mxu1  ;;  %v767_v35 = vpop.f32.mrf.mxu0 }
 0x1f2   : > { %v630_v16 = vadd.f32 %v629_v34, %v516_v25  ;;  %v789_v46 = vadd.f32 %v767_v35, %v626_v4 }
 0x1f3   : > { %v631_v36 = vpop.f32.mrf.mxu1  ;;  %v771_v37 = vpop.f32.mrf.mxu0 }
 0x1f4   : > { %v632_v9 = vadd.f32 %v631_v36, %v518_v26  ;;  %v790_v47 = vadd.f32 %v771_v37, %v630_v16 }
 0x1f5   : > { %v635_v38 = vpop.f32.mrf.mxu1  ;;  %v773_v41 = vpop.f32.mrf.mxu0 }
 0x1f6   : > { %v636_v3 = vadd.f32 %v635_v38, %v522_v28  ;;  %v791_v49 = vadd.f32 %v773_v41, %v632_v9  ;;  %v13012_v28 = vpop.permute.xlu0 %1739 }
 0x1f7   : > { %v637_v42 = vpop.f32.mrf.mxu1  ;;  %v777_v43 = vpop.f32.mrf.mxu0 }
 0x1f8   : > { %v638_v23 = vadd.f32 %v637_v42, %v524_v30  ;;  %v792_v33 = vadd.f32 %v777_v43, %v636_v3 }
 0x1f9   : > { %v641_v45 = vpop.f32.mrf.mxu1  ;;  %v779_v52 = vpop.f32.mrf.mxu0 }
 0x1fa   : > { %v642_v25 = vadd.f32 %v641_v45, %v13002_v27 }
 0x1fb   : > { %v783_v53 = vpop.f32.mrf.mxu0  ;;  %v643_v55 = vpop.f32.mrf.mxu1 }
 0x1fd   : > { %v785_v56 = vpop.f32.mrf.mxu0 }
 0x1ff   : > { %v905_v57 = vpop.f32.mrf.mxu1  ;;  %v1025_v58 = vpop.f32.mrf.mxu0 }
 0x200   : > { %v928_v5 = vadd.f32 %v905_v57, %v788_v17  ;;  %v644_v17 = vadd.f32 %v643_v55, %v13004_v29 }
 0x201   : > { %v907_v60 = vpop.f32.mrf.mxu1  ;;  %v1027_v18 = vpop.f32.mrf.mxu0 }
 0x202   : > { %v929_v20 = vadd.f32 %v907_v60, %v789_v46  ;;  %v1048_v31 = vadd.f32 %v1025_v58, %v928_v5  ;;  %v793_v46 = vadd.f32 %v779_v52, %v638_v23  ;;  %v795_v3 = vadd.f32 %v785_v56, %v644_v17  ;;  %v13014_v52 = vpop.permute.xlu0 %3057  ;;  %v13016_v56 = vpop.permute.xlu1 %2519 }
 0x203   : > { %v911_v61 = vpop.f32.mrf.mxu1  ;;  %v1031_v19 = vpop.f32.mrf.mxu0  ;;  %18830 = vst [vmem:[#allocation26_spill] sm:$0xff] %v13014_v52  ;;  %18831 = vst [vmem:[#allocation27_spill] sm:$0xff] %v13016_v56 }
 0x204   : > { %v930_v24 = vadd.f32 %v911_v61, %v790_v47  ;;  %v1049_v34 = vadd.f32 %v1027_v18, %v929_v20  ;;  %v794_v47 = vadd.f32 %v783_v53, %v642_v25  ;;  %v18834_v25 = vld [vmem:[#allocation12_spill] sm:$0xff] }
 0x205   : > { %v913_v21 = vpop.f32.mrf.mxu1  ;;  %v1033_v0 = vpop.f32.mrf.mxu0 }
 0x206   : > { %v931_v26 = vadd.f32 %v913_v21, %v791_v49  ;;  %v1050_v5 = vadd.f32 %v1031_v19, %v930_v24 }
 0x207   : > { %v917_v39 = vpop.f32.mrf.mxu1  ;;  %v1037_v40 = vpop.f32.mrf.mxu0 }
 0x208   : > { %v932_v16 = vadd.f32 %v917_v39, %v792_v33  ;;  %v1051_v41 = vadd.f32 %v1033_v0, %v931_v26 }
 0x209   : > { %v919_v6 = vpop.f32.mrf.mxu1  ;;  %v1039_v48 = vpop.f32.mrf.mxu0 }
 0x20a   : > { %v933_v37 = vadd.f32 %v919_v6, %v793_v46 }
 0x20b   : > { %v923_v11 = vpop.f32.mrf.mxu1  ;;  %v13006_v51 = vpop.f32.mrf.mxu0 }
 0x20c   : > { %v934_v42 = vadd.f32 %v923_v11, %v794_v47 }
 0x20d   : > { %v925_v13 = vpop.f32.mrf.mxu1  ;;  %v13008_v14 = vpop.f32.mrf.mxu0 }
 0x20e   : > { %v935_v57 = vadd.f32 %v925_v13, %v795_v3 }
 0x20f   : > { %v1163_v2 = vpop.f32.mrf.mxu1  ;;  %v1301_v22 = vpop.f32.mrf.mxu0 }
 0x210   : > { %v1186_v4 = vadd.f32 %v1163_v2, %v1048_v31  ;;  %v1052_v2 = vadd.f32 %v1037_v40, %v932_v16  ;;  %v13020_v40 = vpop.permute.xlu0 %1727  ;;  %v18838_v16 = vld [vmem:[#allocation15_spill] sm:$0xff] }
 0x211   : > { %v1165_v7 = vpop.f32.mrf.mxu1  ;;  %v1303_v8 = vpop.f32.mrf.mxu0 }
 0x212   : > { %v1187_v36 = vadd.f32 %v1165_v7, %v1049_v34  ;;  %v1324_v38 = vadd.f32 %v1301_v22, %v1186_v4  ;;  %v1053_v7 = vadd.f32 %v1039_v48, %v933_v37  ;;  %v18837_v34 = vld [vmem:[#allocation10_spill] sm:$0xff] }
 0x213   : > { %v1169_v10 = vpop.f32.mrf.mxu1  ;;  %v1307_v12 = vpop.f32.mrf.mxu0 }
 0x214   : > { %v1188_v27 = vadd.f32 %v1169_v10, %v1050_v5  ;;  %v1325_v29 = vadd.f32 %v1303_v8, %v1187_v36  ;;  %v1054_v10 = vadd.f32 %v13006_v51, %v934_v42  ;;  %v18839_v36 = vld [vmem:[#allocation11_spill] sm:$0xff] }
 0x215   : > { %v1171_v44 = vpop.f32.mrf.mxu1  ;;  %v1309_v59 = vpop.f32.mrf.mxu0  ;;  %v13044_v5 = vsel %vm1686_vm11, %v18839_v36, %v18838_v16 }
 0x216   : > { %v1189_v45 = vadd.f32 %v1171_v44, %v1051_v41  ;;  %v1326_v18 = vadd.f32 %v1307_v12, %v1188_v27  ;;  %18840 = vst [vmem:[#allocation10_spill] sm:$0xff] %v13044_v5 }
 0x217   : > { %v1175_v50 = vpop.f32.mrf.mxu1  ;;  %v1313_v63 = vpop.f32.mrf.mxu0 }
 0x218   : > { %v1190_v58 = vadd.f32 %v1175_v50, %v1052_v2  ;;  %v1327_v21 = vadd.f32 %v1309_v59, %v1189_v45  ;;  %v1055_v50 = vadd.f32 %v13008_v14, %v935_v57  ;;  %v13026_v59 = vpop.permute.xlu1 %2704 }
 0x219   : > { %v1177_v32 = vpop.f32.mrf.mxu1  ;;  %v1315_v54 = vpop.f32.mrf.mxu0  ;;  %18833 = vst [vmem:[#allocation29_spill] sm:$0xff] %v13026_v59 }
 0x21a   : > { %v1191_v61 = vadd.f32 %v1177_v32, %v1053_v7  ;;  %v1328_v6 = vadd.f32 %v1313_v63, %v1190_v58  ;;  %v13031_v63 = vsel %vm2028_vm10, %v18834_v25, %v12931_v1 }
 0x21b   : > { %v1181_v35 = vpop.f32.mrf.mxu1  ;;  %v1319_v30 = vpop.f32.mrf.mxu0  ;;  %18835 = vst [vmem:[#allocation12_spill] sm:$0xff] %v13031_v63 }
 0x21c   : > { %v1192_v12 = vadd.f32 %v1181_v35, %v1054_v10  ;;  %v1329_v31 = vadd.f32 %v1315_v54, %v1191_v61  ;;  %v13050_v3 = vpop.permute.xlu1 %1745  ;;  %v18845_v10 = vld [vmem:[#allocation17_spill] sm:$0xff]  ;;  %v18846_v61 = vld [vmem:[#allocation14_spill] sm:$0xff] }
 0x21d   : > { %v1183_v9 = vpop.f32.mrf.mxu1  ;;  %v1321_v49 = vpop.f32.mrf.mxu0 }
 0x21e   : > { %v1193_v24 = vadd.f32 %v1183_v9, %v1055_v50  ;;  %v1330_v54 = vadd.f32 %v1319_v30, %v1192_v12  ;;  %v13054_v30 = vpop.permute.xlu0 %1709 }
 0x21f   : > { %v1432_v20 = vpop.f32.mrf.mxu1 }
 0x220   : > { %v1455_v43 = vadd.f32 %v1432_v20, %v1324_v38  ;;  %v1331_v41 = vadd.f32 %v1321_v49, %v1193_v24 }
 0x221   : > { %v1434_v55 = vpop.f32.mrf.mxu1 }
 0x222   : > { %v1456_v60 = vadd.f32 %v1434_v55, %v1325_v29  ;;  %v1570_v53 = vpop.f32.mrf.mxu0  ;;  %v18843_v29 = vld [vmem:[#allocation9_spill] sm:$0xff] }
 0x223   : > { %v1593_v22 = vadd.f32 %v1570_v53, %v1455_v43 }
 0x224   : > { %v1438_v19 = vpop.f32.mrf.mxu1  ;;  %v1572_v8 = vpop.f32.mrf.mxu0 }
 0x225   : > { %v1621_v44 = vadd.f32 %v12910_v62, %v1593_v22  ;;  %v1457_v0 = vadd.f32 %v1438_v19, %v1326_v18  ;;  %v1594_v39 = vadd.f32 %v1572_v8, %v1456_v60  ;;  %v13073_v19 = vsel %vm2215_vm12, %v18846_v61, %v18845_v10 }
 0x226   : > { %v1440_v48 = vpop.f32.mrf.mxu1  ;;  %v1576_v11 = vpop.f32.mrf.mxu0  ;;  %18847 = vst [vmem:[#allocation14_spill] sm:$0xff] %v13073_v19 }
 0x227   : > { %v13023_v13 = vmax.f32 %v1621_v44, 0.0  ;;  %v1622_v51 = vadd.f32 %v12910_v62, %v1594_v39  ;;  %v1458_v15 = vadd.f32 %v1440_v48, %v1327_v21  ;;  %v1595_v23 = vadd.f32 %v1576_v11, %v1457_v0  ;;  %v18849_v21 = vld [vmem:[#allocation13_spill] sm:$0xff]  ;;  %v13079_v39 = vpop.permute.xlu1 %3055 }
 0x228   : > { %v1444_v32 = vpop.f32.mrf.mxu1  ;;  %v1578_v33 = vpop.f32.mrf.mxu0  ;;  %18850 = vst [vmem:[#allocation13_spill] sm:$0xff] %v13079_v39 }
 0x229   : > { %18832 = vst [vmem:[#allocation28_spill] sm:$0xff] %v13023_v13  ;;  %1637 = vst [vmem:[#allocation3 + $0x10] sm:$0xff] %v13023_v13  ;;  %v13034_v14 = vmax.f32 %v1622_v51, 0.0  ;;  %v1623_v4 = vadd.f32 %v18837_v34, %v1595_v23  ;;  %v1459_v62 = vadd.f32 %v1444_v32, %v1328_v6  ;;  %v1596_v17 = vadd.f32 %v1578_v33, %v1458_v15  ;;  %v13084_v6 = vpop.permute.xlu0 %1711  ;;  %v18853_v32 = vld [vmem:[#allocation18_spill] sm:$0xff] }
 0x22a   : > { %1729 = vrot.lane.b32.xlu0 %v13023_v13, %s12432_s22  ;;  %v1446_v26 = vpop.f32.mrf.mxu1  ;;  %v1582_v35 = vpop.f32.mrf.mxu0  ;;  %v2034_v46 = vmul.f32 %v13031_v63, %v13023_v13  ;;  %v1692_v2 = vmul.f32 %v13044_v5, %v13023_v13  ;;  %v2527_v49 = vmul.f32 %v13016_v56, %v13023_v13  ;;  %v2221_v50 = vmul.f32 %v13073_v19, %v13023_v13 }
 0x22b   : > { %18836 = vst [vmem:[#allocation30_spill] sm:$0xff] %v13034_v14  ;;  %1638 = vst [vmem:[#allocation3 + $0x48] sm:$0xff] %v13034_v14  ;;  %v13047_v9 = vmax.f32 %v1623_v4, 0.0  ;;  %v1624_v47 = vadd.f32 %v18837_v34, %v1596_v17  ;;  %v1460_v37 = vadd.f32 %v1446_v26, %v1329_v31  ;;  %v1597_v38 = vadd.f32 %v1582_v35, %v1459_v62  ;;  %v13099_v23 = vpop.permute.xlu1 %1733 }
 0x22c   : > { %1731 = vrot.lane.b32.xlu1 %v13034_v14, %s12432_s22  ;;  %v1450_v27 = vpop.f32.mrf.mxu1  ;;  %v1584_v20 = vpop.f32.mrf.mxu0  ;;  %v1693_v11 = vmul.f32 %v18838_v16, %v13034_v14  ;;  %v2712_v15 = vmul.f32 %v13026_v59, %v13023_v13  ;;  %v2222_v31 = vmul.f32 %v18845_v10, %v13034_v14  ;;  %v13111_v33 = vsel %vm2276_vm13, %v13016_v56, %v18853_v32 }
 0x22d   : > { %18841 = vst [vmem:[#allocation11_spill] sm:$0xff] %v13047_v9  ;;  %1639 = vst [vmem:[#allocation3 + $0x88] sm:$0xff] %v13047_v9  ;;  %v13059_v42 = vmax.f32 %v1624_v47, 0.0  ;;  %v1625_v43 = vadd.f32 %v18843_v29, %v1597_v38  ;;  %v1461_v45 = vadd.f32 %v1450_v27, %v1330_v54  ;;  %v1598_v55 = vadd.f32 %v1584_v20, %v1460_v37  ;;  %v13105_v24 = vpop.permute.xlu0 %2083  ;;  %v18855_v54 = vld [vmem:[#allocation21_spill] sm:$0xff] }
 0x22e   : > { %2067 = vrot.lane.b32.xlu0 %v2034_v46, %s12431_s20  ;;  %v1452_v7 = vpop.f32.mrf.mxu1  ;;  %v1588_v57 = vpop.f32.mrf.mxu0  ;;  %18854 = vst [vmem:[#allocation18_spill] sm:$0xff] %v13111_v33  ;;  %v2528_v34 = vmul.f32 %v13111_v33, %v13034_v14  ;;  %v2035_v62 = vmul.f32 %v12931_v1, %v13034_v14  ;;  %v13127_v26 = vsel %vm2089_vm14, %v13026_v59, %v18855_v54 }
 0x22f   : > { %18842 = vst [vmem:[#allocation31_spill] sm:$0xff] %v13059_v42  ;;  %1640 = vst [vmem:[#allocation3 + $0x90] sm:$0xff] %v13059_v42  ;;  %v13066_v58 = vmax.f32 %v1625_v43, 0.0  ;;  %v1626_v60 = vadd.f32 %v18843_v29, %v1598_v55  ;;  %v1462_v53 = vadd.f32 %v1452_v7, %v1331_v41  ;;  %v1599_v18 = vadd.f32 %v1588_v57, %v1461_v45  ;;  %v13117_v4 = vpop.permute.xlu1 %1707 }
 0x230   : > { %1879 = vrot.lane.b32.xlu1 %v1692_v2, %s12433_s24  ;;  %v1590_v22 = vpop.f32.mrf.mxu0  ;;  %18856 = vst [vmem:[#allocation21_spill] sm:$0xff] %v13127_v26  ;;  %v2713_v35 = vmul.f32 %v13127_v26, %v13034_v14  ;;  %v1695_v46 = vmul.f32 %v13044_v5, %v13047_v9  ;;  %v2037_v38 = vmul.f32 %v13031_v63, %v13047_v9 }
 0x231   : > { %18844 = vst [vmem:[#allocation9_spill] sm:$0xff] %v13066_v58  ;;  %1641 = vst [vmem:[#allocation3 + $0x70] sm:$0xff] %v13066_v58  ;;  %v13076_v8 = vmax.f32 %v1626_v60, 0.0  ;;  %v1627_v44 = vadd.f32 %v18849_v21, %v1599_v18  ;;  %v1600_v0 = vadd.f32 %v1590_v22, %v1462_v53  ;;  %v13122_v17 = vpop.permute.xlu0 %2077  ;;  %v2224_v41 = vmul.f32 %v13073_v19, %v13047_v9 }
 0x232   : > { %2559 = vrot.lane.b32.xlu0 %v2527_v49, %s12429_s18  ;;  %v2715_v2 = vmul.f32 %v13026_v59, %v13047_v9  ;;  %v2530_v29 = vmul.f32 %v13016_v56, %v13047_v9  ;;  %v2225_v43 = vmul.f32 %v18845_v10, %v13059_v42  ;;  %v2531_v7 = vmul.f32 %v13111_v33, %v13059_v42 }
 0x233   : > { %18848 = vst [vmem:[#allocation32_spill] sm:$0xff] %v13076_v8  ;;  %1642 = vst [vmem:[#allocation3 + $0xa0] sm:$0xff] %v13076_v8  ;;  %v13087_v12 = vmax.f32 %v1627_v44, 0.0  ;;  %v1628_v48 = vadd.f32 %v18849_v21, %v1600_v0  ;;  %v13135_v47 = vpop.permute.xlu1 %1895  ;;  %v1696_v57 = vmul.f32 %v18838_v16, %v13059_v42  ;;  %v2038_v53 = vmul.f32 %v12931_v1, %v13059_v42 }
 0x234   : > { %2254 = vrot.lane.b32.xlu1 %v2221_v50, %s12430_s19  ;;  %v2040_v18 = vmul.f32 %v13031_v63, %v13066_v58  ;;  %v2716_v44 = vmul.f32 %v13127_v26, %v13059_v42  ;;  %v2533_v0 = vmul.f32 %v13016_v56, %v13066_v58 }
 0x235   : > { %18851 = vst [vmem:[#allocation33_spill] sm:$0xff] %v13087_v12  ;;  %1643 = vst [vmem:[#allocation3 + $0x80] sm:$0xff] %v13087_v12  ;;  %v13094_v51 = vmax.f32 %v1628_v48, 0.0  ;;  %v13138_v37 = vpop.permute.xlu0 %1877  ;;  %v1698_v48 = vmul.f32 %v13044_v5, %v13066_v58 }
 0x236   : > { %1881 = vrot.lane.b32.xlu0 %v1693_v11, %s12433_s24 }
 0x237   : > { %18852 = vst [vmem:[#allocation34_spill] sm:$0xff] %v13094_v51  ;;  %1644 = vst [vmem:[#allocation3 + $0xb8] sm:$0xff] %v13094_v51  ;;  %v13147_v27 = vpop.permute.xlu1 %1889 }
 0x238   : > { %2744 = vrot.lane.b32.xlu1 %v2712_v15, %s12428_s17  ;;  %v2718_v15 = vmul.f32 %v13026_v59, %v13066_v58 }
 0x239   : > { %v13149_v20 = vpop.permute.xlu0 %2065 }
 0x23a   : > { %2256 = vrot.lane.b32.xlu0 %v2222_v31, %s12430_s19  ;;  %18857 = vst [vmem:[#allocation35_spill] sm:$0xff] %v13149_v20  ;;  %v2227_v31 = vmul.f32 %v13073_v19, %v13066_v58 }
 0x23b   : > { %v13160_v45 = vpop.permute.xlu1 %1883 }
 0x23c   : > { %1735 = vrot.lane.b32.xlu1 %v13047_v9, %s12432_s22 }
 0x23d   : > { %v13162_v55 = vpop.permute.xlu0 %2047 }
 0x23e   : > { %2561 = vrot.lane.b32.xlu0 %v2528_v34, %s12429_s18  ;;  %18858 = vst [vmem:[#allocation36_spill] sm:$0xff] %v13162_v55 }
 0x23f   : > { %v13172_v49 = vpop.permute.xlu1 %1713 }
 0x240   : > { %2069 = vrot.lane.b32.xlu1 %v2035_v62, %s12431_s20 }
 0x241   : > { %v13174_v60 = vpop.permute.xlu0 %2049 }
 0x242   : > { %2746 = vrot.lane.b32.xlu0 %v2713_v35, %s12428_s17  ;;  %18859 = vst [vmem:[#allocation37_spill] sm:$0xff] %v13174_v60  ;;  %v2041_v35 = vmul.f32 %v12931_v1, %v13076_v8  ;;  %v13461_v60 = vld [vmem:[%s18598_s3 + $0x78] sm:$0xff] }
 0x243   : > { %v13184_v22 = vpop.permute.xlu1 %2071 }
 0x244   : > { %1885 = vrot.lane.b32.xlu1 %v1695_v46, %s12433_s24  ;;  %v1699_v46 = vmul.f32 %v18838_v16, %v13076_v8 }
 0x245   : > { %v13186_v21 = vpop.permute.xlu0 %2258 }
 0x246   : > { %1737 = vrot.lane.b32.xlu0 %v13059_v42, %s12432_s22 }
 0x247   : > { %v13194_v50 = vpop.permute.xlu1 %2045 }
 0x248   : > { %2073 = vrot.lane.b32.xlu1 %v2037_v38, %s12431_s20  ;;  %18860 = vst [vmem:[#allocation38_spill] sm:$0xff] %v13194_v50 }
 0x249   : > { %v13199_v11 = vpop.permute.xlu0 %2252 }
 0x24a   : > { %2260 = vrot.lane.b32.xlu0 %v2224_v41, %s12430_s19 }
 0x24b   : > { %v13207_v34 = vpop.permute.xlu1 %2270 }
 0x24c   : > { %2750 = vrot.lane.b32.xlu1 %v2715_v2, %s12428_s17  ;;  %v2228_v2 = vmul.f32 %v18845_v10, %v13076_v8 }
 0x24d   : > { %v13210_v62 = vpop.permute.xlu0 %2234 }
 0x24e   : > { %2565 = vrot.lane.b32.xlu0 %v2530_v29, %s12429_s18  ;;  %18861 = vst [vmem:[#allocation39_spill] sm:$0xff] %v13210_v62  ;;  %v2043_v29 = vmul.f32 %v13031_v63, %v13087_v12 }
 0x24f   : > { %v13219_v38 = vpop.permute.xlu1 %2264 }
 0x250   : > { %2262 = vrot.lane.b32.xlu1 %v2225_v43, %s12430_s19 }
 0x251   : > { %v13222_v41 = vpop.permute.xlu0 %2581 }
 0x252   : > { %1741 = vrot.lane.b32.xlu0 %v13066_v58, %s12432_s22  ;;  %18862 = vst [vmem:[#allocation40_spill] sm:$0xff] %v13222_v41 }
 0x253   : > { %v13231_v43 = vpop.permute.xlu1 %2051 }
 0x254   : > { %2567 = vrot.lane.b32.xlu1 %v2531_v7, %s12429_s18  ;;  %18863 = vst [vmem:[#allocation41_spill] sm:$0xff] %v13231_v43  ;;  %v2534_v7 = vmul.f32 %v13111_v33, %v13076_v8 }
 0x256   : > { %1887 = vrot.lane.b32.xlu0 %v1696_v57, %s12433_s24  ;;  %v13236_v57 = vpop.permute.xlu0 %2575 }
 0x257   : > { %18864 = vst [vmem:[#allocation42_spill] sm:$0xff] %v13236_v57 }
 0x258   : > { %1743 = vrot.lane.b32.xlu1 %v13076_v8, %s12432_s22 }
 0x25a   : > { %2075 = vrot.lane.b32.xlu0 %v2038_v53, %s12431_s20  ;;  %v2536_v53 = vmul.f32 %v13016_v56, %v13087_v12 }
 0x25c   : > { %2079 = vrot.lane.b32.xlu1 %v2040_v18, %s12431_s20  ;;  %v2719_v18 = vmul.f32 %v13127_v26, %v13076_v8 }
 0x25e   : > { %2752 = vrot.lane.b32.xlu0 %v2716_v44, %s12428_s17  ;;  %v13244_v44 = vpop.permute.xlu1 %2232 }
 0x260   : > { %2571 = vrot.lane.b32.xlu1 %v2533_v0, %s12429_s18  ;;  %v2721_v0 = vmul.f32 %v13026_v59, %v13087_v12  ;;  %v2044_v59 = vmul.f32 %v12931_v1, %v13094_v51 }
 0x262   : > { %1891 = vrot.lane.b32.xlu0 %v1698_v48, %s12433_s24  ;;  %v13249_v48 = vpop.permute.xlu0 %2766 }
 0x263   : > { %18865 = vst [vmem:[#allocation43_spill] sm:$0xff] %v13249_v48 }
 0x264   : > { %2756 = vrot.lane.b32.xlu1 %v2718_v15, %s12428_s17  ;;  %v1701_v15 = vmul.f32 %v13044_v5, %v13087_v12  ;;  %v18881_v5 = vld [vmem:[#allocation23_spill] sm:$0xff] }
 0x266   : > { %2266 = vrot.lane.b32.xlu0 %v2227_v31, %s12430_s19  ;;  %v1702_v31 = vmul.f32 %v18838_v16, %v13094_v51 }
 0x268   : > { %1747 = vrot.lane.b32.xlu1 %v13087_v12, %s12432_s22 }
 0x26a   : > { %2081 = vrot.lane.b32.xlu0 %v2041_v35, %s12431_s20  ;;  %v13257_v35 = vpop.permute.xlu1 %2236 }
 0x26b   : > { %18866 = vst [vmem:[#allocation44_spill] sm:$0xff] %v13257_v35  ;;  %v13482_v35 = vld [vmem:[#allocation4 + $0x70] sm:$0xff] }
 0x26c   : > { %1893 = vrot.lane.b32.xlu1 %v1699_v46, %s12433_s24  ;;  %v2230_v46 = vmul.f32 %v13073_v19, %v13087_v12 }
 0x26e   : > { %1749 = vrot.lane.b32.xlu0 %v13094_v51, %s12432_s22 }
 0x270   : > { %2268 = vrot.lane.b32.xlu1 %v2228_v2, %s12430_s19  ;;  %v13262_v2 = vpop.permute.xlu0 %2569 }
 0x271   : > { %18867 = vst [vmem:[#allocation45_spill] sm:$0xff] %v13262_v2  ;;  %v2722_v2 = vmul.f32 %v13127_v26, %v13094_v51 }
 0x272   : > { %2085 = vrot.lane.b32.xlu0 %v2043_v29, %s12431_s20  ;;  %v18868_v29 = vld [vmem:[#allocation19_spill] sm:$0xff] }
 0x273   : > { %v3074_v19 = vmul.f32 %v13014_v52, %v18868_v29 }
 0x274   : > { %2573 = vrot.lane.b32.xlu1 %v2534_v7, %s12429_s18  ;;  %v13267_v7 = vpop.permute.xlu1 %2238 }
 0x275   : > { %18869 = vst [vmem:[#allocation19_spill] sm:$0xff] %v13267_v7 }
 0x276   : > { %2577 = vrot.lane.b32.xlu0 %v2536_v53, %s12429_s18  ;;  %v13271_v53 = vpop.permute.xlu0 %2760 }
 0x277   : > { %18870 = vst [vmem:[#allocation46_spill] sm:$0xff] %v13271_v53 }
 0x278   : > { %2758 = vrot.lane.b32.xlu1 %v2719_v18, %s12428_s17  ;;  %v13276_v18 = vld [vmem:[%s18598_s3 + $0x38] sm:$0xff] }
 0x279   : > { %18871 = vst [vmem:[#allocation47_spill] sm:$0xff] %v13276_v18 }
 0x27a   : > { %2762 = vrot.lane.b32.xlu0 %v2721_v0, %s12428_s17  ;;  %v13282_v0 = vpop.permute.xlu1 %2563 }
 0x27b   : > { %18872 = vst [vmem:[#allocation48_spill] sm:$0xff] %v13282_v0 }
 0x27c   : > { %1897 = vrot.lane.b32.xlu1 %v1701_v15, %s12433_s24  ;;  %v18873_v15 = vld [vmem:[#allocation20_spill] sm:$0xff] }
 0x27e   : > { %1899 = vrot.lane.b32.xlu0 %v1702_v31, %s12433_s24  ;;  %v13286_v31 = vpop.permute.xlu0 %2539  ;;  %v13295_v16 = vpop.permute.xlu1 %2754 }
 0x27f   : > { %18874 = vst [vmem:[#allocation20_spill] sm:$0xff] %v13286_v31  ;;  %18875 = vst [vmem:[#allocation49_spill] sm:$0xff] %v13295_v16 }
 0x280   : > { %2272 = vrot.lane.b32.xlu1 %v2230_v46, %s12430_s19  ;;  %v2231_v46 = vmul.f32 %v18845_v10, %v13094_v51 }
 0x282   : > { %2931 = vrot.lane.b32.xlu0 %v18868_v29, %s12426_s23  ;;  %v13300_v56 = vpop.permute.xlu0 %2724  ;;  %v13305_v10 = vpop.permute.xlu1 %2748 }
 0x283   : > { %18876 = vst [vmem:[#allocation50_spill] sm:$0xff] %v13300_v56  ;;  %18877 = vst [vmem:[#allocation51_spill] sm:$0xff] %v13305_v10  ;;  %v13337_v56 = vld [vmem:[%s18598_s3 + $0x50] sm:$0xff] }
 0x284   : > { %2929 = vrot.lane.b32.xlu1 %v13094_v51, %s12426_s23  ;;  %18882 = vst [vmem:[#allocation23_spill] sm:$0xff] %v13337_v56 }
 0x286   : > { %2927 = vrot.lane.b32.xlu0 %v13087_v12, %s12426_s23  ;;  %v13314_v29 = vpop.permute.xlu1 %2541 }
 0x287   : > { %18879 = vst [vmem:[#allocation53_spill] sm:$0xff] %v13314_v29 }
 0x288   : > { %2543 = vrot.lane.b32.xlu1 %v13276_v18, %s12426_s23 }
 0x28a   : > { %2925 = vrot.lane.b32.xlu0 %v18873_v15, %s12426_s23 }
 0x28c   : > { %2923 = vrot.lane.b32.xlu1 %v13076_v8, %s12426_s23 }
 0x28e   : > { %2274 = vrot.lane.b32.xlu0 %v2231_v46, %s12430_s19  ;;  %v13309_v46 = vpop.permute.xlu0 %2726 }
 0x28f   : > { %18878 = vst [vmem:[#allocation52_spill] sm:$0xff] %v13309_v46  ;;  %v3071_v46 = vmul.f32 %v13014_v52, %v18873_v15  ;;  %v3069_v15 = vmul.f32 %v13079_v39, %v13066_v58 }
 0x290   : > { %2087 = vrot.lane.b32.xlu1 %v2044_v59, %s12431_s20  ;;  %v3072_v59 = vmul.f32 %v13079_v39, %v13087_v12 }
 0x292   : > { %3109 = vrot.lane.b32.xlu0 %v3074_v19, %s12427_s14  ;;  %v13321_v19 = vsel %vm1901_vm15, %v13079_v39, %v13014_v52 }
 0x293   : > { %18880 = vst [vmem:[#allocation54_spill] sm:$0xff] %v13321_v19  ;;  %v3070_v63 = vmul.f32 %v13321_v19, %v13076_v8  ;;  %v3073_v43 = vmul.f32 %v13321_v19, %v13094_v51 }
 0x294   : > { %2728 = vrot.lane.b32.xlu1 %v13276_v18, %s12434_s11 }
 0x296   : > { %2921 = vrot.lane.b32.xlu0 %v13066_v58, %s12426_s23 }
 0x298   : > { %3105 = vrot.lane.b32.xlu1 %v3072_v59, %s12427_s14 }
 0x29a   : > { %2917 = vrot.lane.b32.xlu0 %v13059_v42, %s12426_s23 }
 0x29c   : > { %v13323_v1 = vpop.permute.xlu0 %1729  ;;  %2919 = vrot.lane.b32.xlu1 %v18881_v5, %s12426_s23 }
 0x29e   : > { %3101 = vrot.lane.b32.xlu0 %v3070_v63, %s12427_s14  ;;  %v13330_v59 = vpop.permute.xlu1 %1731 }
 0x2a0   : > { %v13339_v29 = vpop.permute.xlu0 %2067  ;;  %3103 = vrot.lane.b32.xlu1 %v3071_v46, %s12427_s14  ;;  %v18884_v46 = vld [vmem:[#allocation22_spill] sm:$0xff] }
 0x2a2   : > { %2545 = vrot.lane.b32.xlu0 %v13337_v56, %s12426_s23  ;;  %v13344_v10 = vpop.permute.xlu1 %1879 }
 0x2a4   : > { %v13346_v63 = vpop.permute.xlu0 %2559  ;;  %2915 = vrot.lane.b32.xlu1 %v13047_v9, %s12426_s23 }
 0x2a5   : > { %18883 = vst [vmem:[#allocation55_spill] sm:$0xff] %v13346_v63  ;;  %v2537_v63 = vmul.f32 %v13111_v33, %v13094_v51 }
 0x2a6   : > { %3099 = vrot.lane.b32.xlu0 %v3069_v15, %s12427_s14  ;;  %v13353_v31 = vpop.permute.xlu1 %2254  ;;  %v3068_v15 = vmul.f32 %v13014_v52, %v18881_v5 }
 0x2a8   : > { %v13355_v16 = vpop.permute.xlu0 %1881  ;;  %2911 = vrot.lane.b32.xlu1 %v13034_v14, %s12426_s23 }
 0x2aa   : > { %2913 = vrot.lane.b32.xlu0 %v18884_v46, %s12426_s23  ;;  %v13361_v53 = vpop.permute.xlu1 %2744 }
 0x2ab   : > { %18885 = vst [vmem:[#allocation22_spill] sm:$0xff] %v13361_v53  ;;  %v18888_v53 = vld [vmem:[#allocation24_spill] sm:$0xff] }
 0x2ac   : > { %v13365_v0 = vpop.permute.xlu0 %2256  ;;  %2579 = vrot.lane.b32.xlu1 %v2537_v63, %s12429_s18  ;;  %v3067_v63 = vmul.f32 %v13321_v19, %v13059_v42  ;;  %v13493_v42 = vld [vmem:[%s18598_s3 + $0x60] sm:$0xff] }
 0x2ae   : > { %3097 = vrot.lane.b32.xlu0 %v3068_v15, %s12427_s14  ;;  %v13371_v48 = vpop.permute.xlu1 %1735  ;;  %v3064_v15 = vmul.f32 %v13321_v19, %v13034_v14  ;;  %v13474_v14 = vld [vmem:[%s18598_s3 + $0x90] sm:$0xff] }
 0x2b0   : > { %v13375_v57 = vpop.permute.xlu0 %2561  ;;  %2764 = vrot.lane.b32.xlu1 %v2722_v2, %s12428_s17 }
 0x2b1   : > { %18886 = vst [vmem:[#allocation56_spill] sm:$0xff] %v13375_v57 }
 0x2b2   : > { %2909 = vrot.lane.b32.xlu0 %v13023_v13, %s12426_s23  ;;  %v13380_v33 = vpop.permute.xlu1 %2069 }
 0x2b4   : > { %v13384_v5 = vpop.permute.xlu0 %2746  ;;  %3095 = vrot.lane.b32.xlu1 %v3067_v63, %s12427_s14  ;;  %v3066_v63 = vmul.f32 %v13079_v39, %v13047_v9 }
 0x2b5   : > { %18887 = vst [vmem:[#allocation57_spill] sm:$0xff] %v13384_v5 }
 0x2b6   : > { %3089 = vrot.lane.b32.xlu0 %v3064_v15, %s12427_s14  ;;  %v13390_v26 = vpop.permute.xlu1 %1885  ;;  %v18889_v15 = vld [vmem:[#allocation25_spill] sm:$0xff] }
 0x2b8   : > { %v13392_v2 = vpop.permute.xlu0 %1737  ;;  %2730 = vrot.lane.b32.xlu1 %v13337_v56, %s12434_s11 }
 0x2ba   : > { %2889 = vrot.lane.b32.xlu0 %v18888_v53, %s12432_s22  ;;  %v13398_v57 = vpop.permute.xlu1 %2073 }
 0x2bc   : > { %v13402_v5 = vpop.permute.xlu0 %2260  ;;  %3093 = vrot.lane.b32.xlu1 %v3066_v63, %s12427_s14  ;;  %v3065_v63 = vmul.f32 %v13014_v52, %v18884_v46 }
 0x2be   : > { %2891 = vrot.lane.b32.xlu0 %v18889_v15, %s12432_s22  ;;  %v13407_v41 = vpop.permute.xlu1 %2750  ;;  %v1659_v15 = vld [vmem:[%s18599_s4 + $0x10] sm:$0xff] }
 0x2bf   : > { %18890 = vst [vmem:[#allocation24_spill] sm:$0xff] %v13407_v41 }
 0x2c0   : > { %v13411_v7 = vpop.permute.xlu0 %2565  ;;  %3107 = vrot.lane.b32.xlu1 %v3073_v43, %s12427_s14  ;;  %v3063_v43 = vmul.f32 %v13079_v39, %v13023_v13 }
 0x2c1   : > { %18891 = vst [vmem:[#allocation25_spill] sm:$0xff] %v13411_v7 }
 0x2c2   : > { %2895 = vrot.lane.b32.xlu0 %v13337_v56, %s12432_s22  ;;  %v13416_v53 = vpop.permute.xlu1 %2262  ;;  %v1657_v56 = vld [vmem:[%s18599_s4] sm:$0xff] }
 0x2c4   : > { %v1742_v41 = vpop.permute.xlu0 %1741  ;;  %3091 = vrot.lane.b32.xlu1 %v3065_v63, %s12427_s14  ;;  %v13438_v63 = vld [vmem:[#allocation4 + $0x10] sm:$0xff] }
 0x2c5   : > { %v3638_v8 = vmul.f32 %v13438_v63, %v18834_v25 }
 0x2c6   : > { %3248 = vperm.xlu0 %12353, %v1659_v15   ;;  %v13424_v19 = vpop.permute.xlu1 %2567  ;;  %v1660_v15 = vld [vmem:[%s18599_s4 + $0x18] sm:$0xff] }
 0x2c7   : > { %18892 = vst [vmem:[#allocation58_spill] sm:$0xff] %v13424_v19 }
 0x2c8   : > { %v13431_v7 = vpop.permute.xlu0 %1887  ;;  %3087 = vrot.lane.b32.xlu1 %v3063_v43, %s12427_s14  ;;  %v1658_v43 = vld [vmem:[%s18599_s4 + $0x8] sm:$0xff] }
 0x2ca   : > { %3238 = vperm.xlu0 %12353, %v1657_v56   ;;  %v1744_v46 = vpop.permute.xlu1 %1743  ;;  %v13449_v56 = vld [vmem:[#allocation4 + $0x98] sm:$0xff] }
 0x2cb   : > { %v1757_v50 = vsel %vm1751_vm0, %v1742_v41, %v1744_v46  ;;  %v18896_v46 = vmov 0.0  }
 0x2cc   : > { %v13434_v52 = vpop.permute.xlu0 %2075  ;;  %2893 = vrot.lane.b32.xlu1 %v13276_v18, %s12432_s22 }
 0x2ce   : > { %3358 = vrot.lane.b32.xlu0 %v13438_v63, %s12432_s22  ;;  %v13445_v39 = vpop.permute.xlu1 %2079 }
 0x2d0   : > { %v13447_v19 = vpop.permute.xlu0 %2752  ;;  %3253 = vperm.xlu1 %12354, %v1660_v15  }
 0x2d1   : > { %18893 = vst [vmem:[#allocation59_spill] sm:$0xff] %v13447_v19  ;;  %v13469_v19 = vld [vmem:[#allocation4 + $0x88] sm:$0xff] }
 0x2d2   : > { %3346 = vrot.lane.b32.xlu0 %v13449_v56, %s12432_s22  ;;  %v13456_v18 = vpop.permute.xlu1 %2571 }
 0x2d3   : > { %18894 = vst [vmem:[#allocation60_spill] sm:$0xff] %v13456_v18 }
 0x2d4   : > { %v13463_v13 = vpop.permute.xlu0 %1891  ;;  %3243 = vperm.xlu1 %12354, %v1658_v43  }
 0x2d6   : > { %3328 = vrot.lane.b32.xlu0 %v13461_v60, %s12426_s23  ;;  %v13467_v15 = vpop.permute.xlu1 %2756 }
 0x2d7   : > { %18895 = vst [vmem:[#allocation61_spill] sm:$0xff] %v13467_v15  ;;  %v3641_v15 = vmul.f32 %v13469_v19, %v18834_v25 }
 0x2d8   : > { %v13476_v18 = vpop.permute.xlu0 %2266  ;;  %3364 = vrot.lane.b32.xlu1 %v13469_v19, %s12432_s22 }
 0x2da   : > { %3330 = vrot.lane.b32.xlu0 %v13474_v14, %s12426_s23  ;;  %v1748_v43 = vpop.permute.xlu1 %1747 }
 0x2db   : > { %v1758_v51 = vsel %vm1751_vm0, %v13050_v3, %v1748_v43  ;;  %v1755_v3 = vsel %vm1751_vm0, %v13371_v48, %v13392_v2  ;;  %v1752_v2 = vsel %vm1751_vm0, %v13020_v40, %v13323_v1 }
 0x2dc   : > { %v13484_v9 = vpop.permute.xlu0 %2081  ;;  %3352 = vrot.lane.b32.xlu1 %v13482_v35, %s12432_s22 }
 0x2de   : > { %3682 = vrot.lane.b32.xlu0 %v3641_v15, %s12431_s20  ;;  %v1894_v55 = vpop.permute.xlu1 %1893  ;;  %v3319_v15 = vmul.f32 %v13469_v19, %v18839_v36 }
 0x2e0   : > { %v1750_v58 = vpop.permute.xlu0 %1749  ;;  %3326 = vrot.lane.b32.xlu1 %v13493_v42, %s12426_s23 }
 0x2e1   : > { %v1759_v62 = vsel %vm1751_vm0, %v1748_v43, %v1750_v58  ;;  %v1756_v58 = vsel %vm1751_vm0, %v13012_v28, %v1742_v41  ;;  %v3316_v28 = vmul.f32 %v13438_v63, %v18839_v36 }
 0x2e2   : > { %3676 = vrot.lane.b32.xlu0 %v3638_v8, %s12431_s20  ;;  %1800 = vmatprep.subr.mxu1 %v1759_v62  ;;  %v13502_v12 = vpop.permute.xlu1 %2268  ;;  %v3310_v8 = vmul.f32 %v13449_v56, %v18839_v36  ;;  %v1753_v62 = vsel %vm1751_vm0, %v13323_v1, %v13330_v59  ;;  %v3313_v59 = vmul.f32 %v13482_v35, %v18839_v36  ;;  %v13552_v1 = vld [vmem:[%s18598_s3 + $0xa8] sm:$0xff] }
 0x2e3   : > { %1801 = vmatpush1.msra.mxu1 %v1758_v51 }
 0x2e4   : > { %v13509_v20 = vpop.permute.xlu0 %2085  ;;  %3513 = vrot.lane.b32.xlu1 %v3319_v15, %s12433_s24  ;;  %1802 = vmatprep.subr.mxu1 %v1757_v50  ;;  %v1754_v50 = vsel %vm1751_vm0, %v13099_v23, %v13371_v48  ;;  %v3632_v23 = vmul.f32 %v13449_v56, %v18834_v25 }
 0x2e5   : > { %1803 = vmatpush1.msra.mxu1 %v1756_v58  ;;  %v3635_v58 = vmul.f32 %v13482_v35, %v18834_v25  ;;  %v1906_v25 = vsel %vm1901_vm15, %v13147_v27, %v13463_v13  ;;  %v3809_v27 = vmul.f32 %v13449_v56, %v18846_v61  ;;  %v12358_v56 = vld [vmem:[%s18598_s3 + $0x18] sm:$0xff] }
 0x2e6   : > { %3495 = vrot.lane.b32.xlu0 %v3310_v8, %s12433_s24  ;;  %1804 = vmatprep.subr.mxu1 %v1755_v3  ;;  %v13520_v51 = vpop.permute.xlu1 %2573  ;;  %v1907_v3 = vsel %vm1901_vm15, %v13463_v13, %v1894_v55  ;;  %v1904_v55 = vsel %vm1901_vm15, %v13160_v45, %v13390_v26  ;;  %v1903_v13 = vsel %vm1901_vm15, %v13344_v10, %v13355_v16  ;;  %v12357_v16 = vld [vmem:[%s18598_s3] sm:$0xff] }
 0x2e7   : > { %1805 = vmatpush1.msra.mxu1 %v1754_v50  ;;  %v3818_v45 = vmul.f32 %v13469_v19, %v18846_v61  ;;  %v3815_v19 = vmul.f32 %v13438_v63, %v18846_v61  ;;  %v13636_v63 = vld [vmem:[#allocation4 + $0x58] sm:$0xff] }
 0x2e8   : > { %v13530_v41 = vpop.permute.xlu0 %2577  ;;  %3507 = vrot.lane.b32.xlu1 %v3316_v28, %s12433_s24  ;;  %1806 = vmatprep.subr.mxu1 %v1753_v62 }
 0x2e9   : > { %1807 = vmatpush1.msra.mxu1 %v1752_v2  ;;  %v12359_v2 = vld [vmem:[%s18598_s3 + $0x30] sm:$0xff] }
 0x2ea   : > { %3664 = vrot.lane.b32.xlu0 %v3632_v23, %s12431_s20  ;;  %11964 = vmatmul.mubr.msk.f32.vlgmr.msra.gmra.mxu1 %vm1751_vm0, %v13117_v4  ;;  %v13541_v48 = vpop.permute.xlu1 %2758 }
 0x2eb   : > { %1846 = vmatprep.mubr.f32.mxu1 %v18896_v46 }
 0x2ec   : > { %v13546_v43 = vpop.permute.xlu0 %2762  ;;  %3501 = vrot.lane.b32.xlu1 %v3313_v59, %s12433_s24 }
 0x2ee   : > { %3646 = vrot.lane.b32.xlu0 %v13461_v60, %s12434_s11  ;;  %11965 = vmatmul.mubr.msk.f32.gmra.mxu1 %vm1751_vm0, %v13054_v30  ;;  %v1898_v40 = vpop.permute.xlu1 %1897 }
 0x2ef   : > { %1852 = vmatprep.mubr.f32.mxu1 %v18896_v46  ;;  %v1908_v30 = vsel %vm1901_vm15, %v13135_v47, %v1898_v40  ;;  %v1905_v47 = vsel %vm1901_vm15, %v13390_v26, %v13431_v7 }
 0x2f0   : > { %v1900_v36 = vpop.permute.xlu0 %1899  ;;  %3332 = vrot.lane.b32.xlu1 %v13552_v1, %s12426_s23 }
 0x2f1   : > { %v1909_v4 = vsel %vm1901_vm15, %v1898_v40, %v1900_v36  ;;  %v2282_v36 = vsel %vm2276_vm13, %v13476_v18, %v13502_v12  ;;  %v2095_v12 = vsel %vm2089_vm14, %v13445_v39, %v13484_v9  ;;  %v2279_v9 = vsel %vm2276_vm13, %v13186_v21, %v13402_v5 }
 0x2f2   : > { %3648 = vrot.lane.b32.xlu0 %v13474_v14, %s12434_s11  ;;  %11966 = vmatmul.mubr.msk.f32.gmra.mxu1 %vm1751_vm0, %v13084_v6  ;;  %v2273_v15 = vpop.permute.xlu1 %2272  ;;  %v3812_v6 = vmul.f32 %v13482_v35, %v18846_v61  ;;  %v2092_v21 = vsel %vm2089_vm14, %v13184_v22, %v13398_v57  ;;  %v13708_v22 = vld [vmem:[#allocation4 + $0xb0] sm:$0xff] }
 0x2f3   : > { %1950 = vmatprep.subr.mxu0 %v1909_v4  ;;  %1858 = vmatprep.mubr.f32.mxu1 %v18896_v46  ;;  %v2283_v23 = vsel %vm2276_vm13, %v13207_v34, %v2273_v15  ;;  %v2096_v4 = vsel %vm2089_vm14, %v13105_v24, %v13509_v20  ;;  %v4115_v34 = vmul.f32 %v13636_v63, %v18853_v32  ;;  %v12360_v24 = vld [vmem:[%s18598_s3 + $0x48] sm:$0xff] }
 0x2f4   : > { %1951 = vmatpush1.msra.mxu0 %v1908_v30  ;;  %v13571_v8 = vpop.permute.xlu0 %2931  ;;  %3670 = vrot.lane.b32.xlu1 %v3635_v58, %s12431_s20  ;;  %v18898_v30 = vld [vmem:[#allocation38_spill] sm:$0xff] }
 0x2f5   : > { %1952 = vmatprep.subr.mxu0 %v1907_v3  ;;  %v4112_v3 = vmul.f32 %v13708_v22, %v18853_v32 }
 0x2f6   : > { %1953 = vmatpush1.msra.mxu0 %v1906_v25  ;;  %3847 = vrot.lane.b32.xlu0 %v3812_v6, %s12430_s19  ;;  %v13585_v50 = vpop.permute.xlu1 %2929  ;;  %v18902_v25 = vld [vmem:[#allocation32_spill] sm:$0xff] }
 0x2f7   : > { %11967 = vmatmul.mubr.msk.f32.gmra.mxu1 %vm1751_vm0, %v13172_v49  ;;  %1954 = vmatprep.subr.mxu0 %v1905_v47  ;;  %v1902_v49 = vsel %vm1901_vm15, %v13138_v37, %v13344_v10  ;;  %v13618_v10 = vld [vmem:[#allocation4 + $0x8] sm:$0xff]  ;;  %v18903_v47 = vld [vmem:[#allocation9_spill] sm:$0xff] }
 0x2f8   : > { %1955 = vmatpush1.msra.mxu0 %v1904_v55  ;;  %v13592_v35 = vpop.permute.xlu0 %2927  ;;  %3644 = vrot.lane.b32.xlu1 %v13493_v42, %s12434_s11  ;;  %v4118_v62 = vmul.f32 %v13618_v10, %v18853_v32  ;;  %v13738_v55 = vld [vmem:[#allocation4 + $0xa8] sm:$0xff] }
 0x2f9   : > { %1956 = vmatprep.subr.mxu0 %v1903_v13  ;;  %2178 = vmatprep.mubr.f32.mxu1 %v18896_v46  ;;  %v18905_v13 = vld [vmem:[#allocation36_spill] sm:$0xff] }
 0x2fa   : > { %1957 = vmatpush1.msra.mxu0 %v1902_v49  ;;  %3841 = vrot.lane.b32.xlu0 %v3809_v27, %s12430_s19  ;;  %v13606_v26 = vpop.permute.xlu1 %2543  ;;  %v18906_v27 = vld [vmem:[#allocation31_spill] sm:$0xff]  ;;  %v4292_v49 = vmul.f32 %v13636_v63, %v18855_v54 }
 0x2fb   : > { %11968 = vmatmul.mubr.msk.f32.vlgmr.msra.gmra.mxu0 %vm1751_vm0, %v12357_v16 }
 0x2fc   : > { %v13614_v7 = vpop.permute.xlu0 %2925  ;;  %3859 = vrot.lane.b32.xlu1 %v3818_v45, %s12430_s19  ;;  %1996 = vmatprep.mubr.f32.mxu0 %v18896_v46  ;;  %v18907_v45 = vld [vmem:[#allocation11_spill] sm:$0xff] }
 0x2fe   : > { %3823 = vrot.lane.b32.xlu0 %v13461_v60, %s12432_s22  ;;  %v13622_v37 = vpop.permute.xlu1 %2923 }
 0x2ff   : > { %11969 = vmatmul.mubr.msk.f32.gmra.mxu0 %vm1751_vm0, %v12358_v56  ;;  %v4109_v56 = vmul.f32 %v13738_v55, %v18853_v32  ;;  %v4289_v32 = vmul.f32 %v13708_v22, %v18855_v54 }
 0x300   : > { %v2275_v28 = vpop.permute.xlu0 %2274  ;;  %3853 = vrot.lane.b32.xlu1 %v3815_v19, %s12430_s19  ;;  %2002 = vmatprep.mubr.f32.mxu0 %v18896_v46  ;;  %v18908_v19 = vld [vmem:[#allocation44_spill] sm:$0xff] }
 0x301   : > { %v2284_v60 = vsel %vm2276_vm13, %v2273_v15, %v2275_v28  ;;  %v2281_v15 = vsel %vm2276_vm13, %v13219_v38, %v13476_v18  ;;  %v2094_v38 = vsel %vm2089_vm14, %v13122_v17, %v13445_v39  ;;  %v2278_v39 = vsel %vm2276_vm13, %v13353_v31, %v13365_v0  ;;  %v18909_v28 = vld [vmem:[#allocation30_spill] sm:$0xff] }
 0x302   : > { %4161 = vrot.lane.b32.xlu0 %v4118_v62, %s12429_s18  ;;  %2325 = vmatprep.subr.mxu0 %v2284_v60  ;;  %v2088_v61 = vpop.permute.xlu1 %2087  ;;  %v2091_v0 = vsel %vm2089_vm14, %v13339_v29, %v13380_v33  ;;  %v18899_v33 = vld [vmem:[#allocation34_spill] sm:$0xff]  ;;  %v18910_v62 = vld [vmem:[#allocation28_spill] sm:$0xff]  ;;  %v18911_v60 = vld [vmem:[#allocation37_spill] sm:$0xff] }
 0x303   : > { %11970 = vmatmul.mubr.msk.f32.gmra.mxu0 %vm1751_vm0, %v12359_v2  ;;  %v2097_v59 = vsel %vm2089_vm14, %v13509_v20, %v2088_v61  ;;  %v2280_v20 = vsel %vm2276_vm13, %v13402_v5, %v13416_v53  ;;  %v2093_v53 = vsel %vm2089_vm14, %v13398_v57, %v13434_v52  ;;  %v4295_v5 = vmul.f32 %v13618_v10, %v18855_v54  ;;  %v18912_v2 = vld [vmem:[#allocation19_spill] sm:$0xff] }
 0x304   : > { %2326 = vmatpush1.msra.mxu0 %v2283_v23  ;;  %v13646_v40 = vpop.permute.xlu0 %3109  ;;  %3650 = vrot.lane.b32.xlu1 %v13552_v1, %s12434_s11 }
 0x305   : > { %2138 = vmatprep.subr.mxu1 %v2097_v59  ;;  %2327 = vmatprep.subr.mxu0 %v2282_v36  ;;  %v18913_v59 = vld [vmem:[#allocation41_spill] sm:$0xff] }
 0x306   : > { %2008 = vmatprep.mubr.f32.mxu0 %v18896_v46  ;;  %2139 = vmatpush1.msra.mxu1 %v2096_v4  ;;  %v13662_v58 = vpop.permute.xlu1 %2728  ;;  %v4286_v4 = vmul.f32 %v13738_v55, %v18855_v54 }
 0x307   : > { %2328 = vmatpush1.msra.mxu0 %v2281_v15  ;;  %4155 = vrot.lane.b32.xlu0 %v4115_v34, %s12429_s18  ;;  %v18914_v34 = vld [vmem:[#allocation40_spill] sm:$0xff] }
 0x308   : > { %11971 = vmatmul.mubr.msk.f32.gmra.mxu0 %vm1751_vm0, %v12360_v24  ;;  %2140 = vmatprep.subr.mxu1 %v2095_v12  ;;  %v13678_v18 = vpop.permute.xlu0 %2921  ;;  %v18915_v24 = vld [vmem:[#allocation42_spill] sm:$0xff] }
 0x309   : > { %2329 = vmatprep.subr.mxu0 %v2280_v20  ;;  %2141 = vmatpush1.msra.mxu1 %v2094_v38  ;;  %v2588_v20 = vsel %vm2215_vm12, %v13520_v51, %v18915_v24  ;;  %v12361_v38 = vld [vmem:[%s18598_s3 + $0x8] sm:$0xff] }
 0x30a   : > { %2330 = vmatpush1.msra.mxu0 %v2279_v9  ;;  %3821 = vrot.lane.b32.xlu1 %v13493_v42, %s12432_s22  ;;  %v13691_v17 = vpop.permute.xlu1 %3105  ;;  %v2277_v42 = vsel %vm2276_vm13, %v13199_v11, %v13353_v31  ;;  %v18897_v11 = vld [vmem:[#allocation35_spill] sm:$0xff]  ;;  %v18916_v9 = vld [vmem:[#allocation60_spill] sm:$0xff] }
 0x30b   : > { %2142 = vmatprep.subr.mxu1 %v2093_v53  ;;  %2331 = vmatprep.subr.mxu0 %v2278_v39  ;;  %v2090_v57 = vsel %vm2089_vm14, %v18897_v11, %v13339_v29  ;;  %v18901_v29 = vld [vmem:[#allocation39_spill] sm:$0xff]  ;;  %18904 = vst [vmem:[#allocation35_spill] sm:$0xff] %v13738_v55  ;;  %v18917_v39 = vld [vmem:[#allocation45_spill] sm:$0xff] }
 0x30c   : > { %2143 = vmatpush1.msra.mxu1 %v2092_v21  ;;  %2332 = vmatpush1.msra.mxu0 %v2277_v42  ;;  %v13701_v52 = vpop.permute.xlu0 %2917  ;;  %v18918_v21 = vld [vmem:[#allocation58_spill] sm:$0xff] }
 0x30d   : > { %2365 = vmatprep.mubr.f32.mxu0 %v18896_v46  ;;  %4338 = vrot.lane.b32.xlu0 %v4295_v5, %s12428_s17  ;;  %v2586_v42 = vsel %vm2215_vm12, %v18918_v21, %v18917_v39  ;;  %v18919_v5 = vld [vmem:[#allocation43_spill] sm:$0xff] }
 0x30e   : > { %2144 = vmatprep.subr.mxu1 %v2091_v0  ;;  %11976 = vmatmul.mubr.msk.f32.vlgmr.msra.gmra.mxu0 %vm1751_vm0, %v13244_v44  ;;  %v13715_v31 = vpop.permute.xlu1 %2919  ;;  %v18900_v44 = vld [vmem:[#allocation33_spill] sm:$0xff] }
 0x30f   : > { %2145 = vmatpush1.msra.mxu1 %v2090_v57  ;;  %3825 = vrot.lane.b32.xlu1 %v13474_v14, %s12432_s22  ;;  %v18920_v57 = vld [vmem:[#allocation25_spill] sm:$0xff] }
 0x310   : > { %11972 = vmatmul.mubr.msk.f32.vlgmr.msra.gmra.mxu1 %vm1751_vm0, %v18898_v30  ;;  %2434 = vmatprep.subr.mxu1 %v18899_v33  ;;  %v13726_v6 = vpop.permute.xlu0 %3101  ;;  %v18921_v30 = vld [vmem:[#allocation48_spill] sm:$0xff] }
 0x311   : > { %2371 = vmatprep.mubr.f32.mxu0 %v18896_v46  ;;  %2435 = vmatpush1.msra.mxu1 %v18900_v44  ;;  %v18922_v33 = vld [vmem:[#allocation56_spill] sm:$0xff] }
 0x312   : > { %4149 = vrot.lane.b32.xlu0 %v4112_v3, %s12429_s18  ;;  %11977 = vmatmul.mubr.msk.f32.gmra.mxu0 %vm1751_vm0, %v18901_v29  ;;  %v13731_v14 = vpop.permute.xlu1 %3103  ;;  %v2584_v3 = vsel %vm2215_vm12, %v18922_v33, %v18921_v30  ;;  %v12362_v44 = vld [vmem:[%s18598_s3 + $0x20] sm:$0xff]  ;;  %v13930_v30 = vld [vmem:[%s18598_s3 + $0x68] sm:$0xff] }
 0x313   : > { %2436 = vmatprep.subr.mxu1 %v18902_v25  ;;  %2184 = vmatprep.mubr.f32.mxu1 %v18896_v46  ;;  %18938 = vst [vmem:[#allocation38_spill] sm:$0xff] %v13930_v30 }
 0x314   : > { %2437 = vmatpush1.msra.mxu1 %v18903_v47  ;;  %3827 = vrot.lane.b32.xlu1 %v13552_v1, %s12432_s22  ;;  %v13752_v1 = vpop.permute.xlu0 %2545  ;;  %v18924_v47 = vld [vmem:[#allocation55_spill] sm:$0xff] }
 0x315   : > { %11973 = vmatmul.mubr.msk.f32.gmra.mxu1 %vm1751_vm0, %v18905_v13  ;;  %2438 = vmatprep.subr.mxu1 %v18906_v27  ;;  %v2583_v13 = vsel %vm2215_vm12, %v18924_v47, %v18922_v33  ;;  %v18925_v27 = vld [vmem:[#allocation61_spill] sm:$0xff]  ;;  %v13939_v33 = vld [vmem:[%s18598_s3 + $0x80] sm:$0xff] }
 0x316   : > { %2377 = vmatprep.mubr.f32.mxu0 %v18896_v46  ;;  %2439 = vmatpush1.msra.mxu1 %v18907_v45  ;;  %v13747_v16 = vpop.permute.xlu1 %2915  ;;  %v18926_v45 = vld [vmem:[#allocation49_spill] sm:$0xff]  ;;  %18939 = vst [vmem:[#allocation34_spill] sm:$0xff] %v13939_v33 }
 0x317   : > { %4332 = vrot.lane.b32.xlu0 %v4292_v49, %s12428_s17  ;;  %11978 = vmatmul.mubr.msk.f32.gmra.mxu0 %vm1751_vm0, %v18908_v19  ;;  %v2772_v49 = vsel %vm2028_vm10, %v18925_v27, %v13541_v48  ;;  %v18927_v19 = vld [vmem:[#allocation59_spill] sm:$0xff] }
 0x318   : > { %2440 = vmatprep.subr.mxu1 %v18909_v28  ;;  %2190 = vmatprep.mubr.f32.mxu1 %v18896_v46  ;;  %v13771_v23 = vpop.permute.xlu0 %3099 }
 0x319   : > { %2441 = vmatpush1.msra.mxu1 %v18910_v62  ;;  %4143 = vrot.lane.b32.xlu1 %v4109_v56, %s12429_s18  ;;  %v2771_v56 = vsel %vm2028_vm10, %v18927_v19, %v18926_v45  ;;  %v18928_v62 = vld [vmem:[#allocation20_spill] sm:$0xff]  ;;  %v3115_v39 = vsel %vm1686_vm11, %v13771_v23, %v13726_v6 }
 0x31a   : > { %11974 = vmatmul.mubr.msk.f32.gmra.mxu1 %vm1751_vm0, %v18911_v60  ;;  %2383 = vmatprep.mubr.f32.mxu0 %v18896_v46  ;;  %v13763_v61 = vpop.permute.xlu1 %2911  ;;  %v2941_v60 = vsel %vm2933_vm1, %v13585_v50, %v13571_v8 }
 0x31b   : > { %11979 = vmatmul.mubr.msk.f32.gmra.mxu0 %vm1751_vm0, %v18912_v2  ;;  %2196 = vmatprep.mubr.f32.mxu1 %v18896_v46  ;;  %v18929_v2 = vld [vmem:[#allocation47_spill] sm:$0xff] }
 0x31c   : > { %2671 = vmatprep.mubr.f32.mxu0 %v18896_v46  ;;  %v2914_v53 = vpop.permute.xlu0 %2913  ;;  %4119 = vrot.lane.b32.xlu0 %v13930_v30, %s12426_s23 }
 0x31d   : > { %4326 = vrot.lane.b32.xlu1 %v4289_v32, %s12428_s17 }
 0x31e   : > { %11975 = vmatmul.mubr.msk.f32.gmra.mxu1 %vm1751_vm0, %v18913_v59  ;;  %v2580_v36 = vpop.permute.xlu1 %2579 }
 0x31f   : > { %2474 = vmatprep.mubr.f32.mxu1 %v18896_v46  ;;  %v2590_v15 = vsel %vm2215_vm12, %v2580_v36, %v18914_v34  ;;  %v2589_v12 = vsel %vm2215_vm12, %v13530_v41, %v2580_v36  ;;  %v2587_v41 = vsel %vm2215_vm12, %v18916_v9, %v13520_v51  ;;  %v2585_v51 = vsel %vm2215_vm12, %v18920_v57, %v18918_v21  ;;  %v18932_v34 = vld [vmem:[#allocation57_spill] sm:$0xff]  ;;  %v1653_v57 = vld [vmem:[%s18598_s3 + $0x40] sm:$0xff] }
 0x320   : > { %2631 = vmatprep.subr.mxu0 %v2590_v15  ;;  %v3098_v28 = vpop.permute.xlu0 %3097  ;;  %v2940_v36 = vsel %vm2933_vm1, %v13592_v35, %v13585_v50  ;;  %v2939_v15 = vsel %vm2933_vm1, %v13622_v37, %v13614_v7  ;;  %v18933_v50 = vld [vmem:[#allocation23_spill] sm:$0xff]  ;;  %v18934_v35 = vld [vmem:[#allocation22_spill] sm:$0xff]  ;;  %v2937_v7 = vsel %vm2933_vm1, %v13701_v52, %v13715_v31  ;;  %4296 = vrot.lane.b32.xlu0 %v13930_v30, %s12434_s11 }
 0x321   : > { %4320 = vrot.lane.b32.xlu1 %v4286_v4, %s12428_s17  ;;  %2632 = vmatpush1.msra.mxu0 %v2589_v12  ;;  %v18931_v4 = vld [vmem:[#allocation51_spill] sm:$0xff]  ;;  %v2938_v12 = vsel %vm2933_vm1, %v13678_v18, %v13622_v37  ;;  %v2768_v24 = vsel %vm2028_vm10, %v18934_v35, %v18932_v34  ;;  %v2936_v37 = vsel %vm2933_vm1, %v13747_v16, %v13701_v52  ;;  %v18935_v18 = vld [vmem:[#allocation53_spill] sm:$0xff] }
 0x322   : > { %11980 = vmatmul.mubr.msk.f32.vlgmr.msra.gmra.mxu1 %vm1751_vm0, %v12361_v38  ;;  %2633 = vmatprep.subr.mxu0 %v2588_v20  ;;  %v2765_v54 = vpop.permute.xlu1 %2764  ;;  %v2769_v8 = vsel %vm2028_vm10, %v18932_v34, %v18931_v4 }
 0x323   : > { %2480 = vmatprep.mubr.f32.mxu1 %v18896_v46  ;;  %2634 = vmatpush1.msra.mxu0 %v2587_v41  ;;  %v2775_v0 = vsel %vm2028_vm10, %v2765_v54, %v18919_v5  ;;  %v2774_v11 = vsel %vm2028_vm10, %v13546_v43, %v2765_v54  ;;  %v18923_v43 = vld [vmem:[#allocation46_spill] sm:$0xff]  ;;  %v2935_v54 = vsel %vm2933_vm1, %v13763_v61, %v2914_v53 }
 0x324   : > { %2635 = vmatprep.subr.mxu0 %v2586_v42  ;;  %2816 = vmatprep.subr.mxu1 %v2775_v0  ;;  %v2773_v29 = vsel %vm2028_vm10, %v13541_v48, %v18923_v43  ;;  %v18930_v48 = vld [vmem:[#allocation24_spill] sm:$0xff]  ;;  %v2910_v38 = vpop.permute.xlu0 %2909  ;;  %v18936_v41 = vld [vmem:[#allocation50_spill] sm:$0xff] }
 0x325   : > { %2636 = vmatpush1.msra.mxu0 %v2585_v51  ;;  %2817 = vmatpush1.msra.mxu1 %v2774_v11  ;;  %v2770_v32 = vsel %vm2028_vm10, %v18930_v48, %v18927_v19  ;;  %v2934_v9 = vsel %vm2933_vm1, %v2910_v38, %v13763_v61  ;;  %v3116_v61 = vsel %vm1686_vm11, %v13726_v6, %v13731_v14  ;;  %v1650_v0 = vld [vmem:[%s18598_s3 + $0x28] sm:$0xff]  ;;  %v1656_v51 = vld [vmem:[%s18598_s3 + $0x58] sm:$0xff] }
 0x326   : > { %11981 = vmatmul.mubr.msk.f32.gmra.mxu1 %vm1751_vm0, %v12362_v44  ;;  %2637 = vmatprep.subr.mxu0 %v2584_v3  ;;  %v3096_v25 = vpop.permute.xlu1 %3095 }
 0x327   : > { %2486 = vmatprep.mubr.f32.mxu1 %v18896_v46  ;;  %2818 = vmatprep.subr.mxu1 %v2773_v29 }
 0x328   : > { %2638 = vmatpush1.msra.mxu0 %v2583_v13  ;;  %2819 = vmatpush1.msra.mxu1 %v2772_v49  ;;  %v3090_v53 = vpop.permute.xlu0 %3089 }
 0x329   : > { %11984 = vmatmul.mubr.msk.f32.vlgmr.msra.gmra.mxu0 %vm1751_vm0, %v18928_v62  ;;  %2820 = vmatprep.subr.mxu1 %v2771_v56 }
 0x32a   : > { %11982 = vmatmul.mubr.msk.f32.gmra.mxu1 %vm1751_vm0, %v18929_v2  ;;  %2982 = vmatprep.subr.mxu0 %v2941_v60  ;;  %v2731_v59 = vpop.permute.xlu1 %2730 }
 0x32b   : > { %2492 = vmatprep.mubr.f32.mxu1 %v18896_v46  ;;  %2821 = vmatpush1.msra.mxu1 %v2770_v32 }
 0x32c   : > { %2983 = vmatpush1.msra.mxu0 %v2940_v36  ;;  %2822 = vmatprep.subr.mxu1 %v2769_v8  ;;  %v2890_v14 = vpop.permute.xlu0 %2889 }
 0x32d   : > { %2984 = vmatprep.subr.mxu0 %v2939_v15  ;;  %2677 = vmatprep.mubr.f32.mxu0 %v18896_v46 }
 0x32e   : > { %11983 = vmatmul.mubr.msk.f32.gmra.mxu1 %vm1751_vm0, %v18933_v50  ;;  %2985 = vmatpush1.msra.mxu0 %v2938_v12  ;;  %v3094_v20 = vpop.permute.xlu1 %3093 }
 0x32f   : > { %2823 = vmatpush1.msra.mxu1 %v2768_v24  ;;  %2856 = vmatprep.mubr.f32.mxu1 %v18896_v46  ;;  %v3113_v21 = vsel %vm1686_vm11, %v3094_v20, %v3096_v25 }
 0x330   : > { %11985 = vmatmul.mubr.msk.f32.gmra.mxu0 %vm1751_vm0, %v18935_v18  ;;  %2986 = vmatprep.subr.mxu0 %v2937_v7 }
 0x331   : > { %2987 = vmatpush1.msra.mxu0 %v2936_v37  ;;  %2683 = vmatprep.mubr.f32.mxu0 %v18896_v46 }
 0x332   : > { %11988 = vmatmul.mubr.msk.f32.vlgmr.msra.gmra.mxu1 %vm1751_vm0, %v18936_v41  ;;  %2988 = vmatprep.subr.mxu0 %v2935_v54  ;;  %v3108_v31 = vpop.permute.xlu1 %3107 }
 0x333   : > { %2862 = vmatprep.mubr.f32.mxu1 %v18896_v46  ;;  %2989 = vmatpush1.msra.mxu0 %v2934_v9  ;;  %v3118_v52 = vsel %vm1686_vm11, %v3108_v31, %v13646_v40  ;;  %v3117_v16 = vsel %vm1686_vm11, %v13691_v17, %v3108_v31  ;;  %v18937_v40 = vld [vmem:[#allocation52_spill] sm:$0xff] }
 0x334   : > { %11986 = vmatmul.mubr.msk.f32.gmra.mxu0 %vm1751_vm0, %v13606_v26  ;;  %3163 = vmatprep.subr.mxu1 %v3118_v52  ;;  %v3114_v26 = vsel %vm1686_vm11, %v3096_v25, %v3098_v28 }
 0x335   : > { %2689 = vmatprep.mubr.f32.mxu0 %v18896_v46  ;;  %3164 = vmatpush1.msra.mxu1 %v3117_v16 }
 0x336   : > { %11989 = vmatmul.mubr.msk.f32.gmra.mxu1 %vm1751_vm0, %v18937_v40  ;;  %3165 = vmatprep.subr.mxu1 %v3116_v61  ;;  %v3092_v17 = vpop.permute.xlu1 %3091 }
 0x337   : > { %2868 = vmatprep.mubr.f32.mxu1 %v18896_v46  ;;  %3166 = vmatpush1.msra.mxu1 %v3115_v39  ;;  %v3112_v6 = vsel %vm1686_vm11, %v3090_v53, %v3092_v17 }
 0x338   : > { %11987 = vmatmul.mubr.msk.f32.gmra.mxu0 %vm1751_vm0, %v13752_v1  ;;  %3167 = vmatprep.subr.mxu1 %v3114_v26  ;;  %v2892_v1 = vpop.permute.xlu0 %2891 }
 0x339   : > { %3022 = vmatprep.mubr.f32.mxu0 %v18896_v46  ;;  %3168 = vmatpush1.msra.mxu1 %v3113_v21 }
 0x33a   : > { %11990 = vmatmul.mubr.msk.f32.gmra.mxu1 %vm1751_vm0, %v13662_v58  ;;  %3169 = vmatprep.subr.mxu1 %v3112_v6  ;;  %v3088_v23 = vpop.permute.xlu1 %3087  ;;  %v1647_v58 = vld [vmem:[%s18598_s3 + $0x10] sm:$0xff] }
 0x33b   : > { %2874 = vmatprep.mubr.f32.mxu1 %v18896_v46  ;;  %v3111_v42 = vsel %vm1686_vm11, %v3088_v23, %v3090_v53  ;;  %4298 = vrot.lane.b32.xlu0 %v13939_v33, %s12434_s11 }
 0x33c   : > { %11992 = vmatmul.mubr.msk.f32.vlgmr.msra.gmra.mxu0 %vm1751_vm0, %v2890_v14  ;;  %3170 = vmatpush1.msra.mxu1 %v3111_v42  ;;  %v2896_v11 = vpop.permute.xlu0 %2895 }
 0x33d   : > { %3028 = vmatprep.mubr.f32.mxu0 %v18896_v46  ;;  %4121 = vrot.lane.b32.xlu1 %v13939_v33, %s12426_s23 }
 0x33e   : > { %11991 = vmatmul.mubr.msk.f32.gmra.mxu1 %vm1751_vm0, %v2731_v59  ;;  %v2894_v5 = vpop.permute.xlu1 %2893 }
 0x33f   : > { %3203 = vmatprep.mubr.f32.mxu1 %v18896_v46 }
 0x340   : > { %11993 = vmatmul.mubr.msk.f32.gmra.mxu0 %vm1751_vm0, %v2892_v1 }
 0x341   : > { %3034 = vmatprep.mubr.f32.mxu0 %v18896_v46 }
 0x342   : > { %11996 = vmatmul.mubr.msk.f32.vlgmr.msra.gmra.mxu1 %vm1751_vm0, %v1647_v58  ;;  %v13991_v58 = vpop.permute.xlu0 %3248 }
 0x343   : > { %3209 = vmatprep.mubr.f32.mxu1 %v18896_v46 }
 0x344   : > { %11994 = vmatmul.mubr.msk.f32.gmra.mxu0 %vm1751_vm0, %v2894_v5 }
 0x345   : > { %3040 = vmatprep.mubr.f32.mxu0 %v18896_v46 }
 0x346   : > { %11997 = vmatmul.mubr.msk.f32.gmra.mxu1 %vm1751_vm0, %v1650_v0 }
 0x347   : > { %3215 = vmatprep.mubr.f32.mxu1 %v18896_v46 }
 0x348   : > { %11995 = vmatmul.mubr.msk.f32.gmra.mxu0 %vm1751_vm0, %v2896_v11 }
 0x349   : > { %3458 = vmatprep.mubr.f32.mxu0 %v18896_v46 }
 0x34a   : > { %11998 = vmatmul.mubr.msk.f32.gmra.mxu1 %vm1751_vm0, %v1653_v57 }
 0x34b   : > { %3221 = vmatprep.mubr.f32.mxu1 %v18896_v46 }
 0x34e   : > { %11999 = vmatmul.mubr.msk.f32.gmra.mxu1 %vm1751_vm0, %v1656_v51 }
 0x34f   : > { %3607 = vmatprep.mubr.f32.mxu1 %v18896_v46 }
 0x3aa   : > { %v1842_v3 = vpop.f32.mrf.mxu1 }
 0x3ac   : > { %v1844_v44 = vpop.f32.mrf.mxu1 }
 0x3ae   : > { %v13945_v43 = vpop.f32.mrf.mxu1 }
 0x3b0   : > { %v13947_v25 = vpop.f32.mrf.mxu1 }
 0x3b2   : > { %v1854_v27 = vpop.f32.mrf.mxu1 }
 0x3b4   : > { %v13953_v19 = vpop.f32.mrf.mxu1 }
 0x3b7   : > { %v1860_v62 = vpop.f32.mrf.mxu1 }
 0x3b9   : > { %v13959_v32 = vpop.f32.mrf.mxu1 }
 0x3bb   : > { %v1992_v29 = vpop.f32.mrf.mxu0 }
 0x3bc   : > { %v1993_v5 = vadd.f32 %v1992_v29, %v1842_v3 }
 0x3bd   : > { %v1994_v47 = vpop.f32.mrf.mxu0 }
 0x3be   : > { %v1995_v57 = vadd.f32 %v1994_v47, %v1844_v44 }
 0x3bf   : > { %v13949_v13 = vpop.f32.mrf.mxu0 }
 0x3c1   : > { %v13951_v49 = vpop.f32.mrf.mxu0 }
 0x3c3   : > { %v2004_v45 = vpop.f32.mrf.mxu0 }
 0x3c4   : > { %v2005_v56 = vadd.f32 %v2004_v45, %v1854_v27 }
 0x3c5   : > { %v13955_v28 = vpop.f32.mrf.mxu0 }
 0x3c8   : > { %v2010_v60 = vpop.f32.mrf.mxu0 }
 0x3c9   : > { %v2011_v2 = vadd.f32 %v2010_v60, %v1860_v62 }
 0x3ca   : > { %v13957_v48 = vpop.f32.mrf.mxu0 }
 0x3ce   : > { %v2367_v59 = vpop.f32.mrf.mxu0 }
 0x3d0   : > { %v2180_v36 = vpop.f32.mrf.mxu1  ;;  %v2369_v4 = vpop.f32.mrf.mxu0 }
 0x3d1   : > { %v2203_v51 = vadd.f32 %v2180_v36, %v1993_v5 }
 0x3d2   : > { %v2182_v34 = vpop.f32.mrf.mxu1  ;;  %v13961_v8 = vpop.f32.mrf.mxu0 }
 0x3d4   : > { %v13963_v15 = vpop.f32.mrf.mxu0 }
 0x3d5   : > { %v2186_v12 = vpop.f32.mrf.mxu1 }
 0x3d7   : > { %v13965_v50 = vpop.f32.mrf.mxu1  ;;  %v13967_v35 = vpop.f32.mrf.mxu0 }
 0x3d9   : > { %v13971_v38 = vpop.f32.mrf.mxu0 }
 0x3da   : > { %v2192_v24 = vpop.f32.mrf.mxu1 }
 0x3db   : > { %v13969_v20 = vadd.f32 %v2192_v24, %v2005_v56  ;;  %v2385_v54 = vpop.f32.mrf.mxu0  ;;  %v2204_v56 = vadd.f32 %v2182_v34, %v1995_v57  ;;  %v2390_v24 = vadd.f32 %v2367_v59, %v2203_v51  ;;  %v14013_v51 = vpop.permute.xlu1 %3253 }
 0x3dc   : > { %v13973_v7 = vpop.f32.mrf.mxu1 }
 0x3dd   : > { %v13977_v53 = vpop.f32.mrf.mxu0  ;;  %v2391_v29 = vadd.f32 %v2369_v4, %v2204_v56 }
 0x3de   : > { %v2198_v37 = vpop.f32.mrf.mxu1 }
 0x3df   : > { %v2209_v18 = vadd.f32 %v2198_v37, %v2011_v2  ;;  %v3239_v2 = vpop.permute.xlu0 %3238 }
 0x3e0   : > { %v13975_v9 = vpop.f32.mrf.mxu1 }
 0x3e1   : > { %v2396_v41 = vadd.f32 %v2385_v54, %v2209_v18 }
 0x3e2   : > { %v2476_v31 = vpop.f32.mrf.mxu1 }
 0x3e3   : > { %v2499_v3 = vadd.f32 %v2476_v31, %v2390_v24  ;;  %v14009_v34 = vpop.permute.xlu0 %3358  ;;  %v1999_v31 = vadd.f32 %v13949_v13, %v13945_v43  ;;  %v2001_v13 = vadd.f32 %v13951_v49, %v13947_v25 }
 0x3e4   : > { %v2478_v52 = vpop.f32.mrf.mxu1  ;;  %18940 = vst [vmem:[#allocation33_spill] sm:$0xff] %v14009_v34 }
 0x3e5   : > { %v2500_v47 = vadd.f32 %v2478_v52, %v2391_v29  ;;  %v2205_v46 = vadd.f32 %v2186_v12, %v1999_v31 }
 0x3e6   : > { %v2482_v16 = vpop.f32.mrf.mxu1 }
 0x3e7   : > { %v14017_v29 = vpop.permute.xlu0 %3346 }
 0x3e8   : > { %v13979_v61 = vpop.f32.mrf.mxu1 }
 0x3e9   : > { %v2673_v39 = vpop.f32.mrf.mxu0 }
 0x3ea   : > { %v13981_v40 = vpop.f32.mrf.mxu1  ;;  %v2696_v36 = vadd.f32 %v2673_v39, %v2499_v3 }
 0x3eb   : > { %v2675_v26 = vpop.f32.mrf.mxu0  ;;  %v14026_v43 = vpop.permute.xlu0 %3328 }
 0x3ec   : > { %v13983_v17 = vpop.f32.mrf.mxu1 }
 0x3ee   : > { %v2494_v21 = vpop.f32.mrf.mxu1 }
 0x3ef   : > { %v13985_v14 = vadd.f32 %v2494_v21, %v2396_v41  ;;  %v2697_v21 = vadd.f32 %v2675_v26, %v2500_v47  ;;  %v2392_v47 = vadd.f32 %v13961_v8, %v2205_v46 }
 0x3f0   : > { %v13987_v6 = vpop.f32.mrf.mxu1  ;;  %v2679_v23 = vpop.f32.mrf.mxu0 }
 0x3f1   : > { %v2501_v30 = vadd.f32 %v2482_v16, %v2392_v47 }
 0x3f2   : > { %v2858_v42 = vpop.f32.mrf.mxu1  ;;  %v13989_v1 = vpop.f32.mrf.mxu0 }
 0x3f3   : > { %v2881_v5 = vadd.f32 %v2858_v42, %v2696_v36  ;;  %v3244_v42 = vpop.permute.xlu1 %3243  ;;  %v2698_v12 = vadd.f32 %v2679_v23, %v2501_v30  ;;  %v18945_v30 = vld [vmem:[#allocation27_spill] sm:$0xff]  ;;  %v14043_v23 = vpop.permute.xlu0 %3330 }
 0x3f4   : > { %v2860_v0 = vpop.f32.mrf.mxu1  ;;  %v13993_v11 = vpop.f32.mrf.mxu0 }
 0x3f5   : > { %v2882_v4 = vadd.f32 %v2860_v0, %v2697_v21  ;;  %v18943_v0 = vld [vmem:[#allocation12_spill] sm:$0xff] }
 0x3f6   : > { %v2864_v27 = vpop.f32.mrf.mxu1  ;;  %v13995_v45 = vpop.f32.mrf.mxu0 }
 0x3f7   : > { %v2883_v16 = vadd.f32 %v2864_v27, %v2698_v12  ;;  %v14059_v47 = vpop.permute.xlu0 %3682 }
 0x3f8   : > { %v13997_v62 = vpop.f32.mrf.mxu1  ;;  %v13999_v60 = vpop.f32.mrf.mxu0 }
 0x3fa   : > { %v14001_v37 = vpop.f32.mrf.mxu1  ;;  %v14003_v18 = vpop.f32.mrf.mxu0 }
 0x3fc   : > { %v14005_v54 = vpop.f32.mrf.mxu1  ;;  %v3024_v44 = vpop.f32.mrf.mxu0 }
 0x3fd   : > { %v3047_v56 = vadd.f32 %v3024_v44, %v2881_v5  ;;  %v18944_v44 = vld [vmem:[#allocation10_spill] sm:$0xff] }
 0x3fe   : > { %v14007_v41 = vpop.f32.mrf.mxu1  ;;  %v3026_v59 = vpop.f32.mrf.mxu0 }
 0x3ff   : > { %v3048_v52 = vadd.f32 %v3026_v59, %v2882_v4 }
 0x400   : > { %v14011_v57 = vpop.f32.mrf.mxu1  ;;  %v3030_v8 = vpop.f32.mrf.mxu0 }
 0x401   : > { %v3049_v25 = vadd.f32 %v3030_v8, %v2883_v16 }
 0x402   : > { %v3205_v24 = vpop.f32.mrf.mxu1 }
 0x403   : > { %v3228_v39 = vadd.f32 %v3205_v24, %v3047_v56  ;;  %v18947_v56 = vld [vmem:[#allocation15_spill] sm:$0xff] }
 0x404   : > { %v3207_v3 = vpop.f32.mrf.mxu1 }
 0x405   : > { %v3256_v34 = vadd.f32 %v3239_v2, %v3228_v39  ;;  %v3229_v26 = vadd.f32 %v3207_v3, %v3048_v52 }
 0x406   : > { %v3211_v21 = vpop.f32.mrf.mxu1 }
 0x407   : > { %v14020_v36 = vmax.f32 %v3256_v34, 0.0  ;;  %v3257_v33 = vadd.f32 %v3239_v2, %v3229_v26  ;;  %v14034_v2 = vpop.permute.xlu1 %3364  ;;  %v3230_v59 = vadd.f32 %v3211_v21, %v3049_v25  ;;  %v3032_v26 = vpop.f32.mrf.mxu0  ;;  %v2007_v25 = vadd.f32 %v13955_v28, %v13953_v19 }
 0x408   : > { %v14074_v21 = vpop.permute.xlu0 %3676 }
 0x409   : > { %18941 = vst [vmem:[#allocation39_spill] sm:$0xff] %v14020_v36  ;;  %v14022_v55 = vmax.f32 %v3257_v33, 0.0  ;;  %3348 = vrot.lane.b32.xlu0 %v14020_v36, %s12432_s22  ;;  %v3633_v46 = vmul.f32 %v14020_v36, %v18943_v0  ;;  %v2206_v33 = vadd.f32 %v13965_v50, %v2001_v13  ;;  %v3311_v34 = vmul.f32 %v14020_v36, %v18944_v44  ;;  %v18946_v50 = vld [vmem:[#allocation14_spill] sm:$0xff] }
 0x40a   : > { %v4107_v49 = vmul.f32 %v14020_v36, %v18945_v30  ;;  %v3810_v27 = vmul.f32 %v14020_v36, %v18946_v50  ;;  %v3258_v39 = vadd.f32 %v3244_v42, %v3230_v59 }
 0x40b   : > { %18942 = vst [vmem:[#allocation32_spill] sm:$0xff] %v14022_v55  ;;  %3350 = vrot.lane.b32.xlu1 %v14022_v55, %s12432_s22  ;;  %v2393_v5 = vadd.f32 %v13963_v15, %v2206_v33  ;;  %v14049_v31 = vpop.permute.xlu1 %3352  ;;  %v3312_v24 = vmul.f32 %v14022_v55, %v18947_v56  ;;  %v18948_v15 = vld [vmem:[#allocation29_spill] sm:$0xff] }
 0x40c   : > { %v4284_v3 = vmul.f32 %v14020_v36, %v18948_v15  ;;  %v14067_v33 = vmax.f32 %v3258_v39, 0.0  ;;  %v18952_v39 = vld [vmem:[#allocation21_spill] sm:$0xff] }
 0x40d   : > { %3666 = vrot.lane.b32.xlu0 %v3633_v46, %s12431_s20  ;;  %v2502_v4 = vadd.f32 %v13979_v61, %v2393_v5  ;;  %v18949_v61 = vld [vmem:[#allocation17_spill] sm:$0xff]  ;;  %v3213_v46 = vpop.f32.mrf.mxu1  ;;  %v18951_v5 = vld [vmem:[#allocation16_spill] sm:$0xff]  ;;  %v4285_v19 = vmul.f32 %v14022_v55, %v18952_v39 }
 0x40e   : > { %v3811_v12 = vmul.f32 %v14022_v55, %v18949_v61  ;;  %v3634_v59 = vmul.f32 %v14022_v55, %v18951_v5 }
 0x40f   : > { %3497 = vrot.lane.b32.xlu1 %v3311_v34, %s12433_s24  ;;  %v2699_v52 = vadd.f32 %v13989_v1, %v2502_v4  ;;  %v14065_v8 = vpop.permute.xlu1 %3326  ;;  %v18950_v34 = vld [vmem:[#allocation18_spill] sm:$0xff]  ;;  %v2208_v4 = vadd.f32 %v13973_v7, %v2007_v25  ;;  %v4287_v25 = vmul.f32 %v14067_v33, %v18948_v15 }
 0x411   : > { %4139 = vrot.lane.b32.xlu0 %v4107_v49, %s12429_s18  ;;  %v2884_v13 = vadd.f32 %v13997_v62, %v2699_v52  ;;  %v4108_v62 = vmul.f32 %v14022_v55, %v18950_v34  ;;  %v2394_v49 = vadd.f32 %v13967_v35, %v13969_v20  ;;  %v3314_v35 = vmul.f32 %v14067_v33, %v18944_v44  ;;  %v3036_v20 = vpop.f32.mrf.mxu0 }
 0x412   : > { %v2395_v7 = vadd.f32 %v13971_v38, %v2208_v4 }
 0x413   : > { %3843 = vrot.lane.b32.xlu1 %v3810_v27, %s12430_s19  ;;  %v3050_v1 = vadd.f32 %v3032_v26, %v2884_v13  ;;  %v14083_v27 = vpop.permute.xlu1 %3513  ;;  %v3217_v26 = vpop.f32.mrf.mxu1 }
 0x415   : > { %3499 = vrot.lane.b32.xlu0 %v3312_v24, %s12433_s24  ;;  %v3231_v16 = vadd.f32 %v3213_v46, %v3050_v1  ;;  %v2503_v24 = vadd.f32 %v13981_v40, %v2394_v49  ;;  %v3636_v46 = vmul.f32 %v14067_v33, %v18943_v0  ;;  %v3219_v49 = vpop.f32.mrf.mxu1 }
 0x417   : > { %4316 = vrot.lane.b32.xlu1 %v4284_v3, %s12428_s17  ;;  %v3259_v52 = vadd.f32 %v3244_v42, %v3231_v16  ;;  %v2700_v28 = vadd.f32 %v13993_v11, %v2503_v24  ;;  %v14094_v3 = vpop.permute.xlu0 %3495  ;;  %v14101_v13 = vpop.permute.xlu1 %3507  ;;  %v2504_v11 = vadd.f32 %v13983_v17, %v2395_v7  ;;  %v4110_v24 = vmul.f32 %v14067_v33, %v18945_v30 }
 0x418   : > { %v3038_v16 = vpop.f32.mrf.mxu0 }
 0x419   : > { %3845 = vrot.lane.b32.xlu0 %v3811_v12, %s12430_s19  ;;  %v2885_v40 = vadd.f32 %v14001_v37, %v2700_v28  ;;  %v14098_v42 = vmax.f32 %v3259_v52, 0.0  ;;  %v2701_v38 = vadd.f32 %v13995_v45, %v2504_v11  ;;  %v3813_v37 = vmul.f32 %v14067_v33, %v18946_v50 }
 0x41b   : > { %3354 = vrot.lane.b32.xlu1 %v14067_v33, %s12432_s22  ;;  %v3051_v12 = vadd.f32 %v3036_v20, %v2885_v40  ;;  %v2886_v17 = vadd.f32 %v14005_v54, %v2701_v38  ;;  %v3814_v54 = vmul.f32 %v14098_v42, %v18949_v61  ;;  %v4111_v7 = vmul.f32 %v14098_v42, %v18950_v34 }
 0x41c   : > { %v2013_v40 = vadd.f32 %v13957_v48, %v13959_v32  ;;  %v2702_v38 = vadd.f32 %v13999_v60, %v13985_v14  ;;  %v3637_v48 = vmul.f32 %v14098_v42, %v18951_v5  ;;  %v3042_v32 = vpop.f32.mrf.mxu0 }
 0x41d   : > { %4141 = vrot.lane.b32.xlu0 %v4108_v62, %s12429_s18  ;;  %v3232_v1 = vadd.f32 %v3217_v26, %v3051_v12  ;;  %v14112_v62 = vpop.permute.xlu0 %3664  ;;  %v3052_v45 = vadd.f32 %v3038_v16, %v2886_v17  ;;  %v3315_v26 = vmul.f32 %v14098_v42, %v18947_v56  ;;  %v3223_v16 = vpop.f32.mrf.mxu1 }
 0x41e   : > { %v2210_v12 = vadd.f32 %v13975_v9, %v2013_v40  ;;  %v2887_v9 = vadd.f32 %v14007_v41, %v2702_v38 }
 0x41f   : > { %3668 = vrot.lane.b32.xlu1 %v3634_v59, %s12431_s20  ;;  %v14118_v59 = vpop.permute.xlu1 %3501  ;;  %v3260_v4 = vadd.f32 %v13991_v58, %v3232_v1  ;;  %v3233_v52 = vadd.f32 %v3219_v49, %v3052_v45 }
 0x420   : > { %v2397_v1 = vadd.f32 %v13977_v53, %v2210_v12  ;;  %v3053_v60 = vadd.f32 %v3042_v32, %v2887_v9 }
 0x421   : > { %4318 = vrot.lane.b32.xlu0 %v4285_v19, %s12428_s17  ;;  %v14127_v19 = vpop.permute.xlu0 %3646  ;;  %v14129_v28 = vmax.f32 %v3260_v4, 0.0  ;;  %v3261_v20 = vadd.f32 %v13991_v58, %v3233_v52  ;;  %v3044_v4 = vpop.f32.mrf.mxu0 }
 0x422   : > { %v2506_v14 = vadd.f32 %v13987_v6, %v2397_v1  ;;  %v3234_v41 = vadd.f32 %v3223_v16, %v3053_v60  ;;  %v3225_v52 = vpop.f32.mrf.mxu1 }
 0x423   : > { %3503 = vrot.lane.b32.xlu1 %v3314_v35, %s12433_s24  ;;  %v14132_v35 = vpop.permute.xlu1 %3332  ;;  %v4113_v45 = vmul.f32 %v14129_v28, %v18945_v30  ;;  %v3317_v6 = vmul.f32 %v14129_v28, %v18944_v44 }
 0x424   : > { %v2703_v53 = vadd.f32 %v14003_v18, %v2506_v14  ;;  %v3262_v18 = vadd.f32 %v14013_v51, %v3234_v41 }
 0x425   : > { %3356 = vrot.lane.b32.xlu0 %v14098_v42, %s12432_s22  ;;  %v14144_v11 = vpop.permute.xlu0 %3648 }
 0x426   : > { %18953 = vst [vmem:[#allocation9_spill] sm:$0xff] %v14144_v11  ;;  %v14190_v12 = vmax.f32 %v3262_v18, 0.0 }
 0x427   : > { %3672 = vrot.lane.b32.xlu1 %v3636_v46, %s12431_s20  ;;  %v14147_v46 = vmax.f32 %v3261_v20, 0.0  ;;  %v14150_v58 = vpop.permute.xlu1 %3670 }
 0x428   : > { %v3642_v60 = vmul.f32 %v14190_v12, %v18943_v0  ;;  %v4116_v41 = vmul.f32 %v14190_v12, %v18945_v30 }
 0x429   : > { %3849 = vrot.lane.b32.xlu0 %v3813_v37, %s12430_s19  ;;  %v3639_v37 = vmul.f32 %v14129_v28, %v18943_v0  ;;  %v14163_v17 = vpop.permute.xlu0 %3847  ;;  %v3640_v32 = vmul.f32 %v14147_v46, %v18951_v5  ;;  %v3318_v9 = vmul.f32 %v14147_v46, %v18947_v56  ;;  %v4293_v0 = vmul.f32 %v14190_v12, %v18948_v15 }
 0x42b   : > { %4322 = vrot.lane.b32.xlu1 %v4287_v25, %s12428_s17  ;;  %v4288_v25 = vmul.f32 %v14098_v42, %v18952_v39  ;;  %v14169_v49 = vpop.permute.xlu1 %3644 }
 0x42d   : > { %4145 = vrot.lane.b32.xlu0 %v4110_v24, %s12429_s18  ;;  %v2888_v24 = vadd.f32 %v14011_v57, %v2703_v53  ;;  %v3816_v57 = vmul.f32 %v14129_v28, %v18946_v50 }
 0x42f   : > { %3851 = vrot.lane.b32.xlu1 %v3814_v54, %s12430_s19  ;;  %v14179_v54 = vpop.permute.xlu0 %3841  ;;  %v3054_v20 = vadd.f32 %v3044_v4, %v2888_v24  ;;  %v14185_v40 = vpop.permute.xlu1 %3859  ;;  %v4291_v4 = vmul.f32 %v14147_v46, %v18952_v39 }
 0x431   : > { %3360 = vrot.lane.b32.xlu0 %v14129_v28, %s12432_s22 }
 0x433   : > { %4147 = vrot.lane.b32.xlu1 %v4111_v7, %s12429_s18  ;;  %v4290_v7 = vmul.f32 %v14129_v28, %v18948_v15  ;;  %v14193_v38 = vpop.permute.xlu0 %3823  ;;  %v14200_v1 = vpop.permute.xlu1 %3853 }
 0x435   : > { %3505 = vrot.lane.b32.xlu0 %v3315_v26, %s12433_s24  ;;  %v3235_v26 = vadd.f32 %v3225_v52, %v3054_v20  ;;  %v3819_v20 = vmul.f32 %v14190_v12, %v18946_v50 }
 0x437   : > { %3362 = vrot.lane.b32.xlu1 %v14147_v46, %s12432_s22  ;;  %v14208_v16 = vpop.permute.xlu0 %4161  ;;  %v14214_v14 = vpop.permute.xlu1 %3650 }
 0x438   : > { %18954 = vst [vmem:[#allocation36_spill] sm:$0xff] %v14208_v16  ;;  %18955 = vst [vmem:[#allocation31_spill] sm:$0xff] %v14214_v14  ;;  %v18986_v14 = vld [vmem:[#allocation7_spill] sm:$0xff] }
 0x439   : > { %3674 = vrot.lane.b32.xlu0 %v3637_v48, %s12431_s20  ;;  %v3263_v48 = vadd.f32 %v14013_v51, %v3235_v26  ;;  %v3817_v51 = vmul.f32 %v14147_v46, %v18949_v61 }
 0x43b   : > { %3678 = vrot.lane.b32.xlu1 %v3639_v37, %s12431_s20  ;;  %v14205_v37 = vmax.f32 %v3263_v48, 0.0  ;;  %v14222_v53 = vpop.permute.xlu0 %4155  ;;  %v12363_v48 = vld [vmem:[#allocation4 + $0x8] sm:$0xff] }
 0x43c   : > { %18956 = vst [vmem:[#allocation11_spill] sm:$0xff] %v14222_v53 }
 0x43d   : > { %4324 = vrot.lane.b32.xlu0 %v4288_v25, %s12428_s17  ;;  %v4114_v25 = vmul.f32 %v14147_v46, %v18950_v34  ;;  %v3321_v52 = vmul.f32 %v14205_v37, %v18947_v56 }
 0x43f   : > { %4151 = vrot.lane.b32.xlu1 %v4113_v45, %s12429_s18  ;;  %v14227_v45 = vpop.permute.xlu1 %3821  ;;  %v14235_v24 = vpop.permute.xlu0 %4338 }
 0x440   : > { %18957 = vst [vmem:[#allocation44_spill] sm:$0xff] %v14235_v24  ;;  %v18983_v24 = vld [vmem:[#allocation8_spill] sm:$0xff] }
 0x441   : > { %3509 = vrot.lane.b32.xlu0 %v3317_v6, %s12433_s24  ;;  %v3320_v6 = vmul.f32 %v14190_v12, %v18944_v44  ;;  %v14260_v44 = vld [vmem:[%s18598_s3 + $0x98] sm:$0xff] }
 0x442   : > { %18960 = vst [vmem:[#allocation37_spill] sm:$0xff] %v14260_v44 }
 0x443   : > { %4328 = vrot.lane.b32.xlu1 %v4290_v7, %s12428_s17  ;;  %v14240_v30 = vpop.permute.xlu1 %3825  ;;  %v14248_v15 = vpop.permute.xlu0 %4149  ;;  %v3820_v7 = vmul.f32 %v14205_v37, %v18949_v61 }
 0x444   : > { %18958 = vst [vmem:[#allocation30_spill] sm:$0xff] %v14248_v15 }
 0x445   : > { %3855 = vrot.lane.b32.xlu0 %v3816_v57, %s12430_s19  ;;  %v3643_v57 = vmul.f32 %v14205_v37, %v18951_v5  ;;  %v18969_v5 = vld [vmem:[#allocation13_spill] sm:$0xff] }
 0x447   : > { %3366 = vrot.lane.b32.xlu1 %v14190_v12, %s12432_s22  ;;  %v14251_v18 = vpop.permute.xlu1 %3827  ;;  %v14262_v56 = vpop.permute.xlu0 %4332 }
 0x448   : > { %18959 = vst [vmem:[#allocation28_spill] sm:$0xff] %v14251_v18  ;;  %18961 = vst [vmem:[#allocation19_spill] sm:$0xff] %v14262_v56 }
 0x449   : > { %3680 = vrot.lane.b32.xlu0 %v3640_v32, %s12431_s20  ;;  %v18965_v32 = vld [vmem:[#allocation26_spill] sm:$0xff] }
 0x44b   : > { %3511 = vrot.lane.b32.xlu1 %v3318_v9, %s12433_s24  ;;  %v14266_v50 = vpop.permute.xlu1 %4143 }
 0x44c   : > { %18962 = vst [vmem:[#allocation41_spill] sm:$0xff] %v14266_v50 }
 0x44d   : > { %3368 = vrot.lane.b32.xlu0 %v14205_v37, %s12432_s22 }
 0x44f   : > { %3857 = vrot.lane.b32.xlu1 %v3817_v51, %s12430_s19  ;;  %v14278_v26 = vpop.permute.xlu1 %4326 }
 0x450   : > { %18964 = vst [vmem:[#allocation42_spill] sm:$0xff] %v14278_v26  ;;  %v4294_v26 = vmul.f32 %v14205_v37, %v18952_v39 }
 0x451   : > { %3684 = vrot.lane.b32.xlu0 %v3642_v60, %s12431_s20  ;;  %v4635_v60 = vmul.f32 %v14190_v12, %v18969_v5 }
 0x453   : > { %4153 = vrot.lane.b32.xlu1 %v4114_v25, %s12429_s18  ;;  %v14288_v51 = vpop.permute.xlu1 %4320 }
 0x454   : > { %18967 = vst [vmem:[#allocation45_spill] sm:$0xff] %v14288_v51 }
 0x455   : > { %4157 = vrot.lane.b32.xlu0 %v4116_v41, %s12429_s18 }
 0x457   : > { %4330 = vrot.lane.b32.xlu1 %v4291_v4, %s12428_s17  ;;  %v14299_v25 = vpop.permute.xlu1 %4121  ;;  %v18971_v4 = vld [vmem:[#allocation54_spill] sm:$0xff] }
 0x458   : > { %18970 = vst [vmem:[#allocation43_spill] sm:$0xff] %v14299_v25 }
 0x459   : > { %4334 = vrot.lane.b32.xlu0 %v4293_v0, %s12428_s17  ;;  %v4633_v0 = vmul.f32 %v14147_v46, %v18971_v4 }
 0x45b   : > { %3515 = vrot.lane.b32.xlu1 %v3320_v6, %s12433_s24 }
 0x45d   : > { %3517 = vrot.lane.b32.xlu0 %v3321_v52, %s12433_s24  ;;  %v12364_v52 = vld [vmem:[#allocation4 + $0x58] sm:$0xff] }
 0x45f   : > { %3861 = vrot.lane.b32.xlu1 %v3819_v20, %s12430_s19  ;;  %v4634_v20 = vmul.f32 %v12364_v52, %v18965_v32 }
 0x461   : > { %4503 = vrot.lane.b32.xlu0 %v13618_v10, %s12426_s23  ;;  %v14272_v10 = vpop.permute.xlu0 %4119 }
 0x462   : > { %18963 = vst [vmem:[#allocation40_spill] sm:$0xff] %v14272_v10 }
 0x463   : > { %4501 = vrot.lane.b32.xlu1 %v14205_v37, %s12426_s23 }
 0x465   : > { %4499 = vrot.lane.b32.xlu0 %v14190_v12, %s12426_s23  ;;  %v14285_v9 = vpop.permute.xlu0 %4296 }
 0x466   : > { %18966 = vst [vmem:[#allocation60_spill] sm:$0xff] %v14285_v9  ;;  %v4117_v9 = vmul.f32 %v14205_v37, %v18950_v34 }
 0x467   : > { %4123 = vrot.lane.b32.xlu1 %v14260_v44, %s12426_s23 }
 0x469   : > { %4497 = vrot.lane.b32.xlu0 %v13636_v63, %s12426_s23  ;;  %v4637_v63 = vmul.f32 %v12363_v48, %v18965_v32  ;;  %v14294_v61 = vpop.permute.xlu0 %4298 }
 0x46a   : > { %18968 = vst [vmem:[#allocation58_spill] sm:$0xff] %v14294_v61 }
 0x46b   : > { %4495 = vrot.lane.b32.xlu1 %v14147_v46, %s12426_s23 }
 0x46d   : > { %3863 = vrot.lane.b32.xlu0 %v3820_v7, %s12430_s19  ;;  %v14316_v7 = vld [vmem:[%s18598_s3 + $0xb0] sm:$0xff]  ;;  %s12437_s19 = smov 4  }
 0x46e   : > { %18972 = vst [vmem:[#allocation25_spill] sm:$0xff] %v14316_v7 }
 0x46f   : > { %3686 = vrot.lane.b32.xlu1 %v3643_v57, %s12431_s20 }
 0x471   : > { %4672 = vrot.lane.b32.xlu0 %v4637_v63, %s12427_s14 }
 0x473   : > { %4300 = vrot.lane.b32.xlu1 %v14260_v44, %s12434_s11 }
 0x475   : > { %4493 = vrot.lane.b32.xlu0 %v14129_v28, %s12426_s23 }
 0x477   : > { %4668 = vrot.lane.b32.xlu1 %v4635_v60, %s12427_s14  ;;  %v4632_v60 = vmul.f32 %v14129_v28, %v18969_v5 }
 0x479   : > { %4489 = vrot.lane.b32.xlu0 %v14098_v42, %s12426_s23 }
 0x47b   : > { %v14303_v41 = vpop.permute.xlu0 %3348  ;;  %4491 = vrot.lane.b32.xlu1 %v13708_v22, %s12426_s23 }
 0x47d   : > { %4664 = vrot.lane.b32.xlu0 %v4633_v0, %s12427_s14  ;;  %v14310_v6 = vpop.permute.xlu1 %3350 }
 0x47f   : > { %v14318_v57 = vpop.permute.xlu0 %3666  ;;  %4666 = vrot.lane.b32.xlu1 %v4634_v20, %s12427_s14  ;;  %v18974_v20 = vld [vmem:[#allocation35_spill] sm:$0xff] }
 0x481   : > { %4125 = vrot.lane.b32.xlu0 %v14316_v7, %s12426_s23  ;;  %v14323_v48 = vpop.permute.xlu1 %3497 }
 0x483   : > { %v14325_v63 = vpop.permute.xlu0 %4139  ;;  %4487 = vrot.lane.b32.xlu1 %v14067_v33, %s12426_s23 }
 0x484   : > { %18973 = vst [vmem:[#allocation48_spill] sm:$0xff] %v14325_v63 }
 0x485   : > { %4662 = vrot.lane.b32.xlu0 %v4632_v60, %s12427_s14  ;;  %v14332_v0 = vpop.permute.xlu1 %3843  ;;  %v4631_v60 = vmul.f32 %v13708_v22, %v18965_v32 }
 0x487   : > { %v14334_v52 = vpop.permute.xlu0 %3499  ;;  %4483 = vrot.lane.b32.xlu1 %v14022_v55, %s12426_s23 }
 0x489   : > { %4485 = vrot.lane.b32.xlu0 %v18974_v20, %s12426_s23  ;;  %v14340_v61 = vpop.permute.xlu1 %4316 }
 0x48a   : > { %18975 = vst [vmem:[#allocation56_spill] sm:$0xff] %v14340_v61  ;;  %v18978_v61 = vld [vmem:[#allocation38_spill] sm:$0xff] }
 0x48b   : > { %v14344_v25 = vpop.permute.xlu0 %3845  ;;  %4159 = vrot.lane.b32.xlu1 %v4117_v9, %s12429_s18  ;;  %v4630_v9 = vmul.f32 %v14098_v42, %v18971_v4 }
 0x48d   : > { %4660 = vrot.lane.b32.xlu0 %v4631_v60, %s12427_s14  ;;  %v14350_v51 = vpop.permute.xlu1 %3354  ;;  %v4627_v60 = vmul.f32 %v14022_v55, %v18971_v4  ;;  %v18988_v55 = vld [vmem:[#allocation33_spill] sm:$0xff] }
 0x48f   : > { %v14354_v10 = vpop.permute.xlu0 %4141  ;;  %4336 = vrot.lane.b32.xlu1 %v4294_v26, %s12428_s17 }
 0x490   : > { %18976 = vst [vmem:[#allocation46_spill] sm:$0xff] %v14354_v10  ;;  %v4636_v10 = vmul.f32 %v14205_v37, %v18971_v4 }
 0x491   : > { %4481 = vrot.lane.b32.xlu0 %v14020_v36, %s12426_s23  ;;  %v14359_v34 = vpop.permute.xlu1 %3668 }
 0x493   : > { %v14363_v22 = vpop.permute.xlu0 %4318  ;;  %4658 = vrot.lane.b32.xlu1 %v4630_v9, %s12427_s14  ;;  %v4629_v9 = vmul.f32 %v14067_v33, %v18969_v5 }
 0x494   : > { %18977 = vst [vmem:[#allocation55_spill] sm:$0xff] %v14363_v22 }
 0x495   : > { %4652 = vrot.lane.b32.xlu0 %v4627_v60, %s12427_s14  ;;  %v14369_v39 = vpop.permute.xlu1 %3503  ;;  %v18979_v60 = vld [vmem:[#allocation34_spill] sm:$0xff] }
 0x497   : > { %v14371_v26 = vpop.permute.xlu0 %3356  ;;  %4302 = vrot.lane.b32.xlu1 %v14316_v7, %s12434_s11 }
 0x499   : > { %4461 = vrot.lane.b32.xlu0 %v18978_v61, %s12432_s22  ;;  %v14377_v63 = vpop.permute.xlu1 %3672 }
 0x49b   : > { %v14381_v22 = vpop.permute.xlu0 %3849  ;;  %4656 = vrot.lane.b32.xlu1 %v4629_v9, %s12427_s14  ;;  %v4628_v9 = vmul.f32 %v18974_v20, %v18965_v32 }
 0x49d   : > { %4463 = vrot.lane.b32.xlu0 %v18979_v60, %s12432_s22  ;;  %v14386_v56 = vpop.permute.xlu1 %4322  ;;  %v12014_v60 = vld [vmem:[%s18599_s4 + $0x30] sm:$0xff] }
 0x49e   : > { %18980 = vst [vmem:[#allocation61_spill] sm:$0xff] %v14386_v56 }
 0x49f   : > { %v14390_v50 = vpop.permute.xlu0 %4145  ;;  %4670 = vrot.lane.b32.xlu1 %v4636_v10, %s12427_s14  ;;  %v4626_v10 = vmul.f32 %v14020_v36, %v18969_v5 }
 0x4a0   : > { %18981 = vst [vmem:[#allocation49_spill] sm:$0xff] %v14390_v50 }
 0x4a1   : > { %4467 = vrot.lane.b32.xlu0 %v14316_v7, %s12432_s22  ;;  %v14395_v61 = vpop.permute.xlu1 %3851  ;;  %v12012_v7 = vld [vmem:[%s18599_s4 + $0x20] sm:$0xff] }
 0x4a3   : > { %v3361_v56 = vpop.permute.xlu0 %3360  ;;  %4654 = vrot.lane.b32.xlu1 %v4628_v9, %s12427_s14  ;;  %v12015_v9 = vld [vmem:[%s18599_s4 + $0x38] sm:$0xff] }
 0x4a5   : > { %4811 = vperm.xlu0 %12353, %v12014_v60   ;;  %v14403_v4 = vpop.permute.xlu1 %4147  ;;  %v11903_v60 = vld [vmem:[%s18602_s7 + $0x1] ss:$8 sm:$0x3] }
 0x4a6   : > { %18982 = vst [vmem:[#allocation59_spill] sm:$0xff] %v14403_v4  ;;  %v4897_v4 = vrot.slane %v11903_v60, %v18983_v24 }
 0x4a7   : > { %v14410_v50 = vpop.permute.xlu0 %3505  ;;  %4650 = vrot.lane.b32.xlu1 %v4626_v10, %s12427_s14 }
 0x4a9   : > { %4801 = vperm.xlu0 %12353, %v12012_v7   ;;  %v3363_v32 = vpop.permute.xlu1 %3362  ;;  %v11908_v7 = vld [vmem:[%s18602_s7 + $0x6] ss:$8 sm:$0x3] }
 0x4aa   : > { %v5239_v15 = vrot.slane %v11908_v7, %v18983_v24  ;;  %v5235_v11 = vrot.slane %v11908_v7, %v18986_v14  ;;  %v3375_v7 = vsel %vm1751_vm0, %v3361_v56, %v3363_v32 }
 0x4ab   : > { %v14413_v20 = vpop.permute.xlu0 %3674  ;;  %4465 = vrot.lane.b32.xlu1 %v14260_v44, %s12432_s22  ;;  %v12013_v44 = vld [vmem:[%s18599_s4 + $0x28] sm:$0xff] }
 0x4ad   : > { %v14420_v5 = vpop.permute.xlu1 %3678  ;;  %4900 = vrot.lane.b32.xlu0 %v4897_v4, %s12435_s10 }
 0x4af   : > { %v14426_v10 = vpop.permute.xlu0 %4324  ;;  %4816 = vperm.xlu1 %12354, %v12015_v9  }
 0x4b0   : > { %18984 = vst [vmem:[#allocation20_spill] sm:$0xff] %v14426_v10  ;;  %v4893_v10 = vrot.slane %v11903_v60, %v18986_v14 }
 0x4b1   : > { %v14436_v53 = vpop.permute.xlu1 %4151  ;;  %5242 = vrot.lane.b32.xlu0 %v5239_v15, %s12436_s6 }
 0x4b2   : > { %18985 = vst [vmem:[#allocation47_spill] sm:$0xff] %v14436_v53 }
 0x4b3   : > { %v3510_v16 = vpop.permute.xlu0 %3509  ;;  %4806 = vperm.xlu1 %12354, %v12013_v44  }
 0x4b5   : > { %v14440_v9 = vpop.permute.xlu1 %4328  ;;  %5427 = vrot.lane.b32.xlu0 %v4897_v4, %s12417_s9 }
 0x4b6   : > { %18987 = vst [vmem:[#allocation24_spill] sm:$0xff] %v14440_v9 }
 0x4b7   : > { %v14442_v18 = vpop.permute.xlu0 %3855  ;;  %4898 = vrot.lane.b32.xlu1 %v4893_v10, %s12435_s10 }
 0x4b9   : > { %v3367_v24 = vpop.permute.xlu1 %3366  ;;  %5734 = vrot.lane.b32.xlu0 %v5239_v15, %s12437_s19  ;;  %v3374_v15 = vsel %vm1751_vm0, %v18988_v55, %v3361_v56 }
 0x4ba   : > { %v3376_v4 = vsel %vm1751_vm0, %v14034_v2, %v3367_v24  ;;  %v3372_v2 = vsel %vm1751_vm0, %v14049_v31, %v14350_v51 }
 0x4bb   : > { %v14447_v36 = vpop.permute.xlu0 %3680  ;;  %5240 = vrot.lane.b32.xlu1 %v5235_v11, %s12436_s6 }
 0x4bd   : > { %v3512_v44 = vpop.permute.xlu1 %3511 }
 0x4bf   : > { %v3369_v60 = vpop.permute.xlu0 %3368  ;;  %5425 = vrot.lane.b32.xlu1 %v4893_v10, %s12417_s9  ;;  %v3373_v10 = vsel %vm1751_vm0, %v14350_v51, %v14371_v26  ;;  %v18989_v26 = vmov 0.0  }
 0x4c0   : > { %v3377_v9 = vsel %vm1751_vm0, %v3367_v24, %v3369_v60  ;;  %v3371_v24 = vsel %vm1751_vm0, %v14303_v41, %v14310_v6  ;;  %v3523_v60 = vsel %vm1901_vm15, %v14101_v13, %v3510_v16  ;;  %v3520_v13 = vsel %vm1901_vm15, %v14323_v48, %v14334_v52 }
 0x4c1   : > { %3418 = vmatprep.subr.mxu0 %v3377_v9  ;;  %v14453_v53 = vpop.permute.xlu1 %3857 }
 0x4c2   : > { %3419 = vmatpush1.msra.mxu0 %v3376_v4 }
 0x4c3   : > { %v14458_v14 = vpop.permute.xlu0 %3684  ;;  %3420 = vmatprep.subr.mxu0 %v3375_v7  ;;  %5732 = vrot.lane.b32.xlu1 %v5235_v11, %s12437_s19  ;;  %v3370_v11 = vsel %vm1751_vm0, %v14017_v29, %v14303_v41  ;;  %v3524_v41 = vsel %vm1901_vm15, %v3510_v16, %v3512_v44  ;;  %v3521_v44 = vsel %vm1901_vm15, %v14118_v59, %v14369_v39  ;;  %v12367_v7 = vld [vmem:[%s18598_s3 + $0x90] sm:$0xff] }
 0x4c4   : > { %3421 = vmatpush1.msra.mxu0 %v3374_v15 }
 0x4c5   : > { %3422 = vmatprep.subr.mxu0 %v3373_v10  ;;  %v14466_v9 = vpop.permute.xlu1 %4153 }
 0x4c6   : > { %3423 = vmatpush1.msra.mxu0 %v3372_v2 }
 0x4c7   : > { %v14474_v55 = vpop.permute.xlu0 %4157  ;;  %3424 = vmatprep.subr.mxu0 %v3371_v24  ;;  %v3870_v24 = vsel %vm2276_vm13, %v14442_v18, %v14453_v53  ;;  %v3693_v53 = vsel %vm2089_vm14, %v14420_v5, %v14447_v36  ;;  %v3867_v36 = vsel %vm2276_vm13, %v14163_v17, %v14381_v22  ;;  %v3865_v17 = vsel %vm2276_vm13, %v14179_v54, %v14332_v0 }
 0x4c8   : > { %3425 = vmatpush1.msra.mxu0 %v3370_v11 }
 0x4c9   : > { %12016 = vmatmul.mubr.msk.f32.vlgmr.msra.gmra.mxu0 %vm1751_vm0, %v14065_v8  ;;  %v14481_v56 = vpop.permute.xlu1 %4330 }
 0x4ca   : > { %3464 = vmatprep.mubr.f32.mxu0 %v18989_v26 }
 0x4cb   : > { %v14484_v31 = vpop.permute.xlu0 %4334 }
 0x4cd   : > { %12017 = vmatmul.mubr.msk.f32.gmra.mxu0 %vm1751_vm0, %v14026_v43  ;;  %v3516_v51 = vpop.permute.xlu1 %3515 }
 0x4ce   : > { %3470 = vmatprep.mubr.f32.mxu0 %v18989_v26  ;;  %v3525_v8 = vsel %vm1901_vm15, %v14083_v27, %v3516_v51 }
 0x4cf   : > { %v3518_v6 = vpop.permute.xlu0 %3517 }
 0x4d0   : > { %v3526_v32 = vsel %vm1901_vm15, %v3516_v51, %v3518_v6  ;;  %v3694_v51 = vsel %vm2089_vm14, %v14059_v47, %v14458_v14  ;;  %v12368_v6 = vld [vmem:[%s18598_s3 + $0xa8] sm:$0xff]  ;;  %v3868_v47 = vsel %vm2276_vm13, %v14381_v22, %v14395_v61  ;;  %v3866_v61 = vsel %vm2276_vm13, %v14332_v0, %v14344_v25 }
 0x4d1   : > { %12018 = vmatmul.mubr.msk.f32.gmra.mxu0 %vm1751_vm0, %v14043_v23  ;;  %3567 = vmatprep.subr.mxu1 %v3526_v32  ;;  %v3862_v29 = vpop.permute.xlu1 %3861  ;;  %v3522_v23 = vsel %vm1901_vm15, %v14369_v39, %v14410_v50  ;;  %v12365_v50 = vld [vmem:[%s18598_s3 + $0x60] sm:$0xff]  ;;  %v12366_v39 = vld [vmem:[%s18598_s3 + $0x78] sm:$0xff]  ;;  %v3689_v22 = vsel %vm2089_vm14, %v14318_v57, %v14359_v34 }
 0x4d2   : > { %3568 = vmatpush1.msra.mxu1 %v3525_v8  ;;  %3476 = vmatprep.mubr.f32.mxu0 %v18989_v26  ;;  %v3871_v10 = vsel %vm2276_vm13, %v14185_v40, %v3862_v29  ;;  %v3869_v40 = vsel %vm2276_vm13, %v14200_v1, %v14442_v18  ;;  %v3692_v1 = vsel %vm2089_vm14, %v14074_v21, %v14420_v5  ;;  %v12370_v5 = vld [vmem:[%s18598_s3 + $0x80] sm:$0xff] }
 0x4d3   : > { %v14496_v43 = vpop.permute.xlu0 %4503  ;;  %3569 = vmatprep.subr.mxu1 %v3524_v41  ;;  %v3691_v18 = vsel %vm2089_vm14, %v14377_v63, %v14413_v20  ;;  %v3690_v21 = vsel %vm2089_vm14, %v14150_v58, %v14377_v63  ;;  %v3688_v58 = vsel %vm2089_vm14, %v14112_v62, %v14318_v57  ;;  %v18995_v63 = vld [vmem:[#allocation36_spill] sm:$0xff] }
 0x4d4   : > { %3570 = vmatpush1.msra.mxu1 %v3523_v60  ;;  %v18997_v60 = vld [vmem:[#allocation47_spill] sm:$0xff] }
 0x4d5   : > { %12019 = vmatmul.mubr.msk.f32.gmra.mxu0 %vm1751_vm0, %v14132_v35  ;;  %3571 = vmatprep.subr.mxu1 %v3522_v23  ;;  %v14505_v27 = vpop.permute.xlu1 %4501  ;;  %v3519_v35 = vsel %vm1901_vm15, %v14094_v3, %v14323_v48 }
 0x4d6   : > { %3572 = vmatpush1.msra.mxu1 %v3521_v44  ;;  %3776 = vmatprep.mubr.f32.mxu0 %v18989_v26  ;;  %v18998_v44 = vld [vmem:[#allocation30_spill] sm:$0xff] }
 0x4d7   : > { %v14514_v16 = vpop.permute.xlu0 %4499  ;;  %3573 = vmatprep.subr.mxu1 %v3520_v13  ;;  %v18999_v13 = vld [vmem:[#allocation59_spill] sm:$0xff] }
 0x4d8   : > { %3574 = vmatpush1.msra.mxu1 %v3519_v35  ;;  %v4166_v35 = vsel %vm2215_vm12, %v18999_v13, %v18998_v44  ;;  %v14783_v44 = vld [vmem:[#allocation3 + $0x78] sm:$0xff] }
 0x4d9   : > { %12020 = vmatmul.mubr.msk.f32.vlgmr.msra.gmra.mxu1 %vm1751_vm0, %v12365_v50  ;;  %v14523_v59 = vpop.permute.xlu1 %4123  ;;  %v19000_v50 = vld [vmem:[#allocation44_spill] sm:$0xff] }
 0x4da   : > { %3613 = vmatprep.mubr.f32.mxu1 %v18989_v26 }
 0x4db   : > { %v14526_v52 = vpop.permute.xlu0 %4497 }
 0x4dd   : > { %12021 = vmatmul.mubr.msk.f32.gmra.mxu1 %vm1751_vm0, %v12366_v39  ;;  %v14532_v3 = vpop.permute.xlu1 %4495 }
 0x4de   : > { %3619 = vmatprep.mubr.f32.mxu1 %v18989_v26 }
 0x4df   : > { %v3864_v48 = vpop.permute.xlu0 %3863 }
 0x4e0   : > { %v3872_v4 = vsel %vm2276_vm13, %v3862_v29, %v3864_v48  ;;  %v18996_v29 = vld [vmem:[#allocation11_spill] sm:$0xff] }
 0x4e1   : > { %12022 = vmatmul.mubr.msk.f32.gmra.mxu1 %vm1751_vm0, %v12367_v7  ;;  %3913 = vmatprep.subr.mxu1 %v3872_v4  ;;  %v3687_v15 = vpop.permute.xlu1 %3686  ;;  %v4168_v8 = vsel %vm2215_vm12, %v14466_v9, %v18996_v29  ;;  %v19001_v4 = vld [vmem:[#allocation49_spill] sm:$0xff] }
 0x4e2   : > { %3914 = vmatpush1.msra.mxu1 %v3871_v10  ;;  %v3695_v2 = vsel %vm2089_vm14, %v14458_v14, %v3687_v15  ;;  %3625 = vmatprep.mubr.f32.mxu1 %v18989_v26  ;;  %v4165_v7 = vsel %vm2215_vm12, %v19001_v4, %v18999_v13  ;;  %v19002_v15 = vld [vmem:[#allocation37_spill] sm:$0xff]  ;;  %v19004_v10 = vld [vmem:[#allocation46_spill] sm:$0xff] }
 0x4e3   : > { %v14548_v11 = vpop.permute.xlu0 %4672  ;;  %3736 = vmatprep.subr.mxu0 %v3695_v2  ;;  %3915 = vmatprep.subr.mxu1 %v3870_v24  ;;  %v19005_v24 = vld [vmem:[#allocation19_spill] sm:$0xff]  ;;  %v12058_v4 = vld [vmem:[%s18598_s3 + $0xf0] sm:$0xff] }
 0x4e4   : > { %3737 = vmatpush1.msra.mxu0 %v3694_v51  ;;  %3916 = vmatpush1.msra.mxu1 %v3869_v40  ;;  %v19006_v40 = vld [vmem:[#allocation48_spill] sm:$0xff]  ;;  %v14790_v13 = vld [vmem:[%s18598_s3 + $0xd8] sm:$0xff] }
 0x4e5   : > { %12023 = vmatmul.mubr.msk.f32.gmra.mxu1 %vm1751_vm0, %v12368_v6  ;;  %3738 = vmatprep.subr.mxu0 %v3693_v53  ;;  %v14566_v14 = vpop.permute.xlu1 %4300  ;;  %v4163_v53 = vsel %vm2215_vm12, %v19006_v40, %v19004_v10  ;;  %v19007_v6 = vld [vmem:[#allocation24_spill] sm:$0xff] }
 0x4e6   : > { %3917 = vmatprep.subr.mxu1 %v3868_v47  ;;  %3739 = vmatpush1.msra.mxu0 %v3692_v1  ;;  %v4344_v47 = vsel %vm2028_vm10, %v19007_v6, %v14481_v56 }
 0x4e7   : > { %3918 = vmatpush1.msra.mxu1 %v3867_v36  ;;  %v14577_v32 = vpop.permute.xlu0 %4493  ;;  %3740 = vmatprep.subr.mxu0 %v3691_v18  ;;  %v19008_v36 = vld [vmem:[#allocation25_spill] sm:$0xff]  ;;  %v19009_v18 = vld [vmem:[#allocation40_spill] sm:$0xff] }
 0x4e8   : > { %3919 = vmatprep.subr.mxu1 %v3866_v61  ;;  %3741 = vmatpush1.msra.mxu0 %v3690_v21  ;;  %v19010_v61 = vld [vmem:[#allocation42_spill] sm:$0xff]  ;;  %v19011_v21 = vld [vmem:[#allocation20_spill] sm:$0xff] }
 0x4e9   : > { %3920 = vmatpush1.msra.mxu1 %v3865_v17  ;;  %3953 = vmatprep.mubr.f32.mxu1 %v18989_v26  ;;  %v14592_v20 = vpop.permute.xlu1 %4668  ;;  %v4343_v17 = vsel %vm2028_vm10, %v19011_v21, %v19010_v61 }
 0x4ea   : > { %3742 = vmatprep.subr.mxu0 %v3689_v22  ;;  %12028 = vmatmul.mubr.msk.f32.vlgmr.msra.gmra.mxu1 %vm1751_vm0, %v14227_v45  ;;  %v4512_v22 = vsel %vm2933_vm1, %v14505_v27, %v14496_v43  ;;  %v4510_v43 = vsel %vm2933_vm1, %v14532_v3, %v14526_v52  ;;  %v19017_v52 = vld [vmem:[#allocation60_spill] sm:$0xff] }
 0x4eb   : > { %3743 = vmatpush1.msra.mxu0 %v3688_v58  ;;  %v14599_v25 = vpop.permute.xlu0 %4489  ;;  %3959 = vmatprep.mubr.f32.mxu1 %v18989_v26  ;;  %v19012_v58 = vld [vmem:[#allocation61_spill] sm:$0xff] }
 0x4ec   : > { %12024 = vmatmul.mubr.msk.f32.vlgmr.msra.gmra.mxu0 %vm1751_vm0, %v14169_v49  ;;  %4022 = vmatprep.subr.mxu0 %v14205_v37 }
 0x4ed   : > { %4023 = vmatpush1.msra.mxu0 %v14190_v12  ;;  %v14606_v54 = vpop.permute.xlu1 %4491  ;;  %3782 = vmatprep.mubr.f32.mxu0 %v18989_v26  ;;  %v18992_v12 = vld [vmem:[#allocation9_spill] sm:$0xff] }
 0x4ee   : > { %12029 = vmatmul.mubr.msk.f32.gmra.mxu1 %vm1751_vm0, %v14193_v38  ;;  %4024 = vmatprep.subr.mxu0 %v14147_v46  ;;  %v18990_v46 = vld [vmem:[#allocation32_spill] sm:$0xff]  ;;  %v18994_v38 = vld [vmem:[#allocation31_spill] sm:$0xff] }
 0x4ef   : > { %4025 = vmatpush1.msra.mxu0 %v14129_v28  ;;  %3965 = vmatprep.mubr.f32.mxu1 %v18989_v26  ;;  %v14614_v62 = vpop.permute.xlu0 %4664  ;;  %v18991_v28 = vld [vmem:[#allocation39_spill] sm:$0xff] }
 0x4f0   : > { %12025 = vmatmul.mubr.msk.f32.gmra.mxu0 %vm1751_vm0, %v14127_v19  ;;  %4026 = vmatprep.subr.mxu0 %v14098_v42  ;;  %v18993_v42 = vld [vmem:[#allocation28_spill] sm:$0xff] }
 0x4f1   : > { %4027 = vmatpush1.msra.mxu0 %v14067_v33  ;;  %v14620_v49 = vpop.permute.xlu1 %4666  ;;  %3788 = vmatprep.mubr.f32.mxu0 %v18989_v26 }
 0x4f2   : > { %12030 = vmatmul.mubr.msk.f32.gmra.mxu1 %vm1751_vm0, %v14240_v30  ;;  %4028 = vmatprep.subr.mxu0 %v18990_v46  ;;  %v12369_v30 = vld [vmem:[%s18598_s3 + $0x68] sm:$0xff]  ;;  %v4342_v46 = vsel %vm2028_vm10, %v19012_v58, %v19011_v21 }
 0x4f3   : > { %4029 = vmatpush1.msra.mxu0 %v18991_v28  ;;  %3971 = vmatprep.mubr.f32.mxu1 %v18989_v26  ;;  %v14633_v33 = vpop.permute.xlu0 %4125 }
 0x4f4   : > { %12026 = vmatmul.mubr.msk.f32.gmra.mxu0 %vm1751_vm0, %v18992_v12  ;;  %v19013_v12 = vld [vmem:[#allocation45_spill] sm:$0xff] }
 0x4f5   : > { %v14630_v19 = vpop.permute.xlu1 %4487  ;;  %3794 = vmatprep.mubr.f32.mxu0 %v18989_v26 }
 0x4f6   : > { %12031 = vmatmul.mubr.msk.f32.gmra.mxu1 %vm1751_vm0, %v18993_v42  ;;  %v19014_v42 = vld [vmem:[#allocation55_spill] sm:$0xff] }
 0x4f7   : > { %4251 = vmatprep.mubr.f32.mxu1 %v18989_v26  ;;  %v14643_v45 = vpop.permute.xlu0 %4662 }
 0x4f8   : > { %12027 = vmatmul.mubr.msk.f32.gmra.mxu0 %vm1751_vm0, %v18994_v38  ;;  %v4341_v38 = vsel %vm2028_vm10, %v19014_v42, %v19013_v12 }
 0x4f9   : > { %v14640_v37 = vpop.permute.xlu1 %4483  ;;  %4062 = vmatprep.mubr.f32.mxu0 %v18989_v26 }
 0x4fb   : > { %v4486_v23 = vpop.permute.xlu0 %4485 }
 0x4fc   : > { %12032 = vmatmul.mubr.msk.f32.vlgmr.msra.gmra.mxu0 %vm1751_vm0, %v12369_v30  ;;  %v4509_v30 = vsel %vm2933_vm1, %v14577_v32, %v14532_v3  ;;  %v4507_v3 = vsel %vm2933_vm1, %v14630_v19, %v14599_v25  ;;  %v4506_v32 = vsel %vm2933_vm1, %v14640_v37, %v4486_v23  ;;  %v12002_v23 = vld [vmem:[%s18598_s3 + $0x70] sm:$0xff] }
 0x4fd   : > { %v4160_v57 = vpop.permute.xlu1 %4159  ;;  %4068 = vmatprep.mubr.f32.mxu0 %v18989_v26 }
 0x4fe   : > { %v4170_v0 = vsel %vm2215_vm12, %v4160_v57, %v18995_v63  ;;  %v4169_v34 = vsel %vm2215_vm12, %v14474_v55, %v4160_v57  ;;  %v4167_v55 = vsel %vm2215_vm12, %v18997_v60, %v14466_v9  ;;  %v19003_v9 = vld [vmem:[#allocation41_spill] sm:$0xff] }
 0x4ff   : > { %4211 = vmatprep.subr.mxu1 %v4170_v0  ;;  %v4164_v2 = vsel %vm2215_vm12, %v19004_v10, %v19003_v9  ;;  %v4661_v1 = vpop.permute.xlu0 %4660  ;;  %v19016_v0 = vld [vmem:[#allocation43_spill] sm:$0xff] }
 0x500   : > { %12033 = vmatmul.mubr.msk.f32.gmra.mxu0 %vm1751_vm0, %v12370_v5  ;;  %4212 = vmatpush1.msra.mxu1 %v4169_v34  ;;  %v4508_v34 = vsel %vm2933_vm1, %v14599_v25, %v14606_v54  ;;  %v19018_v54 = vld [vmem:[#allocation58_spill] sm:$0xff] }
 0x501   : > { %4213 = vmatprep.subr.mxu1 %v4168_v8  ;;  %v4337_v41 = vpop.permute.xlu1 %4336  ;;  %4074 = vmatprep.mubr.f32.mxu0 %v18989_v26  ;;  %v14744_v8 = vld [vmem:[#allocation3 + $0x50] sm:$0xff]  ;;  %v12011_v9 = vld [vmem:[%s18598_s3 + $0xb8] sm:$0xff] }
 0x502   : > { %4214 = vmatpush1.msra.mxu1 %v4167_v55  ;;  %v4347_v39 = vsel %vm2028_vm10, %v4337_v41, %v19000_v50  ;;  %v4346_v48 = vsel %vm2028_vm10, %v14484_v31, %v4337_v41  ;;  %v4345_v31 = vsel %vm2028_vm10, %v14481_v56, %v19005_v24  ;;  %v4511_v56 = vsel %vm2933_vm1, %v14514_v16, %v14505_v27  ;;  %v19015_v27 = vld [vmem:[#allocation56_spill] sm:$0xff] }
 0x503   : > { %4215 = vmatprep.subr.mxu1 %v4166_v35  ;;  %4388 = vmatprep.subr.mxu0 %v4347_v39  ;;  %v4340_v16 = vsel %vm2028_vm10, %v19015_v27, %v19014_v42  ;;  %v4482_v63 = vpop.permute.xlu0 %4481  ;;  %v4679_v41 = vsel %vm1686_vm11, %v14614_v62, %v14620_v49  ;;  %v14765_v49 = vld [vmem:[#allocation3] sm:$0xff]  ;;  %v12005_v50 = vld [vmem:[%s18598_s3 + $0x88] sm:$0xff]  ;;  %v12052_v39 = vld [vmem:[%s18598_s3 + $0xc0] sm:$0xff] }
 0x504   : > { %12034 = vmatmul.mubr.msk.f32.gmra.mxu0 %vm1751_vm0, %v19002_v15  ;;  %4216 = vmatpush1.msra.mxu1 %v4165_v7  ;;  %v4505_v5 = vsel %vm2933_vm1, %v4482_v63, %v14640_v37  ;;  %v12008_v7 = vld [vmem:[%s18598_s3 + $0xa0] sm:$0xff]  ;;  %v14894_v27 = vld [vmem:[#allocation3 + $0x20] sm:$0xff] }
 0x505   : > { %4389 = vmatpush1.msra.mxu0 %v4346_v48  ;;  %4217 = vmatprep.subr.mxu1 %v4164_v2  ;;  %v14683_v51 = vpop.permute.xlu1 %4658  ;;  %19029 = vst [vmem:[#allocation14_spill] sm:$0xff] %v14894_v27  ;;  %v14907_v63 = vld [vmem:[#allocation3 + $0x60] sm:$0xff] }
 0x506   : > { %4390 = vmatprep.subr.mxu0 %v4345_v31  ;;  %4080 = vmatprep.mubr.f32.mxu0 %v18989_v26  ;;  %19031 = vst [vmem:[#allocation29_spill] sm:$0xff] %v14907_v63 }
 0x507   : > { %4218 = vmatpush1.msra.mxu1 %v4163_v53  ;;  %4391 = vmatpush1.msra.mxu0 %v4344_v47  ;;  %v4653_v37 = vpop.permute.xlu0 %4652 }
 0x508   : > { %12035 = vmatmul.mubr.msk.f32.gmra.mxu0 %vm1751_vm0, %v19008_v36  ;;  %12036 = vmatmul.mubr.msk.f32.vlgmr.msra.gmra.mxu1 %vm1751_vm0, %v19009_v18  ;;  %v12061_v18 = vld [vmem:[%s18598_s3 + $0x108] sm:$0xff] }
 0x509   : > { %4392 = vmatprep.subr.mxu0 %v4343_v17  ;;  %4553 = vmatprep.subr.mxu1 %v4512_v22  ;;  %v4303_v28 = vpop.permute.xlu1 %4302 }
 0x50a   : > { %4393 = vmatpush1.msra.mxu0 %v4342_v46  ;;  %4554 = vmatpush1.msra.mxu1 %v4511_v56 }
 0x50b   : > { %4394 = vmatprep.subr.mxu0 %v4341_v38  ;;  %4555 = vmatprep.subr.mxu1 %v4510_v43  ;;  %v4462_v60 = vpop.permute.xlu0 %4461 }
 0x50c   : > { %4257 = vmatprep.mubr.f32.mxu1 %v18989_v26  ;;  %4395 = vmatpush1.msra.mxu0 %v4340_v16 }
 0x50d   : > { %4428 = vmatprep.mubr.f32.mxu0 %v18989_v26  ;;  %4556 = vmatpush1.msra.mxu1 %v4509_v30  ;;  %v4657_v57 = vpop.permute.xlu1 %4656  ;;  %v14901_v30 = vld [vmem:[#allocation3 + $0xa8] sm:$0xff] }
 0x50e   : > { %12037 = vmatmul.mubr.msk.f32.gmra.mxu1 %vm1751_vm0, %v19016_v0  ;;  %12040 = vmatmul.mubr.msk.f32.vlgmr.msra.gmra.mxu0 %vm1751_vm0, %v19017_v52  ;;  %19030 = vst [vmem:[#allocation15_spill] sm:$0xff] %v14901_v30 }
 0x50f   : > { %4557 = vmatprep.subr.mxu1 %v4508_v34  ;;  %4263 = vmatprep.mubr.f32.mxu1 %v18989_v26  ;;  %v4464_v35 = vpop.permute.xlu0 %4463  ;;  %v14915_v34 = vld [vmem:[#allocation3 + $0x18] sm:$0xff] }
 0x510   : > { %4558 = vmatpush1.msra.mxu1 %v4507_v3  ;;  %4434 = vmatprep.mubr.f32.mxu0 %v18989_v26  ;;  %19032 = vst [vmem:[#allocation17_spill] sm:$0xff] %v14915_v34 }
 0x511   : > { %4559 = vmatprep.subr.mxu1 %v4506_v32  ;;  %v4671_v29 = vpop.permute.xlu1 %4670  ;;  %4955 = vrot.lane.b32.xlu0 %v14744_v8, %s12434_s11 }
 0x512   : > { %4560 = vmatpush1.msra.mxu1 %v4505_v5  ;;  %12041 = vmatmul.mubr.msk.f32.gmra.mxu0 %vm1751_vm0, %v19018_v54  ;;  %v4681_v25 = vsel %vm1686_vm11, %v4671_v29, %v14548_v11  ;;  %v4680_v19 = vsel %vm1686_vm11, %v14592_v20, %v4671_v29  ;;  %v4678_v20 = vsel %vm1686_vm11, %v14643_v45, %v14614_v62  ;;  %v14934_v54 = vld [vmem:[%s18598_s3 + $0xc8] sm:$0xff] }
 0x513   : > { %12038 = vmatmul.mubr.msk.f32.gmra.mxu1 %vm1751_vm0, %v14523_v59  ;;  %4440 = vmatprep.mubr.f32.mxu0 %v18989_v26  ;;  %v14757_v59 = vld [vmem:[#allocation3 + $0x58] sm:$0xff]  ;;  %v4676_v62 = vsel %vm1686_vm11, %v4657_v57, %v14683_v51  ;;  %v4468_v15 = vpop.permute.xlu0 %4467  ;;  %19033 = vst [vmem:[#allocation18_spill] sm:$0xff] %v14934_v54 }
 0x514   : > { %4269 = vmatprep.mubr.f32.mxu1 %v18989_v26  ;;  %4726 = vmatprep.subr.mxu0 %v4681_v25  ;;  %v14939_v25 = vld [vmem:[%s18598_s3 + $0xe0] sm:$0xff] }
 0x515   : > { %4727 = vmatpush1.msra.mxu0 %v4680_v19  ;;  %v4655_v11 = vpop.permute.xlu1 %4654  ;;  %4961 = vrot.lane.b32.xlu1 %v14757_v59, %s12434_s11  ;;  %19034 = vst [vmem:[#allocation16_spill] sm:$0xff] %v14939_v25 }
 0x516   : > { %12042 = vmatmul.mubr.msk.f32.gmra.mxu0 %vm1751_vm0, %v14566_v14  ;;  %4728 = vmatprep.subr.mxu0 %v4679_v41  ;;  %v4677_v14 = vsel %vm1686_vm11, %v14683_v51, %v4661_v1  ;;  %v4675_v45 = vsel %vm1686_vm11, %v4653_v37, %v4655_v11 }
 0x517   : > { %12039 = vmatmul.mubr.msk.f32.gmra.mxu1 %vm1751_vm0, %v14633_v33  ;;  %4446 = vmatprep.mubr.f32.mxu0 %v18989_v26 }
 0x518   : > { %4593 = vmatprep.mubr.f32.mxu1 %v18989_v26  ;;  %4729 = vmatpush1.msra.mxu0 %v4678_v20 }
 0x519   : > { %4730 = vmatprep.subr.mxu0 %v4677_v14  ;;  %v4651_v55 = vpop.permute.xlu1 %4650  ;;  %4943 = vrot.lane.b32.xlu0 %v14765_v49, %s12434_s11 }
 0x51a   : > { %12043 = vmatmul.mubr.msk.f32.gmra.mxu0 %vm1751_vm0, %v4303_v28  ;;  %v4674_v33 = vsel %vm1686_vm11, %v4651_v55, %v4653_v37  ;;  %4949 = vrot.lane.b32.xlu1 %v14783_v44, %s12434_s11 }
 0x51b   : > { %12044 = vmatmul.mubr.msk.f32.vlgmr.msra.gmra.mxu1 %vm1751_vm0, %v4462_v60  ;;  %4731 = vmatpush1.msra.mxu0 %v4676_v62 }
 0x51c   : > { %4732 = vmatprep.subr.mxu0 %v4675_v45  ;;  %4599 = vmatprep.mubr.f32.mxu1 %v18989_v26 }
 0x51d   : > { %4733 = vmatpush1.msra.mxu0 %v4674_v33  ;;  %4766 = vmatprep.mubr.f32.mxu0 %v18989_v26  ;;  %v4466_v48 = vpop.permute.xlu1 %4465 }
 0x51e   : > { %12048 = vmatmul.mubr.msk.f32.vlgmr.msra.gmra.mxu0 %vm1751_vm0, %v12002_v23  ;;  %4925 = vrot.lane.b32.xlu0 %v14790_v13, %s12426_s23 }
 0x51f   : > { %12045 = vmatmul.mubr.msk.f32.gmra.mxu1 %vm1751_vm0, %v4464_v35  ;;  %4772 = vmatprep.mubr.f32.mxu0 %v18989_v26 }
 0x520   : > { %4605 = vmatprep.mubr.f32.mxu1 %v18989_v26  ;;  %4923 = vrot.lane.b32.xlu1 %v12052_v39, %s12426_s23  ;;  %v14848_v1 = vpop.permute.xlu0 %4811 }
 0x521   : > { %19023 = vst [vmem:[#allocation53_spill] sm:$0xff] %v14848_v1 }
 0x522   : > { %12049 = vmatmul.mubr.msk.f32.gmra.mxu0 %vm1751_vm0, %v12005_v50  ;;  %4927 = vrot.lane.b32.xlu0 %v12058_v4, %s12426_s23 }
 0x523   : > { %12046 = vmatmul.mubr.msk.f32.gmra.mxu1 %vm1751_vm0, %v4466_v48  ;;  %4778 = vmatprep.mubr.f32.mxu0 %v18989_v26 }
 0x524   : > { %4611 = vmatprep.mubr.f32.mxu1 %v18989_v26  ;;  %v14863_v17 = vpop.permute.xlu0 %4801 }
 0x526   : > { %12050 = vmatmul.mubr.msk.f32.gmra.mxu0 %vm1751_vm0, %v12008_v7 }
 0x527   : > { %12047 = vmatmul.mubr.msk.f32.gmra.mxu1 %vm1751_vm0, %v4468_v15  ;;  %4784 = vmatprep.mubr.f32.mxu0 %v18989_v26 }
 0x528   : > { %5056 = vmatprep.mubr.f32.mxu1 %v18989_v26  ;;  %v14867_v22 = vpop.permute.xlu0 %4900 }
 0x529   : > { %19024 = vst [vmem:[#allocation50_spill] sm:$0xff] %v14867_v22  ;;  %v5928_v52 = vmul.f32 %v14894_v27, %v14867_v22  ;;  %v5922_v3 = vmul.f32 %v14915_v34, %v14867_v22  ;;  %v5919_v5 = vmul.f32 %v14907_v63, %v14867_v22  ;;  %v5925_v29 = vmul.f32 %v14901_v30, %v14867_v22 }
 0x52a   : > { %12051 = vmatmul.mubr.msk.f32.gmra.mxu0 %vm1751_vm0, %v12011_v9  ;;  %v14826_v10 = vpop.permute.xlu1 %4816 }
 0x52b   : > { %19019 = vst [vmem:[#allocation51_spill] sm:$0xff] %v14826_v10  ;;  %5206 = vmatprep.mubr.f32.mxu0 %v18989_v26 }
 0x52c   : > { %v14876_v46 = vpop.permute.xlu0 %5242 }
 0x52d   : > { %19026 = vst [vmem:[#allocation12_spill] sm:$0xff] %v14876_v46 }
 0x52e   : > { %v14829_v2 = vpop.permute.xlu1 %4806 }
 0x52f   : > { %19020 = vst [vmem:[#allocation57_spill] sm:$0xff] %v14829_v2 }
 0x530   : > { %v14884_v42 = vpop.permute.xlu0 %5427 }
 0x531   : > { %19027 = vst [vmem:[#allocation10_spill] sm:$0xff] %v14884_v42 }
 0x532   : > { %v14831_v24 = vpop.permute.xlu1 %4898 }
 0x533   : > { %19021 = vst [vmem:[#allocation23_spill] sm:$0xff] %v14831_v24  ;;  %v4916_v31 = vmul.f32 %v14831_v24, %v14757_v59  ;;  %v4913_v51 = vmul.f32 %v14831_v24, %v14744_v8  ;;  %v4910_v6 = vmul.f32 %v14831_v24, %v14783_v44  ;;  %v4907_v36 = vmul.f32 %v14831_v24, %v14765_v49 }
 0x534   : > { %v14892_v43 = vpop.permute.xlu0 %5734 }
 0x535   : > { %5111 = vrot.lane.b32.xlu1 %v4916_v31, %s12436_s6  ;;  %19028 = vst [vmem:[#allocation27_spill] sm:$0xff] %v14892_v43  ;;  %v5751_v16 = vmul.f32 %v14892_v43, %v14894_v27  ;;  %v5748_v57 = vmul.f32 %v14892_v43, %v14901_v30  ;;  %v5742_v0 = vmul.f32 %v14892_v43, %v14907_v63 }
 0x536   : > { %v14838_v40 = vpop.permute.xlu1 %5240  ;;  %v5745_v32 = vmul.f32 %v14892_v43, %v14915_v34 }
 0x537   : > { %19022 = vst [vmem:[#allocation22_spill] sm:$0xff] %v14838_v40  ;;  %v5257_v53 = vmul.f32 %v14838_v40, %v14757_v59  ;;  %v5254_v47 = vmul.f32 %v14838_v40, %v14744_v8  ;;  %v5251_v61 = vmul.f32 %v14838_v40, %v14783_v44  ;;  %v5248_v21 = vmul.f32 %v14838_v40, %v14765_v49 }
 0x539   : > { %5105 = vrot.lane.b32.xlu1 %v4913_v51, %s12436_s6  ;;  %5298 = vrot.lane.b32.xlu0 %v5257_v53, %s12435_s10 }
 0x53a   : > { %v14869_v56 = vpop.permute.xlu1 %5425 }
 0x53b   : > { %19025 = vst [vmem:[#allocation52_spill] sm:$0xff] %v14869_v56  ;;  %v5443_v58 = vmul.f32 %v14869_v56, %v14757_v59  ;;  %v5440_v28 = vmul.f32 %v14869_v56, %v14744_v8  ;;  %v5437_v12 = vmul.f32 %v14869_v56, %v14783_v44  ;;  %v5434_v38 = vmul.f32 %v14869_v56, %v14765_v49 }
 0x53d   : > { %5099 = vrot.lane.b32.xlu1 %v4910_v6, %s12436_s6  ;;  %5292 = vrot.lane.b32.xlu0 %v5254_v47, %s12435_s10 }
 0x541   : > { %4929 = vrot.lane.b32.xlu1 %v12061_v18, %s12426_s23  ;;  %5093 = vrot.lane.b32.xlu0 %v4907_v36, %s12436_s6 }
 0x545   : > { %5286 = vrot.lane.b32.xlu1 %v5251_v61, %s12435_s10  ;;  %5280 = vrot.lane.b32.xlu0 %v5248_v21, %s12435_s10 }
 0x549   : > { %5260 = vrot.lane.b32.xlu1 %v12052_v39, %s12434_s11  ;;  %5262 = vrot.lane.b32.xlu0 %v14790_v13, %s12434_s11 }
 0x54d   : > { %5264 = vrot.lane.b32.xlu0 %v12058_v4, %s12434_s11  ;;  %5484 = vrot.lane.b32.xlu1 %v5443_v58, %s12437_s19 }
 0x551   : > { %5478 = vrot.lane.b32.xlu1 %v5440_v28, %s12437_s19  ;;  %5472 = vrot.lane.b32.xlu0 %v5437_v12, %s12437_s19 }
 0x555   : > { %5266 = vrot.lane.b32.xlu1 %v12061_v18, %s12434_s11  ;;  %5466 = vrot.lane.b32.xlu0 %v5434_v38, %s12437_s19 }
 0x559   : > { %5446 = vrot.lane.b32.xlu1 %v12052_v39, %s12432_s22  ;;  %5448 = vrot.lane.b32.xlu0 %v14790_v13, %s12432_s22 }
 0x55d   : > { %5450 = vrot.lane.b32.xlu1 %v12058_v4, %s12432_s22  ;;  %5794 = vrot.lane.b32.xlu0 %v5751_v16, %s12417_s9 }
 0x561   : > { %5452 = vrot.lane.b32.xlu1 %v12061_v18, %s12432_s22  ;;  %5788 = vrot.lane.b32.xlu0 %v5748_v57, %s12417_s9 }
 0x565   : > { %5776 = vrot.lane.b32.xlu1 %v5742_v0, %s12417_s9  ;;  %5971 = vrot.lane.b32.xlu0 %v5928_v52, %s12436_s6 }
 0x569   : > { %5959 = vrot.lane.b32.xlu1 %v5922_v3, %s12436_s6  ;;  %5782 = vrot.lane.b32.xlu0 %v5745_v32, %s12417_s9 }
 0x56d   : > { %5953 = vrot.lane.b32.xlu1 %v5919_v5, %s12436_s6  ;;  %5965 = vrot.lane.b32.xlu0 %v5925_v29, %s12436_s6 }
 0x571   : > { %5752 = vrot.lane.b32.xlu0 %v14934_v54, %s12426_s23  ;;  %5754 = vrot.lane.b32.xlu1 %v14939_v25, %s12426_s23 }
 0x575   : > { %5929 = vrot.lane.b32.xlu0 %v14934_v54, %s12434_s11 }
 0x579   : > { %5931 = vrot.lane.b32.xlu0 %v14939_v25, %s12434_s11 }
 0x589   : > { %v3460_v19 = vpop.f32.mrf.mxu0 }
 0x58b   : > { %v3462_v8 = vpop.f32.mrf.mxu0 }
 0x58d   : > { %v3466_v37 = vpop.f32.mrf.mxu0 }
 0x58f   : > { %v3468_v11 = vpop.f32.mrf.mxu0 }
 0x591   : > { %v3472_v49 = vpop.f32.mrf.mxu0 }
 0x593   : > { %v3474_v55 = vpop.f32.mrf.mxu0 }
 0x595   : > { %v3478_v45 = vpop.f32.mrf.mxu0 }
 0x597   : > { %v14951_v44 = vpop.f32.mrf.mxu0 }
 0x599   : > { %v3609_v41 = vpop.f32.mrf.mxu1 }
 0x59a   : > { %v3610_v5 = vadd.f32 %v3609_v41, %v3460_v19 }
 0x59b   : > { %v3611_v59 = vpop.f32.mrf.mxu1 }
 0x59c   : > { %v3612_v25 = vadd.f32 %v3611_v59, %v3462_v8 }
 0x59d   : > { %v3615_v20 = vpop.f32.mrf.mxu1 }
 0x59e   : > { %v3616_v34 = vadd.f32 %v3615_v20, %v3466_v37 }
 0x59f   : > { %v3617_v60 = vpop.f32.mrf.mxu1 }
 0x5a0   : > { %v3618_v56 = vadd.f32 %v3617_v60, %v3468_v11 }
 0x5a1   : > { %v3621_v14 = vpop.f32.mrf.mxu1 }
 0x5a2   : > { %v3622_v24 = vadd.f32 %v3621_v14, %v3472_v49 }
 0x5a3   : > { %v3623_v62 = vpop.f32.mrf.mxu1 }
 0x5a4   : > { %v3624_v19 = vadd.f32 %v3623_v62, %v3474_v55  ;;  %v14965_v62 = vpop.permute.xlu0 %4955 }
 0x5a5   : > { %v3627_v33 = vpop.f32.mrf.mxu1 }
 0x5a7   : > { %v14949_v23 = vpop.f32.mrf.mxu1 }
 0x5aa   : > { %v3955_v13 = vpop.f32.mrf.mxu1 }
 0x5ac   : > { %v3778_v35 = vpop.f32.mrf.mxu0  ;;  %v3957_v50 = vpop.f32.mrf.mxu1 }
 0x5ad   : > { %v3801_v54 = vadd.f32 %v3778_v35, %v3610_v5 }
 0x5ae   : > { %v3780_v39 = vpop.f32.mrf.mxu0  ;;  %v3961_v4 = vpop.f32.mrf.mxu1 }
 0x5af   : > { %v3802_v30 = vadd.f32 %v3780_v39, %v3612_v25  ;;  %v3978_v10 = vadd.f32 %v3955_v13, %v3801_v54  ;;  %v3628_v25 = vadd.f32 %v3627_v33, %v3478_v45 }
 0x5b0   : > { %v3784_v48 = vpop.f32.mrf.mxu0  ;;  %v3963_v9 = vpop.f32.mrf.mxu1 }
 0x5b1   : > { %v3803_v42 = vadd.f32 %v3784_v48, %v3616_v34  ;;  %v3979_v2 = vadd.f32 %v3957_v50, %v3802_v30 }
 0x5b2   : > { %v3786_v7 = vpop.f32.mrf.mxu0  ;;  %v3967_v53 = vpop.f32.mrf.mxu1 }
 0x5b3   : > { %v3804_v40 = vadd.f32 %v3786_v7, %v3618_v56  ;;  %v3980_v59 = vadd.f32 %v3961_v4, %v3803_v42 }
 0x5b4   : > { %v3790_v15 = vpop.f32.mrf.mxu0  ;;  %v3969_v36 = vpop.f32.mrf.mxu1 }
 0x5b5   : > { %v3805_v41 = vadd.f32 %v3790_v15, %v3622_v24  ;;  %v3981_v34 = vadd.f32 %v3963_v9, %v3804_v40 }
 0x5b6   : > { %v3792_v31 = vpop.f32.mrf.mxu0  ;;  %v14953_v21 = vpop.f32.mrf.mxu1 }
 0x5b7   : > { %v3806_v20 = vadd.f32 %v3792_v31, %v3624_v19  ;;  %v3982_v30 = vadd.f32 %v3967_v53, %v3805_v41  ;;  %v4828_v41 = vld [vmem:[#allocation3 + $0x48] sm:$0xff] }
 0x5b8   : > { %v3796_v51 = vpop.f32.mrf.mxu0  ;;  %v14955_v12 = vpop.f32.mrf.mxu1 }
 0x5b9   : > { %19035 = vst [vmem:[#allocation21_spill] sm:$0xff] %v14955_v12  ;;  %v3807_v56 = vadd.f32 %v3796_v51, %v3628_v25  ;;  %v3983_v40 = vadd.f32 %v3969_v36, %v3806_v20 }
 0x5ba   : > { %v3798_v6 = vpop.f32.mrf.mxu0 }
 0x5bb   : > { %v3984_v15 = vadd.f32 %v14953_v21, %v3807_v56  ;;  %v14986_v56 = vpop.permute.xlu1 %5732 }
 0x5bc   : > { %v4064_v47 = vpop.f32.mrf.mxu0  ;;  %19045 = vst [vmem:[#allocation38_spill] sm:$0xff] %v14986_v56 }
 0x5bd   : > { %v4087_v46 = vadd.f32 %v4064_v47, %v3978_v10  ;;  %v3630_v10 = vadd.f32 %v14949_v23, %v14951_v44 }
 0x5be   : > { %v4066_v18 = vpop.f32.mrf.mxu0 }
 0x5bf   : > { %v4088_v8 = vadd.f32 %v4066_v18, %v3979_v2  ;;  %v3808_v33 = vadd.f32 %v3798_v6, %v3630_v10  ;;  %v19042_v10 = vld [vmem:[#allocation22_spill] sm:$0xff] }
 0x5c0   : > { %v4070_v61 = vpop.f32.mrf.mxu0  ;;  %v19037_v18 = vld [vmem:[#allocation21_spill] sm:$0xff] }
 0x5c1   : > { %v4089_v11 = vadd.f32 %v4070_v61, %v3980_v59  ;;  %v3985_v61 = vadd.f32 %v19037_v18, %v3808_v33  ;;  %v4832_v18 = vld [vmem:[#allocation3 + $0xa0] sm:$0xff] }
 0x5c2   : > { %v4072_v58 = vpop.f32.mrf.mxu0 }
 0x5c3   : > { %v4090_v24 = vadd.f32 %v4072_v58, %v3981_v34  ;;  %v4829_v34 = vld [vmem:[#allocation3 + $0x88] sm:$0xff] }
 0x5c4   : > { %v4076_v28 = vpop.f32.mrf.mxu0 }
 0x5c5   : > { %v4091_v45 = vadd.f32 %v4076_v28, %v3982_v30  ;;  %v4827_v28 = vld [vmem:[#allocation3 + $0x10] sm:$0xff] }
 0x5c6   : > { %v4078_v38 = vpop.f32.mrf.mxu0 }
 0x5c7   : > { %v4092_v7 = vadd.f32 %v4078_v38, %v3983_v40  ;;  %v19047_v40 = vld [vmem:[#allocation23_spill] sm:$0xff] }
 0x5c8   : > { %v14957_v16 = vpop.f32.mrf.mxu0  ;;  %v4253_v57 = vpop.f32.mrf.mxu1 }
 0x5c9   : > { %v4276_v35 = vadd.f32 %v4253_v57, %v4087_v46  ;;  %v4093_v36 = vadd.f32 %v14957_v16, %v3984_v15  ;;  %v4831_v15 = vld [vmem:[#allocation3 + $0x70] sm:$0xff] }
 0x5ca   : > { %v14959_v0 = vpop.f32.mrf.mxu0  ;;  %v4255_v52 = vpop.f32.mrf.mxu1 }
 0x5cb   : > { %19036 = vst [vmem:[#allocation26_spill] sm:$0xff] %v14959_v0  ;;  %v4277_v54 = vadd.f32 %v4255_v52, %v4088_v8 }
 0x5ce   : > { %v4259_v3 = vpop.f32.mrf.mxu1  ;;  %v4430_v32 = vpop.f32.mrf.mxu0 }
 0x5cf   : > { %v4453_v60 = vadd.f32 %v4430_v32, %v4276_v35  ;;  %v4278_v2 = vadd.f32 %v4259_v3, %v4089_v11 }
 0x5d0   : > { %v4261_v29 = vpop.f32.mrf.mxu1  ;;  %v4432_v26 = vpop.f32.mrf.mxu0 }
 0x5d1   : > { %v4454_v42 = vadd.f32 %v4432_v26, %v4277_v54  ;;  %v4279_v50 = vadd.f32 %v4261_v29, %v4090_v24 }
 0x5d2   : > { %v4436_v63 = vpop.f32.mrf.mxu0  ;;  %v19038_v32 = vld [vmem:[#allocation26_spill] sm:$0xff] }
 0x5d3   : > { %v4265_v27 = vpop.f32.mrf.mxu1  ;;  %v4455_v48 = vadd.f32 %v4436_v63, %v4278_v2  ;;  %v4094_v5 = vadd.f32 %v19038_v32, %v3985_v61 }
 0x5d4   : > { %v4438_v43 = vpop.f32.mrf.mxu0  ;;  %v4280_v9 = vadd.f32 %v4265_v27, %v4091_v45  ;;  %v19046_v45 = vld [vmem:[#allocation50_spill] sm:$0xff] }
 0x5d5   : > { %v4267_v1 = vpop.f32.mrf.mxu1  ;;  %v4456_v26 = vadd.f32 %v4438_v43, %v4279_v50  ;;  %v14972_v43 = vpop.permute.xlu0 %4943 }
 0x5d6   : > { %v4442_v22 = vpop.f32.mrf.mxu0  ;;  %v4281_v63 = vadd.f32 %v4267_v1, %v4092_v7 }
 0x5d7   : > { %v4271_v0 = vpop.f32.mrf.mxu1  ;;  %v4457_v58 = vadd.f32 %v4442_v22, %v4280_v9  ;;  %v19040_v22 = vld [vmem:[#allocation57_spill] sm:$0xff] }
 0x5d8   : > { %v4444_v12 = vpop.f32.mrf.mxu0  ;;  %v4282_v29 = vadd.f32 %v4271_v0, %v4093_v36  ;;  %v15014_v36 = vpop.permute.xlu1 %4961 }
 0x5d9   : > { %v4273_v37 = vpop.f32.mrf.mxu1  ;;  %v4458_v19 = vadd.f32 %v4444_v12, %v4281_v63  ;;  %v15005_v7 = vpop.permute.xlu0 %4925 }
 0x5da   : > { %v4448_v39 = vpop.f32.mrf.mxu0  ;;  %v4283_v11 = vadd.f32 %v4273_v37, %v4094_v5 }
 0x5db   : > { %v4595_v49 = vpop.f32.mrf.mxu1 }
 0x5dc   : > { %v14963_v14 = vpop.f32.mrf.mxu0  ;;  %v4618_v46 = vadd.f32 %v4595_v49, %v4453_v60  ;;  %v19041_v49 = vld [vmem:[#allocation12_spill] sm:$0xff] }
 0x5dd   : > { %v4597_v55 = vpop.f32.mrf.mxu1  ;;  %v14981_v0 = vsel %vm5117_vm3, %v19042_v10, %v19041_v49 }
 0x5de   : > { %v4768_v13 = vpop.f32.mrf.mxu0  ;;  %v4619_v4 = vadd.f32 %v4597_v55, %v4454_v42  ;;  %19043 = vst [vmem:[#allocation54_spill] sm:$0xff] %v14981_v0  ;;  %v4830_v42 = vld [vmem:[#allocation3 + $0x90] sm:$0xff] }
 0x5df   : > { %v4601_v23 = vpop.f32.mrf.mxu1  ;;  %v4791_v44 = vadd.f32 %v4768_v13, %v4618_v46  ;;  %v14997_v13 = vsel %vm4902_vm2, %v19047_v40, %v19046_v45 }
 0x5e0   : > { %v4770_v31 = vpop.f32.mrf.mxu0  ;;  %v4620_v51 = vadd.f32 %v4601_v23, %v4455_v48  ;;  %19048 = vst [vmem:[#allocation34_spill] sm:$0xff] %v14997_v13 }
 0x5e1   : > { %v4819_v53 = vadd.f32 %v14863_v17, %v4791_v44  ;;  %v4603_v6 = vpop.f32.mrf.mxu1  ;;  %v4792_v47 = vadd.f32 %v4770_v31, %v4619_v4  ;;  %v19050_v4 = vld [vmem:[#allocation53_spill] sm:$0xff] }
 0x5e2   : > { %v4774_v57 = vpop.f32.mrf.mxu0  ;;  %v4621_v52 = vadd.f32 %v4603_v6, %v4456_v26 }
 0x5e3   : > { %v4835_v38 = vadd.f32 %v4827_v28, %v4819_v53  ;;  %v4820_v27 = vadd.f32 %v14863_v17, %v4792_v47  ;;  %v4607_v21 = vpop.f32.mrf.mxu1  ;;  %v4793_v3 = vadd.f32 %v4774_v57, %v4620_v51  ;;  %v4459_v17 = vadd.f32 %v4448_v39, %v4282_v29  ;;  %v19053_v57 = vld [vmem:[#allocation51_spill] sm:$0xff] }
 0x5e4   : > { %v4622_v16 = vadd.f32 %v4607_v21, %v4457_v58  ;;  %v4776_v8 = vpop.f32.mrf.mxu0  ;;  %v4460_v39 = vadd.f32 %v14963_v14, %v4283_v11  ;;  %v19054_v21 = vld [vmem:[#allocation10_spill] sm:$0xff] }
 0x5e5   : > { %v14975_v59 = vmax.f32 %v4835_v38, 0.0  ;;  %v4836_v1 = vadd.f32 %v4828_v41, %v4820_v27  ;;  %v4821_v35 = vadd.f32 %v19040_v22, %v4793_v3  ;;  %v4609_v25 = vpop.f32.mrf.mxu1  ;;  %v4794_v20 = vadd.f32 %v4776_v8, %v4621_v52  ;;  %v4833_v27 = vld [vmem:[#allocation3 + $0x80] sm:$0xff]  ;;  %v19055_v3 = vld [vmem:[#allocation52_spill] sm:$0xff] }
 0x5e6   : > { %v4623_v54 = vadd.f32 %v4609_v25, %v4458_v19  ;;  %v4780_v60 = vpop.f32.mrf.mxu0  ;;  %v15026_v32 = vsel %vm5429_vm4, %v19055_v3, %v19054_v21  ;;  %v4834_v8 = vld [vmem:[#allocation3 + $0xb8] sm:$0xff]  ;;  %v15043_v25 = vpop.permute.xlu1 %4949 }
 0x5e7   : > { %19039 = vst [vmem:[#allocation13_spill] sm:$0xff] %v14975_v59  ;;  %4851 = vst [vmem:[#allocation3 + $0x10] sm:$0xff] %v14975_v59  ;;  %v14984_v12 = vmax.f32 %v4836_v1, 0.0  ;;  %v4837_v30 = vadd.f32 %v4829_v34, %v4821_v35  ;;  %v4822_v24 = vadd.f32 %v19040_v22, %v4794_v20  ;;  %v4613_v2 = vpop.f32.mrf.mxu1  ;;  %v4795_v37 = vadd.f32 %v4780_v60, %v4622_v16  ;;  %v15035_v16 = vpop.permute.xlu0 %4927  ;;  %v19060_v60 = vld [vmem:[#allocation27_spill] sm:$0xff] }
 0x5e8   : > { %4945 = vrot.lane.b32.xlu0 %v14975_v59, %s12434_s11  ;;  %v4624_v46 = vadd.f32 %v4613_v2, %v4459_v17  ;;  %v4782_v55 = vpop.f32.mrf.mxu0  ;;  %v5249_v33 = vmul.f32 %v14981_v0, %v14975_v59  ;;  %v4908_v26 = vmul.f32 %v14997_v13, %v14975_v59  ;;  %v5740_v63 = vmul.f32 %v14986_v56, %v14975_v59 }
 0x5e9   : > { %19044 = vst [vmem:[#allocation35_spill] sm:$0xff] %v14984_v12  ;;  %4852 = vst [vmem:[#allocation3 + $0x48] sm:$0xff] %v14984_v12  ;;  %v15000_v50 = vmax.f32 %v4837_v30, 0.0  ;;  %v4838_v48 = vadd.f32 %v4830_v42, %v4822_v24  ;;  %v4823_v23 = vadd.f32 %v19050_v4, %v4795_v37  ;;  %v4615_v44 = vpop.f32.mrf.mxu1  ;;  %v4796_v14 = vadd.f32 %v4782_v55, %v4623_v54 }
 0x5ea   : > { %4947 = vrot.lane.b32.xlu1 %v14984_v12, %s12434_s11  ;;  %v4625_v9 = vadd.f32 %v4615_v44, %v4460_v39  ;;  %v4786_v31 = vpop.f32.mrf.mxu0  ;;  %19056 = vst [vmem:[#allocation9_spill] sm:$0xff] %v15026_v32  ;;  %v5435_v41 = vmul.f32 %v15026_v32, %v14975_v59  ;;  %v4909_v35 = vmul.f32 %v19046_v45, %v14984_v12  ;;  %v15058_v54 = vpop.permute.xlu1 %4923 }
 0x5eb   : > { %19049 = vst [vmem:[#allocation33_spill] sm:$0xff] %v15000_v50  ;;  %4853 = vst [vmem:[#allocation3 + $0x88] sm:$0xff] %v15000_v50  ;;  %v15010_v51 = vmax.f32 %v4838_v48, 0.0  ;;  %v4839_v53 = vadd.f32 %v4831_v15, %v4823_v23  ;;  %v4824_v6 = vadd.f32 %v19050_v4, %v4796_v14  ;;  %v4797_v47 = vadd.f32 %v4786_v31, %v4624_v46  ;;  %v15055_v34 = vpop.permute.xlu0 %5298 }
 0x5ec   : > { %5282 = vrot.lane.b32.xlu0 %v5249_v33, %s12435_s10  ;;  %v4788_v61 = vpop.f32.mrf.mxu0  ;;  %v5917_v11 = vmul.f32 %v19047_v40, %v14975_v59  ;;  %v5436_v17 = vmul.f32 %v19054_v21, %v14984_v12  ;;  %v15063_v30 = vsel %vm430_vm5, %v14986_v56, %v19060_v60  ;;  %v5250_v2 = vmul.f32 %v19041_v49, %v14984_v12 }
 0x5ed   : > { %19051 = vst [vmem:[#allocation32_spill] sm:$0xff] %v15010_v51  ;;  %4854 = vst [vmem:[#allocation3 + $0x90] sm:$0xff] %v15010_v51  ;;  %v15019_v58 = vmax.f32 %v4839_v53, 0.0  ;;  %v4840_v28 = vadd.f32 %v4832_v18, %v4824_v6  ;;  %v4825_v38 = vadd.f32 %v19053_v57, %v4797_v47  ;;  %v4798_v52 = vadd.f32 %v4788_v61, %v4625_v9 }
 0x5ee   : > { %5095 = vrot.lane.b32.xlu1 %v4908_v26, %s12436_s6  ;;  %19061 = vst [vmem:[#allocation11_spill] sm:$0xff] %v15063_v30  ;;  %v5741_v24 = vmul.f32 %v15063_v30, %v14984_v12  ;;  %v5918_v39 = vmul.f32 %v14997_v13, %v14984_v12  ;;  %v15077_v42 = vpop.permute.xlu1 %5111  ;;  %v4911_v46 = vmul.f32 %v14997_v13, %v15000_v50 }
 0x5ef   : > { %19052 = vst [vmem:[#allocation39_spill] sm:$0xff] %v15019_v58  ;;  %4855 = vst [vmem:[#allocation3 + $0x70] sm:$0xff] %v15019_v58  ;;  %v15029_v5 = vmax.f32 %v4840_v28, 0.0  ;;  %v4841_v29 = vadd.f32 %v4833_v27, %v4825_v38  ;;  %v4826_v19 = vadd.f32 %v19053_v57, %v4798_v52  ;;  %v15072_v37 = vpop.permute.xlu0 %5292  ;;  %v5252_v33 = vmul.f32 %v14981_v0, %v15000_v50 }
 0x5f0   : > { %5772 = vrot.lane.b32.xlu0 %v5740_v63, %s12417_s9  ;;  %v5438_v4 = vmul.f32 %v15026_v32, %v15000_v50  ;;  %v5920_v23 = vmul.f32 %v19047_v40, %v15000_v50  ;;  %v5743_v14 = vmul.f32 %v14986_v56, %v15000_v50  ;;  %v5439_v9 = vmul.f32 %v19054_v21, %v15010_v51 }
 0x5f1   : > { %19057 = vst [vmem:[#allocation28_spill] sm:$0xff] %v15029_v5  ;;  %4856 = vst [vmem:[#allocation3 + $0xa0] sm:$0xff] %v15029_v5  ;;  %v15038_v1 = vmax.f32 %v4841_v29, 0.0  ;;  %v4842_v22 = vadd.f32 %v4834_v8, %v4826_v19  ;;  %v5744_v26 = vmul.f32 %v15063_v30, %v15010_v51  ;;  %v4912_v6 = vmul.f32 %v19046_v45, %v15010_v51 }
 0x5f2   : > { %5468 = vrot.lane.b32.xlu1 %v5435_v41, %s12437_s19  ;;  %v15089_v48 = vpop.permute.xlu1 %5105  ;;  %v5253_v18 = vmul.f32 %v19041_v49, %v15010_v51  ;;  %v5255_v63 = vmul.f32 %v14981_v0, %v15019_v58  ;;  %v5921_v28 = vmul.f32 %v14997_v13, %v15010_v51  ;;  %v5746_v38 = vmul.f32 %v14986_v56, %v15019_v58 }
 0x5f3   : > { %19058 = vst [vmem:[#allocation31_spill] sm:$0xff] %v15038_v1  ;;  %4857 = vst [vmem:[#allocation3 + $0x80] sm:$0xff] %v15038_v1  ;;  %v15046_v20 = vmax.f32 %v4842_v22, 0.0  ;;  %v15083_v55 = vpop.permute.xlu0 %5093  ;;  %v4914_v27 = vmul.f32 %v14997_v13, %v15019_v58  ;;  %v5923_v29 = vmul.f32 %v19047_v40, %v15019_v58  ;;  %v5441_v8 = vmul.f32 %v15026_v32, %v15019_v58 }
 0x5f4   : > { %5097 = vrot.lane.b32.xlu0 %v4909_v35, %s12436_s6  ;;  %v5256_v22 = vmul.f32 %v19041_v49, %v15029_v5 }
 0x5f5   : > { %19059 = vst [vmem:[#allocation36_spill] sm:$0xff] %v15046_v20  ;;  %4858 = vst [vmem:[#allocation3 + $0xb8] sm:$0xff] %v15046_v20 }
 0x5f6   : > { %5949 = vrot.lane.b32.xlu1 %v5917_v11, %s12436_s6  ;;  %v15102_v15 = vpop.permute.xlu1 %5099 }
 0x5f7   : > { %v15097_v44 = vpop.permute.xlu0 %5280 }
 0x5f8   : > { %5470 = vrot.lane.b32.xlu0 %v5436_v17, %s12437_s19  ;;  %19062 = vst [vmem:[#allocation47_spill] sm:$0xff] %v15097_v44  ;;  %v4915_v17 = vmul.f32 %v19046_v45, %v15029_v5 }
 0x5fa   : > { %4951 = vrot.lane.b32.xlu1 %v15000_v50, %s12434_s11  ;;  %v15114_v53 = vpop.permute.xlu1 %4929 }
 0x5fb   : > { %v15108_v31 = vpop.permute.xlu0 %5262 }
 0x5fc   : > { %5774 = vrot.lane.b32.xlu0 %v5741_v24, %s12417_s9  ;;  %19063 = vst [vmem:[#allocation30_spill] sm:$0xff] %v15108_v31  ;;  %v5442_v24 = vmul.f32 %v19054_v21, %v15029_v5 }
 0x5fe   : > { %5284 = vrot.lane.b32.xlu1 %v5250_v2, %s12435_s10  ;;  %v15126_v61 = vpop.permute.xlu1 %5286 }
 0x5ff   : > { %v15120_v47 = vpop.permute.xlu0 %5264 }
 0x600   : > { %5951 = vrot.lane.b32.xlu0 %v5918_v39, %s12436_s6  ;;  %19064 = vst [vmem:[#allocation59_spill] sm:$0xff] %v15120_v47  ;;  %v15401_v47 = vld [vmem:[%s18598_s3 + $0x138] sm:$0xff] }
 0x602   : > { %5101 = vrot.lane.b32.xlu1 %v4911_v46, %s12436_s6  ;;  %v15139_v52 = vpop.permute.xlu1 %5260  ;;  %v5258_v46 = vmul.f32 %v14981_v0, %v15038_v1 }
 0x603   : > { %v15134_v57 = vpop.permute.xlu0 %5472  ;;  %19065 = vst [vmem:[#allocation44_spill] sm:$0xff] %v15139_v52 }
 0x604   : > { %4953 = vrot.lane.b32.xlu0 %v15010_v51, %s12434_s11 }
 0x606   : > { %5288 = vrot.lane.b32.xlu1 %v5252_v33, %s12435_s10  ;;  %v15150_v41 = vpop.permute.xlu1 %5484  ;;  %v5747_v33 = vmul.f32 %v15063_v30, %v15029_v5 }
 0x607   : > { %v15147_v19 = vpop.permute.xlu0 %5466 }
 0x608   : > { %5474 = vrot.lane.b32.xlu0 %v5438_v4, %s12437_s19  ;;  %v5749_v4 = vmul.f32 %v14986_v56, %v15038_v1 }
 0x60a   : > { %5955 = vrot.lane.b32.xlu1 %v5920_v23, %s12436_s6  ;;  %v15161_v11 = vpop.permute.xlu1 %5478 }
 0x60b   : > { %v15159_v35 = vpop.permute.xlu0 %5448 }
 0x60c   : > { %5778 = vrot.lane.b32.xlu0 %v5743_v14, %s12417_s9  ;;  %19066 = vst [vmem:[#allocation49_spill] sm:$0xff] %v15159_v35 }
 0x60e   : > { %5476 = vrot.lane.b32.xlu1 %v5439_v9, %s12437_s19  ;;  %v15173_v39 = vpop.permute.xlu1 %5266  ;;  %v5924_v9 = vmul.f32 %v14997_v13, %v15029_v5 }
 0x60f   : > { %v15171_v2 = vpop.permute.xlu0 %5794  ;;  %19068 = vst [vmem:[#allocation41_spill] sm:$0xff] %v15173_v39 }
 0x610   : > { %4957 = vrot.lane.b32.xlu0 %v15019_v58, %s12434_s11  ;;  %19067 = vst [vmem:[#allocation37_spill] sm:$0xff] %v15171_v2  ;;  %v6269_v2 = vmul.f32 %v14981_v0, %v15046_v20 }
 0x612   : > { %5780 = vrot.lane.b32.xlu1 %v5744_v26, %s12417_s9  ;;  %v15186_v14 = vpop.permute.xlu1 %5446  ;;  %v5926_v26 = vmul.f32 %v19047_v40, %v15038_v1 }
 0x613   : > { %v15184_v23 = vpop.permute.xlu0 %5788 }
 0x614   : > { %5103 = vrot.lane.b32.xlu0 %v4912_v6, %s12436_s6  ;;  %19069 = vst [vmem:[#allocation46_spill] sm:$0xff] %v15184_v23 }
 0x616   : > { %4959 = vrot.lane.b32.xlu1 %v15029_v5, %s12434_s11 }
 0x617   : > { %v15195_v6 = vpop.permute.xlu0 %5971 }
 0x618   : > { %5290 = vrot.lane.b32.xlu0 %v5253_v18, %s12435_s10  ;;  %19070 = vst [vmem:[#allocation19_spill] sm:$0xff] %v15195_v6  ;;  %v4917_v18 = vmul.f32 %v14997_v13, %v15038_v1  ;;  %v5927_v6 = vmul.f32 %v14997_v13, %v15046_v20 }
 0x61a   : > { %5294 = vrot.lane.b32.xlu1 %v5255_v63, %s12435_s10  ;;  %v15199_v63 = vpop.permute.xlu1 %5450 }
 0x61b   : > { %19071 = vst [vmem:[#allocation48_spill] sm:$0xff] %v15199_v63  ;;  %v15422_v63 = vld [vmem:[#allocation4 + $0x70] sm:$0xff] }
 0x61c   : > { %5957 = vrot.lane.b32.xlu0 %v5921_v28, %s12436_s6  ;;  %v4918_v28 = vmul.f32 %v19046_v45, %v15046_v20 }
 0x61e   : > { %5784 = vrot.lane.b32.xlu1 %v5746_v38, %s12417_s9  ;;  %v5444_v38 = vmul.f32 %v15026_v32, %v15038_v1  ;;  %v6266_v32 = vmul.f32 %v14981_v0, %v15029_v5 }
 0x620   : > { %5107 = vrot.lane.b32.xlu0 %v4914_v27, %s12436_s6  ;;  %v15207_v27 = vpop.permute.xlu0 %5782 }
 0x621   : > { %19072 = vst [vmem:[#allocation24_spill] sm:$0xff] %v15207_v27 }
 0x622   : > { %5961 = vrot.lane.b32.xlu1 %v5923_v29, %s12436_s6  ;;  %v15210_v29 = vpop.permute.xlu1 %5452 }
 0x623   : > { %19073 = vst [vmem:[#allocation25_spill] sm:$0xff] %v15210_v29 }
 0x624   : > { %5480 = vrot.lane.b32.xlu0 %v5441_v8, %s12437_s19  ;;  %v19074_v8 = vld [vmem:[#allocation14_spill] sm:$0xff] }
 0x626   : > { %4963 = vrot.lane.b32.xlu1 %v15038_v1, %s12434_s11 }
 0x628   : > { %5296 = vrot.lane.b32.xlu0 %v5256_v22, %s12435_s10  ;;  %v15219_v22 = vld [vmem:[%s18598_s3 + $0xf8] sm:$0xff] }
 0x629   : > { %19075 = vst [vmem:[#allocation40_spill] sm:$0xff] %v15219_v22 }
 0x62a   : > { %5109 = vrot.lane.b32.xlu1 %v4915_v17, %s12436_s6  ;;  %v15221_v17 = vpop.permute.xlu0 %5965 }
 0x62b   : > { %19076 = vst [vmem:[#allocation42_spill] sm:$0xff] %v15221_v17 }
 0x62c   : > { %4965 = vrot.lane.b32.xlu0 %v15046_v20, %s12434_s11 }
 0x62e   : > { %5482 = vrot.lane.b32.xlu1 %v5442_v24, %s12437_s19  ;;  %v15225_v24 = vpop.permute.xlu1 %5776 }
 0x62f   : > { %19077 = vst [vmem:[#allocation20_spill] sm:$0xff] %v15225_v24 }
 0x630   : > { %5300 = vrot.lane.b32.xlu0 %v5258_v46, %s12435_s10  ;;  %v19078_v46 = vld [vmem:[#allocation15_spill] sm:$0xff] }
 0x632   : > { %5786 = vrot.lane.b32.xlu1 %v5747_v33, %s12417_s9  ;;  %v15231_v33 = vpop.permute.xlu0 %5752 }
 0x633   : > { %19079 = vst [vmem:[#allocation61_spill] sm:$0xff] %v15231_v33 }
 0x634   : > { %5790 = vrot.lane.b32.xlu0 %v5749_v4, %s12417_s9  ;;  %v5445_v4 = vmul.f32 %v19054_v21, %v15046_v20  ;;  %v19085_v21 = vld [vmem:[#allocation17_spill] sm:$0xff] }
 0x636   : > { %5963 = vrot.lane.b32.xlu1 %v5924_v9, %s12436_s6  ;;  %v15237_v9 = vpop.permute.xlu1 %5959 }
 0x637   : > { %19080 = vst [vmem:[#allocation45_spill] sm:$0xff] %v15237_v9 }
 0x638   : > { %5967 = vrot.lane.b32.xlu0 %v5926_v26, %s12436_s6  ;;  %v5259_v26 = vmul.f32 %v19041_v49, %v15046_v20 }
 0x63a   : > { %5113 = vrot.lane.b32.xlu1 %v4917_v18, %s12436_s6  ;;  %v6270_v18 = vmul.f32 %v19074_v8, %v19041_v49 }
 0x63c   : > { %5115 = vrot.lane.b32.xlu0 %v4918_v28, %s12436_s6  ;;  %v15245_v28 = vpop.permute.xlu0 %5929 }
 0x63d   : > { %19081 = vst [vmem:[#allocation55_spill] sm:$0xff] %v15245_v28 }
 0x63e   : > { %5486 = vrot.lane.b32.xlu1 %v5444_v38, %s12437_s19  ;;  %v15248_v38 = vpop.permute.xlu1 %5953 }
 0x63f   : > { %19082 = vst [vmem:[#allocation56_spill] sm:$0xff] %v15248_v38 }
 0x640   : > { %6136 = vrot.lane.b32.xlu0 %v19074_v8, %s12434_s11 }
 0x642   : > { %6134 = vrot.lane.b32.xlu1 %v15046_v20, %s12434_s11  ;;  %v15259_v8 = vpop.permute.xlu1 %5754 }
 0x643   : > { %19084 = vst [vmem:[#allocation60_spill] sm:$0xff] %v15259_v8 }
 0x644   : > { %6132 = vrot.lane.b32.xlu0 %v15038_v1, %s12434_s11 }
 0x646   : > { %5756 = vrot.lane.b32.xlu1 %v15219_v22, %s12426_s23 }
 0x648   : > { %6130 = vrot.lane.b32.xlu0 %v19078_v46, %s12434_s11 }
 0x64a   : > { %6128 = vrot.lane.b32.xlu1 %v15029_v5, %s12434_s11 }
 0x64c   : > { %5488 = vrot.lane.b32.xlu0 %v5445_v4, %s12437_s19  ;;  %v15254_v4 = vpop.permute.xlu0 %5931 }
 0x64d   : > { %19083 = vst [vmem:[#allocation43_spill] sm:$0xff] %v15254_v4  ;;  %v15277_v4 = vld [vmem:[%s18598_s3 + $0x110] sm:$0xff] }
 0x64e   : > { %5302 = vrot.lane.b32.xlu1 %v5259_v26, %s12435_s10  ;;  %v6268_v26 = vmul.f32 %v19042_v10, %v15038_v1  ;;  %19086 = vst [vmem:[#allocation58_spill] sm:$0xff] %v15277_v4 }
 0x650   : > { %6305 = vrot.lane.b32.xlu0 %v6270_v18, %s12435_s10 }
 0x652   : > { %5933 = vrot.lane.b32.xlu1 %v15219_v22, %s12434_s11 }
 0x654   : > { %6126 = vrot.lane.b32.xlu0 %v15019_v58, %s12434_s11 }
 0x656   : > { %6301 = vrot.lane.b32.xlu1 %v6268_v26, %s12435_s10  ;;  %v6267_v26 = vmul.f32 %v19078_v46, %v19041_v49  ;;  %v6265_v46 = vmul.f32 %v19042_v10, %v15019_v58 }
 0x658   : > { %6122 = vrot.lane.b32.xlu0 %v15010_v51, %s12434_s11 }
 0x65a   : > { %v15263_v18 = vpop.permute.xlu0 %4945  ;;  %6124 = vrot.lane.b32.xlu1 %v19085_v21, %s12434_s11 }
 0x65c   : > { %6297 = vrot.lane.b32.xlu0 %v6266_v32, %s12435_s10  ;;  %v15270_v56 = vpop.permute.xlu1 %4947 }
 0x65e   : > { %v15279_v28 = vpop.permute.xlu0 %5282  ;;  %6299 = vrot.lane.b32.xlu1 %v6267_v26, %s12435_s10  ;;  %v19088_v26 = vld [vmem:[#allocation29_spill] sm:$0xff] }
 0x660   : > { %5758 = vrot.lane.b32.xlu0 %v15277_v4, %s12426_s23  ;;  %v15284_v8 = vpop.permute.xlu1 %5095 }
 0x662   : > { %v15286_v32 = vpop.permute.xlu0 %5772  ;;  %6120 = vrot.lane.b32.xlu1 %v15000_v50, %s12434_s11 }
 0x663   : > { %19087 = vst [vmem:[#allocation21_spill] sm:$0xff] %v15286_v32  ;;  %v5750_v32 = vmul.f32 %v15063_v30, %v15046_v20 }
 0x664   : > { %6295 = vrot.lane.b32.xlu0 %v6265_v46, %s12435_s10  ;;  %v15293_v38 = vpop.permute.xlu1 %5468  ;;  %v6264_v46 = vmul.f32 %v19085_v21, %v19041_v49 }
 0x666   : > { %v15295_v33 = vpop.permute.xlu0 %5097  ;;  %6116 = vrot.lane.b32.xlu1 %v14984_v12, %s12434_s11 }
 0x668   : > { %6118 = vrot.lane.b32.xlu0 %v19088_v26, %s12434_s11  ;;  %v15301_v9 = vpop.permute.xlu1 %5949 }
 0x669   : > { %19089 = vst [vmem:[#allocation26_spill] sm:$0xff] %v15301_v9  ;;  %v19092_v9 = vld [vmem:[#allocation18_spill] sm:$0xff] }
 0x66a   : > { %v15305_v17 = vpop.permute.xlu0 %5470  ;;  %5792 = vrot.lane.b32.xlu1 %v5750_v32, %s12417_s9  ;;  %v6263_v32 = vmul.f32 %v14981_v0, %v15010_v51  ;;  %v15433_v51 = vld [vmem:[%s18598_s3 + $0x120] sm:$0xff] }
 0x66c   : > { %6293 = vrot.lane.b32.xlu0 %v6264_v46, %s12435_s10  ;;  %v15311_v24 = vpop.permute.xlu1 %4951  ;;  %v6260_v46 = vmul.f32 %v14981_v0, %v14984_v12  ;;  %v15414_v12 = vld [vmem:[%s18598_s3 + $0x150] sm:$0xff] }
 0x66e   : > { %v15315_v27 = vpop.permute.xlu0 %5774  ;;  %5969 = vrot.lane.b32.xlu1 %v5927_v6, %s12436_s6 }
 0x66f   : > { %19090 = vst [vmem:[#allocation57_spill] sm:$0xff] %v15315_v27 }
 0x670   : > { %6114 = vrot.lane.b32.xlu0 %v14975_v59, %s12434_s11  ;;  %v15320_v30 = vpop.permute.xlu1 %5284 }
 0x672   : > { %v15324_v21 = vpop.permute.xlu0 %5951  ;;  %6291 = vrot.lane.b32.xlu1 %v6263_v32, %s12435_s10  ;;  %v6262_v32 = vmul.f32 %v19042_v10, %v15000_v50 }
 0x673   : > { %19091 = vst [vmem:[#allocation50_spill] sm:$0xff] %v15324_v21 }
 0x674   : > { %6285 = vrot.lane.b32.xlu0 %v6260_v46, %s12435_s10  ;;  %v15330_v13 = vpop.permute.xlu1 %5101  ;;  %v19093_v46 = vld [vmem:[#allocation16_spill] sm:$0xff] }
 0x676   : > { %v15332_v6 = vpop.permute.xlu0 %4953  ;;  %5935 = vrot.lane.b32.xlu1 %v15277_v4, %s12434_s11 }
 0x678   : > { %6094 = vrot.lane.b32.xlu0 %v19092_v9, %s12432_s22  ;;  %v15338_v27 = vpop.permute.xlu1 %5288 }
 0x67a   : > { %v15342_v21 = vpop.permute.xlu0 %5474  ;;  %6289 = vrot.lane.b32.xlu1 %v6262_v32, %s12435_s10  ;;  %v6261_v32 = vmul.f32 %v19088_v26, %v19041_v49 }
 0x67c   : > { %6096 = vrot.lane.b32.xlu0 %v19093_v46, %s12432_s22  ;;  %v15347_v23 = vpop.permute.xlu1 %5955  ;;  %v12066_v46 = vld [vmem:[%s18599_s4 + $0x50] sm:$0xff] }
 0x67d   : > { %19094 = vst [vmem:[#allocation23_spill] sm:$0xff] %v15347_v23 }
 0x67e   : > { %v15351_v39 = vpop.permute.xlu0 %5778  ;;  %6303 = vrot.lane.b32.xlu1 %v6269_v2, %s12435_s10  ;;  %v6259_v2 = vmul.f32 %v19042_v10, %v14975_v59 }
 0x67f   : > { %19095 = vst [vmem:[#allocation53_spill] sm:$0xff] %v15351_v39 }
 0x680   : > { %6100 = vrot.lane.b32.xlu0 %v15277_v4, %s12432_s22  ;;  %v15356_v9 = vpop.permute.xlu1 %5476  ;;  %v12064_v4 = vld [vmem:[%s18599_s4 + $0x40] sm:$0xff] }
 0x682   : > { %v4958_v23 = vpop.permute.xlu0 %4957  ;;  %6287 = vrot.lane.b32.xlu1 %v6261_v32, %s12435_s10  ;;  %v15378_v32 = vld [vmem:[#allocation4 + $0x10] sm:$0xff] }
 0x683   : > { %v6834_v5 = vmul.f32 %v15378_v32, %v19042_v10 }
 0x684   : > { %6444 = vperm.xlu0 %12353, %v12066_v46   ;;  %v15364_v0 = vpop.permute.xlu1 %5780  ;;  %v12067_v46 = vld [vmem:[%s18599_s4 + $0x58] sm:$0xff] }
 0x685   : > { %19096 = vst [vmem:[#allocation51_spill] sm:$0xff] %v15364_v0 }
 0x686   : > { %v15371_v39 = vpop.permute.xlu0 %5103  ;;  %6283 = vrot.lane.b32.xlu1 %v6259_v2, %s12435_s10  ;;  %v12065_v2 = vld [vmem:[%s18599_s4 + $0x48] sm:$0xff] }
 0x688   : > { %6434 = vperm.xlu0 %12353, %v12064_v4   ;;  %v4960_v26 = vpop.permute.xlu1 %4959  ;;  %v15389_v4 = vld [vmem:[#allocation4 + $0x98] sm:$0xff] }
 0x689   : > { %v4973_v52 = vsel %vm4967_vm6, %v4958_v23, %v4960_v26  ;;  %v19100_v26 = vmov 0.0  }
 0x68a   : > { %v15374_v49 = vpop.permute.xlu0 %5290  ;;  %6098 = vrot.lane.b32.xlu1 %v15219_v22, %s12432_s22 }
 0x68c   : > { %6554 = vrot.lane.b32.xlu0 %v15378_v32, %s12434_s11  ;;  %v15385_v0 = vpop.permute.xlu1 %5294 }
 0x68e   : > { %v15387_v29 = vpop.permute.xlu0 %5957  ;;  %6449 = vperm.xlu1 %12354, %v12067_v46  }
 0x68f   : > { %19097 = vst [vmem:[#allocation52_spill] sm:$0xff] %v15387_v29  ;;  %v15409_v29 = vld [vmem:[#allocation4 + $0x88] sm:$0xff] }
 0x690   : > { %6542 = vrot.lane.b32.xlu0 %v15389_v4, %s12434_s11  ;;  %v15396_v22 = vpop.permute.xlu1 %5784 }
 0x691   : > { %19098 = vst [vmem:[#allocation27_spill] sm:$0xff] %v15396_v22 }
 0x692   : > { %v15403_v59 = vpop.permute.xlu0 %5107  ;;  %6439 = vperm.xlu1 %12354, %v12065_v2  }
 0x694   : > { %6524 = vrot.lane.b32.xlu0 %v15401_v47, %s12426_s23  ;;  %v15407_v46 = vpop.permute.xlu1 %5961 }
 0x695   : > { %19099 = vst [vmem:[#allocation14_spill] sm:$0xff] %v15407_v46  ;;  %v6837_v46 = vmul.f32 %v15409_v29, %v19042_v10 }
 0x696   : > { %v15416_v22 = vpop.permute.xlu0 %5480  ;;  %6560 = vrot.lane.b32.xlu1 %v15409_v29, %s12434_s11 }
 0x698   : > { %6526 = vrot.lane.b32.xlu0 %v15414_v12, %s12426_s23  ;;  %v4964_v2 = vpop.permute.xlu1 %4963 }
 0x699   : > { %v4974_v20 = vsel %vm4967_vm6, %v15014_v36, %v4964_v2  ;;  %v4971_v36 = vsel %vm4967_vm6, %v15311_v24, %v15332_v6  ;;  %v4968_v6 = vsel %vm4967_vm6, %v14972_v43, %v15263_v18  ;;  %v15492_v43 = vld [vmem:[%s18598_s3 + $0x168] sm:$0xff] }
 0x69a   : > { %v15424_v50 = vpop.permute.xlu0 %5296  ;;  %6548 = vrot.lane.b32.xlu1 %v15422_v63, %s12434_s11 }
 0x69c   : > { %6878 = vrot.lane.b32.xlu0 %v6837_v46, %s12435_s10  ;;  %v5110_v31 = vpop.permute.xlu1 %5109  ;;  %v6515_v46 = vmul.f32 %v15409_v29, %v19047_v40 }
 0x69e   : > { %v4966_v58 = vpop.permute.xlu0 %4965  ;;  %6522 = vrot.lane.b32.xlu1 %v15433_v51, %s12426_s23 }
 0x69f   : > { %v4975_v35 = vsel %vm4967_vm6, %v4964_v2, %v4966_v58  ;;  %v4972_v58 = vsel %vm4967_vm6, %v14965_v62, %v4958_v23  ;;  %v6512_v62 = vmul.f32 %v15378_v32, %v19047_v40 }
 0x6a0   : > { %6872 = vrot.lane.b32.xlu0 %v6834_v5, %s12435_s10  ;;  %5016 = vmatprep.subr.mxu1 %v4975_v35  ;;  %v15442_v1 = vpop.permute.xlu1 %5482  ;;  %v6506_v5 = vmul.f32 %v15389_v4, %v19047_v40  ;;  %v4969_v35 = vsel %vm4967_vm6, %v15263_v18, %v15270_v56  ;;  %v6509_v56 = vmul.f32 %v15422_v63, %v19047_v40 }
 0x6a1   : > { %5017 = vmatpush1.msra.mxu1 %v4974_v20 }
 0x6a2   : > { %v15449_v44 = vpop.permute.xlu0 %5300  ;;  %6709 = vrot.lane.b32.xlu1 %v6515_v46, %s12436_s6  ;;  %5018 = vmatprep.subr.mxu1 %v4973_v52  ;;  %v4970_v52 = vsel %vm4967_vm6, %v15043_v25, %v15311_v24  ;;  %v6828_v25 = vmul.f32 %v15389_v4, %v19042_v10 }
 0x6a3   : > { %5019 = vmatpush1.msra.mxu1 %v4972_v58 }
 0x6a4   : > { %6691 = vrot.lane.b32.xlu0 %v6506_v5, %s12436_s6  ;;  %5020 = vmatprep.subr.mxu1 %v4971_v36  ;;  %v15460_v20 = vpop.permute.xlu1 %5786  ;;  %v6831_v5 = vmul.f32 %v15422_v63, %v19042_v10 }
 0x6a5   : > { %5021 = vmatpush1.msra.mxu1 %v4970_v52  ;;  %v5123_v52 = vsel %vm5117_vm3, %v15403_v59, %v5110_v31  ;;  %v5120_v31 = vsel %vm5117_vm3, %v15102_v15, %v15330_v13  ;;  %v7014_v15 = vmul.f32 %v15409_v29, %v19055_v3  ;;  %v7011_v29 = vmul.f32 %v15378_v32, %v19055_v3  ;;  %v12373_v32 = vld [vmem:[%s18598_s3 + $0xf0] sm:$0xff] }
 0x6a6   : > { %v15470_v23 = vpop.permute.xlu0 %5790  ;;  %6703 = vrot.lane.b32.xlu1 %v6512_v62, %s12436_s6  ;;  %5022 = vmatprep.subr.mxu1 %v4969_v35  ;;  %v5122_v62 = vsel %vm5117_vm3, %v15089_v48, %v15403_v59  ;;  %v5119_v59 = vsel %vm5117_vm3, %v15284_v8, %v15295_v33  ;;  %v7005_v48 = vmul.f32 %v15389_v4, %v19055_v3  ;;  %v15568_v4 = vld [vmem:[#allocation4 + $0x8] sm:$0xff] }
 0x6a7   : > { %5023 = vmatpush1.msra.mxu1 %v4968_v6 }
 0x6a8   : > { %6860 = vrot.lane.b32.xlu0 %v6828_v25, %s12435_s10  ;;  %12068 = vmatmul.mubr.msk.f32.vlgmr.msra.gmra.mxu1 %vm1751_vm0, %v15058_v54  ;;  %v15481_v24 = vpop.permute.xlu1 %5963 }
 0x6a9   : > { %5062 = vmatprep.mubr.f32.mxu1 %v19100_v26 }
 0x6aa   : > { %v15486_v2 = vpop.permute.xlu0 %5967  ;;  %6697 = vrot.lane.b32.xlu1 %v6509_v56, %s12436_s6 }
 0x6ac   : > { %6842 = vrot.lane.b32.xlu0 %v15401_v47, %s12434_s11  ;;  %12069 = vmatmul.mubr.msk.f32.gmra.mxu1 %vm1751_vm0, %v15005_v7  ;;  %v5114_v54 = vpop.permute.xlu1 %5113 }
 0x6ad   : > { %5068 = vmatprep.mubr.f32.mxu1 %v19100_v26  ;;  %v5124_v7 = vsel %vm5117_vm3, %v15077_v42, %v5114_v54  ;;  %v5121_v42 = vsel %vm5117_vm3, %v15330_v13, %v15371_v39  ;;  %v12371_v39 = vld [vmem:[%s18598_s3 + $0xc0] sm:$0xff] }
 0x6ae   : > { %v5116_v18 = vpop.permute.xlu0 %5115  ;;  %6528 = vrot.lane.b32.xlu1 %v15492_v43, %s12426_s23 }
 0x6af   : > { %v5125_v46 = vsel %vm5117_vm3, %v5114_v54, %v5116_v18 }
 0x6b0   : > { %6844 = vrot.lane.b32.xlu0 %v15414_v12, %s12434_s11  ;;  %12070 = vmatmul.mubr.msk.f32.gmra.mxu1 %vm1751_vm0, %v15035_v16  ;;  %v5487_v58 = vpop.permute.xlu1 %5486  ;;  %v7008_v16 = vmul.f32 %v15422_v63, %v19055_v3 }
 0x6b1   : > { %5166 = vmatprep.subr.mxu0 %v5125_v46  ;;  %5074 = vmatprep.mubr.f32.mxu1 %v19100_v26  ;;  %v5496_v56 = vsel %vm430_vm5, %v15150_v41, %v5487_v58  ;;  %v5495_v46 = vsel %vm430_vm5, %v15416_v22, %v15442_v1  ;;  %v5310_v41 = vsel %vm4902_vm2, %v15055_v34, %v15449_v44  ;;  %v12374_v34 = vld [vmem:[%s18598_s3 + $0x108] sm:$0xff] }
 0x6b2   : > { %5167 = vmatpush1.msra.mxu0 %v5124_v7  ;;  %v15511_v36 = vpop.permute.xlu0 %6136  ;;  %6866 = vrot.lane.b32.xlu1 %v6831_v5, %s12435_s10  ;;  %v15591_v5 = vld [vmem:[#allocation4 + $0x58] sm:$0xff]  ;;  %v5494_v7 = vsel %vm430_vm5, %v15161_v11, %v15416_v22  ;;  %v5309_v1 = vsel %vm4902_vm2, %v15385_v0, %v15424_v50  ;;  %v5308_v11 = vsel %vm4902_vm2, %v15072_v37, %v15385_v0 }
 0x6b3   : > { %5168 = vmatprep.subr.mxu0 %v5123_v52  ;;  %19101 = vst [vmem:[#allocation15_spill] sm:$0xff] %v15591_v5  ;;  %v5492_v50 = vsel %vm430_vm5, %v15134_v57, %v15342_v21  ;;  %v5491_v0 = vsel %vm430_vm5, %v15293_v38, %v15305_v17  ;;  %v5306_v57 = vsel %vm4902_vm2, %v15126_v61, %v15338_v27  ;;  %v19102_v61 = vld [vmem:[#allocation47_spill] sm:$0xff] }
 0x6b4   : > { %5169 = vmatpush1.msra.mxu0 %v5122_v62  ;;  %7043 = vrot.lane.b32.xlu0 %v7008_v16, %s12437_s19  ;;  %v15525_v35 = vpop.permute.xlu1 %6134  ;;  %v5305_v17 = vsel %vm4902_vm2, %v15279_v28, %v15320_v30  ;;  %v19104_v16 = vld [vmem:[#allocation44_spill] sm:$0xff]  ;;  %v19106_v62 = vld [vmem:[#allocation31_spill] sm:$0xff] }
 0x6b5   : > { %12071 = vmatmul.mubr.msk.f32.gmra.mxu1 %vm1751_vm0, %v15114_v53  ;;  %5170 = vmatprep.subr.mxu0 %v5121_v42  ;;  %v5118_v53 = vsel %vm5117_vm3, %v15083_v55, %v15284_v8  ;;  %v12372_v8 = vld [vmem:[%s18598_s3 + $0xd8] sm:$0xff]  ;;  %v19105_v30 = vld [vmem:[#allocation36_spill] sm:$0xff]  ;;  %v19107_v42 = vld [vmem:[#allocation49_spill] sm:$0xff] }
 0x6b6   : > { %5171 = vmatpush1.msra.mxu0 %v5120_v31  ;;  %v15532_v63 = vpop.permute.xlu0 %6132  ;;  %6840 = vrot.lane.b32.xlu1 %v15433_v51, %s12434_s11  ;;  %v19108_v31 = vld [vmem:[#allocation28_spill] sm:$0xff] }
 0x6b7   : > { %5172 = vmatprep.subr.mxu0 %v5119_v59  ;;  %5392 = vmatprep.mubr.f32.mxu1 %v19100_v26  ;;  %v19109_v59 = vld [vmem:[#allocation39_spill] sm:$0xff] }
 0x6b8   : > { %5173 = vmatpush1.msra.mxu0 %v5118_v53  ;;  %7037 = vrot.lane.b32.xlu0 %v7005_v48, %s12437_s19  ;;  %v15546_v13 = vpop.permute.xlu1 %5756  ;;  %v19110_v48 = vld [vmem:[#allocation30_spill] sm:$0xff]  ;;  %v19111_v53 = vld [vmem:[#allocation32_spill] sm:$0xff] }
 0x6b9   : > { %12072 = vmatmul.mubr.msk.f32.vlgmr.msra.gmra.mxu0 %vm1751_vm0, %v12371_v39  ;;  %v19112_v39 = vld [vmem:[#allocation33_spill] sm:$0xff] }
 0x6ba   : > { %v15554_v33 = vpop.permute.xlu0 %6130  ;;  %7055 = vrot.lane.b32.xlu1 %v7014_v15, %s12437_s19  ;;  %5212 = vmatprep.mubr.f32.mxu0 %v19100_v26  ;;  %v7488_v15 = vmul.f32 %v15591_v5, %v19046_v45 }
 0x6bc   : > { %7019 = vrot.lane.b32.xlu0 %v15401_v47, %s12432_s22  ;;  %v15560_v55 = vpop.permute.xlu1 %6128  ;;  %v7314_v47 = vmul.f32 %v15568_v4, %v19060_v60 }
 0x6bd   : > { %12073 = vmatmul.mubr.msk.f32.gmra.mxu0 %vm1751_vm0, %v12372_v8 }
 0x6be   : > { %v5489_v6 = vpop.permute.xlu0 %5488  ;;  %7049 = vrot.lane.b32.xlu1 %v7011_v29, %s12437_s19  ;;  %5218 = vmatprep.mubr.f32.mxu0 %v19100_v26  ;;  %v15685_v29 = vld [vmem:[#allocation4 + $0xa8] sm:$0xff] }
 0x6bf   : > { %v5497_v25 = vsel %vm430_vm5, %v5487_v58, %v5489_v6  ;;  %v7311_v58 = vmul.f32 %v15591_v5, %v19060_v60  ;;  %19113 = vst [vmem:[#allocation29_spill] sm:$0xff] %v15685_v29  ;;  %v19114_v6 = vld [vmem:[#allocation48_spill] sm:$0xff] }
 0x6c0   : > { %7357 = vrot.lane.b32.xlu0 %v7314_v47, %s12417_s9  ;;  %5538 = vmatprep.subr.mxu0 %v5497_v25  ;;  %v5303_v3 = vpop.permute.xlu1 %5302  ;;  %v7305_v47 = vmul.f32 %v15685_v29, %v19060_v60  ;;  %v19115_v25 = vld [vmem:[#allocation35_spill] sm:$0xff] }
 0x6c1   : > { %12074 = vmatmul.mubr.msk.f32.gmra.mxu0 %vm1751_vm0, %v12373_v32  ;;  %v5311_v54 = vsel %vm4902_vm2, %v15449_v44, %v5303_v3  ;;  %v5493_v44 = vsel %vm430_vm5, %v15342_v21, %v15356_v9  ;;  %v5307_v9 = vsel %vm4902_vm2, %v15338_v27, %v15374_v49  ;;  %v7491_v21 = vmul.f32 %v15568_v4, %v19046_v45  ;;  %v19116_v3 = vld [vmem:[#allocation13_spill] sm:$0xff]  ;;  %v19117_v32 = vld [vmem:[#allocation59_spill] sm:$0xff] }
 0x6c2   : > { %5539 = vmatpush1.msra.mxu0 %v5496_v56  ;;  %v15584_v18 = vpop.permute.xlu0 %6305  ;;  %6846 = vrot.lane.b32.xlu1 %v15492_v43, %s12434_s11 }
 0x6c3   : > { %5352 = vmatprep.subr.mxu1 %v5311_v54  ;;  %5540 = vmatprep.subr.mxu0 %v5495_v46  ;;  %v19118_v54 = vld [vmem:[#allocation25_spill] sm:$0xff] }
 0x6c4   : > { %5224 = vmatprep.mubr.f32.mxu0 %v19100_v26  ;;  %5353 = vmatpush1.msra.mxu1 %v5310_v41  ;;  %v15602_v52 = vpop.permute.xlu1 %5933  ;;  %v19119_v41 = vld [vmem:[#allocation41_spill] sm:$0xff] }
 0x6c5   : > { %5541 = vmatpush1.msra.mxu0 %v5494_v7  ;;  %7351 = vrot.lane.b32.xlu0 %v7311_v58, %s12417_s9  ;;  %v7482_v7 = vmul.f32 %v15685_v29, %v19046_v45 }
 0x6c6   : > { %12075 = vmatmul.mubr.msk.f32.gmra.mxu0 %vm1751_vm0, %v12374_v34  ;;  %5354 = vmatprep.subr.mxu1 %v5309_v1  ;;  %v15618_v22 = vpop.permute.xlu0 %6126  ;;  %v19120_v1 = vld [vmem:[#allocation37_spill] sm:$0xff] }
 0x6c7   : > { %5542 = vmatprep.subr.mxu0 %v5493_v44  ;;  %5355 = vmatpush1.msra.mxu1 %v5308_v11  ;;  %v19121_v11 = vld [vmem:[#allocation46_spill] sm:$0xff] }
 0x6c8   : > { %5543 = vmatpush1.msra.mxu0 %v5492_v50  ;;  %7017 = vrot.lane.b32.xlu1 %v15433_v51, %s12432_s22  ;;  %v15631_v37 = vpop.permute.xlu1 %6301  ;;  %v5490_v51 = vsel %vm430_vm5, %v15147_v19, %v15293_v38  ;;  %v5304_v19 = vsel %vm4902_vm2, %v19102_v61, %v15279_v28  ;;  %v15657_v38 = vld [vmem:[#allocation4 + $0xb0] sm:$0xff]  ;;  %v5801_v50 = vsel %vm5429_vm4, %v15460_v20, %v19121_v11  ;;  %v19138_v11 = vld [vmem:[#allocation50_spill] sm:$0xff] }
 0x6c9   : > { %5356 = vmatprep.subr.mxu1 %v5307_v9  ;;  %5544 = vmatprep.subr.mxu0 %v5491_v0  ;;  %19103 = vst [vmem:[#allocation17_spill] sm:$0xff] %v15657_v38  ;;  %v12375_v9 = vld [vmem:[%s18598_s3 + $0xc8] sm:$0xff] }
 0x6ca   : > { %5357 = vmatpush1.msra.mxu1 %v5306_v57  ;;  %5545 = vmatpush1.msra.mxu0 %v5490_v51  ;;  %v15641_v49 = vpop.permute.xlu0 %6122  ;;  %v19122_v57 = vld [vmem:[#allocation27_spill] sm:$0xff] }
 0x6cb   : > { %5578 = vmatprep.mubr.f32.mxu0 %v19100_v26  ;;  %7534 = vrot.lane.b32.xlu0 %v7491_v21, %s12436_s6  ;;  %v19123_v21 = vld [vmem:[#allocation24_spill] sm:$0xff] }
 0x6cc   : > { %5358 = vmatprep.subr.mxu1 %v5305_v17  ;;  %12080 = vmatmul.mubr.msk.f32.vlgmr.msra.gmra.mxu0 %vm1751_vm0, %v15186_v14  ;;  %v15653_v27 = vpop.permute.xlu1 %6124  ;;  %v7308_v14 = vmul.f32 %v15657_v38, %v19060_v60  ;;  %v7485_v60 = vmul.f32 %v15657_v38, %v19046_v45  ;;  %v19124_v17 = vld [vmem:[#allocation51_spill] sm:$0xff] }
 0x6cd   : > { %5359 = vmatpush1.msra.mxu1 %v5304_v19  ;;  %7021 = vrot.lane.b32.xlu1 %v15414_v12, %s12432_s22  ;;  %v5799_v61 = vsel %vm5429_vm4, %v19124_v17, %v19123_v21  ;;  %v19125_v19 = vld [vmem:[#allocation19_spill] sm:$0xff] }
 0x6ce   : > { %12076 = vmatmul.mubr.msk.f32.vlgmr.msra.gmra.mxu1 %vm1751_vm0, %v19104_v16  ;;  %5647 = vmatprep.subr.mxu1 %v19105_v30  ;;  %v15666_v28 = vpop.permute.xlu0 %6297 }
 0x6cf   : > { %5584 = vmatprep.mubr.f32.mxu0 %v19100_v26  ;;  %5648 = vmatpush1.msra.mxu1 %v19106_v62  ;;  %v19127_v62 = vld [vmem:[#allocation20_spill] sm:$0xff] }
 0x6d0   : > { %7345 = vrot.lane.b32.xlu0 %v7308_v14, %s12417_s9  ;;  %12081 = vmatmul.mubr.msk.f32.gmra.mxu0 %vm1751_vm0, %v19107_v42  ;;  %v15671_v12 = vpop.permute.xlu1 %6299  ;;  %v19126_v14 = vld [vmem:[#allocation53_spill] sm:$0xff] }
 0x6d1   : > { %5649 = vmatprep.subr.mxu1 %v19108_v31  ;;  %5398 = vmatprep.mubr.f32.mxu1 %v19100_v26  ;;  %v19128_v42 = vld [vmem:[#allocation57_spill] sm:$0xff] }
 0x6d2   : > { %5650 = vmatpush1.msra.mxu1 %v19109_v59  ;;  %7023 = vrot.lane.b32.xlu1 %v15492_v43, %s12432_s22  ;;  %v15692_v43 = vpop.permute.xlu0 %5758  ;;  %v5797_v31 = vsel %vm5429_vm4, %v19128_v42, %v19127_v62  ;;  %v12376_v59 = vld [vmem:[%s18598_s3 + $0xe0] sm:$0xff] }
 0x6d3   : > { %12077 = vmatmul.mubr.msk.f32.gmra.mxu1 %vm1751_vm0, %v19110_v48  ;;  %5651 = vmatprep.subr.mxu1 %v19111_v53 }
 0x6d4   : > { %5590 = vmatprep.mubr.f32.mxu0 %v19100_v26  ;;  %5652 = vmatpush1.msra.mxu1 %v19112_v39  ;;  %v15687_v8 = vpop.permute.xlu1 %6120 }
 0x6d5   : > { %7528 = vrot.lane.b32.xlu0 %v7488_v15, %s12436_s6  ;;  %12082 = vmatmul.mubr.msk.f32.gmra.mxu0 %vm1751_vm0, %v19114_v6  ;;  %v19130_v15 = vld [vmem:[#allocation21_spill] sm:$0xff]  ;;  %v19131_v6 = vld [vmem:[#allocation14_spill] sm:$0xff] }
 0x6d6   : > { %5653 = vmatprep.subr.mxu1 %v19115_v25  ;;  %5404 = vmatprep.mubr.f32.mxu1 %v19100_v26  ;;  %v15711_v46 = vpop.permute.xlu0 %6295  ;;  %v5796_v39 = vsel %vm5429_vm4, %v19130_v15, %v19128_v42  ;;  %v19132_v25 = vld [vmem:[#allocation45_spill] sm:$0xff]  ;;  %v12060_v42 = vld [vmem:[%s18598_s3 + $0x100] sm:$0xff] }
 0x6d7   : > { %5654 = vmatpush1.msra.mxu1 %v19116_v3  ;;  %7339 = vrot.lane.b32.xlu1 %v7305_v47, %s12417_s9  ;;  %v5977_v47 = vsel %vm5117_vm3, %v19131_v6, %v15481_v24  ;;  %v19133_v3 = vld [vmem:[#allocation52_spill] sm:$0xff] }
 0x6d8   : > { %12078 = vmatmul.mubr.msk.f32.gmra.mxu1 %vm1751_vm0, %v19117_v32  ;;  %5596 = vmatprep.mubr.f32.mxu0 %v19100_v26  ;;  %v15703_v56 = vpop.permute.xlu1 %6116  ;;  %v5976_v32 = vsel %vm5117_vm3, %v19133_v3, %v19132_v25 }
 0x6d9   : > { %12083 = vmatmul.mubr.msk.f32.gmra.mxu0 %vm1751_vm0, %v19118_v54  ;;  %5410 = vmatprep.mubr.f32.mxu1 %v19100_v26 }
 0x6da   : > { %5884 = vmatprep.mubr.f32.mxu0 %v19100_v26  ;;  %v6119_v51 = vpop.permute.xlu0 %6118 }
 0x6db   : > { %7522 = vrot.lane.b32.xlu1 %v7485_v60, %s12436_s6  ;;  %v19134_v60 = vld [vmem:[#allocation61_spill] sm:$0xff]  ;;  %v6139_v21 = vsel %vm4967_vm6, %v15703_v56, %v6119_v51 }
 0x6dc   : > { %12079 = vmatmul.mubr.msk.f32.gmra.mxu1 %vm1751_vm0, %v19119_v41  ;;  %v5793_v58 = vpop.permute.xlu1 %5792  ;;  %v6145_v41 = vsel %vm4967_vm6, %v15525_v35, %v15511_v36 }
 0x6dd   : > { %5687 = vmatprep.mubr.f32.mxu1 %v19100_v26  ;;  %v5803_v34 = vsel %vm5429_vm4, %v5793_v58, %v19120_v1  ;;  %v5802_v44 = vsel %vm5429_vm4, %v15470_v23, %v5793_v58  ;;  %v5800_v23 = vsel %vm5429_vm4, %v19122_v57, %v15460_v20  ;;  %v5798_v20 = vsel %vm5429_vm4, %v19126_v14, %v19124_v17  ;;  %v19135_v58 = vld [vmem:[#allocation40_spill] sm:$0xff] }
 0x6de   : > { %5844 = vmatprep.subr.mxu0 %v5803_v34  ;;  %v6294_v54 = vpop.permute.xlu0 %6293  ;;  %v6144_v34 = vsel %vm4967_vm6, %v15532_v63, %v15525_v35  ;;  %v19139_v35 = vld [vmem:[#allocation58_spill] sm:$0xff] }
 0x6df   : > { %7516 = vrot.lane.b32.xlu1 %v7482_v7, %s12436_s6  ;;  %5845 = vmatpush1.msra.mxu0 %v5802_v44  ;;  %v19137_v44 = vld [vmem:[#allocation56_spill] sm:$0xff]  ;;  %v19140_v63 = vld [vmem:[#allocation26_spill] sm:$0xff] }
 0x6e0   : > { %12084 = vmatmul.mubr.msk.f32.vlgmr.msra.gmra.mxu1 %vm1751_vm0, %v12375_v9  ;;  %5846 = vmatprep.subr.mxu0 %v5801_v50  ;;  %v5970_v0 = vpop.permute.xlu1 %5969  ;;  %v5974_v36 = vsel %vm5117_vm3, %v19138_v11, %v19137_v44  ;;  %v6143_v50 = vsel %vm4967_vm6, %v15560_v55, %v15554_v33  ;;  %v6142_v9 = vsel %vm4967_vm6, %v15618_v22, %v15560_v55  ;;  %v19141_v22 = vld [vmem:[#allocation60_spill] sm:$0xff] }
 0x6e1   : > { %5693 = vmatprep.mubr.f32.mxu1 %v19100_v26  ;;  %5847 = vmatpush1.msra.mxu0 %v5800_v23  ;;  %v5980_v16 = vsel %vm5117_vm3, %v5970_v0, %v19125_v19  ;;  %v5979_v30 = vsel %vm5117_vm3, %v15486_v2, %v5970_v0  ;;  %v19129_v2 = vld [vmem:[#allocation42_spill] sm:$0xff]  ;;  %v5973_v0 = vsel %vm5117_vm3, %v19140_v63, %v19138_v11 }
 0x6e2   : > { %5848 = vmatprep.subr.mxu0 %v5799_v61  ;;  %6021 = vmatprep.subr.mxu1 %v5980_v16  ;;  %v5978_v48 = vsel %vm5117_vm3, %v15481_v24, %v19129_v2  ;;  %v19136_v24 = vld [vmem:[#allocation23_spill] sm:$0xff]  ;;  %v6115_v23 = vpop.permute.xlu0 %6114  ;;  %v6141_v33 = vsel %vm4967_vm6, %v15641_v49, %v15653_v27  ;;  %v6140_v55 = vsel %vm4967_vm6, %v15687_v8, %v15641_v49 }
 0x6e3   : > { %5849 = vmatpush1.msra.mxu0 %v5798_v20  ;;  %6022 = vmatpush1.msra.mxu1 %v5979_v30  ;;  %v5975_v7 = vsel %vm5117_vm3, %v19136_v24, %v19133_v3  ;;  %v6138_v17 = vsel %vm4967_vm6, %v6115_v23, %v15703_v56  ;;  %v19142_v61 = vld [vmem:[#allocation55_spill] sm:$0xff]  ;;  %v6312_v56 = vsel %vm4902_vm2, %v15666_v28, %v15671_v12  ;;  %v12057_v20 = vld [vmem:[%s18598_s3 + $0xe8] sm:$0xff] }
 0x6e4   : > { %12085 = vmatmul.mubr.msk.f32.gmra.mxu1 %vm1751_vm0, %v12376_v59  ;;  %5850 = vmatprep.subr.mxu0 %v5797_v31  ;;  %v6292_v53 = vpop.permute.xlu1 %6291  ;;  %v6311_v19 = vsel %vm4902_vm2, %v15711_v46, %v15666_v28  ;;  %v12063_v31 = vld [vmem:[%s18598_s3 + $0x118] sm:$0xff]  ;;  %v15870_v59 = vld [vmem:[%s18598_s3 + $0x128] sm:$0xff]  ;;  %v15879_v2 = vld [vmem:[%s18598_s3 + $0x140] sm:$0xff] }
 0x6e5   : > { %5699 = vmatprep.mubr.f32.mxu1 %v19100_v26  ;;  %6023 = vmatprep.subr.mxu1 %v5978_v48  ;;  %19144 = vst [vmem:[#allocation18_spill] sm:$0xff] %v15870_v59  ;;  %19145 = vst [vmem:[#allocation16_spill] sm:$0xff] %v15879_v2 }
 0x6e6   : > { %5851 = vmatpush1.msra.mxu0 %v5796_v39  ;;  %6024 = vmatpush1.msra.mxu1 %v5977_v47  ;;  %v6286_v51 = vpop.permute.xlu0 %6285 }
 0x6e7   : > { %12088 = vmatmul.mubr.msk.f32.vlgmr.msra.gmra.mxu0 %vm1751_vm0, %v19134_v60  ;;  %6025 = vmatprep.subr.mxu1 %v5976_v32 }
 0x6e8   : > { %12086 = vmatmul.mubr.msk.f32.gmra.mxu1 %vm1751_vm0, %v19135_v58  ;;  %6186 = vmatprep.subr.mxu0 %v6145_v41  ;;  %v5936_v1 = vpop.permute.xlu1 %5935 }
 0x6e9   : > { %5705 = vmatprep.mubr.f32.mxu1 %v19100_v26  ;;  %6026 = vmatpush1.msra.mxu1 %v5975_v7 }
 0x6ea   : > { %6187 = vmatpush1.msra.mxu0 %v6144_v34  ;;  %6027 = vmatprep.subr.mxu1 %v5974_v36  ;;  %v6095_v12 = vpop.permute.xlu0 %6094 }
 0x6eb   : > { %6188 = vmatprep.subr.mxu0 %v6143_v50  ;;  %5890 = vmatprep.mubr.f32.mxu0 %v19100_v26 }
 0x6ec   : > { %12087 = vmatmul.mubr.msk.f32.gmra.mxu1 %vm1751_vm0, %v19139_v35  ;;  %6189 = vmatpush1.msra.mxu0 %v6142_v9  ;;  %v6290_v57 = vpop.permute.xlu1 %6289 }
 0x6ed   : > { %6028 = vmatpush1.msra.mxu1 %v5973_v0  ;;  %6061 = vmatprep.mubr.f32.mxu1 %v19100_v26  ;;  %v6309_v16 = vsel %vm4902_vm2, %v6290_v57, %v6292_v53 }
 0x6ee   : > { %12089 = vmatmul.mubr.msk.f32.gmra.mxu0 %vm1751_vm0, %v19141_v22  ;;  %6190 = vmatprep.subr.mxu0 %v6141_v33 }
 0x6ef   : > { %6191 = vmatpush1.msra.mxu0 %v6140_v55  ;;  %5896 = vmatprep.mubr.f32.mxu0 %v19100_v26 }
 0x6f0   : > { %12092 = vmatmul.mubr.msk.f32.vlgmr.msra.gmra.mxu1 %vm1751_vm0, %v19142_v61  ;;  %6192 = vmatprep.subr.mxu0 %v6139_v21  ;;  %v6304_v27 = vpop.permute.xlu1 %6303 }
 0x6f1   : > { %6067 = vmatprep.mubr.f32.mxu1 %v19100_v26  ;;  %6193 = vmatpush1.msra.mxu0 %v6138_v17  ;;  %v6314_v49 = vsel %vm4902_vm2, %v6304_v27, %v15584_v18  ;;  %v6313_v8 = vsel %vm4902_vm2, %v15631_v37, %v6304_v27  ;;  %v19143_v18 = vld [vmem:[#allocation43_spill] sm:$0xff] }
 0x6f2   : > { %12090 = vmatmul.mubr.msk.f32.gmra.mxu0 %vm1751_vm0, %v15546_v13  ;;  %6359 = vmatprep.subr.mxu1 %v6314_v49  ;;  %v6310_v13 = vsel %vm4902_vm2, %v6292_v53, %v6294_v54 }
 0x6f3   : > { %5902 = vmatprep.mubr.f32.mxu0 %v19100_v26  ;;  %6360 = vmatpush1.msra.mxu1 %v6313_v8 }
 0x6f4   : > { %12093 = vmatmul.mubr.msk.f32.gmra.mxu1 %vm1751_vm0, %v19143_v18  ;;  %6361 = vmatprep.subr.mxu1 %v6312_v56  ;;  %v6288_v37 = vpop.permute.xlu1 %6287 }
 0x6f5   : > { %6073 = vmatprep.mubr.f32.mxu1 %v19100_v26  ;;  %6362 = vmatpush1.msra.mxu1 %v6311_v19  ;;  %v6308_v28 = vsel %vm4902_vm2, %v6286_v51, %v6288_v37 }
 0x6f6   : > { %12091 = vmatmul.mubr.msk.f32.gmra.mxu0 %vm1751_vm0, %v15692_v43  ;;  %6363 = vmatprep.subr.mxu1 %v6310_v13  ;;  %v6097_v43 = vpop.permute.xlu0 %6096 }
 0x6f7   : > { %6226 = vmatprep.mubr.f32.mxu0 %v19100_v26  ;;  %6364 = vmatpush1.msra.mxu1 %v6309_v16 }
 0x6f8   : > { %12094 = vmatmul.mubr.msk.f32.gmra.mxu1 %vm1751_vm0, %v15602_v52  ;;  %6365 = vmatprep.subr.mxu1 %v6308_v28  ;;  %v6284_v46 = vpop.permute.xlu1 %6283  ;;  %v12054_v52 = vld [vmem:[%s18598_s3 + $0xd0] sm:$0xff] }
 0x6f9   : > { %6079 = vmatprep.mubr.f32.mxu1 %v19100_v26  ;;  %v6307_v30 = vsel %vm4902_vm2, %v6284_v46, %v6286_v51  ;;  %7315 = vrot.lane.b32.xlu0 %v15870_v59, %s12426_s23 }
 0x6fa   : > { %12096 = vmatmul.mubr.msk.f32.vlgmr.msra.gmra.mxu0 %vm1751_vm0, %v6095_v12  ;;  %6366 = vmatpush1.msra.mxu1 %v6307_v30  ;;  %v6101_v62 = vpop.permute.xlu0 %6100 }
 0x6fb   : > { %6232 = vmatprep.mubr.f32.mxu0 %v19100_v26  ;;  %7317 = vrot.lane.b32.xlu1 %v15879_v2, %s12426_s23 }
 0x6fc   : > { %12095 = vmatmul.mubr.msk.f32.gmra.mxu1 %vm1751_vm0, %v5936_v1  ;;  %v6099_v14 = vpop.permute.xlu1 %6098 }
 0x6fd   : > { %6399 = vmatprep.mubr.f32.mxu1 %v19100_v26  ;;  %7492 = vrot.lane.b32.xlu0 %v15870_v59, %s12434_s11 }
 0x6fe   : > { %12097 = vmatmul.mubr.msk.f32.gmra.mxu0 %vm1751_vm0, %v6097_v43 }
 0x6ff   : > { %6238 = vmatprep.mubr.f32.mxu0 %v19100_v26 }
 0x700   : > { %12100 = vmatmul.mubr.msk.f32.vlgmr.msra.gmra.mxu1 %vm1751_vm0, %v12054_v52 }
 0x701   : > { %6405 = vmatprep.mubr.f32.mxu1 %v19100_v26  ;;  %7494 = vrot.lane.b32.xlu0 %v15879_v2, %s12434_s11 }
 0x702   : > { %12098 = vmatmul.mubr.msk.f32.gmra.mxu0 %vm1751_vm0, %v6099_v14 }
 0x703   : > { %6244 = vmatprep.mubr.f32.mxu0 %v19100_v26 }
 0x704   : > { %12101 = vmatmul.mubr.msk.f32.gmra.mxu1 %vm1751_vm0, %v12057_v20 }
 0x705   : > { %6411 = vmatprep.mubr.f32.mxu1 %v19100_v26 }
 0x706   : > { %12099 = vmatmul.mubr.msk.f32.gmra.mxu0 %vm1751_vm0, %v6101_v62  ;;  %v15931_v62 = vpop.permute.xlu0 %6444 }
 0x707   : > { %6654 = vmatprep.mubr.f32.mxu0 %v19100_v26 }
 0x708   : > { %12102 = vmatmul.mubr.msk.f32.gmra.mxu1 %vm1751_vm0, %v12060_v42 }
 0x709   : > { %6417 = vmatprep.mubr.f32.mxu1 %v19100_v26 }
 0x70c   : > { %12103 = vmatmul.mubr.msk.f32.gmra.mxu1 %vm1751_vm0, %v12063_v31 }
 0x70d   : > { %6803 = vmatprep.mubr.f32.mxu1 %v19100_v26 }
 0x768   : > { %v5058_v48 = vpop.f32.mrf.mxu1 }
 0x76a   : > { %v5060_v53 = vpop.f32.mrf.mxu1 }
 0x76c   : > { %v15885_v15 = vpop.f32.mrf.mxu1 }
 0x76e   : > { %v15887_v6 = vpop.f32.mrf.mxu1 }
 0x770   : > { %v5070_v3 = vpop.f32.mrf.mxu1 }
 0x772   : > { %v15893_v60 = vpop.f32.mrf.mxu1 }
 0x775   : > { %v5076_v24 = vpop.f32.mrf.mxu1 }
 0x777   : > { %v15899_v44 = vpop.f32.mrf.mxu1 }
 0x779   : > { %v5208_v39 = vpop.f32.mrf.mxu0 }
 0x77a   : > { %v5209_v42 = vadd.f32 %v5208_v39, %v5058_v48 }
 0x77b   : > { %v5210_v47 = vpop.f32.mrf.mxu0 }
 0x77d   : > { %v15889_v25 = vpop.f32.mrf.mxu0 }
 0x77f   : > { %v15891_v32 = vpop.f32.mrf.mxu0 }
 0x781   : > { %v5220_v54 = vpop.f32.mrf.mxu0 }
 0x782   : > { %v5221_v41 = vadd.f32 %v5220_v54, %v5070_v3  ;;  %v5211_v54 = vadd.f32 %v5210_v47, %v5060_v53 }
 0x783   : > { %v15895_v58 = vpop.f32.mrf.mxu0 }
 0x786   : > { %v5226_v7 = vpop.f32.mrf.mxu0 }
 0x787   : > { %v5227_v1 = vadd.f32 %v5226_v7, %v5076_v24 }
 0x788   : > { %v15897_v34 = vpop.f32.mrf.mxu0 }
 0x78c   : > { %v5580_v11 = vpop.f32.mrf.mxu0 }
 0x78e   : > { %v5394_v36 = vpop.f32.mrf.mxu1  ;;  %v5582_v50 = vpop.f32.mrf.mxu0 }
 0x790   : > { %v5396_v9 = vpop.f32.mrf.mxu1  ;;  %v15901_v35 = vpop.f32.mrf.mxu0 }
 0x792   : > { %v15903_v63 = vpop.f32.mrf.mxu0 }
 0x793   : > { %v5400_v0 = vpop.f32.mrf.mxu1 }
 0x795   : > { %v15905_v57 = vpop.f32.mrf.mxu1  ;;  %v15907_v23 = vpop.f32.mrf.mxu0 }
 0x797   : > { %v15911_v22 = vpop.f32.mrf.mxu0 }
 0x798   : > { %v5406_v33 = vpop.f32.mrf.mxu1 }
 0x799   : > { %v15909_v55 = vadd.f32 %v5406_v33, %v5221_v41  ;;  %v5598_v27 = vpop.f32.mrf.mxu0  ;;  %v5417_v41 = vadd.f32 %v5394_v36, %v5209_v42 }
 0x79a   : > { %v15913_v21 = vpop.f32.mrf.mxu1 }
 0x79b   : > { %v15917_v18 = vpop.f32.mrf.mxu0 }
 0x79c   : > { %v5412_v17 = vpop.f32.mrf.mxu1 }
 0x79d   : > { %v5423_v61 = vadd.f32 %v5412_v17, %v5227_v1  ;;  %v5418_v1 = vadd.f32 %v5396_v9, %v5211_v54 }
 0x79e   : > { %v15915_v49 = vpop.f32.mrf.mxu1 }
 0x79f   : > { %v5609_v8 = vadd.f32 %v5598_v27, %v5423_v61  ;;  %v6435_v61 = vpop.permute.xlu0 %6434  ;;  %v5603_v27 = vadd.f32 %v5580_v11, %v5417_v41  ;;  %v5604_v39 = vadd.f32 %v5582_v50, %v5418_v1  ;;  %v15953_v41 = vpop.permute.xlu1 %6449 }
 0x7a0   : > { %v5689_v51 = vpop.f32.mrf.mxu1 }
 0x7a1   : > { %v5712_v48 = vadd.f32 %v5689_v51, %v5603_v27  ;;  %v5215_v51 = vadd.f32 %v15889_v25, %v15885_v15  ;;  %v5217_v15 = vadd.f32 %v15891_v32, %v15887_v6 }
 0x7a2   : > { %v5691_v56 = vpop.f32.mrf.mxu1 }
 0x7a3   : > { %v5713_v47 = vadd.f32 %v5691_v56, %v5604_v39  ;;  %v15949_v9 = vpop.permute.xlu0 %6554  ;;  %v5419_v29 = vadd.f32 %v5400_v0, %v5215_v51  ;;  %v19148_v0 = vld [vmem:[#allocation54_spill] sm:$0xff] }
 0x7a4   : > { %v5695_v19 = vpop.f32.mrf.mxu1  ;;  %19146 = vst [vmem:[#allocation47_spill] sm:$0xff] %v15949_v9 }
 0x7a6   : > { %v15919_v37 = vpop.f32.mrf.mxu1 }
 0x7a7   : > { %v5886_v13 = vpop.f32.mrf.mxu0  ;;  %v15957_v39 = vpop.permute.xlu0 %6542 }
 0x7a8   : > { %v15921_v16 = vpop.f32.mrf.mxu1  ;;  %v5909_v36 = vadd.f32 %v5886_v13, %v5712_v48 }
 0x7a9   : > { %v5888_v28 = vpop.f32.mrf.mxu0 }
 0x7aa   : > { %v15923_v12 = vpop.f32.mrf.mxu1  ;;  %v5910_v54 = vadd.f32 %v5888_v28, %v5713_v47  ;;  %v5605_v47 = vadd.f32 %v15901_v35, %v5419_v29 }
 0x7ac   : > { %v5707_v46 = vpop.f32.mrf.mxu1  ;;  %v5714_v10 = vadd.f32 %v5695_v19, %v5605_v47 }
 0x7ad   : > { %v15925_v30 = vadd.f32 %v5707_v46, %v5609_v8 }
 0x7ae   : > { %v15927_v43 = vpop.f32.mrf.mxu1  ;;  %v5892_v52 = vpop.f32.mrf.mxu0 }
 0x7af   : > { %v5911_v25 = vadd.f32 %v5892_v52, %v5714_v10  ;;  %v19150_v10 = vld [vmem:[#allocation38_spill] sm:$0xff] }
 0x7b0   : > { %v6063_v14 = vpop.f32.mrf.mxu1  ;;  %v15929_v20 = vpop.f32.mrf.mxu0 }
 0x7b1   : > { %v6086_v2 = vadd.f32 %v6063_v14, %v5909_v36  ;;  %v6440_v14 = vpop.permute.xlu1 %6439 }
 0x7b2   : > { %v6065_v31 = vpop.f32.mrf.mxu1  ;;  %v15933_v3 = vpop.f32.mrf.mxu0 }
 0x7b3   : > { %v6087_v50 = vadd.f32 %v6065_v31, %v5910_v54 }
 0x7b4   : > { %v6069_v24 = vpop.f32.mrf.mxu1  ;;  %v15935_v7 = vpop.f32.mrf.mxu0 }
 0x7b5   : > { %v15974_v31 = vpop.permute.xlu1 %6560  ;;  %v6088_v19 = vadd.f32 %v6069_v24, %v5911_v25 }
 0x7b6   : > { %v15937_v33 = vpop.f32.mrf.mxu1  ;;  %v15939_v17 = vpop.f32.mrf.mxu0 }
 0x7b8   : > { %v15941_v8 = vpop.f32.mrf.mxu1  ;;  %v15943_v46 = vpop.f32.mrf.mxu0 }
 0x7b9   : > { %v15989_v51 = vpop.permute.xlu1 %6548 }
 0x7ba   : > { %v15945_v26 = vpop.f32.mrf.mxu1  ;;  %v6228_v53 = vpop.f32.mrf.mxu0 }
 0x7bb   : > { %v6251_v1 = vadd.f32 %v6228_v53, %v6086_v2  ;;  %v15966_v2 = vpop.permute.xlu0 %6524 }
 0x7bc   : > { %v15947_v42 = vpop.f32.mrf.mxu1  ;;  %v6230_v11 = vpop.f32.mrf.mxu0 }
 0x7bd   : > { %v6252_v56 = vadd.f32 %v6230_v11, %v6087_v50  ;;  %v16005_v25 = vpop.permute.xlu1 %6522 }
 0x7be   : > { %v15951_v59 = vpop.f32.mrf.mxu1  ;;  %v6234_v35 = vpop.f32.mrf.mxu0 }
 0x7bf   : > { %v6253_v6 = vadd.f32 %v6234_v35, %v6088_v19  ;;  %v15983_v52 = vpop.permute.xlu0 %6526 }
 0x7c0   : > { %v6401_v27 = vpop.f32.mrf.mxu1 }
 0x7c1   : > { %v6424_v13 = vadd.f32 %v6401_v27, %v6251_v1 }
 0x7c2   : > { %v6403_v48 = vpop.f32.mrf.mxu1 }
 0x7c3   : > { %v6452_v9 = vadd.f32 %v6435_v61, %v6424_v13  ;;  %v6425_v28 = vadd.f32 %v6403_v48, %v6252_v56  ;;  %v6236_v13 = vpop.f32.mrf.mxu0  ;;  %v15999_v48 = vpop.permute.xlu0 %6878 }
 0x7c5   : > { %v15960_v36 = vmax.f32 %v6452_v9, 0.0  ;;  %v6453_v38 = vadd.f32 %v6435_v61, %v6425_v28  ;;  %v19149_v61 = vld [vmem:[#allocation34_spill] sm:$0xff]  ;;  %v6407_v9 = vpop.f32.mrf.mxu1 }
 0x7c6   : > { %v6426_v11 = vadd.f32 %v6407_v9, %v6253_v6  ;;  %v5607_v9 = vadd.f32 %v15907_v23, %v15909_v55  ;;  %v19154_v6 = vld [vmem:[#allocation12_spill] sm:$0xff]  ;;  %v6240_v55 = vpop.f32.mrf.mxu0 }
 0x7c7   : > { %19147 = vst [vmem:[#allocation44_spill] sm:$0xff] %v15960_v36  ;;  %v15962_v5 = vmax.f32 %v6453_v38, 0.0  ;;  %6544 = vrot.lane.b32.xlu0 %v15960_v36, %s12434_s11  ;;  %v6829_v29 = vmul.f32 %v15960_v36, %v19148_v0  ;;  %v5420_v38 = vadd.f32 %v15905_v57, %v5217_v15  ;;  %v6507_v53 = vmul.f32 %v15960_v36, %v19149_v61  ;;  %v19151_v57 = vld [vmem:[#allocation9_spill] sm:$0xff]  ;;  %v6409_v15 = vpop.f32.mrf.mxu1  ;;  %v16014_v19 = vpop.permute.xlu0 %6872 }
 0x7c8   : > { %v7303_v32 = vmul.f32 %v15960_v36, %v19150_v10  ;;  %v7006_v24 = vmul.f32 %v15960_v36, %v19151_v57  ;;  %v6454_v56 = vadd.f32 %v6440_v14, %v6426_v11 }
 0x7c9   : > { %6546 = vrot.lane.b32.xlu1 %v15962_v5, %s12434_s11  ;;  %v5606_v54 = vadd.f32 %v15903_v63, %v5420_v38  ;;  %v6508_v1 = vmul.f32 %v15962_v5, %v19046_v45  ;;  %v7480_v63 = vmul.f32 %v15960_v36, %v19047_v40  ;;  %v19153_v38 = vld [vmem:[#allocation11_spill] sm:$0xff] }
 0x7cb   : > { %6862 = vrot.lane.b32.xlu0 %v6829_v29, %s12435_s10  ;;  %v5715_v50 = vadd.f32 %v15919_v37, %v5606_v54  ;;  %v19152_v37 = vld [vmem:[#allocation10_spill] sm:$0xff]  ;;  %v16007_v29 = vmax.f32 %v6454_v56, 0.0  ;;  %v16023_v54 = vpop.permute.xlu1 %6709 }
 0x7cc   : > { %v7007_v47 = vmul.f32 %v15962_v5, %v19152_v37 }
 0x7cd   : > { %6693 = vrot.lane.b32.xlu1 %v6507_v53, %s12436_s6  ;;  %v5912_v27 = vadd.f32 %v15929_v20, %v5715_v50  ;;  %v5223_v53 = vadd.f32 %v15895_v58, %v15893_v60  ;;  %v7481_v60 = vmul.f32 %v15962_v5, %v19149_v61  ;;  %v6510_v23 = vmul.f32 %v16007_v29, %v19149_v61 }
 0x7cf   : > { %7335 = vrot.lane.b32.xlu0 %v7303_v32, %s12417_s9  ;;  %v6089_v28 = vadd.f32 %v15937_v33, %v5912_v27  ;;  %v7304_v33 = vmul.f32 %v15962_v5, %v19153_v38  ;;  %v6830_v32 = vmul.f32 %v15962_v5, %v19154_v6  ;;  %v5422_v11 = vadd.f32 %v15913_v21, %v5223_v53  ;;  %v6413_v27 = vpop.f32.mrf.mxu1  ;;  %v16041_v56 = vpop.permute.xlu1 %6703 }
 0x7d1   : > { %7039 = vrot.lane.b32.xlu1 %v7006_v24, %s12437_s19  ;;  %v6254_v20 = vadd.f32 %v6236_v13, %v6089_v28  ;;  %v5716_v24 = vadd.f32 %v15921_v16, %v5607_v9  ;;  %v5608_v21 = vadd.f32 %v15911_v22, %v5422_v11  ;;  %v6832_v13 = vmul.f32 %v16007_v29, %v19148_v0 }
 0x7d2   : > { %v7306_v9 = vmul.f32 %v16007_v29, %v19150_v10 }
 0x7d3   : > { %6695 = vrot.lane.b32.xlu0 %v6508_v1, %s12436_s6  ;;  %v6427_v35 = vadd.f32 %v6409_v15, %v6254_v20  ;;  %v5913_v58 = vadd.f32 %v15933_v3, %v5716_v24  ;;  %v16034_v1 = vpop.permute.xlu0 %6691  ;;  %v5717_v3 = vadd.f32 %v15923_v12, %v5608_v21  ;;  %v7483_v20 = vmul.f32 %v16007_v29, %v19047_v40 }
 0x7d5   : > { %7512 = vrot.lane.b32.xlu1 %v7480_v63, %s12436_s6  ;;  %v6455_v50 = vadd.f32 %v6440_v14, %v6427_v35  ;;  %v6090_v16 = vadd.f32 %v15941_v8, %v5913_v58  ;;  %v5914_v22 = vadd.f32 %v15935_v7, %v5717_v3  ;;  %v7009_v8 = vmul.f32 %v16007_v29, %v19151_v57  ;;  %v6415_v35 = vpop.f32.mrf.mxu1 }
 0x7d6   : > { %v5915_v3 = vadd.f32 %v15939_v17, %v15925_v30 }
 0x7d7   : > { %7041 = vrot.lane.b32.xlu0 %v7007_v47, %s12437_s19  ;;  %v16038_v14 = vmax.f32 %v6455_v50, 0.0  ;;  %v6255_v63 = vadd.f32 %v6240_v55, %v6090_v16  ;;  %v6242_v47 = vpop.f32.mrf.mxu0  ;;  %v16052_v15 = vpop.permute.xlu0 %6860  ;;  %v6091_v12 = vadd.f32 %v15945_v26, %v5914_v22 }
 0x7d8   : > { %v6419_v22 = vpop.f32.mrf.mxu1 }
 0x7d9   : > { %6550 = vrot.lane.b32.xlu1 %v16007_v29, %s12434_s11  ;;  %v6428_v28 = vadd.f32 %v6413_v27, %v6255_v63  ;;  %v6256_v7 = vadd.f32 %v6242_v47, %v6091_v12  ;;  %v7010_v26 = vmul.f32 %v16038_v14, %v19152_v37  ;;  %v7307_v58 = vmul.f32 %v16038_v14, %v19153_v38 }
 0x7da   : > { %v6511_v55 = vmul.f32 %v16038_v14, %v19046_v45 }
 0x7db   : > { %7337 = vrot.lane.b32.xlu0 %v7304_v33, %s12417_s9  ;;  %v16058_v33 = vpop.permute.xlu1 %6697  ;;  %v6456_v53 = vadd.f32 %v15931_v62, %v6428_v28  ;;  %v16067_v11 = vpop.permute.xlu0 %6842 }
 0x7dd   : > { %6864 = vrot.lane.b32.xlu1 %v6830_v32, %s12435_s10  ;;  %v6429_v32 = vadd.f32 %v6415_v35, %v6256_v7  ;;  %v16069_v24 = vmax.f32 %v6456_v53, 0.0  ;;  %v6421_v7 = vpop.f32.mrf.mxu1 }
 0x7df   : > { %7514 = vrot.lane.b32.xlu0 %v7481_v60, %s12436_s6  ;;  %v16072_v50 = vpop.permute.xlu1 %6528  ;;  %v6457_v60 = vadd.f32 %v15931_v62, %v6429_v32  ;;  %v16084_v21 = vpop.permute.xlu0 %6844  ;;  %v7309_v12 = vmul.f32 %v16069_v24, %v19150_v10  ;;  %v7486_v32 = vmul.f32 %v16069_v24, %v19047_v40 }
 0x7e0   : > { %19155 = vst [vmem:[#allocation36_spill] sm:$0xff] %v16084_v21  ;;  %v19191_v21 = vld [vmem:[#allocation47_spill] sm:$0xff] }
 0x7e1   : > { %6699 = vrot.lane.b32.xlu1 %v6510_v23, %s12436_s6  ;;  %v5229_v23 = vadd.f32 %v15897_v34, %v15899_v44  ;;  %v16087_v27 = vmax.f32 %v6457_v60, 0.0  ;;  %v6833_v34 = vmul.f32 %v16038_v14, %v19154_v6  ;;  %v6246_v44 = vpop.f32.mrf.mxu0 }
 0x7e3   : > { %6552 = vrot.lane.b32.xlu0 %v16038_v14, %s12434_s11  ;;  %v5424_v16 = vadd.f32 %v15915_v49, %v5229_v23  ;;  %v16090_v62 = vpop.permute.xlu1 %6866  ;;  %v6092_v49 = vadd.f32 %v15947_v42, %v5915_v3  ;;  %v16103_v28 = vpop.permute.xlu0 %7043 }
 0x7e5   : > { %6868 = vrot.lane.b32.xlu1 %v6832_v13, %s12435_s10  ;;  %v5610_v63 = vadd.f32 %v15917_v18, %v5424_v16  ;;  %v6835_v13 = vmul.f32 %v16069_v24, %v19148_v0  ;;  %v6257_v17 = vadd.f32 %v6246_v44, %v6092_v49  ;;  %v6836_v16 = vmul.f32 %v16087_v27, %v19154_v6 }
 0x7e7   : > { %7045 = vrot.lane.b32.xlu0 %v7009_v8, %s12437_s19  ;;  %v5719_v30 = vadd.f32 %v15927_v43, %v5610_v63  ;;  %v7484_v8 = vmul.f32 %v16038_v14, %v19149_v61  ;;  %v16109_v47 = vpop.permute.xlu1 %6840  ;;  %v6430_v42 = vadd.f32 %v6419_v22, %v6257_v17  ;;  %v6513_v43 = vmul.f32 %v16069_v24, %v19149_v61  ;;  %v16119_v53 = vpop.permute.xlu0 %7037 }
 0x7e8   : > { %v7310_v22 = vmul.f32 %v16087_v27, %v19153_v38 }
 0x7e9   : > { %7518 = vrot.lane.b32.xlu1 %v7483_v20, %s12436_s6  ;;  %v5916_v18 = vadd.f32 %v15943_v46, %v5719_v30  ;;  %v6248_v20 = vpop.f32.mrf.mxu0  ;;  %v6458_v46 = vadd.f32 %v15953_v41, %v6430_v42 }
 0x7eb   : > { %7341 = vrot.lane.b32.xlu0 %v7306_v9, %s12417_s9  ;;  %v6093_v35 = vadd.f32 %v15951_v59, %v5916_v18  ;;  %v7012_v59 = vmul.f32 %v16069_v24, %v19151_v57  ;;  %v16133_v23 = vpop.permute.xlu0 %7019  ;;  %v7487_v18 = vmul.f32 %v16087_v27, %v19149_v61 }
 0x7ed   : > { %7047 = vrot.lane.b32.xlu1 %v7010_v26, %s12437_s19  ;;  %v6258_v9 = vadd.f32 %v6248_v20, %v6093_v35  ;;  %v16125_v26 = vpop.permute.xlu1 %7055 }
 0x7ef   : > { %6556 = vrot.lane.b32.xlu0 %v16069_v24, %s12434_s11  ;;  %v6431_v60 = vadd.f32 %v6421_v7, %v6258_v9  ;;  %v16148_v63 = vpop.permute.xlu0 %7357 }
 0x7f0   : > { %19156 = vst [vmem:[#allocation31_spill] sm:$0xff] %v16148_v63  ;;  %v16382_v63 = vld [vmem:[%s18598_s3 + $0x198] sm:$0xff] }
 0x7f1   : > { %7343 = vrot.lane.b32.xlu1 %v7307_v58, %s12417_s9  ;;  %v16130_v58 = vmax.f32 %v6458_v46, 0.0  ;;  %v16140_v3 = vpop.permute.xlu1 %7049  ;;  %19188 = vst [vmem:[#allocation45_spill] sm:$0xff] %v16382_v63 }
 0x7f3   : > { %6701 = vrot.lane.b32.xlu0 %v6511_v55, %s12436_s6  ;;  %v6459_v55 = vadd.f32 %v15953_v41, %v6431_v60  ;;  %v7013_v41 = vmul.f32 %v16087_v27, %v19152_v37  ;;  %v16162_v30 = vpop.permute.xlu0 %7351  ;;  %v7312_v17 = vmul.f32 %v16130_v58, %v19150_v10  ;;  %v7489_v42 = vmul.f32 %v16130_v58, %v19047_v40 }
 0x7f4   : > { %19158 = vst [vmem:[#allocation28_spill] sm:$0xff] %v16162_v30  ;;  %v6516_v20 = vmul.f32 %v16130_v58, %v19149_v61 }
 0x7f5   : > { %6558 = vrot.lane.b32.xlu1 %v16087_v27, %s12434_s11  ;;  %v16145_v44 = vmax.f32 %v6459_v55, 0.0  ;;  %v16154_v49 = vpop.permute.xlu1 %6846  ;;  %v12377_v55 = vld [vmem:[#allocation4 + $0x8] sm:$0xff] }
 0x7f6   : > { %19157 = vst [vmem:[#allocation49_spill] sm:$0xff] %v16154_v49 }
 0x7f7   : > { %6870 = vrot.lane.b32.xlu0 %v6833_v34, %s12435_s10  ;;  %v6514_v34 = vmul.f32 %v16087_v27, %v19046_v45  ;;  %v6517_v35 = vmul.f32 %v16145_v44, %v19046_v45  ;;  %v16200_v45 = vld [vmem:[%s18598_s3 + $0x158] sm:$0xff] }
 0x7f8   : > { %19162 = vst [vmem:[#allocation33_spill] sm:$0xff] %v16200_v45 }
 0x7f9   : > { %6874 = vrot.lane.b32.xlu1 %v6835_v13, %s12435_s10  ;;  %v6838_v13 = vmul.f32 %v16130_v58, %v19148_v0 }
 0x7fb   : > { %7520 = vrot.lane.b32.xlu0 %v7484_v8, %s12436_s6  ;;  %v16167_v8 = vpop.permute.xlu1 %7017 }
 0x7fd   : > { %7347 = vrot.lane.b32.xlu1 %v7309_v12, %s12417_s9  ;;  %v16175_v12 = vpop.permute.xlu0 %7534 }
 0x7fe   : > { %19159 = vst [vmem:[#allocation39_spill] sm:$0xff] %v16175_v12 }
 0x7ff   : > { %6705 = vrot.lane.b32.xlu0 %v6513_v43, %s12436_s6  ;;  %v16180_v10 = vpop.permute.xlu1 %7021  ;;  %v7015_v43 = vmul.f32 %v16130_v58, %v19151_v57 }
 0x801   : > { %7524 = vrot.lane.b32.xlu1 %v7486_v32, %s12436_s6  ;;  %v16188_v40 = vpop.permute.xlu0 %7345  ;;  %v7016_v32 = vmul.f32 %v16145_v44, %v19152_v37 }
 0x802   : > { %19160 = vst [vmem:[#allocation30_spill] sm:$0xff] %v16188_v40 }
 0x803   : > { %7051 = vrot.lane.b32.xlu0 %v7012_v59, %s12437_s19  ;;  %v16191_v7 = vpop.permute.xlu1 %7023  ;;  %v6839_v59 = vmul.f32 %v16145_v44, %v19154_v6 }
 0x804   : > { %19161 = vst [vmem:[#allocation32_spill] sm:$0xff] %v16191_v7 }
 0x805   : > { %6562 = vrot.lane.b32.xlu1 %v16130_v58, %s12434_s11  ;;  %v16202_v9 = vpop.permute.xlu0 %7528 }
 0x806   : > { %19163 = vst [vmem:[#allocation48_spill] sm:$0xff] %v16202_v9 }
 0x807   : > { %6876 = vrot.lane.b32.xlu0 %v6836_v16, %s12435_s10  ;;  %v16206_v57 = vpop.permute.xlu1 %7339  ;;  %v7833_v16 = vmul.f32 %v12377_v55, %v19154_v6 }
 0x808   : > { %19164 = vst [vmem:[#allocation35_spill] sm:$0xff] %v16206_v57 }
 0x809   : > { %6707 = vrot.lane.b32.xlu1 %v6514_v34, %s12436_s6  ;;  %v16212_v46 = vpop.permute.xlu0 %7315 }
 0x80a   : > { %19166 = vst [vmem:[#allocation13_spill] sm:$0xff] %v16212_v46 }
 0x80b   : > { %6564 = vrot.lane.b32.xlu0 %v16145_v44, %s12434_s11  ;;  %v16218_v60 = vpop.permute.xlu1 %7522 }
 0x80c   : > { %19167 = vst [vmem:[#allocation59_spill] sm:$0xff] %v16218_v60  ;;  %v7490_v60 = vmul.f32 %v16145_v44, %v19149_v61 }
 0x80d   : > { %7053 = vrot.lane.b32.xlu1 %v7013_v41, %s12437_s19  ;;  %v16225_v34 = vpop.permute.xlu0 %7492 }
 0x80e   : > { %19168 = vst [vmem:[#allocation25_spill] sm:$0xff] %v16225_v34  ;;  %v7313_v34 = vmul.f32 %v16145_v44, %v19153_v38 }
 0x80f   : > { %6880 = vrot.lane.b32.xlu0 %v6838_v13, %s12435_s10  ;;  %v16228_v41 = vpop.permute.xlu1 %7516  ;;  %v19171_v13 = vld [vmem:[#allocation22_spill] sm:$0xff] }
 0x810   : > { %19169 = vst [vmem:[#allocation41_spill] sm:$0xff] %v16228_v41 }
 0x811   : > { %7349 = vrot.lane.b32.xlu1 %v7310_v22, %s12417_s9  ;;  %v16234_v37 = vpop.permute.xlu0 %7494  ;;  %v7831_v22 = vmul.f32 %v16130_v58, %v19171_v13 }
 0x812   : > { %19170 = vst [vmem:[#allocation37_spill] sm:$0xff] %v16234_v37 }
 0x813   : > { %7353 = vrot.lane.b32.xlu0 %v7312_v17, %s12417_s9  ;;  %v16239_v17 = vpop.permute.xlu1 %7317 }
 0x814   : > { %19172 = vst [vmem:[#allocation46_spill] sm:$0xff] %v16239_v17 }
 0x815   : > { %7526 = vrot.lane.b32.xlu1 %v7487_v18, %s12436_s6 }
 0x817   : > { %7530 = vrot.lane.b32.xlu0 %v7489_v42, %s12436_s6  ;;  %v19173_v42 = vld [vmem:[#allocation17_spill] sm:$0xff] }
 0x819   : > { %6711 = vrot.lane.b32.xlu1 %v6516_v20, %s12436_s6  ;;  %v7829_v20 = vmul.f32 %v16087_v27, %v19148_v0 }
 0x81b   : > { %6713 = vrot.lane.b32.xlu0 %v6517_v35, %s12436_s6 }
 0x81d   : > { %7057 = vrot.lane.b32.xlu1 %v7015_v43, %s12437_s19  ;;  %v12378_v43 = vld [vmem:[#allocation4 + $0x58] sm:$0xff] }
 0x81f   : > { %7699 = vrot.lane.b32.xlu0 %v15568_v4, %s12434_s11  ;;  %v19165_v4 = vld [vmem:[#allocation15_spill] sm:$0xff] }
 0x821   : > { %7697 = vrot.lane.b32.xlu1 %v16145_v44, %s12434_s11 }
 0x823   : > { %7695 = vrot.lane.b32.xlu0 %v16130_v58, %s12434_s11 }
 0x825   : > { %7319 = vrot.lane.b32.xlu1 %v16200_v45, %s12426_s23 }
 0x827   : > { %7693 = vrot.lane.b32.xlu0 %v19165_v4, %s12434_s11  ;;  %v7830_v4 = vmul.f32 %v12378_v43, %v19154_v6 }
 0x829   : > { %7691 = vrot.lane.b32.xlu1 %v16087_v27, %s12434_s11 }
 0x82b   : > { %7059 = vrot.lane.b32.xlu0 %v7016_v32, %s12437_s19  ;;  %v16256_v32 = vld [vmem:[%s18598_s3 + $0x170] sm:$0xff] }
 0x82c   : > { %19174 = vst [vmem:[#allocation27_spill] sm:$0xff] %v16256_v32 }
 0x82d   : > { %6882 = vrot.lane.b32.xlu1 %v6839_v59, %s12435_s10 }
 0x82f   : > { %7868 = vrot.lane.b32.xlu0 %v7833_v16, %s12435_s10 }
 0x831   : > { %7496 = vrot.lane.b32.xlu1 %v16200_v45, %s12434_s11 }
 0x833   : > { %7689 = vrot.lane.b32.xlu0 %v16069_v24, %s12434_s11 }
 0x835   : > { %7864 = vrot.lane.b32.xlu1 %v7831_v22, %s12435_s10  ;;  %v7828_v22 = vmul.f32 %v16069_v24, %v19171_v13 }
 0x837   : > { %7685 = vrot.lane.b32.xlu0 %v16038_v14, %s12434_s11 }
 0x839   : > { %v16243_v18 = vpop.permute.xlu0 %6544  ;;  %7687 = vrot.lane.b32.xlu1 %v19173_v42, %s12434_s11 }
 0x83b   : > { %7860 = vrot.lane.b32.xlu0 %v7829_v20, %s12435_s10  ;;  %v16250_v35 = vpop.permute.xlu1 %6546 }
 0x83d   : > { %v16258_v59 = vpop.permute.xlu0 %6862  ;;  %7862 = vrot.lane.b32.xlu1 %v7830_v4, %s12435_s10  ;;  %v19176_v4 = vld [vmem:[#allocation29_spill] sm:$0xff] }
 0x83f   : > { %7321 = vrot.lane.b32.xlu0 %v16256_v32, %s12426_s23  ;;  %v16263_v55 = vpop.permute.xlu1 %6693 }
 0x841   : > { %v16265_v16 = vpop.permute.xlu0 %7335  ;;  %7683 = vrot.lane.b32.xlu1 %v16007_v29, %s12434_s11 }
 0x842   : > { %19175 = vst [vmem:[#allocation24_spill] sm:$0xff] %v16265_v16 }
 0x843   : > { %7858 = vrot.lane.b32.xlu0 %v7828_v22, %s12435_s10  ;;  %v16272_v20 = vpop.permute.xlu1 %7039  ;;  %v7827_v22 = vmul.f32 %v19173_v42, %v19154_v6 }
 0x845   : > { %v16274_v43 = vpop.permute.xlu0 %6695  ;;  %7679 = vrot.lane.b32.xlu1 %v15962_v5, %s12434_s11 }
 0x847   : > { %7681 = vrot.lane.b32.xlu0 %v19176_v4, %s12434_s11  ;;  %v16280_v37 = vpop.permute.xlu1 %7512 }
 0x848   : > { %19177 = vst [vmem:[#allocation51_spill] sm:$0xff] %v16280_v37  ;;  %v19180_v37 = vld [vmem:[#allocation18_spill] sm:$0xff] }
 0x849   : > { %v16284_v17 = vpop.permute.xlu0 %7041  ;;  %7355 = vrot.lane.b32.xlu1 %v7313_v34, %s12417_s9  ;;  %v7826_v34 = vmul.f32 %v16038_v14, %v19148_v0 }
 0x84b   : > { %7856 = vrot.lane.b32.xlu0 %v7827_v22, %s12435_s10  ;;  %v16290_v41 = vpop.permute.xlu1 %6550  ;;  %v7823_v22 = vmul.f32 %v15962_v5, %v19148_v0 }
 0x84d   : > { %v16294_v46 = vpop.permute.xlu0 %7337  ;;  %7532 = vrot.lane.b32.xlu1 %v7490_v60, %s12436_s6 }
 0x84e   : > { %19178 = vst [vmem:[#allocation19_spill] sm:$0xff] %v16294_v46  ;;  %v7832_v46 = vmul.f32 %v16145_v44, %v19148_v0 }
 0x84f   : > { %7677 = vrot.lane.b32.xlu0 %v15960_v36, %s12434_s11  ;;  %v16299_v38 = vpop.permute.xlu1 %6864 }
 0x851   : > { %v16303_v42 = vpop.permute.xlu0 %7514  ;;  %7854 = vrot.lane.b32.xlu1 %v7826_v34, %s12435_s10  ;;  %v7825_v34 = vmul.f32 %v16007_v29, %v19171_v13 }
 0x852   : > { %19179 = vst [vmem:[#allocation53_spill] sm:$0xff] %v16303_v42 }
 0x853   : > { %7848 = vrot.lane.b32.xlu0 %v7823_v22, %s12435_s10  ;;  %v16309_v61 = vpop.permute.xlu1 %6699  ;;  %v19181_v22 = vld [vmem:[#allocation16_spill] sm:$0xff] }
 0x855   : > { %v16311_v60 = vpop.permute.xlu0 %6552  ;;  %7498 = vrot.lane.b32.xlu1 %v16256_v32, %s12434_s11 }
 0x857   : > { %7657 = vrot.lane.b32.xlu0 %v19180_v37, %s12432_s22  ;;  %v16317_v16 = vpop.permute.xlu1 %6868 }
 0x859   : > { %v16321_v42 = vpop.permute.xlu0 %7045  ;;  %7852 = vrot.lane.b32.xlu1 %v7825_v34, %s12435_s10  ;;  %v7824_v34 = vmul.f32 %v19176_v4, %v19154_v6  ;;  %v360_v6 = vld [vmem:[%s18602_s7] ss:$8 sm:$0x3] }
 0x85b   : > { %7659 = vrot.lane.b32.xlu0 %v19181_v22, %s12432_s22  ;;  %v16326_v9 = vpop.permute.xlu1 %7518  ;;  %v12118_v22 = vld [vmem:[%s18599_s4 + $0x70] sm:$0xff] }
 0x85c   : > { %19182 = vst [vmem:[#allocation20_spill] sm:$0xff] %v16326_v9 }
 0x85d   : > { %v16330_v57 = vpop.permute.xlu0 %7341  ;;  %7866 = vrot.lane.b32.xlu1 %v7832_v46, %s12435_s10  ;;  %v7822_v46 = vmul.f32 %v15960_v36, %v19171_v13  ;;  %v12119_v13 = vld [vmem:[%s18599_s4 + $0x78] sm:$0xff] }
 0x85e   : > { %19183 = vst [vmem:[#allocation57_spill] sm:$0xff] %v16330_v57 }
 0x85f   : > { %7663 = vrot.lane.b32.xlu0 %v16256_v32, %s12432_s22  ;;  %v16335_v37 = vpop.permute.xlu1 %7047  ;;  %v12116_v32 = vld [vmem:[%s18599_s4 + $0x60] sm:$0xff] }
 0x861   : > { %v6557_v9 = vpop.permute.xlu0 %6556  ;;  %7850 = vrot.lane.b32.xlu1 %v7824_v34, %s12435_s10 }
 0x862   : > { %v6570_v36 = vsel %vm4967_vm6, %v19191_v21, %v6557_v9 }
 0x863   : > { %8007 = vperm.xlu0 %12353, %v12118_v22   ;;  %v16343_v0 = vpop.permute.xlu1 %7343  ;;  %v19185_v22 = vld [vmem:[#allocation8_spill] sm:$0xff] }
 0x864   : > { %19184 = vst [vmem:[#allocation42_spill] sm:$0xff] %v16343_v0  ;;  %v8093_v57 = vrot.slane %v360_v6, %v19185_v22  ;;  %v11909_v0 = vld [vmem:[%s18602_s7 + $0x7] ss:$8 sm:$0x3] }
 0x865   : > { %v16353_v4 = vpop.permute.xlu0 %6701  ;;  %7846 = vrot.lane.b32.xlu1 %v7822_v46, %s12435_s10 }
 0x867   : > { %7997 = vperm.xlu0 %12353, %v12116_v32   ;;  %v6559_v34 = vpop.permute.xlu1 %6558  ;;  %v8394_v32 = vrot.slane %v11909_v0, %v19185_v22  ;;  %v19189_v22 = vld [vmem:[#allocation7_spill] sm:$0xff] }
 0x868   : > { %v8089_v49 = vrot.slane %v360_v6, %v19189_v22 }
 0x869   : > { %v16357_v12 = vpop.permute.xlu0 %6870  ;;  %7661 = vrot.lane.b32.xlu1 %v16200_v45, %s12432_s22  ;;  %v12117_v45 = vld [vmem:[%s18599_s4 + $0x68] sm:$0xff] }
 0x86b   : > { %v16367_v40 = vpop.permute.xlu1 %6874  ;;  %8096 = vrot.lane.b32.xlu0 %v8093_v57, %s12418_s15 }
 0x86d   : > { %v16371_v46 = vpop.permute.xlu0 %7520  ;;  %8012 = vperm.xlu1 %12354, %v12119_v13  }
 0x86e   : > { %19186 = vst [vmem:[#allocation21_spill] sm:$0xff] %v16371_v46 }
 0x86f   : > { %v16376_v30 = vpop.permute.xlu1 %7347  ;;  %8397 = vrot.lane.b32.xlu0 %v8394_v32, %s12438_s27  ;;  %v8390_v32 = vrot.slane %v11909_v0, %v19189_v22 }
 0x870   : > { %19187 = vst [vmem:[#allocation14_spill] sm:$0xff] %v16376_v30 }
 0x871   : > { %v6706_v57 = vpop.permute.xlu0 %6705  ;;  %8002 = vperm.xlu1 %12354, %v12117_v45   ;;  %v16399_v45 = vld [vmem:[%s18598_s3 + $0x180] sm:$0xff] }
 0x873   : > { %v16385_v46 = vpop.permute.xlu1 %7524  ;;  %8121 = vrot.lane.b32.xlu0 %v16382_v63, %s12426_s23 }
 0x874   : > { %19190 = vst [vmem:[#allocation52_spill] sm:$0xff] %v16385_v46 }
 0x875   : > { %v16389_v13 = vpop.permute.xlu0 %7051  ;;  %8094 = vrot.lane.b32.xlu1 %v8089_v49, %s12418_s15 }
 0x877   : > { %v6563_v30 = vpop.permute.xlu1 %6562 }
 0x878   : > { %v6572_v0 = vsel %vm4967_vm6, %v15974_v31, %v6563_v30  ;;  %v6568_v31 = vsel %vm4967_vm6, %v15989_v51, %v16290_v41 }
 0x879   : > { %v16393_v7 = vpop.permute.xlu0 %6876  ;;  %8395 = vrot.lane.b32.xlu1 %v8390_v32, %s12438_s27  ;;  %v6571_v32 = vsel %vm4967_vm6, %v6557_v9, %v6559_v34  ;;  %v19192_v9 = vmov 0.0  }
 0x87b   : > { %v6708_v6 = vpop.permute.xlu1 %6707 }
 0x87d   : > { %v6565_v46 = vpop.permute.xlu0 %6564  ;;  %8119 = vrot.lane.b32.xlu1 %v16399_v45, %s12426_s23 }
 0x87e   : > { %v6573_v63 = vsel %vm4967_vm6, %v6563_v30, %v6565_v46  ;;  %v6569_v46 = vsel %vm4967_vm6, %v16290_v41, %v16311_v60  ;;  %v6567_v30 = vsel %vm4967_vm6, %v16243_v18, %v16250_v35 }
 0x87f   : > { %6614 = vmatprep.subr.mxu0 %v6573_v63  ;;  %v16404_v49 = vpop.permute.xlu1 %7053 }
 0x880   : > { %6615 = vmatpush1.msra.mxu0 %v6572_v0  ;;  %v6719_v0 = vsel %vm5117_vm3, %v16041_v56, %v6706_v57  ;;  %v6716_v56 = vsel %vm5117_vm3, %v16263_v55, %v16274_v43 }
 0x881   : > { %v16409_v22 = vpop.permute.xlu0 %6880  ;;  %6616 = vmatprep.subr.mxu0 %v6571_v32 }
 0x882   : > { %6617 = vmatpush1.msra.mxu0 %v6570_v36  ;;  %v6566_v36 = vsel %vm4967_vm6, %v15957_v39, %v16243_v18  ;;  %v6720_v18 = vsel %vm5117_vm3, %v6706_v57, %v6708_v6  ;;  %v6717_v6 = vsel %vm5117_vm3, %v16058_v33, %v16309_v61 }
 0x883   : > { %6618 = vmatprep.subr.mxu0 %v6569_v46  ;;  %v16416_v63 = vpop.permute.xlu1 %7349  ;;  %v12381_v46 = vld [vmem:[%s18598_s3 + $0x150] sm:$0xff] }
 0x884   : > { %6619 = vmatpush1.msra.mxu0 %v6568_v31 }
 0x885   : > { %v16424_v34 = vpop.permute.xlu0 %7353  ;;  %6620 = vmatprep.subr.mxu0 %v6567_v30 }
 0x886   : > { %6621 = vmatpush1.msra.mxu0 %v6566_v36 }
 0x887   : > { %12120 = vmatmul.mubr.msk.f32.vlgmr.msra.gmra.mxu0 %vm1751_vm0, %v16005_v25  ;;  %v16431_v21 = vpop.permute.xlu1 %7526 }
 0x888   : > { %6660 = vmatprep.mubr.f32.mxu0 %v19192_v9 }
 0x889   : > { %v16434_v51 = vpop.permute.xlu0 %7530 }
 0x88b   : > { %12121 = vmatmul.mubr.msk.f32.gmra.mxu0 %vm1751_vm0, %v15966_v2  ;;  %v6712_v41 = vpop.permute.xlu1 %6711 }
 0x88c   : > { %6666 = vmatprep.mubr.f32.mxu0 %v19192_v9  ;;  %v6721_v25 = vsel %vm5117_vm3, %v16023_v54, %v6712_v41 }
 0x88d   : > { %v6714_v35 = vpop.permute.xlu0 %6713 }
 0x88e   : > { %v6722_v60 = vsel %vm5117_vm3, %v6712_v41, %v6714_v35  ;;  %v7066_v41 = vsel %vm430_vm5, %v16389_v13, %v16404_v49  ;;  %v6889_v49 = vsel %vm4902_vm2, %v16367_v40, %v16393_v7  ;;  %v7063_v7 = vsel %vm430_vm5, %v16103_v28, %v16321_v42 }
 0x88f   : > { %12122 = vmatmul.mubr.msk.f32.gmra.mxu0 %vm1751_vm0, %v15983_v52  ;;  %6763 = vmatprep.subr.mxu1 %v6722_v60  ;;  %v7058_v39 = vpop.permute.xlu1 %7057  ;;  %v6718_v52 = vsel %vm5117_vm3, %v16309_v61, %v16353_v4  ;;  %v12379_v4 = vld [vmem:[%s18598_s3 + $0x120] sm:$0xff]  ;;  %v12380_v61 = vld [vmem:[%s18598_s3 + $0x138] sm:$0xff]  ;;  %v6890_v60 = vsel %vm4902_vm2, %v15999_v48, %v16409_v22  ;;  %v7064_v48 = vsel %vm430_vm5, %v16321_v42, %v16335_v37 }
 0x890   : > { %6764 = vmatpush1.msra.mxu1 %v6721_v25  ;;  %6672 = vmatprep.mubr.f32.mxu0 %v19192_v9  ;;  %v7067_v30 = vsel %vm430_vm5, %v16125_v26, %v7058_v39  ;;  %v7065_v26 = vsel %vm430_vm5, %v16140_v3, %v16389_v13  ;;  %v6888_v3 = vsel %vm4902_vm2, %v16014_v19, %v16367_v40  ;;  %v19198_v42 = vld [vmem:[#allocation28_spill] sm:$0xff] }
 0x891   : > { %v16446_v2 = vpop.permute.xlu0 %7699  ;;  %6765 = vmatprep.subr.mxu1 %v6720_v18  ;;  %v6887_v13 = vsel %vm4902_vm2, %v16317_v16, %v16357_v12  ;;  %v7062_v37 = vsel %vm430_vm5, %v16272_v20, %v16284_v17  ;;  %v6886_v19 = vsel %vm4902_vm2, %v16090_v62, %v16317_v16  ;;  %v7061_v28 = vsel %vm430_vm5, %v16119_v53, %v16272_v20 }
 0x892   : > { %6766 = vmatpush1.msra.mxu1 %v6719_v0  ;;  %v6885_v12 = vsel %vm4902_vm2, %v16258_v59, %v16299_v38  ;;  %v6884_v62 = vsel %vm4902_vm2, %v16052_v15, %v16258_v59  ;;  %v19197_v59 = vld [vmem:[#allocation31_spill] sm:$0xff]  ;;  %v7364_v18 = vsel %vm5429_vm4, %v16416_v63, %v19198_v42 }
 0x893   : > { %12123 = vmatmul.mubr.msk.f32.gmra.mxu0 %vm1751_vm0, %v16072_v50  ;;  %6767 = vmatprep.subr.mxu1 %v6718_v52  ;;  %v16455_v54 = vpop.permute.xlu1 %7697  ;;  %v6715_v50 = vsel %vm5117_vm3, %v16034_v1, %v16263_v55  ;;  %v12384_v38 = vld [vmem:[%s18598_s3 + $0x140] sm:$0xff]  ;;  %v19199_v52 = vld [vmem:[#allocation14_spill] sm:$0xff] }
 0x894   : > { %6768 = vmatpush1.msra.mxu1 %v6717_v6  ;;  %6972 = vmatprep.mubr.f32.mxu0 %v19192_v9  ;;  %v19200_v6 = vld [vmem:[#allocation30_spill] sm:$0xff] }
 0x895   : > { %v16464_v57 = vpop.permute.xlu0 %7695  ;;  %6769 = vmatprep.subr.mxu1 %v6716_v56  ;;  %v19201_v56 = vld [vmem:[#allocation42_spill] sm:$0xff] }
 0x896   : > { %6770 = vmatpush1.msra.mxu1 %v6715_v50  ;;  %v7362_v50 = vsel %vm5429_vm4, %v19201_v56, %v19200_v6 }
 0x897   : > { %12124 = vmatmul.mubr.msk.f32.vlgmr.msra.gmra.mxu1 %vm1751_vm0, %v12379_v4  ;;  %v16473_v33 = vpop.permute.xlu1 %7319  ;;  %v19202_v4 = vld [vmem:[#allocation39_spill] sm:$0xff] }
 0x898   : > { %6809 = vmatprep.mubr.f32.mxu1 %v19192_v9 }
 0x899   : > { %v16476_v43 = vpop.permute.xlu0 %7693 }
 0x89b   : > { %12125 = vmatmul.mubr.msk.f32.gmra.mxu1 %vm1751_vm0, %v12380_v61  ;;  %v16482_v1 = vpop.permute.xlu1 %7691 }
 0x89c   : > { %6815 = vmatprep.mubr.f32.mxu1 %v19192_v9 }
 0x89d   : > { %v7060_v55 = vpop.permute.xlu0 %7059 }
 0x89e   : > { %v7068_v32 = vsel %vm430_vm5, %v7058_v39, %v7060_v55  ;;  %v12382_v39 = vld [vmem:[%s18598_s3 + $0x168] sm:$0xff]  ;;  %vm8098_vm5 = vcmask 982016  }
 0x89f   : > { %12126 = vmatmul.mubr.msk.f32.gmra.mxu1 %vm1751_vm0, %v12381_v46  ;;  %7109 = vmatprep.subr.mxu1 %v7068_v32  ;;  %v6883_v31 = vpop.permute.xlu1 %6882  ;;  %v19203_v32 = vld [vmem:[#allocation57_spill] sm:$0xff] }
 0x8a0   : > { %7110 = vmatpush1.msra.mxu1 %v7067_v30  ;;  %v6891_v36 = vsel %vm4902_vm2, %v16409_v22, %v6883_v31  ;;  %6821 = vmatprep.mubr.f32.mxu1 %v19192_v9  ;;  %v7361_v46 = vsel %vm5429_vm4, %v19203_v32, %v19201_v56  ;;  %v19205_v30 = vld [vmem:[#allocation35_spill] sm:$0xff] }
 0x8a1   : > { %v16498_v35 = vpop.permute.xlu0 %7868  ;;  %6932 = vmatprep.subr.mxu0 %v6891_v36  ;;  %7111 = vmatprep.subr.mxu1 %v7066_v41  ;;  %v19206_v36 = vld [vmem:[#allocation19_spill] sm:$0xff] }
 0x8a2   : > { %6933 = vmatpush1.msra.mxu0 %v6890_v60  ;;  %7112 = vmatpush1.msra.mxu1 %v7065_v26  ;;  %v7360_v41 = vsel %vm5429_vm4, %v19206_v36, %v19205_v30  ;;  %v19207_v60 = vld [vmem:[#allocation48_spill] sm:$0xff] }
 0x8a3   : > { %12127 = vmatmul.mubr.msk.f32.gmra.mxu1 %vm1751_vm0, %v12382_v39  ;;  %6934 = vmatprep.subr.mxu0 %v6889_v49  ;;  %v16516_v22 = vpop.permute.xlu1 %7496  ;;  %v19208_v49 = vld [vmem:[#allocation24_spill] sm:$0xff] }
 0x8a4   : > { %7113 = vmatprep.subr.mxu1 %v7064_v48  ;;  %6935 = vmatpush1.msra.mxu0 %v6888_v3  ;;  %v7359_v39 = vsel %vm5429_vm4, %v19208_v49, %v19206_v36  ;;  %v19209_v48 = vld [vmem:[#allocation52_spill] sm:$0xff] }
 0x8a5   : > { %7114 = vmatpush1.msra.mxu1 %v7063_v7  ;;  %v16527_v25 = vpop.permute.xlu0 %7689  ;;  %6936 = vmatprep.subr.mxu0 %v6887_v13  ;;  %v7540_v3 = vsel %vm5117_vm3, %v19209_v48, %v16431_v21  ;;  %v19210_v7 = vld [vmem:[#allocation27_spill] sm:$0xff]  ;;  %v19211_v13 = vld [vmem:[#allocation13_spill] sm:$0xff] }
 0x8a6   : > { %7115 = vmatprep.subr.mxu1 %v7062_v37  ;;  %6937 = vmatpush1.msra.mxu0 %v6886_v19  ;;  %v19212_v37 = vld [vmem:[#allocation59_spill] sm:$0xff]  ;;  %v19213_v19 = vld [vmem:[#allocation21_spill] sm:$0xff] }
 0x8a7   : > { %7116 = vmatpush1.msra.mxu1 %v7061_v28  ;;  %7149 = vmatprep.mubr.f32.mxu1 %v19192_v9  ;;  %v16542_v40 = vpop.permute.xlu1 %7864  ;;  %v7539_v28 = vsel %vm5117_vm3, %v19213_v19, %v19212_v37  ;;  %v16764_v30 = vld [vmem:[#allocation3 + $0x50] sm:$0xff]  ;;  %v12162_v48 = vld [vmem:[%s18598_s3 + $0x1b0] sm:$0xff]  ;;  %v16790_v37 = vld [vmem:[#allocation3 + $0x78] sm:$0xff] }
 0x8a8   : > { %6938 = vmatprep.subr.mxu0 %v6885_v12  ;;  %12132 = vmatmul.mubr.msk.f32.vlgmr.msra.gmra.mxu1 %vm1751_vm0, %v16167_v8  ;;  %v7708_v12 = vsel %vm4967_vm6, %v16455_v54, %v16446_v2  ;;  %v7706_v2 = vsel %vm4967_vm6, %v16482_v1, %v16476_v43  ;;  %v19219_v43 = vld [vmem:[#allocation25_spill] sm:$0xff]  ;;  %19226 = vst [vmem:[#allocation58_spill] sm:$0xff] %v16764_v30  ;;  %19230 = vst [vmem:[#allocation43_spill] sm:$0xff] %v16790_v37 }
 0x8a9   : > { %6939 = vmatpush1.msra.mxu0 %v6884_v62  ;;  %v16549_v17 = vpop.permute.xlu0 %7685  ;;  %7155 = vmatprep.mubr.f32.mxu1 %v19192_v9  ;;  %v19214_v62 = vld [vmem:[#allocation20_spill] sm:$0xff] }
 0x8aa   : > { %12128 = vmatmul.mubr.msk.f32.vlgmr.msra.gmra.mxu0 %vm1751_vm0, %v16109_v47  ;;  %7218 = vmatprep.subr.mxu0 %v16145_v44  ;;  %v12383_v44 = vld [vmem:[%s18598_s3 + $0x128] sm:$0xff] }
 0x8ab   : > { %7219 = vmatpush1.msra.mxu0 %v16130_v58  ;;  %v16556_v53 = vpop.permute.xlu1 %7687  ;;  %6978 = vmatprep.mubr.f32.mxu0 %v19192_v9 }
 0x8ac   : > { %12133 = vmatmul.mubr.msk.f32.gmra.mxu1 %vm1751_vm0, %v16133_v23  ;;  %7220 = vmatprep.subr.mxu0 %v16087_v27 }
 0x8ad   : > { %7221 = vmatpush1.msra.mxu0 %v16069_v24  ;;  %v16563_v15 = vpop.permute.xlu0 %7860  ;;  %7161 = vmatprep.mubr.f32.mxu1 %v19192_v9  ;;  %v19193_v24 = vld [vmem:[#allocation44_spill] sm:$0xff] }
 0x8ae   : > { %12129 = vmatmul.mubr.msk.f32.gmra.mxu0 %vm1751_vm0, %v16067_v11  ;;  %7222 = vmatprep.subr.mxu0 %v16038_v14  ;;  %v19194_v11 = vld [vmem:[#allocation36_spill] sm:$0xff] }
 0x8af   : > { %7223 = vmatpush1.msra.mxu0 %v16007_v29  ;;  %v16570_v47 = vpop.permute.xlu1 %7862  ;;  %6984 = vmatprep.mubr.f32.mxu0 %v19192_v9  ;;  %v19195_v29 = vld [vmem:[#allocation32_spill] sm:$0xff] }
 0x8b0   : > { %12134 = vmatmul.mubr.msk.f32.gmra.mxu1 %vm1751_vm0, %v16180_v10  ;;  %7224 = vmatprep.subr.mxu0 %v15962_v5  ;;  %v19196_v5 = vld [vmem:[#allocation49_spill] sm:$0xff] }
 0x8b1   : > { %7225 = vmatpush1.msra.mxu0 %v19193_v24  ;;  %v16577_v27 = vpop.permute.xlu0 %7321  ;;  %7167 = vmatprep.mubr.f32.mxu1 %v19192_v9  ;;  %v7538_v24 = vsel %vm5117_vm3, %v19214_v62, %v19213_v19 }
 0x8b2   : > { %12130 = vmatmul.mubr.msk.f32.gmra.mxu0 %vm1751_vm0, %v19194_v11 }
 0x8b3   : > { %v16582_v14 = vpop.permute.xlu1 %7683  ;;  %6990 = vmatprep.mubr.f32.mxu0 %v19192_v9 }
 0x8b4   : > { %12135 = vmatmul.mubr.msk.f32.gmra.mxu1 %vm1751_vm0, %v19195_v29 }
 0x8b5   : > { %7447 = vmatprep.mubr.f32.mxu1 %v19192_v9  ;;  %v16588_v58 = vpop.permute.xlu0 %7858 }
 0x8b6   : > { %12131 = vmatmul.mubr.msk.f32.gmra.mxu0 %vm1751_vm0, %v19196_v5  ;;  %v19215_v5 = vld [vmem:[#allocation41_spill] sm:$0xff] }
 0x8b7   : > { %v16592_v23 = vpop.permute.xlu1 %7679  ;;  %7258 = vmatprep.mubr.f32.mxu0 %v19192_v9 }
 0x8b9   : > { %v16600_v10 = vpop.permute.xlu0 %7681 }
 0x8ba   : > { %12136 = vmatmul.mubr.msk.f32.vlgmr.msra.gmra.mxu0 %vm1751_vm0, %v12383_v44  ;;  %v19216_v44 = vld [vmem:[#allocation53_spill] sm:$0xff]  ;;  %v7702_v42 = vsel %vm4967_vm6, %v16592_v23, %v16600_v10  ;;  %v7875_v10 = vsel %vm4902_vm2, %v16563_v15, %v16570_v47 }
 0x8bb   : > { %v7356_v8 = vpop.permute.xlu1 %7355  ;;  %7264 = vmatprep.mubr.f32.mxu0 %v19192_v9 }
 0x8bc   : > { %v7366_v16 = vsel %vm5429_vm4, %v7356_v8, %v19197_v59  ;;  %v7365_v20 = vsel %vm5429_vm4, %v16424_v34, %v7356_v8  ;;  %v7363_v34 = vsel %vm5429_vm4, %v19199_v52, %v16416_v63  ;;  %v19204_v63 = vld [vmem:[#allocation33_spill] sm:$0xff]  ;;  %v7537_v8 = vsel %vm5117_vm3, %v19216_v44, %v19215_v5 }
 0x8bd   : > { %7407 = vmatprep.subr.mxu1 %v7366_v16  ;;  %v16627_v31 = vpop.permute.xlu0 %7856  ;;  %v7705_v59 = vsel %vm4967_vm6, %v16527_v25, %v16482_v1  ;;  %v7703_v1 = vsel %vm4967_vm6, %v16582_v14, %v16549_v17 }
 0x8be   : > { %12137 = vmatmul.mubr.msk.f32.gmra.mxu0 %vm1751_vm0, %v12384_v38  ;;  %7408 = vmatpush1.msra.mxu1 %v7365_v20  ;;  %v19218_v20 = vld [vmem:[#allocation46_spill] sm:$0xff]  ;;  %v7704_v38 = vsel %vm4967_vm6, %v16549_v17, %v16556_v53 }
 0x8bf   : > { %7409 = vmatprep.subr.mxu1 %v7364_v18  ;;  %v7533_v0 = vpop.permute.xlu1 %7532  ;;  %7270 = vmatprep.mubr.f32.mxu0 %v19192_v9 }
 0x8c0   : > { %7410 = vmatpush1.msra.mxu1 %v7363_v34  ;;  %v7543_v61 = vsel %vm5117_vm3, %v7533_v0, %v19202_v4  ;;  %v7542_v55 = vsel %vm5117_vm3, %v16434_v51, %v7533_v0  ;;  %v7541_v51 = vsel %vm5117_vm3, %v16431_v21, %v19207_v60  ;;  %v7707_v21 = vsel %vm4967_vm6, %v16464_v57, %v16455_v54  ;;  %v19217_v54 = vld [vmem:[#allocation51_spill] sm:$0xff]  ;;  %v19220_v0 = vld [vmem:[#allocation37_spill] sm:$0xff] }
 0x8c1   : > { %7411 = vmatprep.subr.mxu1 %v7362_v50  ;;  %7584 = vmatprep.subr.mxu0 %v7543_v61  ;;  %v7678_v29 = vpop.permute.xlu0 %7677  ;;  %v7536_v57 = vsel %vm5117_vm3, %v19217_v54, %v19216_v44  ;;  %v12109_v34 = vld [vmem:[%s18598_s3 + $0x148] sm:$0xff]  ;;  %v12112_v50 = vld [vmem:[%s18598_s3 + $0x160] sm:$0xff]  ;;  %v12115_v61 = vld [vmem:[%s18598_s3 + $0x178] sm:$0xff] }
 0x8c2   : > { %12138 = vmatmul.mubr.msk.f32.gmra.mxu0 %vm1751_vm0, %v19204_v63  ;;  %7412 = vmatpush1.msra.mxu1 %v7361_v46  ;;  %v7701_v18 = vsel %vm4967_vm6, %v7678_v29, %v16592_v23  ;;  %v16762_v63 = vld [vmem:[#allocation3 + $0x58] sm:$0xff]  ;;  %v8082_v60 = vld [vmem:[#allocation3 + $0x30] sm:$0xff] }
 0x8c3   : > { %7585 = vmatpush1.msra.mxu0 %v7542_v55  ;;  %7413 = vmatprep.subr.mxu1 %v7360_v41  ;;  %v16637_v26 = vpop.permute.xlu1 %7854  ;;  %19225 = vst [vmem:[#allocation50_spill] sm:$0xff] %v16762_v63  ;;  %v12165_v44 = vld [vmem:[%s18598_s3 + $0x1c8] sm:$0xff] }
 0x8c4   : > { %7586 = vmatprep.subr.mxu0 %v7541_v51  ;;  %7276 = vmatprep.mubr.f32.mxu0 %v19192_v9 }
 0x8c5   : > { %7414 = vmatpush1.msra.mxu1 %v7359_v39  ;;  %7587 = vmatpush1.msra.mxu0 %v7540_v3  ;;  %v7849_v25 = vpop.permute.xlu0 %7848  ;;  %v8079_v39 = vld [vmem:[#allocation3 + $0x38] sm:$0xff] }
 0x8c6   : > { %12139 = vmatmul.mubr.msk.f32.gmra.mxu0 %vm1751_vm0, %v19210_v7  ;;  %12140 = vmatmul.mubr.msk.f32.vlgmr.msra.gmra.mxu1 %vm1751_vm0, %v19211_v13 }
 0x8c7   : > { %7588 = vmatprep.subr.mxu0 %v7539_v28  ;;  %7749 = vmatprep.subr.mxu1 %v7708_v12  ;;  %v7499_v11 = vpop.permute.xlu1 %7498  ;;  %v8076_v12 = vld [vmem:[#allocation3 + $0x40] sm:$0xff] }
 0x8c8   : > { %7589 = vmatpush1.msra.mxu0 %v7538_v24  ;;  %7750 = vmatpush1.msra.mxu1 %v7707_v21  ;;  %v8073_v21 = vld [vmem:[#allocation3 + $0xb0] sm:$0xff] }
 0x8c9   : > { %7590 = vmatprep.subr.mxu0 %v7537_v8  ;;  %7751 = vmatprep.subr.mxu1 %v7706_v2  ;;  %v7658_v23 = vpop.permute.xlu0 %7657  ;;  %v19232_v2 = vld [vmem:[#allocation45_spill] sm:$0xff] }
 0x8ca   : > { %7453 = vmatprep.mubr.f32.mxu1 %v19192_v9  ;;  %7591 = vmatpush1.msra.mxu0 %v7536_v57 }
 0x8cb   : > { %7624 = vmatprep.mubr.f32.mxu0 %v19192_v9  ;;  %7752 = vmatpush1.msra.mxu1 %v7705_v59  ;;  %v7853_v16 = vpop.permute.xlu1 %7852 }
 0x8cc   : > { %12141 = vmatmul.mubr.msk.f32.gmra.mxu1 %vm1751_vm0, %v19218_v20  ;;  %12144 = vmatmul.mubr.msk.f32.vlgmr.msra.gmra.mxu0 %vm1751_vm0, %v19219_v43  ;;  %v16837_v43 = vld [vmem:[#allocation3 + $0x20] sm:$0xff] }
 0x8cd   : > { %7753 = vmatprep.subr.mxu1 %v7704_v38  ;;  %7459 = vmatprep.mubr.f32.mxu1 %v19192_v9  ;;  %19234 = vst [vmem:[#allocation38_spill] sm:$0xff] %v16837_v43 }
 0x8ce   : > { %7754 = vmatpush1.msra.mxu1 %v7703_v1  ;;  %7630 = vmatprep.mubr.f32.mxu0 %v19192_v9  ;;  %v16844_v1 = vld [vmem:[#allocation3 + $0xa8] sm:$0xff] }
 0x8cf   : > { %7755 = vmatprep.subr.mxu1 %v7702_v42  ;;  %v7867_v53 = vpop.permute.xlu1 %7866  ;;  %19235 = vst [vmem:[#allocation9_spill] sm:$0xff] %v16844_v1 }
 0x8d0   : > { %7756 = vmatpush1.msra.mxu1 %v7701_v18  ;;  %12145 = vmatmul.mubr.msk.f32.gmra.mxu0 %vm1751_vm0, %v19220_v0  ;;  %v7877_v17 = vsel %vm4902_vm2, %v7867_v53, %v16498_v35  ;;  %v7876_v14 = vsel %vm4902_vm2, %v16542_v40, %v7867_v53  ;;  %v7873_v35 = vsel %vm4902_vm2, %v16637_v26, %v16627_v31  ;;  %v16855_v18 = vld [vmem:[#allocation3 + $0x18] sm:$0xff]  ;;  %v16861_v0 = vld [vmem:[#allocation3 + $0x60] sm:$0xff] }
 0x8d1   : > { %12142 = vmatmul.mubr.msk.f32.gmra.mxu1 %vm1751_vm0, %v16473_v33  ;;  %7636 = vmatprep.mubr.f32.mxu0 %v19192_v9  ;;  %v7874_v33 = vsel %vm4902_vm2, %v16588_v58, %v16563_v15  ;;  %v7660_v15 = vpop.permute.xlu0 %7659  ;;  %v12106_v58 = vld [vmem:[%s18598_s3 + $0x130] sm:$0xff]  ;;  %19236 = vst [vmem:[#allocation10_spill] sm:$0xff] %v16855_v18  ;;  %19237 = vst [vmem:[#allocation11_spill] sm:$0xff] %v16861_v0 }
 0x8d2   : > { %7465 = vmatprep.mubr.f32.mxu1 %v19192_v9  ;;  %7922 = vmatprep.subr.mxu0 %v7877_v17 }
 0x8d3   : > { %7923 = vmatpush1.msra.mxu0 %v7876_v14  ;;  %v7851_v52 = vpop.permute.xlu1 %7850 }
 0x8d4   : > { %12146 = vmatmul.mubr.msk.f32.gmra.mxu0 %vm1751_vm0, %v16516_v22  ;;  %7924 = vmatprep.subr.mxu0 %v7875_v10  ;;  %v7872_v22 = vsel %vm4902_vm2, %v7853_v16, %v16637_v26 }
 0x8d5   : > { %12143 = vmatmul.mubr.msk.f32.gmra.mxu1 %vm1751_vm0, %v16577_v27  ;;  %7642 = vmatprep.mubr.f32.mxu0 %v19192_v9  ;;  %v7871_v27 = vsel %vm4902_vm2, %v7849_v25, %v7851_v52  ;;  %v7664_v6 = vpop.permute.xlu0 %7663 }
 0x8d6   : > { %7789 = vmatprep.mubr.f32.mxu1 %v19192_v9  ;;  %7925 = vmatpush1.msra.mxu0 %v7874_v33 }
 0x8d7   : > { %7926 = vmatprep.subr.mxu0 %v7873_v35  ;;  %v7847_v40 = vpop.permute.xlu1 %7846 }
 0x8d8   : > { %12147 = vmatmul.mubr.msk.f32.gmra.mxu0 %vm1751_vm0, %v7499_v11  ;;  %v7870_v47 = vsel %vm4902_vm2, %v7847_v40, %v7849_v25  ;;  %v16802_v11 = vld [vmem:[#allocation3] sm:$0xff] }
 0x8d9   : > { %12148 = vmatmul.mubr.msk.f32.vlgmr.msra.gmra.mxu1 %vm1751_vm0, %v7658_v23  ;;  %7927 = vmatpush1.msra.mxu0 %v7872_v22  ;;  %19231 = vst [vmem:[#allocation54_spill] sm:$0xff] %v16802_v11 }
 0x8da   : > { %7928 = vmatprep.subr.mxu0 %v7871_v27  ;;  %7795 = vmatprep.mubr.f32.mxu1 %v19192_v9 }
 0x8db   : > { %7929 = vmatpush1.msra.mxu0 %v7870_v47  ;;  %7962 = vmatprep.mubr.f32.mxu0 %v19192_v9  ;;  %v7662_v56 = vpop.permute.xlu1 %7661 }
 0x8dc   : > { %12152 = vmatmul.mubr.msk.f32.vlgmr.msra.gmra.mxu0 %vm1751_vm0, %v12106_v58 }
 0x8dd   : > { %12149 = vmatmul.mubr.msk.f32.gmra.mxu1 %vm1751_vm0, %v7660_v15  ;;  %7968 = vmatprep.mubr.f32.mxu0 %v19192_v9 }
 0x8de   : > { %7801 = vmatprep.mubr.f32.mxu1 %v19192_v9  ;;  %v16743_v4 = vpop.permute.xlu0 %8007 }
 0x8df   : > { %19221 = vst [vmem:[#allocation61_spill] sm:$0xff] %v16743_v4 }
 0x8e0   : > { %12153 = vmatmul.mubr.msk.f32.gmra.mxu0 %vm1751_vm0, %v12109_v34 }
 0x8e1   : > { %12150 = vmatmul.mubr.msk.f32.gmra.mxu1 %vm1751_vm0, %v7662_v56  ;;  %7974 = vmatprep.mubr.f32.mxu0 %v19192_v9 }
 0x8e2   : > { %7807 = vmatprep.mubr.f32.mxu1 %v19192_v9  ;;  %v16756_v32 = vpop.permute.xlu0 %7997 }
 0x8e4   : > { %12154 = vmatmul.mubr.msk.f32.gmra.mxu0 %vm1751_vm0, %v12112_v50 }
 0x8e5   : > { %12151 = vmatmul.mubr.msk.f32.gmra.mxu1 %vm1751_vm0, %v7664_v6  ;;  %7980 = vmatprep.mubr.f32.mxu0 %v19192_v9 }
 0x8e6   : > { %8199 = vmatprep.mubr.f32.mxu1 %v19192_v9  ;;  %v16760_v31 = vpop.permute.xlu0 %8096 }
 0x8e7   : > { %19224 = vst [vmem:[#allocation56_spill] sm:$0xff] %v16760_v31  ;;  %v9066_v42 = vmul.f32 %v16837_v43, %v16760_v31  ;;  %v9063_v17 = vmul.f32 %v16844_v1, %v16760_v31  ;;  %v9060_v14 = vmul.f32 %v16855_v18, %v16760_v31 }
 0x8e8   : > { %12155 = vmatmul.mubr.msk.f32.gmra.mxu0 %vm1751_vm0, %v12115_v61  ;;  %v16753_v55 = vpop.permute.xlu1 %8012 }
 0x8e9   : > { %19222 = vst [vmem:[#allocation40_spill] sm:$0xff] %v16753_v55  ;;  %8349 = vmatprep.mubr.f32.mxu0 %v19192_v9 }
 0x8ea   : > { %v16835_v20 = vpop.permute.xlu0 %8397 }
 0x8eb   : > { %19233 = vst [vmem:[#allocation34_spill] sm:$0xff] %v16835_v20  ;;  %v8889_v38 = vmul.f32 %v16837_v43, %v16835_v20  ;;  %v8886_v25 = vmul.f32 %v16844_v1, %v16835_v20  ;;  %v8883_v53 = vmul.f32 %v16855_v18, %v16835_v20 }
 0x8ec   : > { %v16758_v46 = vpop.permute.xlu1 %8002 }
 0x8ed   : > { %19223 = vst [vmem:[#allocation23_spill] sm:$0xff] %v16758_v46 }
 0x8f0   : > { %v16766_v36 = vpop.permute.xlu1 %8094 }
 0x8f1   : > { %19227 = vst [vmem:[#allocation26_spill] sm:$0xff] %v16766_v36  ;;  %v16771_v41 = vsel %vm8098_vm5, %v16766_v36, %v16760_v31  ;;  %v8112_v49 = vmul.f32 %v16766_v36, %v8082_v60  ;;  %v8109_v7 = vmul.f32 %v16766_v36, %v8079_v39  ;;  %v8106_v62 = vmul.f32 %v16766_v36, %v8076_v12 }
 0x8f2   : > { %19228 = vst [vmem:[#allocation60_spill] sm:$0xff] %v16771_v41  ;;  %v8113_v51 = vmul.f32 %v16771_v41, %v16762_v63  ;;  %v8110_v26 = vmul.f32 %v16771_v41, %v16764_v30  ;;  %v8107_v19 = vmul.f32 %v16771_v41, %v16790_v37  ;;  %v8103_v24 = vmul.f32 %v16766_v36, %v8073_v21 }
 0x8f3   : > { %v8104_v29 = vmul.f32 %v16771_v41, %v16802_v11  ;;  %v8583_v54 = vmul.f32 %v16766_v36, %v16790_v37  ;;  %v8589_v57 = vmul.f32 %v16766_v36, %v16762_v63  ;;  %v8580_v59 = vmul.f32 %v16766_v36, %v16802_v11 }
 0x8f4   : > { %8256 = vrot.lane.b32.xlu1 %v8113_v51, %s12438_s27  ;;  %8250 = vrot.lane.b32.xlu0 %v8110_v26, %s12438_s27  ;;  %v16783_v3 = vpop.permute.xlu1 %8395  ;;  %v8586_v16 = vmul.f32 %v16766_v36, %v16764_v30 }
 0x8f5   : > { %19229 = vst [vmem:[#allocation55_spill] sm:$0xff] %v16783_v3  ;;  %v8412_v13 = vmul.f32 %v16783_v3, %v16762_v63  ;;  %v8409_v28 = vmul.f32 %v16783_v3, %v16764_v30  ;;  %v8403_v5 = vmul.f32 %v16783_v3, %v16802_v11  ;;  %v8406_v8 = vmul.f32 %v16783_v3, %v16790_v37 }
 0x8f8   : > { %8254 = vrot.lane.b32.xlu1 %v8112_v49, %s12438_s27  ;;  %8123 = vrot.lane.b32.xlu0 %v12162_v48, %s12426_s23 }
 0x8fc   : > { %8248 = vrot.lane.b32.xlu1 %v8109_v7, %s12438_s27  ;;  %8453 = vrot.lane.b32.xlu0 %v8412_v13, %s12418_s15 }
 0x900   : > { %8244 = vrot.lane.b32.xlu1 %v8107_v19, %s12438_s27  ;;  %8447 = vrot.lane.b32.xlu0 %v8409_v28, %s12418_s15 }
 0x904   : > { %8242 = vrot.lane.b32.xlu1 %v8106_v62, %s12438_s27  ;;  %8236 = vrot.lane.b32.xlu0 %v8103_v24, %s12438_s27 }
 0x908   : > { %8238 = vrot.lane.b32.xlu1 %v8104_v29, %s12438_s27  ;;  %8435 = vrot.lane.b32.xlu0 %v8403_v5, %s12418_s15 }
 0x90c   : > { %8125 = vrot.lane.b32.xlu1 %v12165_v44, %s12426_s23  ;;  %8417 = vrot.lane.b32.xlu0 %v19232_v2, %s12434_s11 }
 0x910   : > { %8441 = vrot.lane.b32.xlu1 %v8406_v8, %s12418_s15  ;;  %8419 = vrot.lane.b32.xlu0 %v12162_v48, %s12434_s11 }
 0x914   : > { %8415 = vrot.lane.b32.xlu1 %v16399_v45, %s12434_s11  ;;  %8618 = vrot.lane.b32.xlu0 %v8583_v54, %s12438_s27 }
 0x918   : > { %8630 = vrot.lane.b32.xlu1 %v8589_v57, %s12438_s27  ;;  %8612 = vrot.lane.b32.xlu0 %v8580_v59, %s12438_s27 }
 0x91c   : > { %8624 = vrot.lane.b32.xlu1 %v8586_v16, %s12438_s27  ;;  %8594 = vrot.lane.b32.xlu0 %v19232_v2, %s12432_s22 }
 0x920   : > { %8421 = vrot.lane.b32.xlu1 %v12165_v44, %s12434_s11  ;;  %8932 = vrot.lane.b32.xlu0 %v8889_v38, %s12418_s15 }
 0x924   : > { %8592 = vrot.lane.b32.xlu1 %v16399_v45, %s12432_s22  ;;  %8926 = vrot.lane.b32.xlu0 %v8886_v25, %s12418_s15  ;;  %v8880_v45 = vmul.f32 %v16861_v0, %v16835_v20 }
 0x928   : > { %8596 = vrot.lane.b32.xlu1 %v12162_v48, %s12432_s22  ;;  %9109 = vrot.lane.b32.xlu0 %v9066_v42, %s12438_s27 }
 0x92c   : > { %8598 = vrot.lane.b32.xlu1 %v12165_v44, %s12432_s22  ;;  %8920 = vrot.lane.b32.xlu0 %v8883_v53, %s12418_s15 }
 0x930   : > { %8914 = vrot.lane.b32.xlu1 %v8880_v45, %s12418_s15  ;;  %9103 = vrot.lane.b32.xlu0 %v9063_v17, %s12438_s27 }
 0x934   : > { %9097 = vrot.lane.b32.xlu1 %v9060_v14, %s12438_s27 }
 0x947   : > { %v6656_v23 = vpop.f32.mrf.mxu0 }
 0x949   : > { %v6658_v10 = vpop.f32.mrf.mxu0 }
 0x94b   : > { %v6662_v52 = vpop.f32.mrf.mxu0 }
 0x94d   : > { %v6664_v35 = vpop.f32.mrf.mxu0 }
 0x94f   : > { %v6668_v15 = vpop.f32.mrf.mxu0 }
 0x951   : > { %v6670_v58 = vpop.f32.mrf.mxu0 }
 0x953   : > { %v6674_v56 = vpop.f32.mrf.mxu0 }
 0x955   : > { %v16876_v61 = vpop.f32.mrf.mxu0 }
 0x957   : > { %v6805_v33 = vpop.f32.mrf.mxu1 }
 0x958   : > { %v6806_v17 = vadd.f32 %v6805_v33, %v6656_v23 }
 0x959   : > { %v6807_v40 = vpop.f32.mrf.mxu1 }
 0x95a   : > { %v6808_v1 = vadd.f32 %v6807_v40, %v6658_v10 }
 0x95b   : > { %v6811_v22 = vpop.f32.mrf.mxu1 }
 0x95c   : > { %v6812_v9 = vadd.f32 %v6811_v22, %v6662_v52 }
 0x95d   : > { %v6813_v47 = vpop.f32.mrf.mxu1 }
 0x95e   : > { %v6814_v36 = vadd.f32 %v6813_v47, %v6664_v35 }
 0x95f   : > { %v6817_v27 = vpop.f32.mrf.mxu1 }
 0x960   : > { %v6818_v20 = vadd.f32 %v6817_v27, %v6668_v15 }
 0x961   : > { %v6819_v34 = vpop.f32.mrf.mxu1 }
 0x962   : > { %v6820_v23 = vadd.f32 %v6819_v34, %v6670_v58  ;;  %v16888_v34 = vpop.permute.xlu1 %8119 }
 0x963   : > { %v6823_v6 = vpop.f32.mrf.mxu1 }
 0x965   : > { %v16874_v50 = vpop.f32.mrf.mxu1 }
 0x968   : > { %v7151_v60 = vpop.f32.mrf.mxu1 }
 0x96a   : > { %v6974_v51 = vpop.f32.mrf.mxu0  ;;  %v7153_v26 = vpop.f32.mrf.mxu1 }
 0x96b   : > { %v6997_v43 = vadd.f32 %v6974_v51, %v6806_v17 }
 0x96c   : > { %v6976_v49 = vpop.f32.mrf.mxu0  ;;  %v7157_v48 = vpop.f32.mrf.mxu1 }
 0x96d   : > { %v6998_v11 = vadd.f32 %v6976_v49, %v6808_v1  ;;  %v7174_v55 = vadd.f32 %v7151_v60, %v6997_v43  ;;  %v6824_v1 = vadd.f32 %v6823_v6, %v6674_v56 }
 0x96e   : > { %v6980_v39 = vpop.f32.mrf.mxu0  ;;  %v7159_v19 = vpop.f32.mrf.mxu1 }
 0x96f   : > { %v6999_v63 = vadd.f32 %v6980_v39, %v6812_v9  ;;  %v7175_v46 = vadd.f32 %v7153_v26, %v6998_v11 }
 0x970   : > { %v6982_v7 = vpop.f32.mrf.mxu0  ;;  %v7163_v21 = vpop.f32.mrf.mxu1 }
 0x971   : > { %v7000_v31 = vadd.f32 %v6982_v7, %v6814_v36  ;;  %v7176_v40 = vadd.f32 %v7157_v48, %v6999_v63 }
 0x972   : > { %v6986_v13 = vpop.f32.mrf.mxu0  ;;  %v7165_v29 = vpop.f32.mrf.mxu1 }
 0x973   : > { %v7001_v33 = vadd.f32 %v6986_v13, %v6818_v20  ;;  %v7177_v9 = vadd.f32 %v7159_v19, %v7000_v31 }
 0x974   : > { %v6988_v28 = vpop.f32.mrf.mxu0  ;;  %v16878_v8 = vpop.f32.mrf.mxu1 }
 0x975   : > { %v7002_v22 = vadd.f32 %v6988_v28, %v6820_v23  ;;  %v7178_v11 = vadd.f32 %v7163_v21, %v7001_v33  ;;  %v8024_v33 = vld [vmem:[#allocation3 + $0x48] sm:$0xff] }
 0x976   : > { %v6992_v12 = vpop.f32.mrf.mxu0  ;;  %v16880_v57 = vpop.f32.mrf.mxu1 }
 0x977   : > { %19238 = vst [vmem:[#allocation12_spill] sm:$0xff] %v16880_v57  ;;  %v7003_v36 = vadd.f32 %v6992_v12, %v6824_v1  ;;  %v7179_v60 = vadd.f32 %v7165_v29, %v7002_v22 }
 0x978   : > { %v6994_v62 = vpop.f32.mrf.mxu0 }
 0x97a   : > { %v7260_v24 = vpop.f32.mrf.mxu0 }
 0x97b   : > { %v7283_v41 = vadd.f32 %v7260_v24, %v7174_v55  ;;  %v6826_v55 = vadd.f32 %v16874_v50, %v16876_v61  ;;  %v7180_v61 = vadd.f32 %v16878_v8, %v7003_v36 }
 0x97c   : > { %v7262_v5 = vpop.f32.mrf.mxu0 }
 0x97d   : > { %v7284_v10 = vadd.f32 %v7262_v5, %v7175_v46  ;;  %v7004_v6 = vadd.f32 %v6994_v62, %v6826_v55 }
 0x97e   : > { %v7266_v44 = vpop.f32.mrf.mxu0  ;;  %v19240_v29 = vld [vmem:[#allocation12_spill] sm:$0xff] }
 0x97f   : > { %v7285_v35 = vadd.f32 %v7266_v44, %v7176_v40  ;;  %v7181_v44 = vadd.f32 %v19240_v29, %v7004_v6 }
 0x980   : > { %v7268_v2 = vpop.f32.mrf.mxu0 }
 0x981   : > { %v7286_v20 = vadd.f32 %v7268_v2, %v7177_v9  ;;  %v8025_v9 = vld [vmem:[#allocation3 + $0x88] sm:$0xff] }
 0x982   : > { %v7272_v54 = vpop.f32.mrf.mxu0 }
 0x983   : > { %v7287_v56 = vadd.f32 %v7272_v54, %v7178_v11  ;;  %v8023_v54 = vld [vmem:[#allocation3 + $0x10] sm:$0xff] }
 0x984   : > { %v7274_v59 = vpop.f32.mrf.mxu0 }
 0x985   : > { %v7288_v50 = vadd.f32 %v7274_v59, %v7179_v60  ;;  %v19245_v60 = vld [vmem:[#allocation61_spill] sm:$0xff] }
 0x986   : > { %v16882_v16 = vpop.f32.mrf.mxu0  ;;  %v7449_v38 = vpop.f32.mrf.mxu1 }
 0x987   : > { %v7472_v51 = vadd.f32 %v7449_v38, %v7283_v41  ;;  %v7289_v62 = vadd.f32 %v16882_v16, %v7180_v61  ;;  %v19247_v61 = vld [vmem:[#allocation55_spill] sm:$0xff] }
 0x988   : > { %v16884_v25 = vpop.f32.mrf.mxu0  ;;  %v7451_v42 = vpop.f32.mrf.mxu1 }
 0x989   : > { %19239 = vst [vmem:[#allocation15_spill] sm:$0xff] %v16884_v25  ;;  %v7473_v43 = vadd.f32 %v7451_v42, %v7284_v10 }
 0x98c   : > { %v7455_v53 = vpop.f32.mrf.mxu1  ;;  %v7626_v45 = vpop.f32.mrf.mxu0 }
 0x98d   : > { %v7649_v47 = vadd.f32 %v7626_v45, %v7472_v51  ;;  %v7474_v58 = vadd.f32 %v7455_v53, %v7285_v35 }
 0x98e   : > { %v7457_v14 = vpop.f32.mrf.mxu1  ;;  %v7628_v18 = vpop.f32.mrf.mxu0 }
 0x98f   : > { %v7650_v46 = vadd.f32 %v7628_v18, %v7473_v43  ;;  %v7475_v26 = vadd.f32 %v7457_v14, %v7286_v20  ;;  %v8026_v20 = vld [vmem:[#allocation3 + $0x90] sm:$0xff] }
 0x990   : > { %v7632_v0 = vpop.f32.mrf.mxu0  ;;  %v19241_v45 = vld [vmem:[#allocation15_spill] sm:$0xff] }
 0x991   : > { %v7461_v37 = vpop.f32.mrf.mxu1  ;;  %v7651_v39 = vadd.f32 %v7632_v0, %v7474_v58  ;;  %v7290_v17 = vadd.f32 %v19241_v45, %v7181_v44  ;;  %v8030_v45 = vld [vmem:[#allocation3 + $0xb8] sm:$0xff] }
 0x992   : > { %v7634_v30 = vpop.f32.mrf.mxu0  ;;  %v7476_v19 = vadd.f32 %v7461_v37, %v7287_v56 }
 0x993   : > { %v7463_v3 = vpop.f32.mrf.mxu1  ;;  %v7652_v12 = vadd.f32 %v7634_v30, %v7475_v26  ;;  %v16895_v30 = vpop.permute.xlu1 %8256 }
 0x994   : > { %v7638_v4 = vpop.f32.mrf.mxu0  ;;  %v7477_v2 = vadd.f32 %v7463_v3, %v7288_v50  ;;  %v19242_v3 = vld [vmem:[#allocation23_spill] sm:$0xff]  ;;  %v19246_v50 = vld [vmem:[#allocation34_spill] sm:$0xff] }
 0x995   : > { %v7467_v25 = vpop.f32.mrf.mxu1  ;;  %v7653_v0 = vadd.f32 %v7638_v4, %v7476_v19  ;;  %v16920_v19 = vsel %vm8260_vm7, %v19247_v61, %v19246_v50 }
 0x996   : > { %v7640_v57 = vpop.f32.mrf.mxu0  ;;  %v7478_v14 = vadd.f32 %v7467_v25, %v7289_v62  ;;  %19248 = vst [vmem:[#allocation22_spill] sm:$0xff] %v16920_v19 }
 0x997   : > { %v7469_v52 = vpop.f32.mrf.mxu1  ;;  %v7654_v23 = vadd.f32 %v7640_v57, %v7477_v2 }
 0x998   : > { %v7644_v49 = vpop.f32.mrf.mxu0  ;;  %v7479_v35 = vadd.f32 %v7469_v52, %v7290_v17  ;;  %v19243_v52 = vld [vmem:[#allocation60_spill] sm:$0xff] }
 0x999   : > { %v7791_v15 = vpop.f32.mrf.mxu1 }
 0x99a   : > { %v7646_v27 = vpop.f32.mrf.mxu0  ;;  %v7814_v63 = vadd.f32 %v7791_v15, %v7649_v47 }
 0x99b   : > { %v7793_v41 = vpop.f32.mrf.mxu1  ;;  %v7656_v11 = vadd.f32 %v7646_v27, %v7479_v35  ;;  %v8027_v27 = vld [vmem:[#allocation3 + $0x70] sm:$0xff]  ;;  %v19252_v35 = vld [vmem:[#allocation58_spill] sm:$0xff] }
 0x99c   : > { %v7964_v31 = vpop.f32.mrf.mxu0  ;;  %v7815_v48 = vadd.f32 %v7793_v41, %v7650_v46 }
 0x99d   : > { %v7797_v7 = vpop.f32.mrf.mxu1  ;;  %v7987_v13 = vadd.f32 %v7964_v31, %v7814_v63  ;;  %v19244_v63 = vld [vmem:[#allocation56_spill] sm:$0xff] }
 0x99e   : > { %v7966_v28 = vpop.f32.mrf.mxu0  ;;  %v7816_v18 = vadd.f32 %v7797_v7, %v7651_v39 }
 0x99f   : > { %v8015_v21 = vadd.f32 %v16756_v32, %v7987_v13  ;;  %v7799_v24 = vpop.f32.mrf.mxu1  ;;  %v7988_v5 = vadd.f32 %v7966_v28, %v7815_v48  ;;  %v16913_v48 = vpop.permute.xlu1 %8254 }
 0x9a0   : > { %v7970_v38 = vpop.f32.mrf.mxu0  ;;  %v7817_v59 = vadd.f32 %v7799_v24, %v7652_v12  ;;  %v8028_v24 = vld [vmem:[#allocation3 + $0xa0] sm:$0xff] }
 0x9a1   : > { %v8031_v42 = vadd.f32 %v8023_v54, %v8015_v21  ;;  %v8016_v8 = vadd.f32 %v16756_v32, %v7988_v5  ;;  %v7803_v37 = vpop.f32.mrf.mxu1  ;;  %v7989_v53 = vadd.f32 %v7970_v38, %v7816_v18  ;;  %v7655_v32 = vadd.f32 %v7644_v49, %v7478_v14 }
 0x9a2   : > { %v7818_v16 = vadd.f32 %v7803_v37, %v7653_v0  ;;  %v7972_v10 = vpop.f32.mrf.mxu0  ;;  %v19249_v0 = vld [vmem:[#allocation40_spill] sm:$0xff] }
 0x9a3   : > { %v16898_v40 = vmax.f32 %v8031_v42, 0.0  ;;  %v8032_v4 = vadd.f32 %v8024_v33, %v8016_v8  ;;  %v8017_v51 = vadd.f32 %v19242_v3, %v7989_v53  ;;  %v7805_v1 = vpop.f32.mrf.mxu1  ;;  %v7990_v22 = vadd.f32 %v7972_v10, %v7817_v59  ;;  %v8029_v42 = vld [vmem:[#allocation3 + $0x80] sm:$0xff]  ;;  %v16940_v53 = vpop.permute.xlu1 %8248 }
 0x9a4   : > { %v7819_v43 = vadd.f32 %v7805_v1, %v7654_v23  ;;  %v7976_v47 = vpop.f32.mrf.mxu0  ;;  %v19250_v10 = vld [vmem:[#allocation50_spill] sm:$0xff] }
 0x9a5   : > { %8047 = vst [vmem:[#allocation3 + $0x10] sm:$0xff] %v16898_v40  ;;  %v16902_v25 = vmax.f32 %v8032_v4, 0.0  ;;  %v8033_v57 = vadd.f32 %v8025_v9, %v8017_v51  ;;  %v8018_v15 = vadd.f32 %v19242_v3, %v7990_v22  ;;  %v7809_v55 = vpop.f32.mrf.mxu1  ;;  %v7991_v36 = vadd.f32 %v7976_v47, %v7818_v16  ;;  %v19251_v4 = vld [vmem:[#allocation26_spill] sm:$0xff]  ;;  %v8122_v22 = vpop.permute.xlu0 %8121  ;;  %v19253_v9 = vld [vmem:[#allocation43_spill] sm:$0xff] }
 0x9a6   : > { %v7820_v58 = vadd.f32 %v7809_v55, %v7655_v32  ;;  %v7978_v46 = vpop.f32.mrf.mxu0  ;;  %v8581_v49 = vmul.f32 %v19243_v52, %v16898_v40  ;;  %v8105_v41 = vmul.f32 %v19244_v63, %v16898_v40  ;;  %v8404_v29 = vmul.f32 %v16920_v19, %v16898_v40 }
 0x9a7   : > { %8048 = vst [vmem:[#allocation3 + $0x48] sm:$0xff] %v16902_v25  ;;  %v16910_v6 = vmax.f32 %v8033_v57, 0.0  ;;  %v8034_v56 = vadd.f32 %v8026_v20, %v8018_v15  ;;  %v8019_v31 = vadd.f32 %v19245_v60, %v7991_v36  ;;  %v7811_v26 = vpop.f32.mrf.mxu1  ;;  %v7992_v39 = vadd.f32 %v7978_v46, %v7819_v43  ;;  %v16961_v1 = vpop.permute.xlu1 %8244  ;;  %v19254_v57 = vld [vmem:[#allocation54_spill] sm:$0xff] }
 0x9a8   : > { %v7821_v7 = vadd.f32 %v7811_v26, %v7656_v11  ;;  %v7982_v13 = vpop.f32.mrf.mxu0  ;;  %8614 = vrot.lane.b32.xlu1 %v8581_v49, %s12438_s27  ;;  %8240 = vrot.lane.b32.xlu0 %v8105_v41, %s12438_s27  ;;  %v8405_v62 = vmul.f32 %v19246_v50, %v16902_v25  ;;  %v8878_v14 = vmul.f32 %v19247_v61, %v16898_v40  ;;  %v19255_v11 = vmov 0.0  }
 0x9a9   : > { %8049 = vst [vmem:[#allocation3 + $0x88] sm:$0xff] %v16910_v6  ;;  %v16923_v28 = vmax.f32 %v8034_v56, 0.0  ;;  %v8035_v12 = vadd.f32 %v8027_v27, %v8019_v31  ;;  %v8020_v18 = vadd.f32 %v19245_v60, %v7992_v39  ;;  %v7993_v21 = vadd.f32 %v7982_v13, %v7820_v58  ;;  %v16983_v55 = vpop.permute.xlu0 %8250 }
 0x9aa   : > { %v7984_v5 = vpop.f32.mrf.mxu0  ;;  %v8407_v17 = vmul.f32 %v16920_v19, %v16910_v6  ;;  %v9058_v3 = vmul.f32 %v19251_v4, %v16910_v6  ;;  %v8582_v51 = vmul.f32 %v19244_v63, %v16902_v25  ;;  %v8879_v43 = vmul.f32 %v16920_v19, %v16902_v25 }
 0x9ab   : > { %8050 = vst [vmem:[#allocation3 + $0x90] sm:$0xff] %v16923_v28  ;;  %v16931_v44 = vmax.f32 %v8035_v12, 0.0  ;;  %v8036_v2 = vadd.f32 %v8028_v24, %v8020_v18  ;;  %v8021_v54 = vadd.f32 %v19249_v0, %v7993_v21  ;;  %v7994_v38 = vadd.f32 %v7984_v5, %v7821_v7  ;;  %v16975_v47 = vpop.permute.xlu1 %8242 }
 0x9ac   : > { %8439 = vrot.lane.b32.xlu1 %v8405_v62, %s12418_s15  ;;  %8437 = vrot.lane.b32.xlu0 %v8404_v29, %s12418_s15  ;;  %v8585_v32 = vmul.f32 %v19244_v63, %v16923_v28  ;;  %v8882_v15 = vmul.f32 %v16920_v19, %v16923_v28  ;;  %v9056_v36 = vmul.f32 %v19243_v52, %v16902_v25 }
 0x9ad   : > { %8051 = vst [vmem:[#allocation3 + $0x70] sm:$0xff] %v16931_v44  ;;  %v16937_v59 = vmax.f32 %v8036_v2, 0.0  ;;  %v8037_v8 = vadd.f32 %v8029_v42, %v8021_v54  ;;  %v8022_v37 = vadd.f32 %v19249_v0, %v7994_v38  ;;  %v8111_v20 = vmul.f32 %v19244_v63, %v16931_v44  ;;  %v8124_v46 = vpop.permute.xlu0 %8123 }
 0x9ae   : > { %v8410_v49 = vmul.f32 %v16920_v19, %v16931_v44  ;;  %v8584_v41 = vmul.f32 %v19243_v52, %v16910_v6  ;;  %v8884_v60 = vmul.f32 %v19247_v61, %v16931_v44  ;;  %v8881_v31 = vmul.f32 %v19247_v61, %v16910_v6 }
 0x9af   : > { %8052 = vst [vmem:[#allocation3 + $0xa0] sm:$0xff] %v16937_v59  ;;  %v16947_v23 = vmax.f32 %v8037_v8, 0.0  ;;  %v8038_v33 = vadd.f32 %v8030_v45, %v8022_v37  ;;  %v16993_v58 = vpop.permute.xlu1 %8238  ;;  %v9061_v39 = vmul.f32 %v19251_v4, %v16931_v44  ;;  %v8408_v27 = vmul.f32 %v19246_v50, %v16923_v28  ;;  %v19256_v37 = vld [vmem:[#allocation11_spill] sm:$0xff] }
 0x9b0   : > { %8443 = vrot.lane.b32.xlu1 %v8407_v17, %s12418_s15  ;;  %8910 = vrot.lane.b32.xlu0 %v8878_v14, %s12418_s15  ;;  %v8588_v13 = vmul.f32 %v19244_v63, %v16937_v59  ;;  %v9059_v12 = vmul.f32 %v19243_v52, %v16923_v28  ;;  %v8885_v18 = vmul.f32 %v16920_v19, %v16937_v59 }
 0x9b1   : > { %8053 = vst [vmem:[#allocation3 + $0x80] sm:$0xff] %v16947_v23  ;;  %v16952_v16 = vmax.f32 %v8038_v33, 0.0  ;;  %8159 = vmatprep.subr.mxu1 %v16947_v23  ;;  %v17014_v26 = vpop.permute.xlu0 %8453  ;;  %v8587_v21 = vmul.f32 %v19243_v52, %v16931_v44  ;;  %v9062_v5 = vmul.f32 %v19243_v52, %v16937_v59  ;;  %v8411_v62 = vmul.f32 %v19246_v50, %v16937_v59 }
 0x9b2   : > { %8160 = vmatpush1.msra.mxu1 %v19250_v10  ;;  %v8590_v2 = vmul.f32 %v19243_v52, %v16947_v23  ;;  %v8114_v0 = vmul.f32 %v19244_v63, %v16947_v23  ;;  %v8413_v38 = vmul.f32 %v16920_v19, %v16947_v23  ;;  %v9057_v45 = vmul.f32 %v19256_v37, %v19244_v63 }
 0x9b3   : > { %8054 = vst [vmem:[#allocation3 + $0xb8] sm:$0xff] %v16952_v16  ;;  %8161 = vmatprep.subr.mxu1 %v16931_v44  ;;  %v8126_v56 = vpop.permute.xlu1 %8125  ;;  %v8414_v54 = vmul.f32 %v19246_v50, %v16952_v16  ;;  %v8887_v17 = vmul.f32 %v19247_v61, %v16947_v23  ;;  %v9055_v10 = vmul.f32 %v19251_v4, %v16898_v40 }
 0x9b4   : > { %9093 = vrot.lane.b32.xlu1 %v9058_v3, %s12438_s27  ;;  %8616 = vrot.lane.b32.xlu0 %v8582_v51, %s12438_s27  ;;  %v9064_v3 = vmul.f32 %v19251_v4, %v16947_v23  ;;  %v17083_v51 = vld [vmem:[%s18598_s3 + $0x1a0] sm:$0xff] }
 0x9b5   : > { %8162 = vmatpush1.msra.mxu1 %v19252_v35  ;;  %v17024_v7 = vpop.permute.xlu0 %8447  ;;  %19257 = vst [vmem:[#allocation17_spill] sm:$0xff] %v17083_v51 }
 0x9b6   : > { %8163 = vmatprep.subr.mxu1 %v16910_v6 }
 0x9b7   : > { %8164 = vmatpush1.msra.mxu1 %v19253_v9  ;;  %v17060_v8 = vpop.permute.xlu1 %8441  ;;  %v17097_v9 = vld [vmem:[%s18598_s3 + $0x1b8] sm:$0xff] }
 0x9b8   : > { %8165 = vmatprep.subr.mxu1 %v16898_v40  ;;  %8622 = vrot.lane.b32.xlu1 %v8585_v32, %s12438_s27  ;;  %19258 = vst [vmem:[#allocation29_spill] sm:$0xff] %v17097_v9 }
 0x9b9   : > { %8912 = vrot.lane.b32.xlu0 %v8879_v43, %s12418_s15  ;;  %8166 = vmatpush1.msra.mxu1 %v19254_v57  ;;  %v17036_v24 = vpop.permute.xlu0 %8236  ;;  %v17102_v43 = vld [vmem:[%s18598_s3 + $0x188] sm:$0xff]  ;;  %v9356_v57 = vld [vmem:[#allocation3 + $0x8] sm:$0xff] }
 0x9ba   : > { %12172 = vmatmul.mubr.msk.f32.vlgmr.msra.gmra.mxu1 %vm1751_vm0, %v16888_v34  ;;  %v8108_v34 = vmul.f32 %v19244_v63, %v16910_v6  ;;  %19259 = vst [vmem:[#allocation18_spill] sm:$0xff] %v17102_v43 }
 0x9bb   : > { %8205 = vmatprep.mubr.f32.mxu1 %v19255_v11  ;;  %v17072_v33 = vpop.permute.xlu1 %8415 }
 0x9bc   : > { %8918 = vrot.lane.b32.xlu1 %v8882_v15, %s12418_s15 }
 0x9bd   : > { %9089 = vrot.lane.b32.xlu0 %v9056_v36, %s12438_s27  ;;  %v17046_v29 = vpop.permute.xlu0 %8435 }
 0x9be   : > { %12173 = vmatmul.mubr.msk.f32.gmra.mxu1 %vm1751_vm0, %v8122_v22  ;;  %v8591_v22 = vmul.f32 %v19244_v63, %v16952_v16 }
 0x9bf   : > { %8211 = vmatprep.mubr.f32.mxu1 %v19255_v11  ;;  %v17089_v32 = vpop.permute.xlu1 %8630 }
 0x9c0   : > { %8252 = vrot.lane.b32.xlu1 %v8111_v20, %s12438_s27  ;;  %v9368_v20 = vmul.f32 %v9356_v57, %v19246_v50  ;;  %v9347_v57 = vld [vmem:[#allocation3 + $0x28] sm:$0xff] }
 0x9c1   : > { %8246 = vrot.lane.b32.xlu0 %v8108_v34, %s12438_s27  ;;  %v17058_v42 = vpop.permute.xlu0 %8417  ;;  %v9353_v34 = vld [vmem:[#allocation3 + $0x68] sm:$0xff] }
 0x9c2   : > { %12174 = vmatmul.mubr.msk.f32.gmra.mxu1 %vm1751_vm0, %v8124_v46  ;;  %v9365_v46 = vmul.f32 %v9353_v34, %v19246_v50 }
 0x9c3   : > { %8217 = vmatprep.mubr.f32.mxu1 %v19255_v11  ;;  %v17110_v36 = vpop.permute.xlu1 %8624 }
 0x9c4   : > { %8449 = vrot.lane.b32.xlu1 %v8410_v49, %s12418_s15 }
 0x9c5   : > { %8620 = vrot.lane.b32.xlu0 %v8584_v41, %s12438_s27  ;;  %v17070_v14 = vpop.permute.xlu0 %8419 }
 0x9c6   : > { %12175 = vmatmul.mubr.msk.f32.gmra.mxu1 %vm1751_vm0, %v8126_v56  ;;  %v8888_v56 = vmul.f32 %v16920_v19, %v16952_v16 }
 0x9c7   : > { %8547 = vmatprep.mubr.f32.mxu1 %v19255_v11  ;;  %v17119_v41 = vpop.permute.xlu1 %8421 }
 0x9c8   : > { %8922 = vrot.lane.b32.xlu1 %v8884_v60, %s12418_s15  ;;  %v19261_v60 = vld [vmem:[#allocation38_spill] sm:$0xff] }
 0x9c9   : > { %8916 = vrot.lane.b32.xlu0 %v8881_v31, %s12418_s15  ;;  %v17087_v35 = vpop.permute.xlu0 %8618  ;;  %v9367_v31 = vmul.f32 %v19261_v60, %v16920_v19 }
 0x9cc   : > { %9099 = vrot.lane.b32.xlu1 %v9061_v39, %s12438_s27 }
 0x9cd   : > { %8445 = vrot.lane.b32.xlu0 %v8408_v27, %s12418_s15  ;;  %v17108_v15 = vpop.permute.xlu0 %8612  ;;  %v17132_v27 = vpop.permute.xlu1 %8592 }
 0x9d0   : > { %8628 = vrot.lane.b32.xlu1 %v8588_v13, %s12438_s27  ;;  %v9065_v13 = vmul.f32 %v19243_v52, %v16952_v16 }
 0x9d1   : > { %9095 = vrot.lane.b32.xlu0 %v9059_v12, %s12438_s27  ;;  %v17117_v49 = vpop.permute.xlu0 %8594  ;;  %v9363_v12 = vmul.f32 %v19247_v61, %v16937_v59 }
 0x9d2   : > { %19260 = vst [vmem:[#allocation16_spill] sm:$0xff] %v17117_v49 }
 0x9d4   : > { %8924 = vrot.lane.b32.xlu1 %v8885_v18, %s12418_s15  ;;  %v19262_v18 = vld [vmem:[#allocation9_spill] sm:$0xff] }
 0x9d5   : > { %8626 = vrot.lane.b32.xlu0 %v8587_v21, %s12438_s27  ;;  %v17130_v39 = vpop.permute.xlu0 %8932  ;;  %v9364_v21 = vmul.f32 %v19262_v18, %v16920_v19 }
 0x9d8   : > { %9101 = vrot.lane.b32.xlu1 %v9062_v5, %s12438_s27  ;;  %v9350_v5 = vld [vmem:[#allocation3 + $0x98] sm:$0xff] }
 0x9d9   : > { %8451 = vrot.lane.b32.xlu0 %v8411_v62, %s12418_s15  ;;  %v17143_v62 = vpop.permute.xlu0 %8926 }
 0x9da   : > { %19263 = vst [vmem:[#allocation8_spill] sm:$0xff] %v17143_v62  ;;  %v17287_v62 = vld [vmem:[#allocation4 + $0x98] sm:$0xff] }
 0x9dc   : > { %8632 = vrot.lane.b32.xlu1 %v8590_v2, %s12438_s27  ;;  %v17145_v2 = vpop.permute.xlu1 %8596 }
 0x9dd   : > { %8258 = vrot.lane.b32.xlu0 %v8114_v0, %s12438_s27  ;;  %19264 = vst [vmem:[#allocation47_spill] sm:$0xff] %v17145_v2  ;;  %v9362_v0 = vmul.f32 %v9350_v5, %v19246_v50 }
 0x9e0   : > { %8457 = vrot.lane.b32.xlu1 %v8414_v54, %s12418_s15  ;;  %v17153_v54 = vld [vmem:[%s18598_s3 + $0x1d0] sm:$0xff] }
 0x9e1   : > { %8455 = vrot.lane.b32.xlu0 %v8413_v38, %s12418_s15  ;;  %19265 = vst [vmem:[#allocation44_spill] sm:$0xff] %v17153_v54  ;;  %v17158_v38 = vpop.permute.xlu0 %9109 }
 0x9e2   : > { %19266 = vst [vmem:[#allocation36_spill] sm:$0xff] %v17158_v38 }
 0x9e4   : > { %9091 = vrot.lane.b32.xlu1 %v9057_v45, %s12438_s27  ;;  %v17160_v45 = vpop.permute.xlu1 %8598 }
 0x9e5   : > { %8928 = vrot.lane.b32.xlu0 %v8887_v17, %s12418_s15  ;;  %19267 = vst [vmem:[#allocation32_spill] sm:$0xff] %v17160_v45  ;;  %v9360_v17 = vmul.f32 %v19247_v61, %v16923_v28 }
 0x9e8   : > { %9087 = vrot.lane.b32.xlu1 %v9055_v10, %s12438_s27  ;;  %v19268_v10 = vld [vmem:[#allocation10_spill] sm:$0xff]  ;;  %v17172_v34 = vpop.permute.xlu1 %8914 }
 0x9e9   : > { %9105 = vrot.lane.b32.xlu0 %v9064_v3, %s12438_s27  ;;  %v9361_v3 = vmul.f32 %v19268_v10, %v16920_v19  ;;  %19270 = vst [vmem:[#allocation31_spill] sm:$0xff] %v17172_v34 }
 0x9ec   : > { %8892 = vrot.lane.b32.xlu1 %v17083_v51, %s12426_s23 }
 0x9ed   : > { %8634 = vrot.lane.b32.xlu0 %v8591_v22, %s12438_s27  ;;  %v9366_v22 = vmul.f32 %v19247_v61, %v16952_v16 }
 0x9f0   : > { %8894 = vrot.lane.b32.xlu1 %v17097_v9, %s12426_s23 }
 0x9f1   : > { %8890 = vrot.lane.b32.xlu0 %v17102_v43, %s12426_s23 }
 0x9f4   : > { %9403 = vrot.lane.b32.xlu1 %v9368_v20, %s12418_s15  ;;  %v17170_v20 = vpop.permute.xlu0 %8920 }
 0x9f5   : > { %9067 = vrot.lane.b32.xlu0 %v17102_v43, %s12434_s11  ;;  %19269 = vst [vmem:[#allocation49_spill] sm:$0xff] %v17170_v20  ;;  %v9595_v20 = vld [vmem:[#allocation4 + $0x78] sm:$0xff] }
 0x9f8   : > { %9397 = vrot.lane.b32.xlu1 %v9365_v46, %s12418_s15  ;;  %v9359_v46 = vmul.f32 %v9347_v57, %v19246_v50  ;;  %v17182_v60 = vpop.permute.xlu0 %9103 }
 0x9f9   : > { %9069 = vrot.lane.b32.xlu0 %v17083_v51, %s12434_s11  ;;  %19271 = vst [vmem:[#allocation28_spill] sm:$0xff] %v17182_v60 }
 0x9fc   : > { %8930 = vrot.lane.b32.xlu1 %v8888_v56, %s12418_s15  ;;  %v9358_v56 = vmul.f32 %v19256_v37, %v16920_v19  ;;  %v12171_v37 = vld [vmem:[%s18599_s4 + $0x98] sm:$0xff] }
 0x9fd   : > { %9401 = vrot.lane.b32.xlu0 %v9367_v31, %s12418_s15  ;;  %v17184_v31 = vpop.permute.xlu1 %9097 }
 0x9fe   : > { %19272 = vst [vmem:[#allocation14_spill] sm:$0xff] %v17184_v31 }
 0xa00   : > { %9107 = vrot.lane.b32.xlu1 %v9065_v13, %s12438_s27  ;;  %v9357_v13 = vmul.f32 %v19247_v61, %v16902_v25 }
 0xa01   : > { %9071 = vrot.lane.b32.xlu0 %v17097_v9, %s12434_s11 }
 0xa04   : > { %9393 = vrot.lane.b32.xlu1 %v9363_v12, %s12418_s15 }
 0xa05   : > { %9395 = vrot.lane.b32.xlu0 %v9364_v21, %s12418_s15 }
 0xa08   : > { %9391 = vrot.lane.b32.xlu1 %v9362_v0, %s12418_s15  ;;  %v12169_v0 = vld [vmem:[%s18599_s4 + $0x88] sm:$0xff] }
 0xa09   : > { %8896 = vrot.lane.b32.xlu0 %v17153_v54, %s12426_s23 }
 0xa0c   : > { %9387 = vrot.lane.b32.xlu1 %v9360_v17, %s12418_s15 }
 0xa0d   : > { %9389 = vrot.lane.b32.xlu0 %v9361_v3, %s12418_s15  ;;  %v12170_v3 = vld [vmem:[%s18599_s4 + $0x90] sm:$0xff] }
 0xa10   : > { %9399 = vrot.lane.b32.xlu1 %v9366_v22, %s12418_s15  ;;  %v17221_v22 = vld [vmem:[%s18598_s3 + $0x1e0] sm:$0xff] }
 0xa11   : > { %9073 = vrot.lane.b32.xlu0 %v17153_v54, %s12434_s11 }
 0xa14   : > { %9385 = vrot.lane.b32.xlu1 %v9359_v46, %s12418_s15 }
 0xa15   : > { %9383 = vrot.lane.b32.xlu0 %v9358_v56, %s12418_s15  ;;  %v12168_v56 = vld [vmem:[%s18599_s4 + $0x80] sm:$0xff] }
 0xa18   : > { %9381 = vrot.lane.b32.xlu1 %v9357_v13, %s12418_s15  ;;  %v17230_v13 = vld [vmem:[#allocation4 + $0x88] sm:$0xff] }
 0xa19   : > { %9232 = vrot.lane.b32.xlu0 %v17102_v43, %s12432_s22  ;;  %19275 = vst [vmem:[#allocation39_spill] sm:$0xff] %v17230_v13  ;;  %v9592_v43 = vld [vmem:[#allocation4 + $0x30] sm:$0xff] }
 0xa1a   : > { %v17191_v12 = vpop.permute.xlu0 %8240  ;;  %v17193_v18 = vpop.permute.xlu1 %8614 }
 0xa1c   : > { %9236 = vrot.lane.b32.xlu1 %v17097_v9, %s12432_s22  ;;  %v9598_v9 = vld [vmem:[#allocation4 + $0x40] sm:$0xff] }
 0xa1d   : > { %9234 = vrot.lane.b32.xlu0 %v17083_v51, %s12432_s22  ;;  %v9610_v45 = vmul.f32 %v9598_v9, %v19251_v4 }
 0xa1e   : > { %v17202_v21 = vpop.permute.xlu0 %8437  ;;  %v17204_v5 = vpop.permute.xlu1 %8439 }
 0xa20   : > { %9547 = vperm.xlu1 %12354, %v12171_v37  }
 0xa21   : > { %9238 = vrot.lane.b32.xlu0 %v17153_v54, %s12432_s22  ;;  %v17246_v54 = vld [vmem:[#allocation4 + $0x10] sm:$0xff] }
 0xa22   : > { %v17211_v17 = vpop.permute.xlu0 %8910  ;;  %v17213_v10 = vpop.permute.xlu1 %8443  ;;  %v9611_v34 = vmul.f32 %v17246_v54, %v19243_v52  ;;  %v9892_v2 = vmul.f32 %v17246_v54, %v19247_v61 }
 0xa23   : > { %19273 = vst [vmem:[#allocation30_spill] sm:$0xff] %v17211_v17 }
 0xa24   : > { %9537 = vperm.xlu1 %12354, %v12169_v0   ;;  %v17239_v0 = vld [vmem:[%s18598_s3 + $0x1f8] sm:$0xff] }
 0xa25   : > { %9542 = vperm.xlu0 %12353, %v12170_v3   ;;  %v9614_v3 = vmul.f32 %v17230_v13, %v19243_v52 }
 0xa26   : > { %v17223_v57 = vpop.permute.xlu0 %8616  ;;  %v17225_v46 = vpop.permute.xlu1 %9093 }
 0xa27   : > { %19274 = vst [vmem:[#allocation42_spill] sm:$0xff] %v17225_v46  ;;  %v9601_v46 = vld [vmem:[#allocation4] sm:$0xff] }
 0xa28   : > { %9620 = vrot.lane.b32.xlu1 %v17221_v22, %s12426_s23  ;;  %v9613_v31 = vmul.f32 %v9601_v46, %v19251_v4  ;;  %v17265_v46 = vld [vmem:[#allocation4 + $0x70] sm:$0xff] }
 0xa29   : > { %9532 = vperm.xlu0 %12353, %v12168_v56   ;;  %19279 = vst [vmem:[#allocation19_spill] sm:$0xff] %v17265_v46 }
 0xa2a   : > { %v17234_v37 = vpop.permute.xlu1 %8622 }
 0xa2b   : > { %v17243_v19 = vpop.permute.xlu0 %8912 }
 0xa2c   : > { %19276 = vst [vmem:[#allocation57_spill] sm:$0xff] %v17243_v19  ;;  %9757 = vrot.lane.b32.xlu1 %v9614_v3, %s12438_s27  ;;  %v17262_v19 = vld [vmem:[%s18598_s3 + $0x210] sm:$0xff] }
 0xa2d   : > { %9622 = vrot.lane.b32.xlu0 %v17239_v0, %s12426_s23 }
 0xa2e   : > { %v17250_v56 = vpop.permute.xlu1 %8918 }
 0xa2f   : > { %19277 = vst [vmem:[#allocation33_spill] sm:$0xff] %v17250_v56  ;;  %v17253_v17 = vpop.permute.xlu0 %9089  ;;  %v9895_v56 = vmul.f32 %v17230_v13, %v19247_v61 }
 0xa30   : > { %19278 = vst [vmem:[#allocation35_spill] sm:$0xff] %v17253_v17  ;;  %9755 = vrot.lane.b32.xlu1 %v9613_v31, %s12438_s27 }
 0xa31   : > { %9751 = vrot.lane.b32.xlu0 %v9611_v34, %s12438_s27  ;;  %v9608_v34 = vmul.f32 %v17265_v46, %v19243_v52 }
 0xa32   : > { %v8253_v3 = vpop.permute.xlu1 %8252 }
 0xa33   : > { %v8247_v60 = vpop.permute.xlu0 %8246 }
 0xa34   : > { %9749 = vrot.lane.b32.xlu1 %v9610_v45, %s12438_s27  ;;  %v9607_v45 = vmul.f32 %v9595_v20, %v19251_v4  ;;  %v9604_v20 = vmul.f32 %v9592_v43, %v19251_v4 }
 0xa35   : > { %9624 = vrot.lane.b32.xlu0 %v17262_v19, %s12426_s23 }
 0xa36   : > { %v17270_v17 = vpop.permute.xlu1 %8449 }
 0xa37   : > { %v17274_v31 = vpop.permute.xlu0 %8620 }
 0xa38   : > { %9745 = vrot.lane.b32.xlu1 %v9608_v34, %s12438_s27 }
 0xa39   : > { %9936 = vrot.lane.b32.xlu0 %v9895_v56, %s12418_s15  ;;  %v9605_v56 = vmul.f32 %v17287_v62, %v19243_v52 }
 0xa3a   : > { %v17280_v9 = vpop.permute.xlu1 %8922 }
 0xa3b   : > { %19280 = vst [vmem:[#allocation48_spill] sm:$0xff] %v17280_v9  ;;  %v17283_v51 = vpop.permute.xlu0 %8916 }
 0xa3c   : > { %19281 = vst [vmem:[#allocation24_spill] sm:$0xff] %v17283_v51  ;;  %9743 = vrot.lane.b32.xlu1 %v9607_v45, %s12438_s27  ;;  %v17301_v51 = vld [vmem:[%s18598_s3 + $0x228] sm:$0xff] }
 0xa3d   : > { %9930 = vrot.lane.b32.xlu0 %v9892_v2, %s12418_s15 }
 0xa3e   : > { %v17291_v49 = vpop.permute.xlu1 %9099 }
 0xa3f   : > { %19282 = vst [vmem:[#allocation52_spill] sm:$0xff] %v17291_v49  ;;  %v8446_v34 = vpop.permute.xlu0 %8445  ;;  %v9886_v49 = vmul.f32 %v17287_v62, %v19247_v61 }
 0xa40   : > { %9739 = vrot.lane.b32.xlu1 %v9605_v56, %s12438_s27  ;;  %v9889_v56 = vmul.f32 %v17265_v46, %v19247_v61  ;;  %v10072_v61 = vmul.f32 %v17230_v13, %v19251_v4  ;;  %v8266_v13 = vsel %vm8260_vm7, %v16983_v55, %v8253_v3 }
 0xa41   : > { %9737 = vrot.lane.b32.xlu0 %v9604_v20, %s12438_s27 }
 0xa42   : > { %v17303_v45 = vpop.permute.xlu1 %8628 }
 0xa43   : > { %v17305_v2 = vpop.permute.xlu0 %9095 }
 0xa44   : > { %19283 = vst [vmem:[#allocation27_spill] sm:$0xff] %v17305_v2  ;;  %9626 = vrot.lane.b32.xlu1 %v17301_v51, %s12426_s23 }
 0xa45   : > { %9918 = vrot.lane.b32.xlu0 %v9886_v49, %s12418_s15 }
 0xa46   : > { %v17312_v43 = vpop.permute.xlu1 %8924 }
 0xa47   : > { %19284 = vst [vmem:[#allocation13_spill] sm:$0xff] %v17312_v43  ;;  %v17316_v20 = vpop.permute.xlu0 %8626 }
 0xa48   : > { %9924 = vrot.lane.b32.xlu1 %v9889_v56, %s12418_s15  ;;  %v10066_v56 = vmul.f32 %v17265_v46, %v19251_v4  ;;  %v10069_v46 = vmul.f32 %v17246_v54, %v19251_v4 }
 0xa49   : > { %9900 = vrot.lane.b32.xlu0 %v17239_v0, %s12434_s11 }
 0xa4a   : > { %v17321_v52 = vpop.permute.xlu1 %9101 }
 0xa4b   : > { %19285 = vst [vmem:[#allocation59_spill] sm:$0xff] %v17321_v52  ;;  %v8452_v2 = vpop.permute.xlu0 %8451  ;;  %v8267_v52 = vsel %vm8260_vm7, %v16913_v48, %v16895_v30 }
 0xa4c   : > { %9898 = vrot.lane.b32.xlu1 %v17221_v22, %s12434_s11 }
 0xa4d   : > { %9902 = vrot.lane.b32.xlu0 %v17262_v19, %s12434_s11 }
 0xa4e   : > { %v17327_v49 = vpop.permute.xlu1 %8632 }
 0xa4f   : > { %v8259_v9 = vpop.permute.xlu0 %8258 }
 0xa50   : > { %v8268_v43 = vsel %vm8260_vm7, %v16895_v30, %v8259_v9  ;;  %10113 = vrot.lane.b32.xlu1 %v10072_v61, %s12438_s27  ;;  %v8265_v9 = vsel %vm8260_vm7, %v16940_v53, %v16983_v55  ;;  %v10063_v30 = vmul.f32 %v17287_v62, %v19251_v4  ;;  %v8263_v53 = vsel %vm8260_vm7, %v16975_v47, %v16961_v1 }
 0xa51   : > { %10101 = vrot.lane.b32.xlu0 %v10066_v56, %s12438_s27  ;;  %8309 = vmatprep.subr.mxu0 %v8268_v43  ;;  %v8262_v55 = vsel %vm8260_vm7, %v16993_v58, %v17191_v12  ;;  %v8463_v47 = vsel %vm8098_vm5, %v17024_v7, %v17270_v17  ;;  %v10360_v12 = vld [vmem:[#allocation4 + $0x8] sm:$0xff]  ;;  %v8461_v7 = vsel %vm8098_vm5, %v17060_v8, %v17213_v10 }
 0xa52   : > { %8310 = vmatpush1.msra.mxu0 %v8267_v52  ;;  %v8458_v38 = vpop.permute.xlu1 %8457  ;;  %v8264_v52 = vsel %vm8260_vm7, %v16961_v1, %v8247_v60  ;;  %v8261_v1 = vsel %vm8260_vm7, %v17036_v24, %v16993_v58  ;;  %v12385_v60 = vld [vmem:[%s18598_s3 + $0x180] sm:$0xff]  ;;  %v8462_v58 = vsel %vm8098_vm5, %v17213_v10, %v8446_v34  ;;  %v8459_v34 = vsel %vm8098_vm5, %v17046_v29, %v17202_v21  ;;  %v12386_v10 = vld [vmem:[%s18598_s3 + $0x198] sm:$0xff] }
 0xa53   : > { %v8456_v61 = vpop.permute.xlu0 %8455  ;;  %8311 = vmatprep.subr.mxu0 %v8266_v13 }
 0xa54   : > { %8312 = vmatpush1.msra.mxu0 %v8265_v9  ;;  %10107 = vrot.lane.b32.xlu1 %v10069_v46, %s12438_s27  ;;  %v8466_v48 = vsel %vm8098_vm5, %v8456_v61, %v8458_v38  ;;  %v8465_v3 = vsel %vm8098_vm5, %v17014_v26, %v8456_v61  ;;  %v8464_v26 = vsel %vm8098_vm5, %v17270_v17, %v8452_v2  ;;  %v17410_v2 = vld [vmem:[#allocation4 + $0x58] sm:$0xff]  ;;  %v17479_v9 = vld [vmem:[#allocation4 + $0xa8] sm:$0xff] }
 0xa55   : > { %10095 = vrot.lane.b32.xlu0 %v10063_v30, %s12438_s27  ;;  %8313 = vmatprep.subr.mxu0 %v8264_v52  ;;  %v8460_v46 = vsel %vm8098_vm5, %v17202_v21, %v17204_v5  ;;  %19286 = vst [vmem:[#allocation21_spill] sm:$0xff] %v17410_v2  ;;  %v10369_v29 = vmul.f32 %v17410_v2, %v19246_v50 }
 0xa56   : > { %8507 = vmatprep.subr.mxu1 %v8466_v48  ;;  %8314 = vmatpush1.msra.mxu0 %v8263_v53  ;;  %v17362_v13 = vpop.permute.xlu1 %9091  ;;  %v19289_v48 = vld [vmem:[#allocation16_spill] sm:$0xff] }
 0xa57   : > { %8508 = vmatpush1.msra.mxu1 %v8465_v3  ;;  %v17364_v38 = vpop.permute.xlu0 %8928  ;;  %8315 = vmatprep.subr.mxu0 %v8262_v55  ;;  %v19290_v3 = vld [vmem:[#allocation18_spill] sm:$0xff]  ;;  %v19291_v55 = vld [vmem:[#allocation8_spill] sm:$0xff] }
 0xa58   : > { %8509 = vmatprep.subr.mxu1 %v8464_v26  ;;  %8316 = vmatpush1.msra.mxu0 %v8261_v1  ;;  %v19293_v1 = vld [vmem:[#allocation48_spill] sm:$0xff] }
 0xa59   : > { %8510 = vmatpush1.msra.mxu1 %v8463_v47  ;;  %10077 = vrot.lane.b32.xlu0 %v17239_v0, %s12432_s22  ;;  %v10372_v0 = vmul.f32 %v10360_v12, %v19246_v50 }
 0xa5a   : > { %9904 = vrot.lane.b32.xlu1 %v17301_v51, %s12434_s11  ;;  %12176 = vmatmul.mubr.msk.f32.vlgmr.msra.gmra.mxu0 %vm1751_vm0, %v12385_v60  ;;  %v17384_v24 = vpop.permute.xlu1 %9087 }
 0xa5b   : > { %8511 = vmatprep.subr.mxu1 %v8462_v58  ;;  %v17389_v17 = vpop.permute.xlu0 %9105  ;;  %8355 = vmatprep.mubr.f32.mxu0 %v19255_v11 }
 0xa5c   : > { %8512 = vmatpush1.msra.mxu1 %v8461_v7  ;;  %v19295_v7 = vld [vmem:[#allocation17_spill] sm:$0xff] }
 0xa5d   : > { %8513 = vmatprep.subr.mxu1 %v8460_v46  ;;  %10415 = vrot.lane.b32.xlu0 %v10372_v0, %s12418_s15  ;;  %v19297_v0 = vld [vmem:[#allocation33_spill] sm:$0xff] }
 0xa5e   : > { %8514 = vmatpush1.msra.mxu1 %v8459_v34  ;;  %10075 = vrot.lane.b32.xlu1 %v17221_v22, %s12432_s22  ;;  %v17402_v8 = vpop.permute.xlu1 %8892  ;;  %v19298_v34 = vld [vmem:[#allocation28_spill] sm:$0xff] }
 0xa5f   : > { %12177 = vmatmul.mubr.msk.f32.gmra.mxu0 %vm1751_vm0, %v12386_v10  ;;  %12180 = vmatmul.mubr.msk.f32.vlgmr.msra.gmra.mxu1 %vm1751_vm0, %v17072_v33  ;;  %v8635_v5 = vpop.permute.xlu0 %8634  ;;  %v19299_v10 = vld [vmem:[#allocation59_spill] sm:$0xff] }
 0xa60   : > { %8793 = vmatprep.subr.mxu1 %v16952_v16  ;;  %8361 = vmatprep.mubr.f32.mxu0 %v19255_v11  ;;  %v8643_v33 = vsel %vm8260_vm7, %v17327_v49, %v8635_v5  ;;  %v9116_v5 = vsel %vm8260_vm7, %v19299_v10, %v19298_v34 }
 0xa61   : > { %8794 = vmatpush1.msra.mxu1 %v16947_v23  ;;  %8553 = vmatprep.mubr.f32.mxu1 %v19255_v11  ;;  %v12387_v23 = vld [vmem:[%s18598_s3 + $0x1b0] sm:$0xff] }
 0xa62   : > { %8795 = vmatprep.subr.mxu1 %v16937_v59  ;;  %10409 = vrot.lane.b32.xlu0 %v10369_v29, %s12418_s15  ;;  %v17422_v21 = vpop.permute.xlu1 %8894  ;;  %v19300_v29 = vld [vmem:[#allocation24_spill] sm:$0xff] }
 0xa63   : > { %8796 = vmatpush1.msra.mxu1 %v16931_v44  ;;  %10079 = vrot.lane.b32.xlu1 %v17262_v19, %s12432_s22  ;;  %v17427_v22 = vpop.permute.xlu0 %8890  ;;  %v8642_v44 = vsel %vm8260_vm7, %v17089_v32, %v17327_v49  ;;  %v8641_v19 = vsel %vm8260_vm7, %v17316_v20, %v17303_v45  ;;  %v8640_v32 = vsel %vm8260_vm7, %v17110_v36, %v17316_v20  ;;  %v12388_v49 = vld [vmem:[%s18598_s3 + $0x1c8] sm:$0xff]  ;;  %v17469_v36 = vld [vmem:[#allocation4 + $0xb0] sm:$0xff] }
 0xa64   : > { %12178 = vmatmul.mubr.msk.f32.gmra.mxu0 %vm1751_vm0, %v12387_v23  ;;  %12181 = vmatmul.mubr.msk.f32.gmra.mxu1 %vm1751_vm0, %v17058_v42  ;;  %19287 = vst [vmem:[#allocation20_spill] sm:$0xff] %v17469_v36  ;;  %v10366_v56 = vmul.f32 %v17469_v36, %v19246_v50  ;;  %v10543_v30 = vmul.f32 %v17469_v36, %v19244_v63  ;;  %v19301_v23 = vld [vmem:[#allocation52_spill] sm:$0xff] }
 0xa65   : > { %8684 = vmatprep.subr.mxu0 %v8643_v33  ;;  %8797 = vmatprep.subr.mxu1 %v16923_v28  ;;  %v8936_v33 = vsel %vm8098_vm5, %v19300_v29, %v19297_v0 }
 0xa66   : > { %8685 = vmatpush1.msra.mxu0 %v8642_v44  ;;  %8798 = vmatpush1.msra.mxu1 %v16910_v6  ;;  %v17443_v43 = vpop.permute.xlu1 %9403  ;;  %v10549_v6 = vmul.f32 %v10360_v12, %v19244_v63  ;;  %v19294_v12 = vld [vmem:[#allocation47_spill] sm:$0xff]  ;;  %v9115_v44 = vsel %vm8260_vm7, %v19301_v23, %v19299_v10 }
 0xa67   : > { %8686 = vmatprep.subr.mxu0 %v8641_v19  ;;  %8799 = vmatprep.subr.mxu1 %v16902_v25  ;;  %v17446_v42 = vpop.permute.xlu0 %9067 }
 0xa68   : > { %8367 = vmatprep.mubr.f32.mxu0 %v19255_v11  ;;  %8559 = vmatprep.mubr.f32.mxu1 %v19255_v11 }
 0xa69   : > { %8687 = vmatpush1.msra.mxu0 %v8640_v32  ;;  %8800 = vmatpush1.msra.mxu1 %v16898_v40  ;;  %v8639_v40 = vsel %vm8260_vm7, %v17274_v31, %v17234_v37  ;;  %v10363_v37 = vmul.f32 %v17479_v9, %v19246_v50 }
 0xa6a   : > { %10592 = vrot.lane.b32.xlu0 %v10549_v6, %s12438_s27  ;;  %10081 = vrot.lane.b32.xlu1 %v17301_v51, %s12432_s22  ;;  %v17458_v45 = vpop.permute.xlu1 %9397  ;;  %v8638_v51 = vsel %vm8260_vm7, %v17087_v35, %v17274_v31  ;;  %v8636_v35 = vsel %vm8260_vm7, %v17108_v15, %v17193_v18  ;;  %v10546_v15 = vmul.f32 %v17410_v2, %v19244_v63  ;;  %v19302_v6 = vld [vmem:[#allocation32_spill] sm:$0xff] }
 0xa6b   : > { %12179 = vmatmul.mubr.msk.f32.gmra.mxu0 %vm1751_vm0, %v12388_v49  ;;  %12182 = vmatmul.mubr.msk.f32.gmra.mxu1 %vm1751_vm0, %v17070_v14  ;;  %v17471_v20 = vpop.permute.xlu0 %9069  ;;  %v8637_v14 = vsel %vm8260_vm7, %v17193_v18, %v17223_v57  ;;  %v19303_v49 = vld [vmem:[#allocation29_spill] sm:$0xff] }
 0xa6c   : > { %8688 = vmatprep.subr.mxu0 %v8639_v40  ;;  %8565 = vmatprep.mubr.f32.mxu1 %v19255_v11  ;;  %v19304_v40 = vld [vmem:[#allocation31_spill] sm:$0xff] }
 0xa6d   : > { %8689 = vmatpush1.msra.mxu0 %v8638_v51  ;;  %8724 = vmatprep.mubr.f32.mxu0 %v19255_v11  ;;  %v19305_v51 = vld [vmem:[#allocation57_spill] sm:$0xff] }
 0xa6e   : > { %8690 = vmatprep.subr.mxu0 %v8637_v14  ;;  %10403 = vrot.lane.b32.xlu0 %v10366_v56, %s12418_s15  ;;  %v8931_v31 = vpop.permute.xlu1 %8930  ;;  %v8935_v56 = vsel %vm8098_vm5, %v19305_v51, %v19304_v40  ;;  %v19306_v14 = vld [vmem:[#allocation30_spill] sm:$0xff] }
 0xa6f   : > { %8691 = vmatpush1.msra.mxu0 %v8636_v35  ;;  %10397 = vrot.lane.b32.xlu1 %v10363_v37, %s12418_s15  ;;  %v17492_v61 = vpop.permute.xlu0 %9401  ;;  %v8941_v57 = vsel %vm8098_vm5, %v8931_v31, %v17130_v39  ;;  %v8940_v18 = vsel %vm8098_vm5, %v17364_v38, %v8931_v31  ;;  %v19292_v38 = vld [vmem:[#allocation13_spill] sm:$0xff]  ;;  %v8934_v37 = vsel %vm8098_vm5, %v19306_v14, %v19305_v51  ;;  %v19307_v35 = vld [vmem:[#allocation14_spill] sm:$0xff]  ;;  %v19308_v31 = vld [vmem:[#allocation27_spill] sm:$0xff] }
 0xa70   : > { %12183 = vmatmul.mubr.msk.f32.gmra.mxu1 %vm1751_vm0, %v17119_v41  ;;  %12184 = vmatmul.mubr.msk.f32.vlgmr.msra.gmra.mxu0 %vm1751_vm0, %v17132_v27  ;;  %v19288_v27 = vld [vmem:[#allocation36_spill] sm:$0xff]  ;;  %v8939_v26 = vsel %vm8098_vm5, %v19292_v38, %v19291_v55  ;;  %v8938_v47 = vsel %vm8098_vm5, %v19293_v1, %v19292_v38  ;;  %v12390_v55 = vld [vmem:[#allocation3 + $0xa8] sm:$0xff] }
 0xa71   : > { %8730 = vmatprep.mubr.f32.mxu0 %v19255_v11  ;;  %8833 = vmatprep.mubr.f32.mxu1 %v19255_v11 }
 0xa72   : > { %10586 = vrot.lane.b32.xlu0 %v10546_v15, %s12438_s27  ;;  %8982 = vmatprep.subr.mxu0 %v8941_v57  ;;  %v9108_v41 = vpop.permute.xlu1 %9107  ;;  %v9114_v57 = vsel %vm8260_vm7, %v19308_v31, %v19307_v35 }
 0xa73   : > { %10580 = vrot.lane.b32.xlu1 %v10543_v30, %s12438_s27  ;;  %8983 = vmatpush1.msra.mxu0 %v8940_v18  ;;  %v17510_v39 = vpop.permute.xlu0 %9071  ;;  %v9118_v52 = vsel %vm8260_vm7, %v9108_v41, %v19288_v27  ;;  %v9117_v53 = vsel %vm8260_vm7, %v17389_v17, %v9108_v41  ;;  %v19296_v17 = vld [vmem:[#allocation49_spill] sm:$0xff]  ;;  %v19309_v41 = vld [vmem:[#allocation44_spill] sm:$0xff]  ;;  %v19310_v27 = vld [vmem:[#allocation42_spill] sm:$0xff] }
 0xa74   : > { %12185 = vmatmul.mubr.msk.f32.gmra.mxu0 %vm1751_vm0, %v19289_v48  ;;  %12188 = vmatmul.mubr.msk.f32.vlgmr.msra.gmra.mxu1 %vm1751_vm0, %v19290_v3  ;;  %v8937_v46 = vsel %vm8098_vm5, %v19297_v0, %v19296_v17  ;;  %v12389_v18 = vld [vmem:[#allocation3 + $0x20] sm:$0xff]  ;;  %v19311_v48 = vld [vmem:[#allocation35_spill] sm:$0xff] }
 0xa75   : > { %8736 = vmatprep.mubr.f32.mxu0 %v19255_v11  ;;  %8839 = vmatprep.mubr.f32.mxu1 %v19255_v11  ;;  %v9112_v3 = vsel %vm8260_vm7, %v19311_v48, %v17362_v13  ;;  %v12391_v13 = vld [vmem:[#allocation3 + $0x18] sm:$0xff] }
 0xa76   : > { %8984 = vmatprep.subr.mxu0 %v8939_v26  ;;  %9159 = vmatprep.subr.mxu1 %v9118_v52  ;;  %v17528_v60 = vpop.permute.xlu1 %9393  ;;  %v9113_v52 = vsel %vm8260_vm7, %v19310_v27, %v19308_v31 }
 0xa77   : > { %8985 = vmatpush1.msra.mxu0 %v8938_v47  ;;  %9160 = vmatpush1.msra.mxu1 %v9117_v53  ;;  %v17530_v58 = vpop.permute.xlu0 %9395  ;;  %v9111_v53 = vsel %vm8260_vm7, %v17384_v24, %v19311_v48  ;;  %v12161_v47 = vld [vmem:[%s18598_s3 + $0x1a8] sm:$0xff] }
 0xa78   : > { %12186 = vmatmul.mubr.msk.f32.gmra.mxu0 %vm1751_vm0, %v19294_v12  ;;  %12189 = vmatmul.mubr.msk.f32.gmra.mxu1 %vm1751_vm0, %v19295_v7  ;;  %v12167_v7 = vld [vmem:[%s18598_s3 + $0x1d8] sm:$0xff] }
 0xa79   : > { %8742 = vmatprep.mubr.f32.mxu0 %v19255_v11  ;;  %8845 = vmatprep.mubr.f32.mxu1 %v19255_v11 }
 0xa7a   : > { %8986 = vmatprep.subr.mxu0 %v8937_v46  ;;  %9161 = vmatprep.subr.mxu1 %v9116_v5  ;;  %v17550_v19 = vpop.permute.xlu1 %9391  ;;  %v8201_v17 = vpop.f32.mrf.mxu1 }
 0xa7b   : > { %8987 = vmatpush1.msra.mxu0 %v8936_v33  ;;  %9162 = vmatpush1.msra.mxu1 %v9115_v44  ;;  %v8897_v32 = vpop.permute.xlu0 %8896 }
 0xa7c   : > { %12187 = vmatmul.mubr.msk.f32.gmra.mxu0 %vm1751_vm0, %v19302_v6  ;;  %12190 = vmatmul.mubr.msk.f32.gmra.mxu1 %vm1751_vm0, %v19303_v49  ;;  %v8203_v0 = vpop.f32.mrf.mxu1 }
 0xa7d   : > { %8988 = vmatprep.subr.mxu0 %v8935_v56  ;;  %8851 = vmatprep.mubr.f32.mxu1 %v19255_v11 }
 0xa7e   : > { %8989 = vmatpush1.msra.mxu0 %v8934_v37  ;;  %9022 = vmatprep.mubr.f32.mxu0 %v19255_v11  ;;  %v9388_v15 = vpop.permute.xlu1 %9387  ;;  %v8207_v46 = vpop.f32.mrf.mxu1 }
 0xa7f   : > { %9163 = vmatprep.subr.mxu1 %v9114_v57  ;;  %9272 = vmatprep.subr.mxu0 %v12389_v18  ;;  %v9390_v30 = vpop.permute.xlu0 %9389 }
 0xa80   : > { %12191 = vmatmul.mubr.msk.f32.gmra.mxu1 %vm1751_vm0, %v19309_v41  ;;  %12192 = vmatmul.mubr.msk.f32.vlgmr.msra.gmra.mxu0 %vm1751_vm0, %v17427_v22  ;;  %v17649_v34 = vpop.f32.mrf.mxu1 }
 0xa81   : > { %9164 = vmatpush1.msra.mxu1 %v9113_v52  ;;  %9273 = vmatpush1.msra.mxu0 %v16952_v16  ;;  %v9412_v16 = vsel %vm8098_vm5, %v17492_v61, %v17443_v43 }
 0xa82   : > { %9165 = vmatprep.subr.mxu1 %v9112_v3  ;;  %9274 = vmatprep.subr.mxu0 %v12390_v55  ;;  %v9400_v38 = vpop.permute.xlu1 %9399  ;;  %v17651_v10 = vpop.f32.mrf.mxu1 }
 0xa83   : > { %9028 = vmatprep.mubr.f32.mxu0 %v19255_v11  ;;  %9166 = vmatpush1.msra.mxu1 %v9111_v53  ;;  %v9074_v22 = vpop.permute.xlu0 %9073 }
 0xa84   : > { %9199 = vmatprep.mubr.f32.mxu1 %v19255_v11  ;;  %9275 = vmatpush1.msra.mxu0 %v16937_v59  ;;  %v12392_v59 = vld [vmem:[#allocation3 + $0x60] sm:$0xff]  ;;  %v8215_v5 = vpop.f32.mrf.mxu1 }
 0xa85   : > { %12193 = vmatmul.mubr.msk.f32.gmra.mxu0 %vm1751_vm0, %v17402_v8  ;;  %12196 = vmatmul.mubr.msk.f32.vlgmr.msra.gmra.mxu1 %vm1751_vm0, %v17446_v42  ;;  %v9411_v8 = vsel %vm8098_vm5, %v9400_v38, %v17492_v61 }
 0xa86   : > { %9276 = vmatprep.subr.mxu0 %v12391_v13  ;;  %9457 = vmatprep.subr.mxu1 %v9412_v16  ;;  %v9386_v24 = vpop.permute.xlu1 %9385  ;;  %v17653_v29 = vpop.f32.mrf.mxu1 }
 0xa87   : > { %9277 = vmatpush1.msra.mxu0 %v16923_v28  ;;  %9034 = vmatprep.mubr.f32.mxu0 %v19255_v11  ;;  %v9384_v26 = vpop.permute.xlu0 %9383  ;;  %v9410_v28 = vsel %vm8098_vm5, %v17530_v58, %v17458_v45  ;;  %v9407_v45 = vsel %vm8098_vm5, %v9388_v15, %v9390_v30 }
 0xa88   : > { %9278 = vmatprep.subr.mxu0 %v12392_v59  ;;  %9205 = vmatprep.mubr.f32.mxu1 %v19255_v11  ;;  %v8221_v44 = vpop.f32.mrf.mxu1 }
 0xa89   : > { %9279 = vmatpush1.msra.mxu0 %v16902_v25  ;;  %12197 = vmatmul.mubr.msk.f32.gmra.mxu1 %vm1751_vm0, %v17471_v20  ;;  %v9409_v25 = vsel %vm8098_vm5, %v17528_v60, %v17530_v58  ;;  %v9406_v20 = vsel %vm8098_vm5, %v9384_v26, %v9386_v24  ;;  %v12164_v58 = vld [vmem:[%s18598_s3 + $0x1c0] sm:$0xff] }
 0xa8a   : > { %12194 = vmatmul.mubr.msk.f32.gmra.mxu0 %vm1751_vm0, %v17422_v21  ;;  %9211 = vmatprep.mubr.f32.mxu1 %v19255_v11  ;;  %v9382_v43 = vpop.permute.xlu1 %9381  ;;  %v9408_v21 = vsel %vm8098_vm5, %v9390_v30, %v17550_v19 }
 0xa8b   : > { %9040 = vmatprep.mubr.f32.mxu0 %v19255_v11  ;;  %9458 = vmatpush1.msra.mxu1 %v9411_v8  ;;  %v9233_v42 = vpop.permute.xlu0 %9232  ;;  %v9405_v61 = vsel %vm8098_vm5, %v9382_v43, %v9384_v26 }
 0xa8c   : > { %9459 = vmatprep.subr.mxu1 %v9410_v28 }
 0xa8d   : > { %12198 = vmatmul.mubr.msk.f32.gmra.mxu1 %vm1751_vm0, %v17510_v39  ;;  %v12158_v39 = vld [vmem:[%s18598_s3 + $0x190] sm:$0xff] }
 0xa8e   : > { %12195 = vmatmul.mubr.msk.f32.gmra.mxu0 %vm1751_vm0, %v8897_v32  ;;  %9460 = vmatpush1.msra.mxu1 %v9409_v25  ;;  %v9237_v60 = vpop.permute.xlu1 %9236 }
 0xa8f   : > { %9217 = vmatprep.mubr.f32.mxu1 %v19255_v11  ;;  %9461 = vmatprep.subr.mxu1 %v9408_v21  ;;  %v9235_v1 = vpop.permute.xlu0 %9234 }
 0xa90   : > { %9462 = vmatpush1.msra.mxu1 %v9407_v45  ;;  %9312 = vmatprep.mubr.f32.mxu0 %v19255_v11 }
 0xa91   : > { %12199 = vmatmul.mubr.msk.f32.gmra.mxu1 %vm1751_vm0, %v9074_v22  ;;  %9463 = vmatprep.subr.mxu1 %v9406_v20 }
 0xa92   : > { %12200 = vmatmul.mubr.msk.f32.vlgmr.msra.gmra.mxu0 %vm1751_vm0, %v9233_v42  ;;  %9464 = vmatpush1.msra.mxu1 %v9405_v61 }
 0xa93   : > { %9497 = vmatprep.mubr.f32.mxu1 %v19255_v11  ;;  %9318 = vmatprep.mubr.f32.mxu0 %v19255_v11  ;;  %v9239_v12 = vpop.permute.xlu0 %9238 }
 0xa95   : > { %12204 = vmatmul.mubr.msk.f32.vlgmr.msra.gmra.mxu1 %vm1751_vm0, %v12158_v39 }
 0xa96   : > { %12201 = vmatmul.mubr.msk.f32.gmra.mxu0 %vm1751_vm0, %v9235_v1  ;;  %9503 = vmatprep.mubr.f32.mxu1 %v19255_v11 }
 0xa97   : > { %9324 = vmatprep.mubr.f32.mxu0 %v19255_v11 }
 0xa99   : > { %12205 = vmatmul.mubr.msk.f32.gmra.mxu1 %vm1751_vm0, %v12161_v47 }
 0xa9a   : > { %12202 = vmatmul.mubr.msk.f32.gmra.mxu0 %vm1751_vm0, %v9237_v60  ;;  %9509 = vmatprep.mubr.f32.mxu1 %v19255_v11 }
 0xa9b   : > { %9330 = vmatprep.mubr.f32.mxu0 %v19255_v11  ;;  %v17673_v39 = vpop.permute.xlu1 %9547 }
 0xa9d   : > { %12206 = vmatmul.mubr.msk.f32.gmra.mxu1 %vm1751_vm0, %v12164_v58 }
 0xa9e   : > { %12203 = vmatmul.mubr.msk.f32.gmra.mxu0 %vm1751_vm0, %v9239_v12  ;;  %9515 = vmatprep.mubr.f32.mxu1 %v19255_v11 }
 0xa9f   : > { %9700 = vmatprep.mubr.f32.mxu0 %v19255_v11 }
 0xaa1   : > { %12207 = vmatmul.mubr.msk.f32.gmra.mxu1 %vm1751_vm0, %v12167_v7 }
 0xaa2   : > { %9849 = vmatprep.mubr.f32.mxu1 %v19255_v11 }
 0xb1a   : > { %v8351_v33 = vpop.f32.mrf.mxu0 }
 0xb1b   : > { %v8352_v60 = vadd.f32 %v8351_v33, %v8201_v17 }
 0xb1c   : > { %v8353_v23 = vpop.f32.mrf.mxu0 }
 0xb1d   : > { %v8354_v7 = vadd.f32 %v8353_v23, %v8203_v0 }
 0xb1f   : > { %v8357_v19 = vpop.f32.mrf.mxu0  ;;  %v8549_v32 = vpop.f32.mrf.mxu1 }
 0xb21   : > { %v8359_v6 = vpop.f32.mrf.mxu0  ;;  %v8551_v49 = vpop.f32.mrf.mxu1 }
 0xb22   : > { %v8360_v17 = vadd.f32 %v8359_v6, %v17649_v34 }
 0xb24   : > { %v8363_v40 = vpop.f32.mrf.mxu0  ;;  %v8555_v51 = vpop.f32.mrf.mxu1 }
 0xb26   : > { %v8365_v56 = vpop.f32.mrf.mxu0  ;;  %v8557_v14 = vpop.f32.mrf.mxu1 }
 0xb27   : > { %v8366_v31 = vadd.f32 %v8365_v56, %v8215_v5  ;;  %v8572_v5 = vadd.f32 %v8549_v32, %v8352_v60  ;;  %v17682_v60 = vpop.permute.xlu0 %9542 }
 0xb2b   : > { %v17655_v37 = vpop.f32.mrf.mxu0  ;;  %v17657_v35 = vpop.f32.mrf.mxu1 }
 0xb2c   : > { %v8370_v34 = vadd.f32 %v17655_v37, %v17653_v29 }
 0xb2d   : > { %v8371_v57 = vpop.f32.mrf.mxu0  ;;  %v8563_v15 = vpop.f32.mrf.mxu1 }
 0xb2e   : > { %v8372_v18 = vadd.f32 %v8371_v57, %v8221_v44  ;;  %v17659_v30 = vadd.f32 %v8563_v15, %v8366_v31  ;;  %v17675_v31 = vpop.permute.xlu1 %9537  ;;  %v8358_v57 = vadd.f32 %v8357_v19, %v8207_v46  ;;  %v8573_v15 = vadd.f32 %v8551_v49, %v8354_v7 }
 0xb2f   : > { %v8364_v46 = vadd.f32 %v8363_v40, %v17651_v10 }
 0xb30   : > { %v17661_v41 = vpop.f32.mrf.mxu1  ;;  %v8726_v27 = vpop.f32.mrf.mxu0 }
 0xb31   : > { %v8576_v6 = vadd.f32 %v17657_v35, %v8364_v46 }
 0xb32   : > { %v8569_v52 = vpop.f32.mrf.mxu1  ;;  %v8728_v48 = vpop.f32.mrf.mxu0 }
 0xb33   : > { %v8579_v3 = vadd.f32 %v8569_v52, %v8372_v18  ;;  %v8749_v18 = vadd.f32 %v8726_v27, %v8572_v5  ;;  %v17687_v49 = vpop.permute.xlu1 %9620 }
 0xb34   : > { %v8732_v53 = vpop.f32.mrf.mxu0  ;;  %v8835_v55 = vpop.f32.mrf.mxu1 }
 0xb36   : > { %v8734_v38 = vpop.f32.mrf.mxu0  ;;  %v8837_v22 = vpop.f32.mrf.mxu1 }
 0xb37   : > { %v17695_v35 = vpop.permute.xlu1 %9757 }
 0xb38   : > { %v8738_v16 = vpop.f32.mrf.mxu0  ;;  %v8841_v13 = vpop.f32.mrf.mxu1 }
 0xb39   : > { %v8753_v40 = vadd.f32 %v8738_v16, %v8576_v6 }
 0xb3a   : > { %v17663_v24 = vpop.f32.mrf.mxu0  ;;  %v8843_v26 = vpop.f32.mrf.mxu1 }
 0xb3c   : > { %v17665_v59 = vpop.f32.mrf.mxu0  ;;  %v8847_v8 = vpop.f32.mrf.mxu1 }
 0xb3e   : > { %v8746_v28 = vpop.f32.mrf.mxu0  ;;  %v17667_v43 = vpop.f32.mrf.mxu1 }
 0xb3f   : > { %v8756_v25 = vadd.f32 %v8746_v28, %v8579_v3  ;;  %v8574_v28 = vadd.f32 %v8555_v51, %v8358_v57  ;;  %v8575_v51 = vadd.f32 %v8557_v14, %v8360_v17  ;;  %v8578_v14 = vadd.f32 %v17661_v41, %v8370_v34 }
 0xb40   : > { %v17669_v42 = vpop.f32.mrf.mxu1  ;;  %v9024_v21 = vpop.f32.mrf.mxu0 }
 0xb41   : > { %v8751_v33 = vadd.f32 %v8732_v53, %v8574_v28  ;;  %v9533_v28 = vpop.permute.xlu0 %9532 }
 0xb42   : > { %v8855_v20 = vpop.f32.mrf.mxu1  ;;  %v9026_v45 = vpop.f32.mrf.mxu0 }
 0xb43   : > { %v17671_v61 = vadd.f32 %v8855_v20, %v8756_v25  ;;  %v8750_v25 = vadd.f32 %v8728_v48, %v8573_v15  ;;  %v8858_v20 = vadd.f32 %v8835_v55, %v8749_v18  ;;  %v8860_v27 = vadd.f32 %v8841_v13, %v8751_v33 }
 0xb45   : > { %v9030_v1 = vpop.f32.mrf.mxu0  ;;  %v9201_v47 = vpop.f32.mrf.mxu1  ;;  %v8859_v0 = vadd.f32 %v8837_v22, %v8750_v25  ;;  %v9047_v23 = vadd.f32 %v9024_v21, %v8858_v20  ;;  %v8752_v22 = vadd.f32 %v8734_v38, %v8575_v51  ;;  %v8862_v25 = vadd.f32 %v8847_v8, %v8753_v40 }
 0xb46   : > { %v9049_v21 = vadd.f32 %v9030_v1, %v8860_v27  ;;  %v8755_v38 = vadd.f32 %v17665_v59, %v8578_v14 }
 0xb47   : > { %v9032_v58 = vpop.f32.mrf.mxu0  ;;  %v9203_v12 = vpop.f32.mrf.mxu1  ;;  %v9048_v48 = vadd.f32 %v9026_v45, %v8859_v0  ;;  %v9224_v55 = vadd.f32 %v9201_v47, %v9047_v23  ;;  %v8861_v13 = vadd.f32 %v8843_v26, %v8752_v22 }
 0xb48   : > { %v8864_v41 = vadd.f32 %v17669_v42, %v8755_v38 }
 0xb49   : > { %v9207_v44 = vpop.f32.mrf.mxu1  ;;  %v9225_v5 = vadd.f32 %v9203_v12, %v9048_v48  ;;  %v9050_v1 = vadd.f32 %v9032_v58, %v8861_v13 }
 0xb4a   : > { %v9036_v56 = vpop.f32.mrf.mxu0  ;;  %v9226_v45 = vadd.f32 %v9207_v44, %v9049_v21 }
 0xb4b   : > { %v9209_v52 = vpop.f32.mrf.mxu1  ;;  %v9051_v17 = vadd.f32 %v9036_v56, %v8862_v25 }
 0xb4c   : > { %v17677_v3 = vpop.f32.mrf.mxu0  ;;  %v9227_v26 = vadd.f32 %v9209_v52, %v9050_v1  ;;  %v17706_v52 = vpop.permute.xlu1 %9755  ;;  %v19314_v1 = vld [vmem:[#allocation55_spill] sm:$0xff] }
 0xb4d   : > { %v9213_v36 = vpop.f32.mrf.mxu1 }
 0xb4e   : > { %v9042_v2 = vpop.f32.mrf.mxu0  ;;  %v9228_v23 = vadd.f32 %v9213_v36, %v9051_v17 }
 0xb4f   : > { %v17680_v32 = vpop.f32.mrf.mxu1  ;;  %v9053_v48 = vadd.f32 %v9042_v2, %v8864_v41 }
 0xb50   : > { %v17685_v19 = vpop.f32.mrf.mxu0 }
 0xb51   : > { %v9219_v7 = vpop.f32.mrf.mxu1 }
 0xb52   : > { %v9314_v53 = vpop.f32.mrf.mxu0  ;;  %v9230_v36 = vadd.f32 %v9219_v7, %v9053_v48  ;;  %v19313_v7 = vld [vmem:[#allocation22_spill] sm:$0xff] }
 0xb53   : > { %v17692_v57 = vpop.f32.mrf.mxu1  ;;  %v9337_v10 = vadd.f32 %v9314_v53, %v9224_v55  ;;  %v19312_v53 = vld [vmem:[#allocation60_spill] sm:$0xff] }
 0xb54   : > { %v9316_v15 = vpop.f32.mrf.mxu0 }
 0xb55   : > { %v9338_v47 = vadd.f32 %v9316_v15, %v9225_v5  ;;  %v9499_v18 = vpop.f32.mrf.mxu1 }
 0xb56   : > { %v9522_v29 = vadd.f32 %v9499_v18, %v9337_v10  ;;  %v9320_v37 = vpop.f32.mrf.mxu0 }
 0xb57   : > { %v9339_v12 = vadd.f32 %v9320_v37, %v9226_v45  ;;  %v9501_v20 = vpop.f32.mrf.mxu1 }
 0xb58   : > { %v9550_v16 = vadd.f32 %v9533_v28, %v9522_v29  ;;  %v9523_v33 = vadd.f32 %v9501_v20, %v9338_v47  ;;  %v9322_v0 = vpop.f32.mrf.mxu0 }
 0xb59   : > { %v9505_v44 = vpop.f32.mrf.mxu1  ;;  %v9340_v55 = vadd.f32 %v9322_v0, %v9227_v26  ;;  %v19315_v0 = vld [vmem:[#allocation39_spill] sm:$0xff]  ;;  %v9623_v26 = vpop.permute.xlu0 %9622 }
 0xb5a   : > { %v17699_v46 = vmax.f32 %v9550_v16, 0.0  ;;  %v9551_v8 = vadd.f32 %v9533_v28, %v9523_v33  ;;  %v9524_v51 = vadd.f32 %v9505_v44, %v9339_v12  ;;  %v9326_v27 = vpop.f32.mrf.mxu0  ;;  %v17719_v28 = vpop.permute.xlu1 %9749  ;;  %v8754_v44 = vadd.f32 %v17663_v24, %v17659_v30 }
 0xb5b   : > { %v9507_v59 = vpop.f32.mrf.mxu1  ;;  %v9341_v34 = vadd.f32 %v9326_v27, %v9228_v23 }
 0xb5c   : > { %v17701_v58 = vmax.f32 %v9551_v8, 0.0  ;;  %v9552_v56 = vadd.f32 %v17675_v31, %v9524_v51  ;;  %v9328_v6 = vpop.f32.mrf.mxu0  ;;  %v10064_v42 = vmul.f32 %v17699_v46, %v19312_v53  ;;  %v9606_v21 = vmul.f32 %v17699_v46, %v19244_v63  ;;  %v19316_v8 = vld [vmem:[#allocation19_spill] sm:$0xff] }
 0xb5d   : > { %v9511_v22 = vpop.f32.mrf.mxu1  ;;  %v9525_v15 = vadd.f32 %v9507_v59, %v9340_v55  ;;  %v9887_v47 = vmul.f32 %v17699_v46, %v19313_v7  ;;  %v10361_v12 = vmul.f32 %v17699_v46, %v19314_v1  ;;  %v8863_v27 = vadd.f32 %v17667_v43, %v8754_v44  ;;  %v17769_v48 = vpop.permute.xlu0 %9751 }
 0xb5e   : > { %v9332_v5 = vpop.f32.mrf.mxu0  ;;  %10097 = vrot.lane.b32.xlu1 %v10064_v42, %s12438_s27  ;;  %9741 = vrot.lane.b32.xlu0 %v9606_v21, %s12438_s27  ;;  %v17712_v40 = vmax.f32 %v9552_v56, 0.0  ;;  %v9526_v14 = vadd.f32 %v9511_v22, %v9341_v34  ;;  %v9888_v13 = vmul.f32 %v17701_v58, %v19246_v50  ;;  %v17740_v33 = vpop.permute.xlu1 %9745  ;;  %v10065_v41 = vmul.f32 %v17701_v58, %v19244_v63 }
 0xb5f   : > { %v9343_v2 = vadd.f32 %v9332_v5, %v9230_v36  ;;  %v9513_v10 = vpop.f32.mrf.mxu1  ;;  %v9553_v25 = vadd.f32 %v17675_v31, %v9525_v15  ;;  %v10362_v51 = vmul.f32 %v17701_v58, %v19313_v7  ;;  %v9052_v30 = vadd.f32 %v17677_v3, %v8863_v27 }
 0xb60   : > { %v9554_v29 = vadd.f32 %v17682_v60, %v9526_v14  ;;  %v9890_v38 = vmul.f32 %v17712_v40, %v19313_v7  ;;  %v10541_v31 = vmul.f32 %v17712_v40, %v19251_v4  ;;  %v10539_v43 = vmul.f32 %v17701_v58, %v19312_v53  ;;  %v9334_v15 = vpop.f32.mrf.mxu0 }
 0xb61   : > { %v9517_v45 = vpop.f32.mrf.mxu1  ;;  %v17733_v17 = vmax.f32 %v9553_v25, 0.0  ;;  %v9229_v55 = vadd.f32 %v17680_v32, %v9052_v30  ;;  %v9609_v59 = vmul.f32 %v17712_v40, %v19244_v63  ;;  %v9625_v32 = vpop.permute.xlu0 %9624  ;;  %v10364_v21 = vmul.f32 %v17712_v40, %v19314_v1 }
 0xb62   : > { %v9528_v18 = vadd.f32 %v9517_v45, %v9343_v2  ;;  %9922 = vrot.lane.b32.xlu1 %v9888_v13, %s12418_s15  ;;  %9920 = vrot.lane.b32.xlu0 %v9887_v47, %s12418_s15  ;;  %v17735_v16 = vmax.f32 %v9554_v29, 0.0  ;;  %v9054_v2 = vadd.f32 %v17685_v19, %v17671_v61  ;;  %v10540_v27 = vmul.f32 %v17479_v9, %v19244_v63 }
 0xb63   : > { %v10068_v23 = vmul.f32 %v17733_v17, %v19244_v63  ;;  %v10365_v24 = vmul.f32 %v17733_v17, %v19313_v7  ;;  %v9891_v14 = vmul.f32 %v17733_v17, %v19246_v50  ;;  %v9519_v19 = vpop.f32.mrf.mxu1 }
 0xb64   : > { %v9556_v37 = vadd.f32 %v17673_v39, %v9528_v18  ;;  %v9612_v3 = vmul.f32 %v17735_v16, %v19244_v63  ;;  %v9893_v34 = vmul.f32 %v17735_v16, %v19313_v7  ;;  %v10367_v22 = vmul.f32 %v17735_v16, %v19314_v1 }
 0xb65   : > { %v17803_v5 = vpop.permute.xlu0 %9936  ;;  %v9231_v13 = vadd.f32 %v17692_v57, %v9054_v2  ;;  %v10542_v18 = vmul.f32 %v17733_v17, %v19312_v53  ;;  %v10070_v29 = vmul.f32 %v17735_v16, %v19312_v53 }
 0xb66   : > { %v17729_v20 = vmax.f32 %v9556_v37, 0.0  ;;  %9926 = vrot.lane.b32.xlu1 %v9890_v38, %s12418_s15  ;;  %10393 = vrot.lane.b32.xlu0 %v10361_v12, %s12418_s15 }
 0xb67   : > { %v9344_v45 = vadd.f32 %v9334_v15, %v9231_v13 }
 0xb68   : > { %9660 = vmatprep.subr.mxu0 %v17729_v20  ;;  %v10370_v30 = vmul.f32 %v17729_v20, %v19314_v1 }
 0xb69   : > { %9661 = vmatpush1.msra.mxu0 %v19315_v0  ;;  %v17819_v61 = vpop.permute.xlu0 %9930  ;;  %v9529_v25 = vadd.f32 %v9519_v19, %v9344_v45 }
 0xb6a   : > { %9662 = vmatprep.subr.mxu0 %v17735_v16  ;;  %10576 = vrot.lane.b32.xlu1 %v10541_v31, %s12438_s27 }
 0xb6b   : > { %10099 = vrot.lane.b32.xlu0 %v10065_v41, %s12438_s27  ;;  %9663 = vmatpush1.msra.mxu0 %v17246_v54  ;;  %v17760_v54 = vpop.permute.xlu1 %9743  ;;  %v9557_v38 = vadd.f32 %v17673_v39, %v9529_v25  ;;  %v10073_v41 = vmul.f32 %v17729_v20, %v19312_v53  ;;  %v9615_v39 = vmul.f32 %v17729_v20, %v19244_v63  ;;  %v19318_v25 = vld [vmem:[#allocation21_spill] sm:$0xff] }
 0xb6c   : > { %9664 = vmatprep.subr.mxu0 %v17712_v40 }
 0xb6d   : > { %9665 = vmatpush1.msra.mxu0 %v19316_v8  ;;  %v17830_v37 = vpop.permute.xlu0 %9737  ;;  %v17840_v0 = vmax.f32 %v9557_v38, 0.0 }
 0xb6e   : > { %10105 = vrot.lane.b32.xlu1 %v10068_v23, %s12438_s27  ;;  %9666 = vmatprep.subr.mxu0 %v17699_v46  ;;  %v9896_v23 = vmul.f32 %v17729_v20, %v19313_v7 }
 0xb6f   : > { %10395 = vrot.lane.b32.xlu0 %v10362_v51, %s12418_s15  ;;  %9667 = vmatpush1.msra.mxu0 %v17287_v62  ;;  %v9342_v62 = vadd.f32 %v9328_v6, %v9229_v55  ;;  %v10067_v6 = vmul.f32 %v17712_v40, %v19312_v53  ;;  %v9897_v44 = vmul.f32 %v17840_v0, %v19246_v50 }
 0xb70   : > { %12224 = vmatmul.mubr.msk.f32.vlgmr.msra.gmra.mxu0 %vm1751_vm0, %v17687_v49  ;;  %v17780_v49 = vpop.permute.xlu1 %9739 }
 0xb71   : > { %9706 = vmatprep.mubr.f32.mxu0 %v19255_v11  ;;  %v9527_v56 = vadd.f32 %v9513_v10, %v9342_v62  ;;  %v10544_v10 = vmul.f32 %v17735_v16, %v19251_v4  ;;  %v10547_v62 = vmul.f32 %v17729_v20, %v19251_v4 }
 0xb72   : > { %10401 = vrot.lane.b32.xlu1 %v10365_v24, %s12418_s15 }
 0xb73   : > { %10572 = vrot.lane.b32.xlu0 %v10539_v43, %s12438_s27  ;;  %v9555_v36 = vadd.f32 %v17682_v60, %v9527_v56  ;;  %v10538_v43 = vmul.f32 %v17699_v46, %v19251_v4  ;;  %v17893_v4 = vld [vmem:[%s18598_s3 + $0x218] sm:$0xff] }
 0xb74   : > { %12225 = vmatmul.mubr.msk.f32.gmra.mxu0 %vm1751_vm0, %v9623_v26  ;;  %v9627_v42 = vpop.permute.xlu1 %9626  ;;  %v17844_v26 = vpop.permute.xlu0 %9918  ;;  %19317 = vst [vmem:[#allocation41_spill] sm:$0xff] %v17893_v4 }
 0xb75   : > { %9712 = vmatprep.mubr.f32.mxu0 %v19255_v11  ;;  %v17808_v60 = vmax.f32 %v9555_v36, 0.0 }
 0xb76   : > { %9753 = vrot.lane.b32.xlu1 %v9612_v3, %s12438_s27  ;;  %v17879_v3 = vld [vmem:[%s18598_s3 + $0x200] sm:$0xff] }
 0xb77   : > { %9747 = vrot.lane.b32.xlu0 %v9609_v59, %s12438_s27  ;;  %v10071_v47 = vmul.f32 %v17808_v60, %v19244_v63  ;;  %v10368_v57 = vmul.f32 %v17808_v60, %v19313_v7  ;;  %v10545_v12 = vmul.f32 %v17808_v60, %v19312_v53  ;;  %v9894_v31 = vmul.f32 %v17808_v60, %v19246_v50 }
 0xb78   : > { %12226 = vmatmul.mubr.msk.f32.gmra.mxu0 %vm1751_vm0, %v9625_v32  ;;  %v17854_v8 = vpop.permute.xlu1 %9924  ;;  %v17857_v51 = vpop.permute.xlu0 %9900  ;;  %v10074_v59 = vmul.f32 %v17840_v0, %v19244_v63  ;;  %v10839_v63 = vld [vmem:[#allocation4 + $0x90] sm:$0xff] }
 0xb79   : > { %9718 = vmatprep.mubr.f32.mxu0 %v19255_v11 }
 0xb7a   : > { %9932 = vrot.lane.b32.xlu1 %v9893_v34, %s12418_s15  ;;  %v17898_v34 = vld [vmem:[%s18598_s3 + $0x1e8] sm:$0xff] }
 0xb7b   : > { %10103 = vrot.lane.b32.xlu0 %v10067_v6, %s12438_s27 }
 0xb7c   : > { %12227 = vmatmul.mubr.msk.f32.gmra.mxu0 %vm1751_vm0, %v9627_v42  ;;  %v17866_v24 = vpop.permute.xlu1 %9898  ;;  %v17870_v55 = vpop.permute.xlu0 %9902  ;;  %v10851_v42 = vmul.f32 %v10839_v63, %v19246_v50 }
 0xb7d   : > { %10030 = vmatprep.mubr.f32.mxu0 %v19255_v11 }
 0xb7e   : > { %10405 = vrot.lane.b32.xlu1 %v10367_v22, %s12418_s15  ;;  %v10836_v22 = vld [vmem:[#allocation4 + $0x38] sm:$0xff] }
 0xb7f   : > { %10399 = vrot.lane.b32.xlu0 %v10364_v21, %s12418_s15  ;;  %v10848_v21 = vmul.f32 %v10836_v22, %v19246_v50 }
 0xb80   : > { %v17883_v32 = vpop.permute.xlu1 %10113  ;;  %v17887_v56 = vpop.permute.xlu0 %10101 }
 0xb82   : > { %10582 = vrot.lane.b32.xlu1 %v10544_v10, %s12438_s27  ;;  %v10838_v10 = vld [vmem:[#allocation4 + $0x8] sm:$0xff] }
 0xb83   : > { %9928 = vrot.lane.b32.xlu0 %v9891_v14, %s12418_s15  ;;  %v10371_v14 = vmul.f32 %v17840_v0, %v19313_v7  ;;  %v10850_v13 = vmul.f32 %v10838_v10, %v19313_v7 }
 0xb84   : > { %v17904_v6 = vpop.permute.xlu1 %10107  ;;  %v17907_v36 = vpop.permute.xlu0 %10095 }
 0xb86   : > { %10111 = vrot.lane.b32.xlu1 %v10071_v47, %s12438_s27  ;;  %v10548_v47 = vmul.f32 %v17840_v0, %v19312_v53 }
 0xb87   : > { %10578 = vrot.lane.b32.xlu0 %v10542_v18, %s12438_s27  ;;  %v10846_v18 = vmul.f32 %v17808_v60, %v19314_v1 }
 0xb88   : > { %v17913_v2 = vpop.permute.xlu1 %9904  ;;  %v17916_v15 = vpop.permute.xlu0 %10077 }
 0xb8a   : > { %10407 = vrot.lane.b32.xlu1 %v10368_v57, %s12418_s15  ;;  %v10847_v57 = vmul.f32 %v19318_v25, %v19313_v7 }
 0xb8b   : > { %10109 = vrot.lane.b32.xlu0 %v10070_v29, %s12438_s27  ;;  %v10833_v29 = vld [vmem:[#allocation4 + $0x20] sm:$0xff] }
 0xb8c   : > { %v17925_v45 = vpop.permute.xlu1 %10075  ;;  %v17929_v19 = vpop.permute.xlu0 %10415  ;;  %v10845_v53 = vmul.f32 %v10833_v29, %v19246_v50 }
 0xb8e   : > { %10584 = vrot.lane.b32.xlu1 %v10545_v12, %s12438_s27 }
 0xb8f   : > { %9934 = vrot.lane.b32.xlu0 %v9894_v31, %s12418_s15  ;;  %v17948_v31 = vld [vmem:[%s18598_s3 + $0x230] sm:$0xff] }
 0xb90   : > { %v17938_v38 = vpop.permute.xlu1 %10079  ;;  %v17941_v12 = vpop.permute.xlu0 %10409  ;;  %19319 = vst [vmem:[#allocation53_spill] sm:$0xff] %v17948_v31 }
 0xb92   : > { %10115 = vrot.lane.b32.xlu1 %v10073_v41, %s12438_s27 }
 0xb93   : > { %9759 = vrot.lane.b32.xlu0 %v9615_v39, %s12438_s27  ;;  %v10843_v39 = vmul.f32 %v17733_v17, %v19314_v1 }
 0xb94   : > { %v17953_v41 = vpop.permute.xlu1 %10081 }
 0xb95   : > { %19320 = vst [vmem:[#allocation51_spill] sm:$0xff] %v17953_v41 }
 0xb96   : > { %9940 = vrot.lane.b32.xlu1 %v9897_v44, %s12418_s15  ;;  %v17957_v44 = vpop.permute.xlu0 %10592 }
 0xb97   : > { %9938 = vrot.lane.b32.xlu0 %v9896_v23, %s12418_s15  ;;  %v19321_v23 = vld [vmem:[#allocation20_spill] sm:$0xff] }
 0xb9a   : > { %10574 = vrot.lane.b32.xlu1 %v10540_v27, %s12438_s27  ;;  %v10844_v27 = vmul.f32 %v19321_v23, %v19313_v7 }
 0xb9b   : > { %10411 = vrot.lane.b32.xlu0 %v10370_v30, %s12418_s15  ;;  %v10849_v30 = vmul.f32 %v17840_v0, %v19314_v1 }
 0xb9e   : > { %10570 = vrot.lane.b32.xlu1 %v10538_v43, %s12438_s27  ;;  %v10830_v43 = vld [vmem:[#allocation4 + $0x28] sm:$0xff] }
 0xb9f   : > { %10588 = vrot.lane.b32.xlu0 %v10547_v62, %s12438_s27  ;;  %v17965_v62 = vpop.permute.xlu1 %10397  ;;  %v10842_v63 = vmul.f32 %v10830_v43, %v19246_v50  ;;  %v12266_v43 = vld [vmem:[%s18599_s4 + $0xd0] sm:$0xff] }
 0xba0   : > { %19322 = vst [vmem:[#allocation46_spill] sm:$0xff] %v17965_v62 }
 0xba2   : > { %10375 = vrot.lane.b32.xlu1 %v17879_v3, %s12426_s23 }
 0xba3   : > { %10117 = vrot.lane.b32.xlu0 %v10074_v59, %s12438_s27  ;;  %v17968_v59 = vpop.permute.xlu0 %10403  ;;  %v17977_v22 = vpop.permute.xlu1 %10580 }
 0xba4   : > { %19323 = vst [vmem:[#allocation25_spill] sm:$0xff] %v17977_v22  ;;  %v12303_v22 = vld [vmem:[%s18599_s4 + $0x138] sm:$0xff] }
 0xba6   : > { %10377 = vrot.lane.b32.xlu1 %v17893_v4, %s12426_s23 }
 0xba7   : > { %10373 = vrot.lane.b32.xlu0 %v17898_v34, %s12426_s23  ;;  %v17981_v10 = vpop.permute.xlu0 %10586 }
 0xba8   : > { %19324 = vst [vmem:[#allocation37_spill] sm:$0xff] %v17981_v10 }
 0xbaa   : > { %10886 = vrot.lane.b32.xlu1 %v10851_v42, %s12418_s15  ;;  %v10841_v42 = vmul.f32 %v17479_v9, %v19313_v7  ;;  %v12223_v9 = vld [vmem:[%s18599_s4 + $0xb8] sm:$0xff] }
 0xbab   : > { %10550 = vrot.lane.b32.xlu0 %v17898_v34, %s12434_s11 }
 0xbae   : > { %10880 = vrot.lane.b32.xlu1 %v10848_v21, %s12418_s15  ;;  %v10840_v21 = vmul.f32 %v17701_v58, %v19314_v1 }
 0xbaf   : > { %10552 = vrot.lane.b32.xlu0 %v17879_v3, %s12434_s11 }
 0xbb2   : > { %10413 = vrot.lane.b32.xlu1 %v10371_v14, %s12418_s15 }
 0xbb3   : > { %10884 = vrot.lane.b32.xlu0 %v10850_v13, %s12418_s15  ;;  %v12221_v13 = vld [vmem:[%s18599_s4 + $0xa8] sm:$0xff] }
 0xbb6   : > { %10590 = vrot.lane.b32.xlu1 %v10548_v47, %s12438_s27 }
 0xbb7   : > { %10554 = vrot.lane.b32.xlu0 %v17893_v4, %s12434_s11 }
 0xbba   : > { %10876 = vrot.lane.b32.xlu1 %v10846_v18, %s12418_s15  ;;  %v12222_v18 = vld [vmem:[%s18599_s4 + $0xb0] sm:$0xff] }
 0xbbb   : > { %10878 = vrot.lane.b32.xlu0 %v10847_v57, %s12418_s15  ;;  %v12267_v57 = vld [vmem:[%s18599_s4 + $0xd8] sm:$0xff] }
 0xbbe   : > { %10874 = vrot.lane.b32.xlu1 %v10845_v53, %s12418_s15  ;;  %v12220_v53 = vld [vmem:[%s18599_s4 + $0xa0] sm:$0xff] }
 0xbbf   : > { %10379 = vrot.lane.b32.xlu0 %v17948_v31, %s12426_s23 }
 0xbc2   : > { %10870 = vrot.lane.b32.xlu1 %v10843_v39, %s12418_s15 }
 0xbc3   : > { %10872 = vrot.lane.b32.xlu0 %v10844_v27, %s12418_s15  ;;  %v12265_v27 = vld [vmem:[%s18599_s4 + $0xc8] sm:$0xff] }
 0xbc6   : > { %10882 = vrot.lane.b32.xlu1 %v10849_v30, %s12418_s15 }
 0xbc7   : > { %10556 = vrot.lane.b32.xlu0 %v17948_v31, %s12434_s11 }
 0xbca   : > { %10868 = vrot.lane.b32.xlu1 %v10842_v63, %s12418_s15 }
 0xbcb   : > { %10866 = vrot.lane.b32.xlu0 %v10841_v42, %s12418_s15 }
 0xbce   : > { %10864 = vrot.lane.b32.xlu1 %v10840_v21, %s12418_s15  ;;  %v12279_v21 = vld [vmem:[%s18599_s4 + $0xf8] sm:$0xff] }
 0xbcf   : > { %10715 = vrot.lane.b32.xlu0 %v17898_v34, %s12432_s22 }
 0xbd0   : > { %v17986_v50 = vpop.permute.xlu1 %10097  ;;  %v17988_v14 = vpop.permute.xlu0 %9741 }
 0xbd2   : > { %10719 = vrot.lane.b32.xlu1 %v17893_v4, %s12432_s22 }
 0xbd3   : > { %10717 = vrot.lane.b32.xlu0 %v17879_v3, %s12432_s22 }
 0xbd4   : > { %v17997_v7 = vpop.permute.xlu1 %9922  ;;  %v17999_v1 = vpop.permute.xlu0 %9920 }
 0xbd6   : > { %11030 = vperm.xlu1 %12354, %v12223_v9  }
 0xbd7   : > { %10721 = vrot.lane.b32.xlu0 %v17948_v31, %s12432_s22 }
 0xbd8   : > { %v18006_v47 = vpop.permute.xlu1 %9926  ;;  %v10394_v25 = vpop.permute.xlu0 %10393 }
 0xbda   : > { %11020 = vperm.xlu1 %12354, %v12221_v13   ;;  %v12264_v13 = vld [vmem:[%s18599_s4 + $0xc0] sm:$0xff] }
 0xbdb   : > { %11025 = vperm.xlu0 %12353, %v12222_v18  }
 0xbdc   : > { %v18014_v29 = vpop.permute.xlu1 %10576 }
 0xbdd   : > { %19325 = vst [vmem:[#allocation45_spill] sm:$0xff] %v18014_v29  ;;  %v10100_v39 = vpop.permute.xlu0 %10099 }
 0xbde   : > { %11108 = vperm.xlu1 %12354, %v12267_v57   ;;  %v18021_v23 = vsel %vm8260_vm7, %v17986_v50, %v10100_v39 }
 0xbdf   : > { %11015 = vperm.xlu0 %12353, %v12220_v53   ;;  %v12278_v53 = vld [vmem:[%s18599_s4 + $0xf0] sm:$0xff] }
 0xbe0   : > { %v18026_v30 = vpop.permute.xlu1 %10105 }
 0xbe1   : > { %v18031_v63 = vpop.permute.xlu0 %10395 }
 0xbe2   : > { %19326 = vst [vmem:[#allocation12_spill] sm:$0xff] %v18031_v63  ;;  %v18035_v42 = vsel %vm8098_vm5, %v10394_v25, %v18031_v63  ;;  %11098 = vperm.xlu1 %12354, %v12265_v27   ;;  %v12277_v25 = vld [vmem:[%s18599_s4 + $0xe8] sm:$0xff]  ;;  %v12291_v27 = vld [vmem:[%s18599_s4 + $0x118] sm:$0xff] }
 0xbe3   : > { %19327 = vst [vmem:[#allocation15_spill] sm:$0xff] %v18035_v42  ;;  %11103 = vperm.xlu0 %12353, %v12266_v43   ;;  %v12301_v42 = vld [vmem:[%s18599_s4 + $0x128] sm:$0xff] }
 0xbe4   : > { %v18040_v9 = vpop.permute.xlu1 %10401 }
 0xbe5   : > { %19328 = vst [vmem:[#allocation23_spill] sm:$0xff] %v18040_v9  ;;  %v18045_v18 = vpop.permute.xlu0 %10572 }
 0xbe6   : > { %19329 = vst [vmem:[#allocation56_spill] sm:$0xff] %v18045_v18  ;;  %11263 = vperm.xlu1 %12354, %v12279_v21   ;;  %v12276_v21 = vld [vmem:[%s18599_s4 + $0xe0] sm:$0xff]  ;;  %v12289_v18 = vld [vmem:[%s18599_s4 + $0x108] sm:$0xff] }
 0xbe7   : > { %11093 = vperm.xlu0 %12353, %v12264_v13  }
 0xbe8   : > { %v9754_v57 = vpop.permute.xlu1 %9753 }
 0xbe9   : > { %v9748_v39 = vpop.permute.xlu0 %9747 }
 0xbea   : > { %11253 = vperm.xlu1 %12354, %v12277_v25   ;;  %v12290_v25 = vld [vmem:[%s18599_s4 + $0x110] sm:$0xff] }
 0xbeb   : > { %11258 = vperm.xlu0 %12353, %v12278_v53  }
 0xbec   : > { %v9933_v43 = vpop.permute.xlu1 %9932 }
 0xbed   : > { %v18059_v13 = vpop.permute.xlu0 %10103 }
 0xbee   : > { %11434 = vperm.xlu1 %12354, %v12291_v27  }
 0xbef   : > { %11248 = vperm.xlu0 %12353, %v12276_v21   ;;  %v12288_v21 = vld [vmem:[%s18599_s4 + $0x100] sm:$0xff] }
 0xbf0   : > { %v18064_v29 = vpop.permute.xlu1 %10405 }
 0xbf1   : > { %v18069_v53 = vpop.permute.xlu0 %10399 }
 0xbf2   : > { %19330 = vst [vmem:[#allocation61_spill] sm:$0xff] %v18069_v53  ;;  %11424 = vperm.xlu1 %12354, %v12289_v18   ;;  %v12302_v18 = vld [vmem:[%s18599_s4 + $0x130] sm:$0xff] }
 0xbf3   : > { %11429 = vperm.xlu0 %12353, %v12290_v25  }
 0xbf4   : > { %v18074_v27 = vpop.permute.xlu1 %10582 }
 0xbf5   : > { %19331 = vst [vmem:[#allocation34_spill] sm:$0xff] %v18074_v27  ;;  %v9929_v31 = vpop.permute.xlu0 %9928  ;;  %v11734_v27 = vld [vmem:[#allocation5] sm:$0x1] }
 0xbf6   : > { %11589 = vperm.xlu1 %12354, %v12303_v22   ;;  %v12300_v22 = vld [vmem:[%s18599_s4 + $0x120] sm:$0xff] }
 0xbf7   : > { %11419 = vperm.xlu0 %12353, %v12288_v21  }
 0xbf8   : > { %v18082_v10 = vpop.permute.xlu1 %10111 }
 0xbf9   : > { %v18087_v25 = vpop.permute.xlu0 %10578 }
 0xbfa   : > { %19332 = vst [vmem:[#allocation40_spill] sm:$0xff] %v18087_v25  ;;  %11579 = vperm.xlu1 %12354, %v12301_v42   ;;  %v9766_v25 = vsel %vm8260_vm7, %v17769_v48, %v9754_v57  ;;  %v9946_v57 = vsel %vm8098_vm5, %v17819_v61, %v9933_v43  ;;  %v12393_v61 = vld [vmem:[%s18598_s3 + $0x1e0] sm:$0xff] }
 0xbfb   : > { %11584 = vperm.xlu0 %12353, %v12302_v18   ;;  %v9767_v18 = vsel %vm8260_vm7, %v17706_v52, %v17695_v35  ;;  %v9763_v52 = vsel %vm8260_vm7, %v17760_v54, %v17740_v33  ;;  %v9945_v54 = vsel %vm8098_vm5, %v18006_v47, %v9929_v31 }
 0xbfc   : > { %v18089_v63 = vpop.permute.xlu1 %10407 }
 0xbfd   : > { %v18094_v21 = vpop.permute.xlu0 %10109 }
 0xbfe   : > { %11737 = vperm.xlu1 %12354, %v11734_v27   ;;  %v9765_v27 = vsel %vm8260_vm7, %v17719_v28, %v17769_v48  ;;  %v9762_v28 = vsel %vm8260_vm7, %v17780_v49, %v17988_v14 }
 0xbff   : > { %11574 = vperm.xlu0 %12353, %v12300_v22  }
 0xc00   : > { %v18096_v62 = vpop.permute.xlu1 %10584 }
 0xc01   : > { %19333 = vst [vmem:[#allocation50_spill] sm:$0xff] %v18096_v62  ;;  %v9935_v4 = vpop.permute.xlu0 %9934 }
 0xc02   : > { %v9947_v48 = vsel %vm8098_vm5, %v9933_v43, %v9935_v4  ;;  %v9944_v4 = vsel %vm8098_vm5, %v17854_v8, %v18006_v47  ;;  %v9942_v8 = vsel %vm8098_vm5, %v17844_v26, %v17999_v1  ;;  %v19336_v43 = vld [vmem:[#allocation51_spill] sm:$0xff] }
 0xc04   : > { %v10116_v41 = vpop.permute.xlu1 %10115 }
 0xc05   : > { %v9760_v53 = vpop.permute.xlu0 %9759 }
 0xc06   : > { %v9768_v42 = vsel %vm8260_vm7, %v17695_v35, %v9760_v53  ;;  %v9764_v53 = vsel %vm8260_vm7, %v17740_v33, %v9748_v39  ;;  %v9761_v33 = vsel %vm8260_vm7, %v17830_v37, %v17780_v49  ;;  %v9943_v49 = vsel %vm8098_vm5, %v17999_v1, %v17997_v7 }
 0xc07   : > { %9809 = vmatprep.subr.mxu1 %v9768_v42  ;;  %v10125_v1 = vsel %vm8260_vm7, %v17883_v32, %v10116_v41  ;;  %v10123_v32 = vsel %vm8260_vm7, %v17904_v6, %v18094_v21  ;;  %v10122_v6 = vsel %vm8260_vm7, %v18059_v13, %v18026_v30  ;;  %v19340_v42 = vld [vmem:[#allocation37_spill] sm:$0xff] }
 0xc08   : > { %9810 = vmatpush1.msra.mxu1 %v9767_v18  ;;  %v9941_v9 = vpop.permute.xlu1 %9940  ;;  %v19341_v18 = vld [vmem:[#allocation50_spill] sm:$0xff] }
 0xc09   : > { %v9939_v22 = vpop.permute.xlu0 %9938  ;;  %9811 = vmatprep.subr.mxu1 %v9766_v25  ;;  %v19338_v25 = vld [vmem:[#allocation46_spill] sm:$0xff] }
 0xc0a   : > { %v9948_v62 = vsel %vm8098_vm5, %v17803_v5, %v9939_v22  ;;  %9812 = vmatpush1.msra.mxu1 %v9765_v27  ;;  %v9949_v35 = vsel %vm8098_vm5, %v9939_v22, %v9941_v9  ;;  %v10599_v27 = vsel %vm8260_vm7, %v19341_v18, %v19340_v42 }
 0xc0b   : > { %9813 = vmatprep.subr.mxu1 %v9764_v53  ;;  %9990 = vmatprep.subr.mxu0 %v9949_v35  ;;  %v19342_v53 = vld [vmem:[#allocation34_spill] sm:$0xff] }
 0xc0c   : > { %9814 = vmatpush1.msra.mxu1 %v9763_v52  ;;  %9991 = vmatpush1.msra.mxu0 %v9948_v62  ;;  %v18120_v5 = vpop.permute.xlu1 %10574  ;;  %v12394_v62 = vld [vmem:[%s18598_s3 + $0x1f8] sm:$0xff]  ;;  %v10598_v35 = vsel %vm8260_vm7, %v19342_v53, %v19341_v18 }
 0xc0d   : > { %v18124_v9 = vpop.permute.xlu0 %10411  ;;  %9815 = vmatprep.subr.mxu1 %v9762_v28  ;;  %9992 = vmatprep.subr.mxu0 %v9947_v48  ;;  %v19343_v52 = vld [vmem:[#allocation15_spill] sm:$0xff]  ;;  %v19344_v48 = vld [vmem:[#allocation53_spill] sm:$0xff] }
 0xc0e   : > { %9816 = vmatpush1.msra.mxu1 %v9761_v33  ;;  %9993 = vmatpush1.msra.mxu0 %v9946_v57  ;;  %v19345_v57 = vld [vmem:[#allocation25_spill] sm:$0xff] }
 0xc0f   : > { %12228 = vmatmul.mubr.msk.f32.vlgmr.msra.gmra.mxu1 %vm1751_vm0, %v12393_v61  ;;  %9994 = vmatprep.subr.mxu0 %v9945_v54  ;;  %v19347_v54 = vld [vmem:[#allocation45_spill] sm:$0xff]  ;;  %v12397_v61 = vld [vmem:[#allocation4 + $0x8] sm:$0xff] }
 0xc10   : > { %9995 = vmatpush1.msra.mxu0 %v9944_v4  ;;  %v18141_v37 = vpop.permute.xlu1 %10570  ;;  %9855 = vmatprep.mubr.f32.mxu1 %v19255_v11 }
 0xc11   : > { %v18147_v31 = vpop.permute.xlu0 %10588  ;;  %9996 = vmatprep.subr.mxu0 %v9943_v49 }
 0xc12   : > { %9997 = vmatpush1.msra.mxu0 %v9942_v8  ;;  %v19348_v8 = vld [vmem:[#allocation56_spill] sm:$0xff] }
 0xc13   : > { %12229 = vmatmul.mubr.msk.f32.gmra.mxu1 %vm1751_vm0, %v12394_v62  ;;  %12232 = vmatmul.mubr.msk.f32.vlgmr.msra.gmra.mxu0 %vm1751_vm0, %v17866_v24  ;;  %v12395_v24 = vld [vmem:[%s18598_s3 + $0x210] sm:$0xff] }
 0xc14   : > { %10276 = vmatprep.subr.mxu0 %v17840_v0  ;;  %v18156_v14 = vpop.permute.xlu1 %10375  ;;  %9861 = vmatprep.mubr.f32.mxu1 %v19255_v11 }
 0xc15   : > { %10277 = vmatpush1.msra.mxu0 %v17729_v20  ;;  %v10118_v26 = vpop.permute.xlu0 %10117  ;;  %10036 = vmatprep.mubr.f32.mxu0 %v19255_v11 }
 0xc16   : > { %10278 = vmatprep.subr.mxu0 %v17808_v60  ;;  %v10126_v7 = vsel %vm8260_vm7, %v10116_v41, %v10118_v26  ;;  %v10594_v26 = vsel %vm8260_vm7, %v18141_v37, %v19348_v8 }
 0xc17   : > { %10279 = vmatpush1.msra.mxu0 %v17735_v16  ;;  %12230 = vmatmul.mubr.msk.f32.gmra.mxu1 %vm1751_vm0, %v12395_v24  ;;  %v10124_v16 = vsel %vm8260_vm7, %v18094_v21, %v18082_v10  ;;  %v10121_v10 = vsel %vm8260_vm7, %v17887_v56, %v18059_v13  ;;  %v19337_v13 = vld [vmem:[#allocation41_spill] sm:$0xff]  ;;  %v12399_v24 = vld [vmem:[#allocation4 + $0xb0] sm:$0xff] }
 0xc18   : > { %12233 = vmatmul.mubr.msk.f32.gmra.mxu0 %vm1751_vm0, %v17857_v51  ;;  %10167 = vmatprep.subr.mxu1 %v10126_v7  ;;  %v18172_v20 = vpop.permute.xlu1 %10377  ;;  %v12398_v7 = vld [vmem:[#allocation4 + $0x58] sm:$0xff] }
 0xc19   : > { %10280 = vmatprep.subr.mxu0 %v17733_v17  ;;  %10168 = vmatpush1.msra.mxu1 %v10125_v1  ;;  %v18175_v47 = vpop.permute.xlu0 %10373 }
 0xc1a   : > { %10281 = vmatpush1.msra.mxu0 %v17712_v40  ;;  %10169 = vmatprep.subr.mxu1 %v10124_v16  ;;  %v12396_v40 = vld [vmem:[%s18598_s3 + $0x228] sm:$0xff] }
 0xc1b   : > { %10282 = vmatprep.subr.mxu0 %v17701_v58  ;;  %9867 = vmatprep.mubr.f32.mxu1 %v19255_v11 }
 0xc1c   : > { %10042 = vmatprep.mubr.f32.mxu0 %v19255_v11  ;;  %10170 = vmatpush1.msra.mxu1 %v10123_v32  ;;  %v18187_v51 = vpop.permute.xlu1 %10886 }
 0xc1d   : > { %10283 = vmatpush1.msra.mxu0 %v17699_v46  ;;  %12231 = vmatmul.mubr.msk.f32.gmra.mxu1 %vm1751_vm0, %v12396_v40  ;;  %v18197_v41 = vpop.permute.xlu0 %10550  ;;  %v10119_v46 = vsel %vm8260_vm7, %v17907_v36, %v17986_v50 }
 0xc1e   : > { %12234 = vmatmul.mubr.msk.f32.gmra.mxu0 %vm1751_vm0, %v17870_v55  ;;  %10171 = vmatprep.subr.mxu1 %v10122_v6 }
 0xc1f   : > { %10172 = vmatpush1.msra.mxu1 %v10121_v10  ;;  %10048 = vmatprep.mubr.f32.mxu0 %v19255_v11 }
 0xc20   : > { %10173 = vmatprep.subr.mxu1 %v18021_v23  ;;  %10207 = vmatprep.mubr.f32.mxu1 %v19255_v11  ;;  %v18210_v30 = vpop.permute.xlu1 %10880 }
 0xc21   : > { %10174 = vmatpush1.msra.mxu1 %v10119_v46  ;;  %v18212_v39 = vpop.permute.xlu0 %10552  ;;  %v12213_v46 = vld [vmem:[%s18598_s3 + $0x208] sm:$0xff] }
 0xc22   : > { %12235 = vmatmul.mubr.msk.f32.gmra.mxu0 %vm1751_vm0, %v17913_v2  ;;  %12236 = vmatmul.mubr.msk.f32.vlgmr.msra.gmra.mxu1 %vm1751_vm0, %v17925_v45 }
 0xc23   : > { %10213 = vmatprep.mubr.f32.mxu1 %v19255_v11  ;;  %10316 = vmatprep.mubr.f32.mxu0 %v19255_v11 }
 0xc24   : > { %v10414_v55 = vpop.permute.xlu1 %10413 }
 0xc25   : > { %v18220_v56 = vpop.permute.xlu0 %10884  ;;  %v10424_v36 = vsel %vm8098_vm5, %v10414_v55, %v17929_v19  ;;  %v10423_v2 = vsel %vm8098_vm5, %v18124_v9, %v10414_v55  ;;  %v10421_v19 = vsel %vm8098_vm5, %v18064_v29, %v18089_v63  ;;  %v19335_v29 = vld [vmem:[#allocation61_spill] sm:$0xff]  ;;  %v19346_v9 = vld [vmem:[#allocation40_spill] sm:$0xff] }
 0xc26   : > { %12237 = vmatmul.mubr.msk.f32.gmra.mxu1 %vm1751_vm0, %v17916_v15  ;;  %12240 = vmatmul.mubr.msk.f32.vlgmr.msra.gmra.mxu0 %vm1751_vm0, %v17898_v34  ;;  %v10422_v34 = vsel %vm8098_vm5, %v18089_v63, %v17941_v12  ;;  %v10597_v33 = vsel %vm8260_vm7, %v19346_v9, %v19345_v57  ;;  %v10596_v4 = vsel %vm8260_vm7, %v19347_v54, %v19346_v9 }
 0xc27   : > { %10219 = vmatprep.mubr.f32.mxu1 %v19255_v11  ;;  %10322 = vmatprep.mubr.f32.mxu0 %v19255_v11 }
 0xc28   : > { %10465 = vmatprep.subr.mxu1 %v10424_v36  ;;  %v10591_v45 = vpop.permute.xlu1 %10590 }
 0xc29   : > { %10466 = vmatpush1.msra.mxu1 %v10423_v2  ;;  %v18232_v50 = vpop.permute.xlu0 %10554  ;;  %v10601_v15 = vsel %vm8260_vm7, %v10591_v45, %v17957_v44 }
 0xc2a   : > { %12238 = vmatmul.mubr.msk.f32.gmra.mxu1 %vm1751_vm0, %v17938_v38  ;;  %12241 = vmatmul.mubr.msk.f32.gmra.mxu0 %vm1751_vm0, %v17879_v3  ;;  %v10600_v38 = vsel %vm8260_vm7, %v18147_v31, %v10591_v45  ;;  %v19334_v3 = vld [vmem:[#allocation23_spill] sm:$0xff]  ;;  %v10595_v31 = vsel %vm8260_vm7, %v19348_v8, %v18120_v5  ;;  %v10895_v5 = vsel %vm8098_vm5, %v18220_v56, %v18187_v51 }
 0xc2b   : > { %10467 = vmatprep.subr.mxu1 %v10422_v34  ;;  %10225 = vmatprep.mubr.f32.mxu1 %v19255_v11  ;;  %v10420_v12 = vsel %vm8098_vm5, %v19334_v3, %v17968_v59  ;;  %v10419_v63 = vsel %vm8098_vm5, %v19335_v29, %v19334_v3  ;;  %v19339_v59 = vld [vmem:[#allocation12_spill] sm:$0xff] }
 0xc2c   : > { %10328 = vmatprep.mubr.f32.mxu0 %v19255_v11  ;;  %10468 = vmatpush1.msra.mxu1 %v10421_v19  ;;  %v18253_v23 = vpop.permute.xlu1 %10876  ;;  %v10418_v21 = vsel %vm8098_vm5, %v19339_v59, %v19338_v25 }
 0xc2d   : > { %10469 = vmatprep.subr.mxu1 %v10420_v12  ;;  %10642 = vmatprep.subr.mxu0 %v10601_v15  ;;  %v18255_v44 = vpop.permute.xlu0 %10878 }
 0xc2e   : > { %12239 = vmatmul.mubr.msk.f32.gmra.mxu1 %vm1751_vm0, %v19336_v43  ;;  %12242 = vmatmul.mubr.msk.f32.gmra.mxu0 %vm1751_vm0, %v19337_v13 }
 0xc2f   : > { %10470 = vmatpush1.msra.mxu1 %v10419_v63  ;;  %10643 = vmatpush1.msra.mxu0 %v10600_v38 }
 0xc30   : > { %10471 = vmatprep.subr.mxu1 %v10418_v21  ;;  %10644 = vmatprep.subr.mxu0 %v10599_v27  ;;  %v10875_v22 = vpop.permute.xlu1 %10874  ;;  %v18360_v36 = vpop.f32.mrf.mxu0 }
 0xc31   : > { %10334 = vmatprep.mubr.f32.mxu0 %v19255_v11  ;;  %10472 = vmatpush1.msra.mxu1 %v19343_v52  ;;  %v10380_v28 = vpop.permute.xlu0 %10379 }
 0xc32   : > { %10505 = vmatprep.mubr.f32.mxu1 %v19255_v11  ;;  %10645 = vmatpush1.msra.mxu0 %v10598_v35  ;;  %v18362_v2 = vpop.f32.mrf.mxu0 }
 0xc33   : > { %12243 = vmatmul.mubr.msk.f32.gmra.mxu0 %vm1751_vm0, %v19344_v48  ;;  %12244 = vmatmul.mubr.msk.f32.vlgmr.msra.gmra.mxu1 %vm1751_vm0, %v18175_v47 }
 0xc34   : > { %10646 = vmatprep.subr.mxu0 %v10597_v33  ;;  %10755 = vmatprep.subr.mxu1 %v12397_v61  ;;  %v10871_v49 = vpop.permute.xlu1 %10870  ;;  %v9708_v45 = vpop.f32.mrf.mxu0 }
 0xc35   : > { %10647 = vmatpush1.msra.mxu0 %v10596_v4  ;;  %10756 = vmatpush1.msra.mxu1 %v17840_v0  ;;  %v10873_v62 = vpop.permute.xlu0 %10872 }
 0xc36   : > { %10648 = vmatprep.subr.mxu0 %v10595_v31  ;;  %10757 = vmatprep.subr.mxu1 %v12398_v7  ;;  %v10890_v40 = vsel %vm8098_vm5, %v10871_v49, %v10873_v62 }
 0xc37   : > { %10511 = vmatprep.mubr.f32.mxu1 %v19255_v11  ;;  %10649 = vmatpush1.msra.mxu0 %v10594_v26 }
 0xc38   : > { %10682 = vmatprep.mubr.f32.mxu0 %v19255_v11  ;;  %10758 = vmatpush1.msra.mxu1 %v17808_v60  ;;  %v10883_v0 = vpop.permute.xlu1 %10882  ;;  %v12400_v60 = vld [vmem:[#allocation4 + $0xa8] sm:$0xff] }
 0xc39   : > { %12245 = vmatmul.mubr.msk.f32.gmra.mxu1 %vm1751_vm0, %v18156_v14  ;;  %12248 = vmatmul.mubr.msk.f32.vlgmr.msra.gmra.mxu0 %vm1751_vm0, %v18197_v41  ;;  %v10557_v37 = vpop.permute.xlu0 %10556  ;;  %v10894_v14 = vsel %vm8098_vm5, %v10883_v0, %v18220_v56  ;;  %v12210_v41 = vld [vmem:[%s18598_s3 + $0x1f0] sm:$0xff]  ;;  %v12219_v56 = vld [vmem:[%s18598_s3 + $0x238] sm:$0xff] }
 0xc3a   : > { %10759 = vmatprep.subr.mxu1 %v12399_v24  ;;  %10940 = vmatprep.subr.mxu0 %v10895_v5 }
 0xc3b   : > { %10760 = vmatpush1.msra.mxu1 %v17733_v17  ;;  %10517 = vmatprep.mubr.f32.mxu1 %v19255_v11  ;;  %v10893_v17 = vsel %vm8098_vm5, %v18255_v44, %v18210_v30 }
 0xc3c   : > { %10761 = vmatprep.subr.mxu1 %v12400_v60  ;;  %10688 = vmatprep.mubr.f32.mxu0 %v19255_v11  ;;  %v10869_v1 = vpop.permute.xlu1 %10868 }
 0xc3d   : > { %10762 = vmatpush1.msra.mxu1 %v17701_v58  ;;  %12249 = vmatmul.mubr.msk.f32.gmra.mxu0 %vm1751_vm0, %v18212_v39  ;;  %v10867_v47 = vpop.permute.xlu0 %10866  ;;  %v10892_v58 = vsel %vm8098_vm5, %v18253_v23, %v18255_v44  ;;  %v12216_v39 = vld [vmem:[%s18598_s3 + $0x220] sm:$0xff] }
 0xc3e   : > { %12246 = vmatmul.mubr.msk.f32.gmra.mxu1 %vm1751_vm0, %v18172_v20  ;;  %10694 = vmatprep.mubr.f32.mxu0 %v19255_v11  ;;  %v10891_v20 = vsel %vm8098_vm5, %v10873_v62, %v10875_v22  ;;  %v10889_v51 = vsel %vm8098_vm5, %v10867_v47, %v10869_v1 }
 0xc3f   : > { %10523 = vmatprep.mubr.f32.mxu1 %v19255_v11  ;;  %10941 = vmatpush1.msra.mxu0 %v10894_v14 }
 0xc40   : > { %10942 = vmatprep.subr.mxu0 %v10893_v17  ;;  %v10865_v16 = vpop.permute.xlu1 %10864 }
 0xc41   : > { %12250 = vmatmul.mubr.msk.f32.gmra.mxu0 %vm1751_vm0, %v18232_v50  ;;  %v10716_v32 = vpop.permute.xlu0 %10715  ;;  %v10888_v6 = vsel %vm8098_vm5, %v10865_v16, %v10867_v47  ;;  %v9710_v50 = vpop.f32.mrf.mxu0 }
 0xc42   : > { %12247 = vmatmul.mubr.msk.f32.gmra.mxu1 %vm1751_vm0, %v10380_v28  ;;  %10943 = vmatpush1.msra.mxu0 %v10892_v58 }
 0xc43   : > { %10700 = vmatprep.mubr.f32.mxu0 %v19255_v11  ;;  %10944 = vmatprep.subr.mxu0 %v10891_v20  ;;  %v9714_v34 = vpop.f32.mrf.mxu0 }
 0xc44   : > { %10945 = vmatpush1.msra.mxu0 %v10890_v40  ;;  %10795 = vmatprep.mubr.f32.mxu1 %v19255_v11  ;;  %v10720_v30 = vpop.permute.xlu1 %10719 }
 0xc45   : > { %12251 = vmatmul.mubr.msk.f32.gmra.mxu0 %vm1751_vm0, %v10557_v37  ;;  %10946 = vmatprep.subr.mxu0 %v10889_v51  ;;  %v10718_v10 = vpop.permute.xlu0 %10717  ;;  %v9716_v15 = vpop.f32.mrf.mxu0 }
 0xc46   : > { %12252 = vmatmul.mubr.msk.f32.vlgmr.msra.gmra.mxu1 %vm1751_vm0, %v10716_v32  ;;  %10947 = vmatpush1.msra.mxu0 %v10888_v6 }
 0xc47   : > { %10980 = vmatprep.mubr.f32.mxu0 %v19255_v11  ;;  %10801 = vmatprep.mubr.f32.mxu1 %v19255_v11  ;;  %v9720_v19 = vpop.f32.mrf.mxu0 }
 0xc49   : > { %12256 = vmatmul.mubr.msk.f32.vlgmr.msra.gmra.mxu0 %vm1751_vm0, %v12210_v41  ;;  %v10722_v55 = vpop.permute.xlu0 %10721  ;;  %v9722_v3 = vpop.f32.mrf.mxu0 }
 0xc4a   : > { %12253 = vmatmul.mubr.msk.f32.gmra.mxu1 %vm1751_vm0, %v10718_v10  ;;  %10986 = vmatprep.mubr.f32.mxu0 %v19255_v11 }
 0xc4b   : > { %10807 = vmatprep.mubr.f32.mxu1 %v19255_v11 }
 0xc4d   : > { %12257 = vmatmul.mubr.msk.f32.gmra.mxu0 %vm1751_vm0, %v12213_v46 }
 0xc4e   : > { %12254 = vmatmul.mubr.msk.f32.gmra.mxu1 %vm1751_vm0, %v10720_v30  ;;  %10992 = vmatprep.mubr.f32.mxu0 %v19255_v11 }
 0xc4f   : > { %10813 = vmatprep.mubr.f32.mxu1 %v19255_v11 }
 0xc51   : > { %12258 = vmatmul.mubr.msk.f32.gmra.mxu0 %vm1751_vm0, %v12216_v39 }
 0xc52   : > { %12255 = vmatmul.mubr.msk.f32.gmra.mxu1 %vm1751_vm0, %v10722_v55  ;;  %10998 = vmatprep.mubr.f32.mxu0 %v19255_v11 }
 0xc53   : > { %11187 = vmatprep.mubr.f32.mxu1 %v19255_v11 }
 0xc55   : > { %12259 = vmatmul.mubr.msk.f32.gmra.mxu0 %vm1751_vm0, %v12219_v56 }
 0xc56   : > { %11342 = vmatprep.mubr.f32.mxu0 %v19255_v11 }
 0xccf   : > { %v9851_v38 = vpop.f32.mrf.mxu1 }
 0xcd1   : > { %v9853_v12 = vpop.f32.mrf.mxu1 }
 0xcd3   : > { %v9857_v23 = vpop.f32.mrf.mxu1  ;;  %v18364_v44 = vpop.f32.mrf.mxu0 }
 0xcd4   : > { %19349 = vst [vmem:[#allocation26_spill] sm:$0xff] %v18364_v44  ;;  %v9858_v10 = vadd.f32 %v9857_v23, %v9708_v45 }
 0xcd5   : > { %v9859_v29 = vpop.f32.mrf.mxu1  ;;  %v10034_v63 = vpop.f32.mrf.mxu0 }
 0xcd6   : > { %v9860_v46 = vadd.f32 %v9859_v29, %v9710_v50 }
 0xcd7   : > { %v9863_v43 = vpop.f32.mrf.mxu1 }
 0xcd8   : > { %v10038_v13 = vpop.f32.mrf.mxu0  ;;  %v9864_v40 = vadd.f32 %v9863_v43, %v9714_v34 }
 0xcd9   : > { %v9865_v25 = vpop.f32.mrf.mxu1 }
 0xcda   : > { %v10040_v59 = vpop.f32.mrf.mxu0  ;;  %v9866_v6 = vadd.f32 %v9865_v25, %v9716_v15 }
 0xcdb   : > { %v19356_v45 = vld [vmem:[#allocation26_spill] sm:$0xff] }
 0xcdd   : > { %v9869_v21 = vpop.f32.mrf.mxu1 }
 0xcde   : > { %v10044_v42 = vpop.f32.mrf.mxu0  ;;  %v9870_v39 = vadd.f32 %v9869_v21, %v9720_v19 }
 0xcdf   : > { %v9871_v18 = vpop.f32.mrf.mxu1  ;;  %v10059_v55 = vadd.f32 %v10044_v42, %v9864_v40 }
 0xce0   : > { %v10046_v27 = vpop.f32.mrf.mxu0 }
 0xce1   : > { %v10060_v56 = vadd.f32 %v10046_v27, %v9866_v6 }
 0xce2   : > { %v10050_v22 = vpop.f32.mrf.mxu0  ;;  %v10209_v53 = vpop.f32.mrf.mxu1 }
 0xce3   : > { %v10061_v44 = vadd.f32 %v10050_v22, %v9870_v39 }
 0xce4   : > { %v10052_v35 = vpop.f32.mrf.mxu0  ;;  %v10211_v52 = vpop.f32.mrf.mxu1 }
 0xce6   : > { %v10215_v28 = vpop.f32.mrf.mxu1  ;;  %v18366_v48 = vpop.f32.mrf.mxu0 }
 0xce7   : > { %19350 = vst [vmem:[#allocation58_spill] sm:$0xff] %v18366_v48  ;;  %v9872_v48 = vadd.f32 %v9871_v18, %v9722_v3 }
 0xce8   : > { %v10217_v57 = vpop.f32.mrf.mxu1  ;;  %v18368_v9 = vpop.f32.mrf.mxu0 }
 0xce9   : > { %19351 = vst [vmem:[#allocation43_spill] sm:$0xff] %v18368_v9  ;;  %v10062_v21 = vadd.f32 %v10052_v35, %v9872_v48 }
 0xcea   : > { %v10221_v33 = vpop.f32.mrf.mxu1  ;;  %v10324_v54 = vpop.f32.mrf.mxu0 }
 0xceb   : > { %v10236_v34 = vadd.f32 %v10221_v33, %v10059_v55 }
 0xcec   : > { %v10223_v4 = vpop.f32.mrf.mxu1  ;;  %v10326_v61 = vpop.f32.mrf.mxu0 }
 0xced   : > { %v10237_v15 = vadd.f32 %v10223_v4, %v10060_v56 }
 0xcee   : > { %v10227_v49 = vpop.f32.mrf.mxu1  ;;  %v10330_v8 = vpop.f32.mrf.mxu0 }
 0xcef   : > { %v10238_v42 = vadd.f32 %v10227_v49, %v10061_v44 }
 0xcf0   : > { %v10229_v31 = vpop.f32.mrf.mxu1  ;;  %v10332_v62 = vpop.f32.mrf.mxu0 }
 0xcf1   : > { %v10239_v27 = vadd.f32 %v10229_v31, %v10062_v21 }
 0xcf3   : > { %v10336_v26 = vpop.f32.mrf.mxu0  ;;  %v18370_v7 = vpop.f32.mrf.mxu1 }
 0xcf4   : > { %19352 = vst [vmem:[#allocation54_spill] sm:$0xff] %v18370_v7  ;;  %v10058_v7 = vadd.f32 %v10040_v59, %v9860_v46  ;;  %v10347_v22 = vadd.f32 %v10336_v26, %v10238_v42 }
 0xcf5   : > { %v10338_v0 = vpop.f32.mrf.mxu0  ;;  %v18372_v5 = vpop.f32.mrf.mxu1 }
 0xcf6   : > { %19353 = vst [vmem:[#allocation11_spill] sm:$0xff] %v18372_v5  ;;  %v10057_v5 = vadd.f32 %v10038_v13, %v9858_v10  ;;  %v10235_v29 = vadd.f32 %v10217_v57, %v10058_v7  ;;  %v10348_v48 = vadd.f32 %v10338_v0, %v10239_v27 }
 0xcf8   : > { %v10234_v19 = vadd.f32 %v10215_v28, %v10057_v5  ;;  %v10344_v3 = vadd.f32 %v10326_v61, %v10235_v29  ;;  %v19358_v28 = vld [vmem:[#allocation43_spill] sm:$0xff] }
 0xcf9   : > { %v10513_v37 = vpop.f32.mrf.mxu1  ;;  %v18374_v24 = vpop.f32.mrf.mxu0 }
 0xcfa   : > { %19354 = vst [vmem:[#allocation38_spill] sm:$0xff] %v18374_v24  ;;  %v9852_v24 = vadd.f32 %v9851_v38, %v18360_v36  ;;  %v10345_v36 = vadd.f32 %v10330_v8, %v10236_v34  ;;  %v10346_v38 = vadd.f32 %v10332_v62, %v10237_v15  ;;  %v10343_v59 = vadd.f32 %v10324_v54, %v10234_v19 }
 0xcfb   : > { %v10515_v60 = vpop.f32.mrf.mxu1  ;;  %v18376_v14 = vpop.f32.mrf.mxu0  ;;  %v19359_v54 = vld [vmem:[#allocation54_spill] sm:$0xff] }
 0xcfc   : > { %19355 = vst [vmem:[#allocation9_spill] sm:$0xff] %v18376_v14  ;;  %v9854_v14 = vadd.f32 %v9853_v12, %v18362_v2  ;;  %v10055_v50 = vadd.f32 %v19356_v45, %v9852_v24  ;;  %v19357_v24 = vld [vmem:[#allocation58_spill] sm:$0xff]  ;;  %v10532_v7 = vadd.f32 %v10513_v37, %v10343_v59  ;;  %v10533_v35 = vadd.f32 %v10515_v60, %v10344_v3 }
 0xcfd   : > { %v10690_v1 = vpop.f32.mrf.mxu0  ;;  %v19360_v62 = vld [vmem:[#allocation11_spill] sm:$0xff] }
 0xcfe   : > { %v10519_v47 = vpop.f32.mrf.mxu1  ;;  %v10056_v23 = vadd.f32 %v10034_v63, %v9854_v14  ;;  %v10232_v12 = vadd.f32 %v10209_v53, %v10055_v50  ;;  %v10709_v26 = vadd.f32 %v10690_v1, %v10532_v7  ;;  %v11026_v50 = vpop.permute.xlu0 %11025  ;;  %v11044_v7 = vld [vmem:[#allocation3 + $0x90] sm:$0xff] }
 0xcff   : > { %v10692_v17 = vpop.f32.mrf.mxu0  ;;  %v10534_v33 = vadd.f32 %v10519_v47, %v10345_v36 }
 0xd00   : > { %v10521_v16 = vpop.f32.mrf.mxu1  ;;  %v10233_v13 = vadd.f32 %v10211_v52, %v10056_v23  ;;  %v10341_v63 = vadd.f32 %v19357_v24, %v10232_v12  ;;  %v10710_v5 = vadd.f32 %v10692_v17, %v10533_v35  ;;  %v11048_v24 = vld [vmem:[#allocation3 + $0xb8] sm:$0xff] }
 0xd01   : > { %v10696_v58 = vpop.f32.mrf.mxu0  ;;  %v10535_v4 = vadd.f32 %v10521_v16, %v10346_v38 }
 0xd02   : > { %v10525_v32 = vpop.f32.mrf.mxu1  ;;  %v10342_v57 = vadd.f32 %v19358_v28, %v10233_v13  ;;  %v10711_v8 = vadd.f32 %v10696_v58, %v10534_v33  ;;  %v10530_v61 = vadd.f32 %v19359_v54, %v10341_v63  ;;  %v19362_v58 = vld [vmem:[#allocation38_spill] sm:$0xff] }
 0xd03   : > { %v10698_v20 = vpop.f32.mrf.mxu0  ;;  %v10536_v49 = vadd.f32 %v10525_v32, %v10347_v22  ;;  %v19361_v37 = vld [vmem:[#allocation9_spill] sm:$0xff]  ;;  %v11031_v32 = vpop.permute.xlu1 %11030 }
 0xd04   : > { %v10527_v51 = vpop.f32.mrf.mxu1  ;;  %v10712_v53 = vadd.f32 %v10698_v20, %v10535_v4  ;;  %v10531_v31 = vadd.f32 %v19360_v62, %v10342_v57  ;;  %v10707_v20 = vadd.f32 %v19362_v58, %v10530_v61  ;;  %v11016_v22 = vpop.permute.xlu0 %11015  ;;  %v11046_v33 = vld [vmem:[#allocation3 + $0xa0] sm:$0xff] }
 0xd05   : > { %v10702_v41 = vpop.f32.mrf.mxu0  ;;  %v10537_v47 = vadd.f32 %v10527_v51, %v10348_v48 }
 0xd06   : > { %v18378_v30 = vpop.f32.mrf.mxu1  ;;  %v10713_v16 = vadd.f32 %v10702_v41, %v10536_v49  ;;  %v10708_v60 = vadd.f32 %v19361_v37, %v10531_v31  ;;  %v11042_v49 = vld [vmem:[#allocation3 + $0x48] sm:$0xff]  ;;  %v12263_v37 = vld [vmem:[%s18598_s3 + $0x290] sm:$0xff] }
 0xd07   : > { %v10704_v11 = vpop.f32.mrf.mxu0  ;;  %v10820_v51 = vadd.f32 %v18378_v30, %v10707_v20 }
 0xd08   : > { %v10799_v9 = vpop.f32.mrf.mxu1  ;;  %v10714_v55 = vadd.f32 %v10704_v11, %v10537_v47 }
 0xd09   : > { %v18382_v43 = vpop.f32.mrf.mxu0  ;;  %v10821_v45 = vadd.f32 %v10799_v9, %v10708_v60 }
 0xd0a   : > { %v10803_v25 = vpop.f32.mrf.mxu1  ;;  %v11005_v59 = vadd.f32 %v18382_v43, %v10820_v51  ;;  %v11043_v43 = vld [vmem:[#allocation3 + $0x88] sm:$0xff] }
 0xd0b   : > { %v10984_v2 = vpop.f32.mrf.mxu0  ;;  %v10822_v56 = vadd.f32 %v10803_v25, %v10709_v26  ;;  %v11021_v25 = vpop.permute.xlu1 %11020 }
 0xd0c   : > { %v10805_v18 = vpop.f32.mrf.mxu1  ;;  %v11006_v38 = vadd.f32 %v10984_v2, %v10821_v45  ;;  %v11033_v57 = vadd.f32 %v11016_v22, %v11005_v59 }
 0xd0d   : > { %v10988_v40 = vpop.f32.mrf.mxu0  ;;  %v10823_v39 = vadd.f32 %v10805_v18, %v10710_v5  ;;  %v11047_v18 = vld [vmem:[#allocation3 + $0x80] sm:$0xff] }
 0xd0e   : > { %v10809_v44 = vpop.f32.mrf.mxu1  ;;  %v11007_v42 = vadd.f32 %v10988_v40, %v10822_v56  ;;  %v11034_v63 = vadd.f32 %v11016_v22, %v11006_v38  ;;  %v11045_v40 = vld [vmem:[#allocation3 + $0x70] sm:$0xff]  ;;  %v11104_v56 = vpop.permute.xlu0 %11103 }
 0xd0f   : > { %v10990_v52 = vpop.f32.mrf.mxu0  ;;  %v10824_v6 = vadd.f32 %v10809_v44, %v10711_v8  ;;  %v11109_v20 = vpop.permute.xlu1 %11108 }
 0xd10   : > { %v10811_v14 = vpop.f32.mrf.mxu1  ;;  %v11008_v29 = vadd.f32 %v10990_v52, %v10823_v39  ;;  %v11035_v30 = vadd.f32 %v11021_v25, %v11007_v42  ;;  %v11041_v52 = vld [vmem:[#allocation3 + $0x10] sm:$0xff]  ;;  %v18407_v54 = vadd.f32 %v11042_v49, %v11034_v63 }
 0xd11   : > { %v10825_v10 = vadd.f32 %v10811_v14, %v10712_v53  ;;  %v10994_v46 = vpop.f32.mrf.mxu0  ;;  %v18412_v62 = vadd.f32 %v11041_v52, %v11033_v57 }
 0xd12   : > { %v10815_v0 = vpop.f32.mrf.mxu1  ;;  %v11009_v41 = vadd.f32 %v10994_v46, %v10824_v6  ;;  %v11036_v3 = vadd.f32 %v11021_v25, %v11008_v29  ;;  %v18404_v8 = vadd.f32 %v11043_v43, %v11035_v30  ;;  %v11058_v14 = vmax.f32 %v18407_v54, 0.0  ;;  %v12262_v46 = vld [vmem:[%s18598_s3 + $0x278] sm:$0xff] }
 0xd13   : > { %v10826_v34 = vadd.f32 %v10815_v0, %v10713_v16  ;;  %v10996_v15 = vpop.f32.mrf.mxu0  ;;  %v11057_v47 = vmax.f32 %v18412_v62, 0.0  ;;  %v12260_v16 = vld [vmem:[%s18598_s3 + $0x248] sm:$0xff]  ;;  %v19363_v6 = vmov 0.0  }
 0xd14   : > { %v11010_v1 = vadd.f32 %v10996_v15, %v10825_v10  ;;  %v10817_v17 = vpop.f32.mrf.mxu1  ;;  %v11037_v9 = vadd.f32 %v11026_v50, %v11009_v41  ;;  %v18401_v44 = vadd.f32 %v11044_v7, %v11036_v3  ;;  %v11059_v5 = vmax.f32 %v18404_v8, 0.0  ;;  %v12261_v10 = vld [vmem:[%s18598_s3 + $0x260] sm:$0xff] }
 0xd15   : > { %v10827_v23 = vadd.f32 %v10817_v17, %v10714_v55  ;;  %v11000_v19 = vpop.f32.mrf.mxu0  ;;  %v12273_v3 = vld [vmem:[%s18598_s3 + $0x2c0] sm:$0xff] }
 0xd16   : > { %v11011_v21 = vadd.f32 %v11000_v19, %v10826_v34  ;;  %v11038_v12 = vadd.f32 %v11026_v50, %v11010_v1  ;;  %v18399_v35 = vadd.f32 %v11045_v40, %v11037_v9  ;;  %v11060_v26 = vmax.f32 %v18401_v44, 0.0  ;;  %v11099_v50 = vpop.permute.xlu1 %11098  ;;  %v11094_v19 = vpop.permute.xlu0 %11093  ;;  %v12272_v9 = vld [vmem:[%s18598_s3 + $0x2a8] sm:$0xff] }
 0xd17   : > { %v11002_v36 = vpop.f32.mrf.mxu0 }
 0xd18   : > { %v11039_v13 = vadd.f32 %v11031_v32, %v11011_v21  ;;  %v11012_v11 = vadd.f32 %v11002_v36, %v10827_v23  ;;  %v18395_v28 = vadd.f32 %v11046_v33, %v11038_v12  ;;  %v11061_v31 = vmax.f32 %v18399_v35, 0.0 }
 0xd1a   : > { %v11040_v27 = vadd.f32 %v11031_v32, %v11012_v11  ;;  %v18393_v4 = vadd.f32 %v11047_v18, %v11039_v13  ;;  %v11062_v61 = vmax.f32 %v18395_v28, 0.0  ;;  %v12274_v18 = vld [vmem:[%s18598_s3 + $0x2d8] sm:$0xff]  ;;  %v11264_v63 = vpop.permute.xlu1 %11263  ;;  %v11259_v57 = vpop.permute.xlu0 %11258 }
 0xd1c   : > { %v18397_v2 = vadd.f32 %v11048_v24, %v11040_v27  ;;  %v11063_v53 = vmax.f32 %v18393_v4, 0.0  ;;  %v12275_v27 = vld [vmem:[%s18598_s3 + $0x2f0] sm:$0xff] }
 0xd1e   : > { %v11064_v48 = vmax.f32 %v18397_v2, 0.0 }
 0xd20   : > { %11147 = vmatprep.subr.mxu1 %v11064_v48 }
 0xd21   : > { %11148 = vmatpush1.msra.mxu1 %v11063_v53 }
 0xd22   : > { %11149 = vmatprep.subr.mxu1 %v11062_v61 }
 0xd23   : > { %11150 = vmatpush1.msra.mxu1 %v11061_v31 }
 0xd24   : > { %11151 = vmatprep.subr.mxu1 %v11060_v26 }
 0xd25   : > { %11152 = vmatpush1.msra.mxu1 %v11059_v5 }
 0xd26   : > { %11153 = vmatprep.subr.mxu1 %v11058_v14 }
 0xd27   : > { %11154 = vmatpush1.msra.mxu1 %v11057_v47 }
 0xd28   : > { %12268 = vmatmul.mubr.msk.f32.vlgmr.msra.gmra.mxu1 %vm1751_vm0, %v12260_v16  ;;  %v11254_v16 = vpop.permute.xlu1 %11253 }
 0xd29   : > { %11193 = vmatprep.mubr.f32.mxu1 %v19363_v6 }
 0xd2c   : > { %12269 = vmatmul.mubr.msk.f32.gmra.mxu1 %vm1751_vm0, %v12261_v10 }
 0xd2d   : > { %11199 = vmatprep.mubr.f32.mxu1 %v19363_v6 }
 0xd30   : > { %12270 = vmatmul.mubr.msk.f32.gmra.mxu1 %vm1751_vm0, %v12262_v46 }
 0xd31   : > { %11205 = vmatprep.mubr.f32.mxu1 %v19363_v6 }
 0xd34   : > { %12271 = vmatmul.mubr.msk.f32.gmra.mxu1 %vm1751_vm0, %v12263_v37 }
 0xd35   : > { %11513 = vmatprep.mubr.f32.mxu1 %v19363_v6 }
 0xde8   : > { %v11189_v60 = vpop.f32.mrf.mxu1 }
 0xde9   : > { %v11190_v38 = vadd.f32 %v11189_v60, %v11094_v19 }
 0xdea   : > { %v11191_v39 = vpop.f32.mrf.mxu1 }
 0xdeb   : > { %v11192_v42 = vadd.f32 %v11191_v39, %v11094_v19  ;;  %v11212_v59 = vmax.f32 %v11190_v38, 0.0  ;;  %v11249_v39 = vpop.permute.xlu0 %11248 }
 0xdec   : > { %v11195_v0 = vpop.f32.mrf.mxu1 }
 0xded   : > { %v11196_v29 = vadd.f32 %v11195_v0, %v11099_v50  ;;  %v11213_v25 = vmax.f32 %v11192_v42, 0.0 }
 0xdee   : > { %v11197_v32 = vpop.f32.mrf.mxu1 }
 0xdef   : > { %v11198_v41 = vadd.f32 %v11197_v32, %v11099_v50  ;;  %v11214_v11 = vmax.f32 %v11196_v29, 0.0 }
 0xdf0   : > { %v11201_v58 = vpop.f32.mrf.mxu1 }
 0xdf1   : > { %v11202_v51 = vadd.f32 %v11201_v58, %v11104_v56  ;;  %v11215_v13 = vmax.f32 %v11198_v41, 0.0 }
 0xdf2   : > { %v11203_v55 = vpop.f32.mrf.mxu1 }
 0xdf3   : > { %v11204_v1 = vadd.f32 %v11203_v55, %v11104_v56  ;;  %v11216_v12 = vmax.f32 %v11202_v51, 0.0 }
 0xdf4   : > { %v11207_v34 = vpop.f32.mrf.mxu1 }
 0xdf5   : > { %v11208_v15 = vadd.f32 %v11207_v34, %v11109_v20  ;;  %v11217_v36 = vmax.f32 %v11204_v1, 0.0 }
 0xdf6   : > { %v11209_v45 = vpop.f32.mrf.mxu1 }
 0xdf7   : > { %v11210_v17 = vadd.f32 %v11209_v45, %v11109_v20  ;;  %v11218_v21 = vmax.f32 %v11208_v15, 0.0  ;;  %v11435_v45 = vpop.permute.xlu1 %11434 }
 0xdf9   : > { %v11219_v23 = vmax.f32 %v11210_v17, 0.0 }
 0xdfb   : > { %11302 = vmatprep.subr.mxu0 %v11219_v23  ;;  %v11425_v19 = vpop.permute.xlu1 %11424 }
 0xdfc   : > { %11303 = vmatpush1.msra.mxu0 %v11218_v21 }
 0xdfd   : > { %11304 = vmatprep.subr.mxu0 %v11217_v36 }
 0xdfe   : > { %11305 = vmatpush1.msra.mxu0 %v11216_v12 }
 0xdff   : > { %11306 = vmatprep.subr.mxu0 %v11215_v13 }
 0xe00   : > { %11307 = vmatpush1.msra.mxu0 %v11214_v11 }
 0xe01   : > { %11308 = vmatprep.subr.mxu0 %v11213_v25 }
 0xe02   : > { %11309 = vmatpush1.msra.mxu0 %v11212_v59 }
 0xe03   : > { %12280 = vmatmul.mubr.msk.f32.vlgmr.msra.gmra.mxu0 %vm1751_vm0, %v12272_v9 }
 0xe04   : > { %11348 = vmatprep.mubr.f32.mxu0 %v19363_v6 }
 0xe07   : > { %12281 = vmatmul.mubr.msk.f32.gmra.mxu0 %vm1751_vm0, %v12273_v3 }
 0xe08   : > { %11354 = vmatprep.mubr.f32.mxu0 %v19363_v6 }
 0xe0b   : > { %12282 = vmatmul.mubr.msk.f32.gmra.mxu0 %vm1751_vm0, %v12274_v18 }
 0xe0c   : > { %11360 = vmatprep.mubr.f32.mxu0 %v19363_v6 }
 0xe0f   : > { %12283 = vmatmul.mubr.msk.f32.gmra.mxu0 %vm1751_vm0, %v12275_v27 }
 0xe10   : > { %11668 = vmatprep.mubr.f32.mxu0 %v19363_v6 }
 0xec3   : > { %v11344_v22 = vpop.f32.mrf.mxu0 }
 0xec4   : > { %v11345_v56 = vadd.f32 %v11344_v22, %v11249_v39 }
 0xec5   : > { %v11346_v30 = vpop.f32.mrf.mxu0 }
 0xec6   : > { %v11347_v58 = vadd.f32 %v11346_v30, %v11249_v39  ;;  %v18508_v44 = vadd.f32 %v11345_v56, %v11057_v47  ;;  %v11430_v47 = vpop.permute.xlu0 %11429 }
 0xec7   : > { %v11350_v33 = vpop.f32.mrf.mxu0 }
 0xec8   : > { %v11351_v0 = vadd.f32 %v11350_v33, %v11254_v16  ;;  %v18501_v2 = vadd.f32 %v11347_v58, %v11058_v14  ;;  %v11383_v62 = vmax.f32 %v18508_v44, 0.0  ;;  %v12287_v14 = vld [vmem:[%s18598_s3 + $0x350] sm:$0xff] }
 0xec9   : > { %v11352_v24 = vpop.f32.mrf.mxu0 }
 0xeca   : > { %v11353_v37 = vadd.f32 %v11352_v24, %v11254_v16  ;;  %v18496_v28 = vadd.f32 %v11351_v0, %v11059_v5  ;;  %v12286_v5 = vld [vmem:[%s18598_s3 + $0x338] sm:$0xff]  ;;  %v11420_v1 = vpop.permute.xlu0 %11419 }
 0xecb   : > { %v11356_v40 = vpop.f32.mrf.mxu0 }
 0xecc   : > { %v11357_v10 = vadd.f32 %v11356_v40, %v11259_v57  ;;  %v18491_v15 = vadd.f32 %v11353_v37, %v11060_v26  ;;  %v11385_v54 = vmax.f32 %v18496_v28, 0.0  ;;  %v12285_v26 = vld [vmem:[%s18598_s3 + $0x320] sm:$0xff]  ;;  %v12296_v40 = vld [vmem:[%s18598_s3 + $0x368] sm:$0xff] }
 0xecd   : > { %v11358_v7 = vpop.f32.mrf.mxu0 }
 0xece   : > { %v11359_v49 = vadd.f32 %v11358_v7, %v11259_v57  ;;  %v18487_v34 = vadd.f32 %v11357_v10, %v11061_v31  ;;  %v11386_v8 = vmax.f32 %v18491_v15, 0.0  ;;  %v12284_v31 = vld [vmem:[%s18598_s3 + $0x308] sm:$0xff]  ;;  %v12297_v57 = vld [vmem:[%s18598_s3 + $0x380] sm:$0xff]  ;;  %v12298_v7 = vld [vmem:[%s18598_s3 + $0x398] sm:$0xff] }
 0xecf   : > { %v11362_v43 = vpop.f32.mrf.mxu0 }
 0xed0   : > { %v11363_v52 = vadd.f32 %v11362_v43, %v11264_v63  ;;  %v18479_v20 = vadd.f32 %v11359_v49, %v11062_v61  ;;  %v11384_v61 = vmax.f32 %v18501_v2, 0.0  ;;  %v12299_v43 = vld [vmem:[%s18598_s3 + $0x3b0] sm:$0xff]  ;;  %v11585_v49 = vpop.permute.xlu0 %11584 }
 0xed1   : > { %v11364_v46 = vpop.f32.mrf.mxu0 }
 0xed2   : > { %v11365_v60 = vadd.f32 %v11364_v46, %v11264_v63  ;;  %v18475_v32 = vadd.f32 %v11363_v52, %v11063_v53  ;;  %v11388_v35 = vmax.f32 %v18479_v20, 0.0  ;;  %v11590_v52 = vpop.permute.xlu1 %11589  ;;  %v12439_v20 = vmov 1966171168  }
 0xed4   : > { %v18483_v55 = vadd.f32 %v11365_v60, %v11064_v48  ;;  %v11389_v53 = vmax.f32 %v18475_v32, 0.0  ;;  %v11387_v48 = vmax.f32 %v18487_v34, 0.0  ;;  %v11575_v16 = vpop.permute.xlu0 %11574  ;;  %v11733_v32 = vld [vmem:[%s18600_s5] sm:$0x1] }
 0xed6   : > { %v11390_v4 = vmax.f32 %v18483_v55, 0.0  ;;  %v11580_v0 = vpop.permute.xlu1 %11579  ;;  %v11822_v55 = vunpack.c.l.s4 %v12439_v20 }
 0xed8   : > { %11473 = vmatprep.subr.mxu1 %v11390_v4 }
 0xed9   : > { %11474 = vmatpush1.msra.mxu1 %v11389_v53 }
 0xeda   : > { %11475 = vmatprep.subr.mxu1 %v11388_v35 }
 0xedb   : > { %11476 = vmatpush1.msra.mxu1 %v11387_v48 }
 0xedc   : > { %11477 = vmatprep.subr.mxu1 %v11386_v8 }
 0xedd   : > { %11478 = vmatpush1.msra.mxu1 %v11385_v54 }
 0xede   : > { %11479 = vmatprep.subr.mxu1 %v11384_v61 }
 0xedf   : > { %11480 = vmatpush1.msra.mxu1 %v11383_v62 }
 0xee0   : > { %12292 = vmatmul.mubr.msk.f32.vlgmr.msra.gmra.mxu1 %vm1751_vm0, %v12284_v31 }
 0xee1   : > { %11519 = vmatprep.mubr.f32.mxu1 %v19363_v6 }
 0xee4   : > { %12293 = vmatmul.mubr.msk.f32.gmra.mxu1 %vm1751_vm0, %v12285_v26 }
 0xee5   : > { %11525 = vmatprep.mubr.f32.mxu1 %v19363_v6 }
 0xee8   : > { %12294 = vmatmul.mubr.msk.f32.gmra.mxu1 %vm1751_vm0, %v12286_v5 }
 0xee9   : > { %11531 = vmatprep.mubr.f32.mxu1 %v19363_v6 }
 0xeec   : > { %12295 = vmatmul.mubr.msk.f32.gmra.mxu1 %vm1751_vm0, %v12287_v14 }
 0xeed   : > { %11811 = vmatprep.mubr.f32.mxu1 %v19363_v6 }
 0xfa0   : > { %v11515_v17 = vpop.f32.mrf.mxu1 }
 0xfa1   : > { %v11516_v50 = vadd.f32 %v11515_v17, %v11420_v1 }
 0xfa2   : > { %v11517_v51 = vpop.f32.mrf.mxu1 }
 0xfa3   : > { %v11538_v41 = vmax.f32 %v11516_v50, 0.0  ;;  %v11518_v23 = vadd.f32 %v11517_v51, %v11420_v1 }
 0xfa4   : > { %v11521_v29 = vpop.f32.mrf.mxu1 }
 0xfa5   : > { %v11539_v21 = vmax.f32 %v11518_v23, 0.0  ;;  %v11522_v42 = vadd.f32 %v11521_v29, %v11425_v19 }
 0xfa6   : > { %v11523_v36 = vpop.f32.mrf.mxu1 }
 0xfa7   : > { %v11540_v38 = vmax.f32 %v11522_v42, 0.0  ;;  %v11524_v12 = vadd.f32 %v11523_v36, %v11425_v19 }
 0xfa8   : > { %v11527_v13 = vpop.f32.mrf.mxu1 }
 0xfa9   : > { %v11541_v11 = vmax.f32 %v11524_v12, 0.0  ;;  %v11528_v25 = vadd.f32 %v11527_v13, %v11430_v47  ;;  %v19365_v13 = vld [vmem:[#allocation6_spill] sm:$0xff] }
 0xfaa   : > { %v11529_v59 = vpop.f32.mrf.mxu1 }
 0xfab   : > { %v11542_v9 = vmax.f32 %v11528_v25, 0.0  ;;  %v11530_v3 = vadd.f32 %v11529_v59, %v11430_v47 }
 0xfac   : > { %v11533_v18 = vpop.f32.mrf.mxu1 }
 0xfad   : > { %v11543_v27 = vmax.f32 %v11530_v3, 0.0  ;;  %v11534_v22 = vadd.f32 %v11533_v18, %v11435_v45 }
 0xfae   : > { %v11535_v30 = vpop.f32.mrf.mxu1 }
 0xfaf   : > { %v11544_v33 = vmax.f32 %v11534_v22, 0.0  ;;  %v11536_v24 = vadd.f32 %v11535_v30, %v11435_v45 }
 0xfb1   : > { %v11545_v63 = vmax.f32 %v11536_v24, 0.0 }
 0xfb3   : > { %11628 = vmatprep.subr.mxu0 %v11545_v63 }
 0xfb4   : > { %11629 = vmatpush1.msra.mxu0 %v11544_v33 }
 0xfb5   : > { %11630 = vmatprep.subr.mxu0 %v11543_v27 }
 0xfb6   : > { %11631 = vmatpush1.msra.mxu0 %v11542_v9  ;;  %v19366_v9 = vlaneseq }
 0xfb7   : > { %11632 = vmatprep.subr.mxu0 %v11541_v11 }
 0xfb8   : > { %11633 = vmatpush1.msra.mxu0 %v11540_v38  ;;  %vm11838_vm8 = vcmp.lt.s32.totalorder %v19366_v9, 256 }
 0xfb9   : > { %11634 = vmatprep.subr.mxu0 %v11539_v21  ;;  %v19364_v21 = vld [vmem:[#allocation7_spill] sm:$0xff] }
 0xfba   : > { %11635 = vmatpush1.msra.mxu0 %v11538_v41 }
 0xfbb   : > { %12304 = vmatmul.mubr.msk.f32.vlgmr.msra.gmra.mxu0 %vm1751_vm0, %v12296_v40 }
 0xfbc   : > { %11674 = vmatprep.mubr.f32.mxu0 %v19363_v6 }
 0xfbf   : > { %12305 = vmatmul.mubr.msk.f32.gmra.mxu0 %vm1751_vm0, %v12297_v57 }
 0xfc0   : > { %11680 = vmatprep.mubr.f32.mxu0 %v19363_v6 }
 0xfc3   : > { %12306 = vmatmul.mubr.msk.f32.gmra.mxu0 %vm1751_vm0, %v12298_v7 }
 0xfc4   : > { %11686 = vmatprep.mubr.f32.mxu0 %v19363_v6 }
 0xfc7   : > { %12307 = vmatmul.mubr.msk.f32.gmra.mxu0 %vm1751_vm0, %v12299_v43 }
0x107b   : > { %v11670_v10 = vpop.f32.mrf.mxu0 }
0x107c   : > { %v11671_v46 = vadd.f32 %v11670_v10, %v11575_v16 }
0x107d   : > { %v11672_v37 = vpop.f32.mrf.mxu0 }
0x107e   : > { %v11701_v60 = vadd.f32 %v11671_v46, %v11383_v62  ;;  %v11673_v39 = vadd.f32 %v11672_v37, %v11575_v16 }
0x107f   : > { %v11676_v58 = vpop.f32.mrf.mxu0 }
0x1080   : > { %v11709_v56 = vmax.f32 %v11701_v60, 0.0  ;;  %v11702_v6 = vadd.f32 %v11673_v39, %v11384_v61  ;;  %v11677_v31 = vadd.f32 %v11676_v58, %v11580_v0 }
0x1081   : > { %v11678_v26 = vpop.f32.mrf.mxu0 }
0x1082   : > { %11717 = vst [vmem:[#allocation3 + $0x10] sm:$0xff] %v11709_v56  ;;  %v11710_v5 = vmax.f32 %v11702_v6, 0.0  ;;  %v11703_v14 = vadd.f32 %v11677_v31, %v11385_v54  ;;  %v11679_v47 = vadd.f32 %v11678_v26, %v11580_v0 }
0x1083   : > { %v11682_v45 = vpop.f32.mrf.mxu0 }
0x1084   : > { %11718 = vst [vmem:[#allocation3 + $0x48] sm:$0xff] %v11710_v5  ;;  %v11711_v1 = vmax.f32 %v11703_v14, 0.0  ;;  %v11704_v44 = vadd.f32 %v11679_v47, %v11386_v8  ;;  %v11683_v62 = vadd.f32 %v11682_v45, %v11585_v49 }
0x1085   : > { %v11684_v17 = vpop.f32.mrf.mxu0 }
0x1086   : > { %11719 = vst [vmem:[#allocation3 + $0x88] sm:$0xff] %v11711_v1  ;;  %v11712_v50 = vmax.f32 %v11704_v44, 0.0  ;;  %v11705_v2 = vadd.f32 %v11683_v62, %v11387_v48  ;;  %v11685_v61 = vadd.f32 %v11684_v17, %v11585_v49 }
0x1087   : > { %v11688_v51 = vpop.f32.mrf.mxu0 }
0x1088   : > { %11720 = vst [vmem:[#allocation3 + $0x90] sm:$0xff] %v11712_v50  ;;  %v11713_v41 = vmax.f32 %v11705_v2, 0.0  ;;  %v11706_v28 = vadd.f32 %v11685_v61, %v11388_v35  ;;  %v11689_v54 = vadd.f32 %v11688_v51, %v11590_v52 }
0x1089   : > { %v11690_v23 = vpop.f32.mrf.mxu0 }
0x108a   : > { %11721 = vst [vmem:[#allocation3 + $0x70] sm:$0xff] %v11713_v41  ;;  %v11714_v19 = vmax.f32 %v11706_v28, 0.0  ;;  %v11707_v15 = vadd.f32 %v11689_v54, %v11389_v53  ;;  %v11691_v8 = vadd.f32 %v11690_v23, %v11590_v52  ;;  %v11823_v53 = vunpack.c.0.s8 %v11822_v55 }
0x108c   : > { %11722 = vst [vmem:[#allocation3 + $0xa0] sm:$0xff] %v11714_v19  ;;  %v11715_v29 = vmax.f32 %v11707_v15, 0.0  ;;  %v11708_v34 = vadd.f32 %v11691_v8, %v11390_v4  ;;  %v11738_v4 = vpop.permute.xlu1 %11737  ;;  %v11826_v11 = vsub.s32 %v11823_v53, %v19365_v13 }
0x108d   : > { %v11743_v42 = vrot.slane %v11738_v4, %v19364_v21 }
0x108e   : > { %11723 = vst [vmem:[#allocation3 + $0x80] sm:$0xff] %v11715_v29  ;;  %v11716_v48 = vmax.f32 %v11708_v34, 0.0 }
0x1090   : > { %11724 = vst [vmem:[#allocation3 + $0xb8] sm:$0xff] %v11716_v48  ;;  %11771 = vmatprep.subr.mxu1 %v11716_v48 }
0x1091   : > { %11772 = vmatpush1.msra.mxu1 %v11715_v29 }
0x1092   : > { %11773 = vmatprep.subr.mxu1 %v11714_v19 }
0x1093   : > { %11774 = vmatpush1.msra.mxu1 %v11713_v41 }
0x1094   : > { %11775 = vmatprep.subr.mxu1 %v11712_v50 }
0x1095   : > { %11776 = vmatpush1.msra.mxu1 %v11711_v1 }
0x1096   : > { %11777 = vmatprep.subr.mxu1 %v11710_v5 }
0x1097   : > { %11778 = vmatpush1.msra.mxu1 %v11709_v56 }
0x1098   : > { %12308 = vmatmul.mubr.msk.f32.vlgmr.msra.gmra.mxu1 %vm1751_vm0, %v11733_v32 }
0x1158   : > { %v11813_v35 = vpop.f32.mrf.mxu1 }
0x1159   : > { %v11814_v38 = vadd.f32 %v11813_v35, %v11743_v42 }
0x115a   : > { %v11815_v36 = vpop.f32.mrf.mxu1 }
0x115b   : > { %v11816_v12 = vadd.f32 %v11815_v36, %v11743_v42 }
0x115d   : > { %v11820_v25 = vcombine.low %v11814_v38, %v11816_v12 }
0x115f   : > { %v11827_v59 = vrot.slane %v11820_v25, %v11826_v11 }
0x1161   : > { %v11834_v3 = vrot.slane %v11827_v59, %v11826_v11 }
0x1163   : > { %11840 = vst.msk [vmem:[%s12504_s16] sm:$0x3] %vm11838_vm8, %v11834_v3 }
0x1164 PF: > { %s20_s29 = sadd.s32 1, %s12407_s29  }
0x1165   : > { %p17_p5 = scmp.ge.s32.totalorder %s20_s29, 4  }
0x1167   :  { %19 = sbr.rel (!%p17_p5) target bundleno = 3 (0x3), region = 111 }

</bundles_post_ra>
